<compile_context>
chip_gen: v7x
topology: tpu7x:2x2x1
jax: 0.10.0
libtpu: 0.0.40
codegen_flags: <defaults>
</compile_context>

<pallas_src>
import functools

import numpy as np
import jax
import jax.numpy as jnp
from jax import lax
from jax.experimental import pallas as pl
from jax.experimental.pallas import tpu as pltpu

LEAKY_SLOPE = 0.01   # torch.nn.LeakyReLU default
BN_EPS = 1e-5        # torch.nn.BatchNorm2d default
POOL_H = 13          # MaxPool2d(kernel_size=(13, 1))

WEIGHT_ORDER = ("at1", "bt1", "at2", "bt2", "at3", "bt3",
                "as1", "bs1", "as2", "bs2", "as3", "bs3",
                "wtw", "mtk", "st", "ft", "wst", "ss", "fs", "beff")


# ---------------------------------------------------------------------------
# Host-side (numpy) construction of the per-layer matrices (runs once)
# ---------------------------------------------------------------------------
def _band_matrix(taps, n_in, stride, pad):
    """(n_in, n_out) matrix M with (a @ M)[o] == sum_j taps[j] * a_pad[stride*o + j]."""
    taps = np.asarray(taps, np.float32)
    kt = taps.shape[0]
    n_out = (n_in + 2 * pad - kt) // stride + 1
    m = np.zeros((n_in, n_out), np.float32)
    for o in range(n_out):
        for j in range(kt):
            i = stride * o + j - pad
            if 0 <= i < n_in:
                m[i, o] = taps[j]
    return m


def _block_band(w_taps, n_in, stride, pad, scale):
    """w_taps: (Cout, Cin, k).  Returns (Cin*n_in, Cout*n_out) so that an
    activation laid out as lanes [ci*n_in + i] right-multiplied by this matrix
    gives the conv output laid out as lanes [co*n_out + o] (BN scale folded)."""
    cout, cin, kt = w_taps.shape
    n_out = (n_in + 2 * pad - kt) // stride + 1
    m = np.zeros((cin * n_in, cout * n_out), np.float32)
    for ci in range(cin):
        for co in range(cout):
            m[ci * n_in:(ci + 1) * n_in, co * n_out:(co + 1) * n_out] = \
                _band_matrix(w_taps[co, ci], n_in, stride, pad) * scale[co]
    return m


def prepare_kernel_params(raw, height, width, block_b):
    """Fold eval-mode BN, build block-band matrices, the composite row/column
    selections and the (constant-feature-folded) classifier matrices."""
    def to_np(v):
        if isinstance(v, dict):
            return {k: np.asarray(x, np.float32) for k, x in v.items()}
        return np.asarray(v, np.float32)

    r = {k: to_np(v) for k, v in raw.items()}
    C = r["w_t1"].shape[1]
    n_cls = r["w_clf"].shape[0]
    npad = ((n_cls + 127) // 128) * 128

    def fold(bn):
        sc = (bn["gamma"] / np.sqrt(bn["var"] + BN_EPS)).astype(np.float32)
        return sc, (bn["beta"] - bn["mean"] * sc).astype(np.float32)

    def lrelu(v):
        return np.where(v >= 0, v, LEAKY_SLOPE * v).astype(np.float32)

    # ---- output sizes along each axis of each branch ----
    w1 = width - 28 + 1
    w2 = (w1 - 14) // 2 + 1
    w3 = (w2 - 7) // 2 + 1
    h2 = (height + 62 - 1) // 2 + 1
    h3 = (h2 + 62 - 1) // 2 + 1

    sh1 = height - 8 + 1
    sh2 = (sh1 + 2 - 4) // 2 + 1
    sh3 = (sh2 - 2) // 2 + 1
    sw2 = (width + 54 - 1) // 2 + 1
    sw3 = (sw2 + 54 - 1) // 2 + 1

    assert sh3 // POOL_H == 1, "pooled spectral height must be 1"
    assert C * h3 * w3 + C * sw3 == r["w_clf"].shape[1]

    # ---- folded BN + block-band matrices ----
    sc_t1, bi_t1 = fold(r["bn_t1"]); sc_t2, bi_t2 = fold(r["bn_t2"]); sc_t3, bi_t3 = fold(r["bn_t3"])
    sc_s1, bi_s1 = fold(r["bn_s1"]); sc_s2, bi_s2 = fold(r["bn_s2"]); sc_s3, bi_s3 = fold(r["bn_s3"])

    at1 = _block_band(r["w_t1"][:, :, 0, :], width, 1, 0, sc_t1)
    at2 = _block_band(r["w_t2"][:, :, 0, :], w1, 2, 0, sc_t2)
    at3 = _block_band(r["w_t3"][:, :, 0, :], w2, 2, 0, sc_t3)
    as1 = _block_band(r["w_s1"][:, :, :, 0], height, 1, 0, sc_s1)
    as2 = _block_band(r["w_s2"][:, :, :, 0], sh1, 2, 1, sc_s2)
    as3 = _block_band(r["w_s3"][:, :, :, 0], sh2, 2, 0, sc_s3)

    bt1 = np.repeat(bi_t1, w1)[None, :]
    bt2 = np.repeat(bi_t2, w2)[None, :]
    bt3 = np.repeat(bi_t3, w3)[None, :]
    bs1 = np.repeat(bi_s1, sh1)[None, :]
    bs2 = np.repeat(bi_s2, sh2)[None, :]
    bs3 = np.repeat(bi_s3, sh3)[None, :]

    # ---- composite classification of final temporal rows / spectral columns:
    #      0 = depends on an input row/col, 2 = constant caused by layer-2 zero
    #      padding, 3 = constant caused by layer-3 zero padding. ----
    def classify(n3, s3, p3, n2, s2, p2, n0):
        kind = np.zeros(n3, np.int32)
        out_idx, in_idx = [], []
        for o in range(n3):
            i2 = s3 * o - p3
            if not (0 <= i2 < n2):
                kind[o] = 3
                continue
            i0 = s2 * i2 - p2
            if not (0 <= i0 < n0):
                kind[o] = 2
            else:
                out_idx.append(o)
                in_idx.append(i0)
        return kind, np.array(out_idx, np.int32), np.array(in_idx, np.int32)

    kind_t, t_o3, t_rows = classify(h3, 2, 31, h2, 2, 31, height)
    kind_s, s_w3, s_cols = classify(sw3, 2, 27, sw2, 2, 27, width)
    n_rt, n_cs = len(t_o3), len(s_w3)

    # classifier split in torch flatten order (C, H, W)
    wt = r["w_clf"][:, :C * h3 * w3].reshape(n_cls, C, h3, w3)
    ws = r["w_clf"][:, C * h3 * w3:].reshape(n_cls, C, sw3)

    # ---- constant (padding-derived) rows/cols -> fold into classifier bias ----
    # A zero-padded row/col that enters layer 2 produces lrelu(bias2); pushed
    # through layer 3's full-coverage conv it stays constant along the conv
    # axis; a row/col introduced by layer-3 padding is lrelu(bias3).
    v2_t = lrelu(bi_t2)
    v3p2_t = lrelu(sc_t3 * (r["w_t3"][:, :, 0, :].sum(2) @ v2_t) + bi_t3)
    v3p3_t = lrelu(bi_t3)
    v2_s = lrelu(bi_s2)
    v3p2_s = lrelu(sc_s3 * (r["w_s3"][:, :, :, 0].sum(2) @ v2_s) + bi_s3)
    v3p3_s = lrelu(bi_s3)

    vc_t = np.zeros((C, h3), np.float32)
    vc_t[:, kind_t == 2] = v3p2_t[:, None]
    vc_t[:, kind_t == 3] = v3p3_t[:, None]
    vc_s = np.zeros((C, sw3), np.float32)
    vc_s[:, kind_s == 2] = v3p2_s[:, None]
    vc_s[:, kind_s == 3] = v3p3_s[:, None]

    b_eff = (r["b_clf"]
             + np.einsum("co,nco->n", vc_t, wt.sum(3))
             + np.einsum("cw,ncw->n", vc_s, ws)).astype(np.float32)

    # ---- classifier matrices for the input-dependent features ----
    # temporal: "wide" weight + row mask + per-sample row-sum + class fold,
    # all plain 2-D matmuls / elementwise (no in-kernel reshape needed).
    wtw = np.transpose(wt[:, :, t_o3, :], (1, 3, 2, 0)).reshape(C * w3, n_rt * n_cls)
    mtk = (np.arange(block_b * n_rt)[:, None] % n_rt
           == np.arange(n_rt * n_cls)[None, :] // n_cls).astype(np.float32)
    st = (np.arange(block_b * n_rt)[None, :] // n_rt
          == np.arange(block_b)[:, None]).astype(np.float32)
    ft = np.zeros((n_rt * n_cls, npad), np.float32)
    ft[np.arange(n_rt * n_cls), np.arange(n_rt * n_cls) % n_cls] = 1.0

    # spectral: per-(col, channel) weight tiled over the batch block, then a
    # per-sample row-sum matmul and a class fold.
    wst = np.tile(np.transpose(ws[:, :, s_w3], (2, 1, 0)).reshape(n_cs, C * n_cls),
                  (block_b, 1))
    ss = (np.arange(block_b * n_cs)[None, :] // n_cs
          == np.arange(block_b)[:, None]).astype(np.float32)
    fs = np.zeros((n_cls, npad), np.float32)
    fs[np.arange(n_cls), np.arange(n_cls)] = 1.0

    beff = np.zeros((1, npad), np.float32)
    beff[0, :n_cls] = b_eff

    mats = dict(at1=at1, bt1=bt1, at2=at2, bt2=bt2, at3=at3, bt3=bt3,
                as1=as1, bs1=bs1, as2=as2, bs2=bs2, as3=as3, bs3=bs3,
                wtw=wtw, mtk=mtk, st=st, ft=ft, wst=wst, ss=ss, fs=fs, beff=beff)
    kp = {k: jnp.asarray(v) for k, v in mats.items()}
    kp["meta"] = dict(C=C, n_cls=n_cls, npad=npad, block_b=block_b,
                      height=height, width=width, sh3=sh3,
                      n_rt=n_rt, n_cs=n_cs, t_rows=t_rows, s_cols=s_cols)
    return kp


# ---------------------------------------------------------------------------
# The fused Pallas kernel (one grid step == one batch block of `block_b`)
# ---------------------------------------------------------------------------
def crlnet_forward(x, kp):
    m = kp["meta"]
    C, n_cls, npad = m["C"], m["n_cls"], m["npad"]
    bb, n_rt, n_cs, sh3 = m["block_b"], m["n_rt"], m["n_cs"], m["sh3"]
    B, Cx, H, W = x.shape
    assert Cx == C and H == m["height"] and W == m["width"]

    bp = ((B + bb - 1) // bb) * bb
    if bp != B:
        x = jnp.pad(x, ((0, bp - B), (0, 0), (0, 0), (0, 0)))

    # Wrapper-side layout plumbing (plain XLA, outside the kernel): keep only
    # the input rows / columns that actually reach the classifier and present
    # them with (batch * spatial) on sublanes and (channel * conv-axis) on
    # lanes, so every layer in the kernel is one lane-dense 2-D matmul.
    xt = jnp.transpose(x[:, :, m["t_rows"], :], (0, 2, 1, 3)).reshape(bp * n_rt, C * W)
    xs = jnp.transpose(x[:, :, :, m["s_cols"]], (0, 3, 1, 2)).reshape(bp * n_cs, C * H)

    def kernel(xt_ref, xs_ref,
               at1, bt1, at2, bt2, at3, bt3,
               as1, bs1, as2, bs2, as3, bs3,
               wtw, mtk, st, ft, wst, ss, fs, beff,
               out_ref):
        def lrelu(v):
            return jnp.where(v >= 0, v, LEAKY_SLOPE * v)

        def mm(a, b):
            return jnp.dot(a, b, preferred_element_type=jnp.float32)

        # temporal branch: conv along W == block-band matmul on the lane axis
        t = lrelu(mm(xt_ref[...], at1[...]) + bt1[...])
        t = lrelu(mm(t, at2[...]) + bt2[...])
        t = lrelu(mm(t, at3[...]) + bt3[...])              # (bb*n_rt, C*w3)

        # spectral branch: conv along H == block-band matmul on the lane axis
        s = lrelu(mm(xs_ref[...], as1[...]) + bs1[...])
        s = lrelu(mm(s, as2[...]) + bs2[...])
        s = lrelu(mm(s, as3[...]) + bs3[...])              # (bb*n_cs, C*sh3)

        # classifier, temporal part: per-row logits for every (row, class)
        # pair, masked to the row's own weight slice, summed per sample, then
        # folded onto the padded class lanes.  All plain 2-D MXU matmuls.
        g = mm(t, wtw[...]) * mtk[...]                     # (bb*n_rt, n_rt*n_cls)
        logits = mm(mm(st[...], g), ft[...])               # (bb, npad)

        # classifier, spectral part: MaxPool2d((13,1)) == one lane-axis max
        # per channel block, then a weighted per-sample row-sum matmul.
        wst_v = wst[...]
        q = None
        for c in range(C):
            pooled = jnp.max(s[:, c * sh3:c * sh3 + POOL_H], axis=1, keepdims=True)
            part = pooled * wst_v[:, c * n_cls:(c + 1) * n_cls]
            q = part if q is None else q + part            # (bb*n_cs, n_cls)
        logits = logits + mm(mm(ss[...], q), fs[...])      # (bb, npad)

        out_ref[...] = logits + beff[...]

    weights = [kp[k] for k in WEIGHT_ORDER]

    def const_spec(a):                                     # resident, full block
        return pl.BlockSpec(a.shape, lambda g: (0, 0))

    out = pl.pallas_call(
        kernel,
        out_shape=jax.ShapeDtypeStruct((bp, npad), jnp.float32),
        grid=(bp // bb,),
        in_specs=[pl.BlockSpec((bb * n_rt, C * W), lambda g: (g, 0)),
                  pl.BlockSpec((bb * n_cs, C * H), lambda g: (g, 0))]
                 + [const_spec(a) for a in weights],
        out_specs=pl.BlockSpec((bb, npad), lambda g: (g, 0)),
        compiler_params=pltpu.CompilerParams(
            dimension_semantics=("parallel",)),
    )(xt, xs, *weights)
    return out[:B, :n_cls]


# ---------------------------------------------------------------------------
# Deterministic synthetic parameters (shapes match the PyTorch module)
# ---------------------------------------------------------------------------
def init_raw_params(key, num_classes=4, input_ch=1):
    C = input_ch
    keys = iter(jax.random.split(key, 64))

    def conv_w(shape):
        fan_in = shape[1] * shape[2] * shape[3]
        return jax.random.normal(next(keys), shape, jnp.float32) / jnp.sqrt(fan_in)

    def bn(ch):
        return dict(
            gamma=1.0 + 0.1 * jax.random.normal(next(keys), (ch,), jnp.float32),
            beta=0.1 * jax.random.normal(next(keys), (ch,), jnp.float32),
            mean=0.1 * jax.random.normal(next(keys), (ch,), jnp.float32),
            var=0.5 + 0.1 * jnp.abs(jax.random.normal(next(keys), (ch,), jnp.float32)),
        )

    raw = {
        "w_t1": conv_w((2 * C, C, 1, 28)), "bn_t1": bn(2 * C),
        "w_t2": conv_w((2 * C, 2 * C, 1, 14)), "bn_t2": bn(2 * C),
        "w_t3": conv_w((C, 2 * C, 1, 7)), "bn_t3": bn(C),
        "w_s1": conv_w((2 * C, C, 8, 1)), "bn_s1": bn(2 * C),
        "w_s2": conv_w((2 * C, 2 * C, 4, 1)), "bn_s2": bn(2 * C),
        "w_s3": conv_w((C, 2 * C, 2, 1)), "bn_s3": bn(C),
        "w_clf": jax.random.normal(next(keys), (num_classes, 3304), jnp.float32)
                 / jnp.sqrt(3304.0),
        "b_clf": 0.01 * jax.random.normal(next(keys), (num_classes,), jnp.float32),
    }
    return raw


def reference_forward(x, raw):
    """Pure-XLA reference of CRLNet.forward (eval-mode BN) for validation."""
    def conv(a, w, stride, pad):
        return lax.conv_general_dilated(
            a, w, window_strides=stride,
            padding=[(pad[0], pad[0]), (pad[1], pad[1])],
            dimension_numbers=("NCHW", "OIHW", "NCHW"),
            precision=lax.Precision.HIGHEST)

    def bn(a, p):
        s = p["gamma"] / jnp.sqrt(p["var"] + BN_EPS)
        b = p["beta"] - p["mean"] * s
        return a * s[None, :, None, None] + b[None, :, None, None]

    def lrelu(a):
        return jnp.where(a >= 0, a, LEAKY_SLOPE * a)

    t = lrelu(bn(conv(x, raw["w_t1"], (1, 1), (0, 0)), raw["bn_t1"]))
    t = lrelu(bn(conv(t, raw["w_t2"], (2, 2), (31, 0)), raw["bn_t2"]))
    t = lrelu(bn(conv(t, raw["w_t3"], (2, 2), (31, 0)), raw["bn_t3"]))
    t = t.reshape(t.shape[0], -1)

    s = lrelu(bn(conv(x, raw["w_s1"], (1, 1), (0, 0)), raw["bn_s1"]))
    s = lrelu(bn(conv(s, raw["w_s2"], (2, 2), (1, 27)), raw["bn_s2"]))
    s = lrelu(bn(conv(s, raw["w_s3"], (2, 2), (0, 27)), raw["bn_s3"]))
    b_, c_, h_, w_ = s.shape
    hp = h_ // POOL_H
    s = jnp.max(s[:, :, :hp * POOL_H, :].reshape(b_, c_, hp, POOL_H, w_), axis=3)
    s = s.reshape(b_, -1)

    feat = jnp.concatenate([t, s], axis=1)
    return jnp.dot(feat, raw["w_clf"].T,
                   precision=lax.Precision.HIGHEST) + raw["b_clf"][None, :]


if __name__ == "__main__":
    key = jax.random.PRNGKey(0)
    k_x, k_p = jax.random.split(key)

    # Smallest input consistent with nn.Linear(3304, .): (B, 1, 67, 252).
    # B=16 with an 8-sample batch block -> grid of 2 "parallel" steps.
    B, C, H, W = 16, 1, 67, 252
    x = jax.random.normal(k_x, (B, C, H, W), jnp.float32)

    raw = init_raw_params(k_p, num_classes=4, input_ch=C)
    kparams = prepare_kernel_params(raw, H, W, block_b=8)

    fwd = jax.jit(functools.partial(crlnet_forward, kp=kparams))
    logits = fwd(x)
    jax.block_until_ready(logits)
    assert logits.shape == (B, 4), logits.shape

    # sanity check against a plain-XLA reference of the same module
    ref = reference_forward(x, raw)
    err = float(jnp.max(jnp.abs(logits - ref)))
    # all-f32 path; 3e-2 leaves margin for the MXU's internal f32 pass scheme
    assert err < 3e-2, f"kernel/reference mismatch: max abs err = {err}"

    print("KERNEL_OK")
</pallas_src>

<mosaic_0001>
module attributes {stable_mosaic.version = 11 : i64} {
  func.func @kernel(%arg0: i32, %arg1: memref<128x252xf32, #tpu.memory_space<vmem>>, %arg2: memref<504x67xf32, #tpu.memory_space<vmem>>, %arg3: memref<252x450xf32, #tpu.memory_space<vmem>>, %arg4: memref<1x450xf32, #tpu.memory_space<vmem>>, %arg5: memref<450x212xf32, #tpu.memory_space<vmem>>, %arg6: memref<1x212xf32, #tpu.memory_space<vmem>>, %arg7: memref<212x50xf32, #tpu.memory_space<vmem>>, %arg8: memref<1x50xf32, #tpu.memory_space<vmem>>, %arg9: memref<67x120xf32, #tpu.memory_space<vmem>>, %arg10: memref<1x120xf32, #tpu.memory_space<vmem>>, %arg11: memref<120x60xf32, #tpu.memory_space<vmem>>, %arg12: memref<1x60xf32, #tpu.memory_space<vmem>>, %arg13: memref<60x15xf32, #tpu.memory_space<vmem>>, %arg14: memref<1x15xf32, #tpu.memory_space<vmem>>, %arg15: memref<50x64xf32, #tpu.memory_space<vmem>>, %arg16: memref<128x64xf32, #tpu.memory_space<vmem>>, %arg17: memref<8x128xf32, #tpu.memory_space<vmem>>, %arg18: memref<64x128xf32, #tpu.memory_space<vmem>>, %arg19: memref<504x4xf32, #tpu.memory_space<vmem>>, %arg20: memref<8x504xf32, #tpu.memory_space<vmem>>, %arg21: memref<4x128xf32, #tpu.memory_space<vmem>>, %arg22: memref<1x128xf32, #tpu.memory_space<vmem>>, %arg23: memref<8x128xf32, #tpu.memory_space<vmem>>) attributes {dimension_semantics = [#tpu.dimension_semantics<parallel>], iteration_bounds = array<i64: 2>, scalar_prefetch = 0 : i64, scratch_operands = 0 : i64, tpu.core_type = #tpu.core_type<tc>, window_params = [{transform_indices = @transform_0, window_bounds = array<i64: 128, 252>}, {transform_indices = @transform_1, window_bounds = array<i64: 504, 67>}, {pipeline_mode = #tpu.pipeline_mode<synchronous>, transform_indices = @transform_2, window_bounds = array<i64: 252, 450>}, {pipeline_mode = #tpu.pipeline_mode<synchronous>, transform_indices = @transform_3, window_bounds = array<i64: 1, 450>}, {pipeline_mode = #tpu.pipeline_mode<synchronous>, transform_indices = @transform_4, window_bounds = array<i64: 450, 212>}, {pipeline_mode = #tpu.pipeline_mode<synchronous>, transform_indices = @transform_5, window_bounds = array<i64: 1, 212>}, {pipeline_mode = #tpu.pipeline_mode<synchronous>, transform_indices = @transform_6, window_bounds = array<i64: 212, 50>}, {pipeline_mode = #tpu.pipeline_mode<synchronous>, transform_indices = @transform_7, window_bounds = array<i64: 1, 50>}, {pipeline_mode = #tpu.pipeline_mode<synchronous>, transform_indices = @transform_8, window_bounds = array<i64: 67, 120>}, {pipeline_mode = #tpu.pipeline_mode<synchronous>, transform_indices = @transform_9, window_bounds = array<i64: 1, 120>}, {pipeline_mode = #tpu.pipeline_mode<synchronous>, transform_indices = @transform_10, window_bounds = array<i64: 120, 60>}, {pipeline_mode = #tpu.pipeline_mode<synchronous>, transform_indices = @transform_11, window_bounds = array<i64: 1, 60>}, {pipeline_mode = #tpu.pipeline_mode<synchronous>, transform_indices = @transform_12, window_bounds = array<i64: 60, 15>}, {pipeline_mode = #tpu.pipeline_mode<synchronous>, transform_indices = @transform_13, window_bounds = array<i64: 1, 15>}, {pipeline_mode = #tpu.pipeline_mode<synchronous>, transform_indices = @transform_14, window_bounds = array<i64: 50, 64>}, {pipeline_mode = #tpu.pipeline_mode<synchronous>, transform_indices = @transform_15, window_bounds = array<i64: 128, 64>}, {pipeline_mode = #tpu.pipeline_mode<synchronous>, transform_indices = @transform_16, window_bounds = array<i64: 8, 128>}, {pipeline_mode = #tpu.pipeline_mode<synchronous>, transform_indices = @transform_17, window_bounds = array<i64: 64, 128>}, {pipeline_mode = #tpu.pipeline_mode<synchronous>, transform_indices = @transform_18, window_bounds = array<i64: 504, 4>}, {pipeline_mode = #tpu.pipeline_mode<synchronous>, transform_indices = @transform_19, window_bounds = array<i64: 8, 504>}, {pipeline_mode = #tpu.pipeline_mode<synchronous>, transform_indices = @transform_20, window_bounds = array<i64: 4, 128>}, {pipeline_mode = #tpu.pipeline_mode<synchronous>, transform_indices = @transform_21, window_bounds = array<i64: 1, 128>}, {transform_indices = @transform_22, window_bounds = array<i64: 8, 128>}]} {
    %c0 = arith.constant 0 : index
    %c0_0 = arith.constant 0 : index
    %0 = vector.load %arg1[%c0, %c0_0] : memref<128x252xf32, #tpu.memory_space<vmem>>, vector<128x252xf32>
    %c0_1 = arith.constant 0 : index
    %c0_2 = arith.constant 0 : index
    %1 = vector.load %arg3[%c0_1, %c0_2] : memref<252x450xf32, #tpu.memory_space<vmem>>, vector<252x450xf32>
    %cst = arith.constant dense<0.000000e+00> : vector<128x450xf32>
    %2 = tpu.matmul %0, %1, %cst {dimension_numbers = #tpu.dot_dimension_numbers<[1], [0], [0], [1], [0, 0, 1, 1], [], []>} : vector<128x252xf32>, vector<252x450xf32>, vector<128x450xf32> -> vector<128x450xf32>
    %c0_3 = arith.constant 0 : index
    %c0_4 = arith.constant 0 : index
    %3 = vector.load %arg4[%c0_3, %c0_4] : memref<1x450xf32, #tpu.memory_space<vmem>>, vector<1x450xf32>
    %4 = vector.broadcast %3 : vector<1x450xf32> to vector<128x450xf32>
    %5 = arith.addf %2, %4 : vector<128x450xf32>
    %cst_5 = arith.constant 0.000000e+00 : f32
    %6 = vector.broadcast %cst_5 : f32 to vector<128x450xf32>
    %7 = arith.cmpf oge, %5, %6 : vector<128x450xf32>
    %cst_6 = arith.constant 0.00999999977 : f32
    %8 = vector.broadcast %cst_6 : f32 to vector<128x450xf32>
    %9 = arith.mulf %8, %5 : vector<128x450xf32>
    %10 = arith.select %7, %5, %9 : vector<128x450xi1>, vector<128x450xf32>
    %c0_7 = arith.constant 0 : index
    %c0_8 = arith.constant 0 : index
    %11 = vector.load %arg5[%c0_7, %c0_8] : memref<450x212xf32, #tpu.memory_space<vmem>>, vector<450x212xf32>
    %cst_9 = arith.constant dense<0.000000e+00> : vector<128x212xf32>
    %12 = tpu.matmul %10, %11, %cst_9 {dimension_numbers = #tpu.dot_dimension_numbers<[1], [0], [0], [1], [0, 0, 1, 1], [], []>} : vector<128x450xf32>, vector<450x212xf32>, vector<128x212xf32> -> vector<128x212xf32>
    %c0_10 = arith.constant 0 : index
    %c0_11 = arith.constant 0 : index
    %13 = vector.load %arg6[%c0_10, %c0_11] : memref<1x212xf32, #tpu.memory_space<vmem>>, vector<1x212xf32>
    %14 = vector.broadcast %13 : vector<1x212xf32> to vector<128x212xf32>
    %15 = arith.addf %12, %14 : vector<128x212xf32>
    %cst_12 = arith.constant 0.000000e+00 : f32
    %16 = vector.broadcast %cst_12 : f32 to vector<128x212xf32>
    %17 = arith.cmpf oge, %15, %16 : vector<128x212xf32>
    %cst_13 = arith.constant 0.00999999977 : f32
    %18 = vector.broadcast %cst_13 : f32 to vector<128x212xf32>
    %19 = arith.mulf %18, %15 : vector<128x212xf32>
    %20 = arith.select %17, %15, %19 : vector<128x212xi1>, vector<128x212xf32>
    %c0_14 = arith.constant 0 : index
    %c0_15 = arith.constant 0 : index
    %21 = vector.load %arg7[%c0_14, %c0_15] : memref<212x50xf32, #tpu.memory_space<vmem>>, vector<212x50xf32>
    %cst_16 = arith.constant dense<0.000000e+00> : vector<128x50xf32>
    %22 = tpu.matmul %20, %21, %cst_16 {dimension_numbers = #tpu.dot_dimension_numbers<[1], [0], [0], [1], [0, 0, 1, 1], [], []>} : vector<128x212xf32>, vector<212x50xf32>, vector<128x50xf32> -> vector<128x50xf32>
    %c0_17 = arith.constant 0 : index
    %c0_18 = arith.constant 0 : index
    %23 = vector.load %arg8[%c0_17, %c0_18] : memref<1x50xf32, #tpu.memory_space<vmem>>, vector<1x50xf32>
    %24 = vector.broadcast %23 : vector<1x50xf32> to vector<128x50xf32>
    %25 = arith.addf %22, %24 : vector<128x50xf32>
    %cst_19 = arith.constant 0.000000e+00 : f32
    %26 = vector.broadcast %cst_19 : f32 to vector<128x50xf32>
    %27 = arith.cmpf oge, %25, %26 : vector<128x50xf32>
    %cst_20 = arith.constant 0.00999999977 : f32
    %28 = vector.broadcast %cst_20 : f32 to vector<128x50xf32>
    %29 = arith.mulf %28, %25 : vector<128x50xf32>
    %30 = arith.select %27, %25, %29 : vector<128x50xi1>, vector<128x50xf32>
    %c0_21 = arith.constant 0 : index
    %c0_22 = arith.constant 0 : index
    %31 = vector.load %arg2[%c0_21, %c0_22] : memref<504x67xf32, #tpu.memory_space<vmem>>, vector<504x67xf32>
    %c0_23 = arith.constant 0 : index
    %c0_24 = arith.constant 0 : index
    %32 = vector.load %arg9[%c0_23, %c0_24] : memref<67x120xf32, #tpu.memory_space<vmem>>, vector<67x120xf32>
    %cst_25 = arith.constant dense<0.000000e+00> : vector<504x120xf32>
    %33 = tpu.matmul %31, %32, %cst_25 {dimension_numbers = #tpu.dot_dimension_numbers<[1], [0], [0], [1], [0, 0, 1, 1], [], []>} : vector<504x67xf32>, vector<67x120xf32>, vector<504x120xf32> -> vector<504x120xf32>
    %c0_26 = arith.constant 0 : index
    %c0_27 = arith.constant 0 : index
    %34 = vector.load %arg10[%c0_26, %c0_27] : memref<1x120xf32, #tpu.memory_space<vmem>>, vector<1x120xf32>
    %35 = vector.broadcast %34 : vector<1x120xf32> to vector<504x120xf32>
    %36 = arith.addf %33, %35 : vector<504x120xf32>
    %cst_28 = arith.constant 0.000000e+00 : f32
    %37 = vector.broadcast %cst_28 : f32 to vector<504x120xf32>
    %38 = arith.cmpf oge, %36, %37 : vector<504x120xf32>
    %cst_29 = arith.constant 0.00999999977 : f32
    %39 = vector.broadcast %cst_29 : f32 to vector<504x120xf32>
    %40 = arith.mulf %39, %36 : vector<504x120xf32>
    %41 = arith.select %38, %36, %40 : vector<504x120xi1>, vector<504x120xf32>
    %c0_30 = arith.constant 0 : index
    %c0_31 = arith.constant 0 : index
    %42 = vector.load %arg11[%c0_30, %c0_31] : memref<120x60xf32, #tpu.memory_space<vmem>>, vector<120x60xf32>
    %cst_32 = arith.constant dense<0.000000e+00> : vector<504x60xf32>
    %43 = tpu.matmul %41, %42, %cst_32 {dimension_numbers = #tpu.dot_dimension_numbers<[1], [0], [0], [1], [0, 0, 1, 1], [], []>} : vector<504x120xf32>, vector<120x60xf32>, vector<504x60xf32> -> vector<504x60xf32>
    %c0_33 = arith.constant 0 : index
    %c0_34 = arith.constant 0 : index
    %44 = vector.load %arg12[%c0_33, %c0_34] : memref<1x60xf32, #tpu.memory_space<vmem>>, vector<1x60xf32>
    %45 = vector.broadcast %44 : vector<1x60xf32> to vector<504x60xf32>
    %46 = arith.addf %43, %45 : vector<504x60xf32>
    %cst_35 = arith.constant 0.000000e+00 : f32
    %47 = vector.broadcast %cst_35 : f32 to vector<504x60xf32>
    %48 = arith.cmpf oge, %46, %47 : vector<504x60xf32>
    %cst_36 = arith.constant 0.00999999977 : f32
    %49 = vector.broadcast %cst_36 : f32 to vector<504x60xf32>
    %50 = arith.mulf %49, %46 : vector<504x60xf32>
    %51 = arith.select %48, %46, %50 : vector<504x60xi1>, vector<504x60xf32>
    %c0_37 = arith.constant 0 : index
    %c0_38 = arith.constant 0 : index
    %52 = vector.load %arg13[%c0_37, %c0_38] : memref<60x15xf32, #tpu.memory_space<vmem>>, vector<60x15xf32>
    %cst_39 = arith.constant dense<0.000000e+00> : vector<504x15xf32>
    %53 = tpu.matmul %51, %52, %cst_39 {dimension_numbers = #tpu.dot_dimension_numbers<[1], [0], [0], [1], [0, 0, 1, 1], [], []>} : vector<504x60xf32>, vector<60x15xf32>, vector<504x15xf32> -> vector<504x15xf32>
    %c0_40 = arith.constant 0 : index
    %c0_41 = arith.constant 0 : index
    %54 = vector.load %arg14[%c0_40, %c0_41] : memref<1x15xf32, #tpu.memory_space<vmem>>, vector<1x15xf32>
    %55 = vector.broadcast %54 : vector<1x15xf32> to vector<504x15xf32>
    %56 = arith.addf %53, %55 : vector<504x15xf32>
    %cst_42 = arith.constant 0.000000e+00 : f32
    %57 = vector.broadcast %cst_42 : f32 to vector<504x15xf32>
    %58 = arith.cmpf oge, %56, %57 : vector<504x15xf32>
    %cst_43 = arith.constant 0.00999999977 : f32
    %59 = vector.broadcast %cst_43 : f32 to vector<504x15xf32>
    %60 = arith.mulf %59, %56 : vector<504x15xf32>
    %61 = arith.select %58, %56, %60 : vector<504x15xi1>, vector<504x15xf32>
    %c0_44 = arith.constant 0 : index
    %c0_45 = arith.constant 0 : index
    %62 = vector.load %arg15[%c0_44, %c0_45] : memref<50x64xf32, #tpu.memory_space<vmem>>, vector<50x64xf32>
    %cst_46 = arith.constant dense<0.000000e+00> : vector<128x64xf32>
    %63 = tpu.matmul %30, %62, %cst_46 {dimension_numbers = #tpu.dot_dimension_numbers<[1], [0], [0], [1], [0, 0, 1, 1], [], []>} : vector<128x50xf32>, vector<50x64xf32>, vector<128x64xf32> -> vector<128x64xf32>
    %c0_47 = arith.constant 0 : index
    %c0_48 = arith.constant 0 : index
    %64 = vector.load %arg16[%c0_47, %c0_48] : memref<128x64xf32, #tpu.memory_space<vmem>>, vector<128x64xf32>
    %65 = arith.mulf %63, %64 : vector<128x64xf32>
    %c0_49 = arith.constant 0 : index
    %c0_50 = arith.constant 0 : index
    %66 = vector.load %arg17[%c0_49, %c0_50] : memref<8x128xf32, #tpu.memory_space<vmem>>, vector<8x128xf32>
    %cst_51 = arith.constant dense<0.000000e+00> : vector<8x64xf32>
    %67 = tpu.matmul %66, %65, %cst_51 {dimension_numbers = #tpu.dot_dimension_numbers<[1], [0], [0], [1], [0, 0, 1, 1], [], []>} : vector<8x128xf32>, vector<128x64xf32>, vector<8x64xf32> -> vector<8x64xf32>
    %c0_52 = arith.constant 0 : index
    %c0_53 = arith.constant 0 : index
    %68 = vector.load %arg18[%c0_52, %c0_53] : memref<64x128xf32, #tpu.memory_space<vmem>>, vector<64x128xf32>
    %cst_54 = arith.constant dense<0.000000e+00> : vector<8x128xf32>
    %69 = tpu.matmul %67, %68, %cst_54 {dimension_numbers = #tpu.dot_dimension_numbers<[1], [0], [0], [1], [0, 0, 1, 1], [], []>} : vector<8x64xf32>, vector<64x128xf32>, vector<8x128xf32> -> vector<8x128xf32>
    %c0_55 = arith.constant 0 : index
    %c0_56 = arith.constant 0 : index
    %70 = vector.load %arg19[%c0_55, %c0_56] : memref<504x4xf32, #tpu.memory_space<vmem>>, vector<504x4xf32>
    %71 = vector.extract_strided_slice %61 {offsets = [0, 0], sizes = [504, 13], strides = [1, 1]} : vector<504x15xf32> to vector<504x13xf32>
    %cst_57 = arith.constant dense<0xFF800000> : vector<504xf32>
    %72 = vector.multi_reduction <maximumf>, %71, %cst_57 [1] : vector<504x13xf32> to vector<504xf32>
    %73 = vector.shape_cast %72 : vector<504xf32> to vector<504x1xf32>
    %74 = vector.broadcast %73 : vector<504x1xf32> to vector<504x4xf32>
    %75 = arith.mulf %74, %70 : vector<504x4xf32>
    %c0_58 = arith.constant 0 : index
    %c0_59 = arith.constant 0 : index
    %76 = vector.load %arg20[%c0_58, %c0_59] : memref<8x504xf32, #tpu.memory_space<vmem>>, vector<8x504xf32>
    %cst_60 = arith.constant dense<0.000000e+00> : vector<8x4xf32>
    %77 = tpu.matmul %76, %75, %cst_60 {dimension_numbers = #tpu.dot_dimension_numbers<[1], [0], [0], [1], [0, 0, 1, 1], [], []>} : vector<8x504xf32>, vector<504x4xf32>, vector<8x4xf32> -> vector<8x4xf32>
    %c0_61 = arith.constant 0 : index
    %c0_62 = arith.constant 0 : index
    %78 = vector.load %arg21[%c0_61, %c0_62] : memref<4x128xf32, #tpu.memory_space<vmem>>, vector<4x128xf32>
    %cst_63 = arith.constant dense<0.000000e+00> : vector<8x128xf32>
    %79 = tpu.matmul %77, %78, %cst_63 {dimension_numbers = #tpu.dot_dimension_numbers<[1], [0], [0], [1], [0, 0, 1, 1], [], []>} : vector<8x4xf32>, vector<4x128xf32>, vector<8x128xf32> -> vector<8x128xf32>
    %80 = arith.addf %69, %79 : vector<8x128xf32>
    %c0_64 = arith.constant 0 : index
    %c0_65 = arith.constant 0 : index
    %81 = vector.load %arg22[%c0_64, %c0_65] : memref<1x128xf32, #tpu.memory_space<vmem>>, vector<1x128xf32>
    %82 = vector.broadcast %81 : vector<1x128xf32> to vector<8x128xf32>
    %83 = arith.addf %80, %82 : vector<8x128xf32>
    %c0_66 = arith.constant 0 : index
    %c0_67 = arith.constant 0 : index
    %84 = vector.load %arg23[%c0_66, %c0_67] : memref<8x128xf32, #tpu.memory_space<vmem>>, vector<8x128xf32>
    tpu.vector_store %arg23[%c0_66, %c0_67], %83 {strides = array<i32>} : memref<8x128xf32, #tpu.memory_space<vmem>>, vector<8x128xf32>,
    return
  }
  func.func @transform_0(%arg0: i32) -> (i32, i32) {
    %c0_i32 = arith.constant 0 : i32
    %c0_i32_0 = arith.constant 0 : i32
    return %arg0, %c0_i32 : i32, i32
  }
  func.func @transform_1(%arg0: i32) -> (i32, i32) {
    %c0_i32 = arith.constant 0 : i32
    %c0_i32_0 = arith.constant 0 : i32
    return %arg0, %c0_i32 : i32, i32
  }
  func.func @transform_2(%arg0: i32) -> (i32, i32) {
    %c0_i32 = arith.constant 0 : i32
    %c0_i32_0 = arith.constant 0 : i32
    %c0_i32_1 = arith.constant 0 : i32
    return %c0_i32, %c0_i32_0 : i32, i32
  }
  func.func @transform_3(%arg0: i32) -> (i32, i32) {
    %c0_i32 = arith.constant 0 : i32
    %c0_i32_0 = arith.constant 0 : i32
    %c0_i32_1 = arith.constant 0 : i32
    return %c0_i32, %c0_i32_0 : i32, i32
  }
  func.func @transform_4(%arg0: i32) -> (i32, i32) {
    %c0_i32 = arith.constant 0 : i32
    %c0_i32_0 = arith.constant 0 : i32
    %c0_i32_1 = arith.constant 0 : i32
    return %c0_i32, %c0_i32_0 : i32, i32
  }
  func.func @transform_5(%arg0: i32) -> (i32, i32) {
    %c0_i32 = arith.constant 0 : i32
    %c0_i32_0 = arith.constant 0 : i32
    %c0_i32_1 = arith.constant 0 : i32
    return %c0_i32, %c0_i32_0 : i32, i32
  }
  func.func @transform_6(%arg0: i32) -> (i32, i32) {
    %c0_i32 = arith.constant 0 : i32
    %c0_i32_0 = arith.constant 0 : i32
    %c0_i32_1 = arith.constant 0 : i32
    return %c0_i32, %c0_i32_0 : i32, i32
  }
  func.func @transform_7(%arg0: i32) -> (i32, i32) {
    %c0_i32 = arith.constant 0 : i32
    %c0_i32_0 = arith.constant 0 : i32
    %c0_i32_1 = arith.constant 0 : i32
    return %c0_i32, %c0_i32_0 : i32, i32
  }
  func.func @transform_8(%arg0: i32) -> (i32, i32) {
    %c0_i32 = arith.constant 0 : i32
    %c0_i32_0 = arith.constant 0 : i32
    %c0_i32_1 = arith.constant 0 : i32
    return %c0_i32, %c0_i32_0 : i32, i32
  }
  func.func @transform_9(%arg0: i32) -> (i32, i32) {
    %c0_i32 = arith.constant 0 : i32
    %c0_i32_0 = arith.constant 0 : i32
    %c0_i32_1 = arith.constant 0 : i32
    return %c0_i32, %c0_i32_0 : i32, i32
  }
  func.func @transform_10(%arg0: i32) -> (i32, i32) {
    %c0_i32 = arith.constant 0 : i32
    %c0_i32_0 = arith.constant 0 : i32
    %c0_i32_1 = arith.constant 0 : i32
    return %c0_i32, %c0_i32_0 : i32, i32
  }
  func.func @transform_11(%arg0: i32) -> (i32, i32) {
    %c0_i32 = arith.constant 0 : i32
    %c0_i32_0 = arith.constant 0 : i32
    %c0_i32_1 = arith.constant 0 : i32
    return %c0_i32, %c0_i32_0 : i32, i32
  }
  func.func @transform_12(%arg0: i32) -> (i32, i32) {
    %c0_i32 = arith.constant 0 : i32
    %c0_i32_0 = arith.constant 0 : i32
    %c0_i32_1 = arith.constant 0 : i32
    return %c0_i32, %c0_i32_0 : i32, i32
  }
  func.func @transform_13(%arg0: i32) -> (i32, i32) {
    %c0_i32 = arith.constant 0 : i32
    %c0_i32_0 = arith.constant 0 : i32
    %c0_i32_1 = arith.constant 0 : i32
    return %c0_i32, %c0_i32_0 : i32, i32
  }
  func.func @transform_14(%arg0: i32) -> (i32, i32) {
    %c0_i32 = arith.constant 0 : i32
    %c0_i32_0 = arith.constant 0 : i32
    %c0_i32_1 = arith.constant 0 : i32
    return %c0_i32, %c0_i32_0 : i32, i32
  }
  func.func @transform_15(%arg0: i32) -> (i32, i32) {
    %c0_i32 = arith.constant 0 : i32
    %c0_i32_0 = arith.constant 0 : i32
    %c0_i32_1 = arith.constant 0 : i32
    return %c0_i32, %c0_i32_0 : i32, i32
  }
  func.func @transform_16(%arg0: i32) -> (i32, i32) {
    %c0_i32 = arith.constant 0 : i32
    %c0_i32_0 = arith.constant 0 : i32
    %c0_i32_1 = arith.constant 0 : i32
    return %c0_i32, %c0_i32_0 : i32, i32
  }
  func.func @transform_17(%arg0: i32) -> (i32, i32) {
    %c0_i32 = arith.constant 0 : i32
    %c0_i32_0 = arith.constant 0 : i32
    %c0_i32_1 = arith.constant 0 : i32
    return %c0_i32, %c0_i32_0 : i32, i32
  }
  func.func @transform_18(%arg0: i32) -> (i32, i32) {
    %c0_i32 = arith.constant 0 : i32
    %c0_i32_0 = arith.constant 0 : i32
    %c0_i32_1 = arith.constant 0 : i32
    return %c0_i32, %c0_i32_0 : i32, i32
  }
  func.func @transform_19(%arg0: i32) -> (i32, i32) {
    %c0_i32 = arith.constant 0 : i32
    %c0_i32_0 = arith.constant 0 : i32
    %c0_i32_1 = arith.constant 0 : i32
    return %c0_i32, %c0_i32_0 : i32, i32
  }
  func.func @transform_20(%arg0: i32) -> (i32, i32) {
    %c0_i32 = arith.constant 0 : i32
    %c0_i32_0 = arith.constant 0 : i32
    %c0_i32_1 = arith.constant 0 : i32
    return %c0_i32, %c0_i32_0 : i32, i32
  }
  func.func @transform_21(%arg0: i32) -> (i32, i32) {
    %c0_i32 = arith.constant 0 : i32
    %c0_i32_0 = arith.constant 0 : i32
    %c0_i32_1 = arith.constant 0 : i32
    return %c0_i32, %c0_i32_0 : i32, i32
  }
  func.func @transform_22(%arg0: i32) -> (i32, i32) {
    %c0_i32 = arith.constant 0 : i32
    %c0_i32_0 = arith.constant 0 : i32
    return %arg0, %c0_i32 : i32, i32
  }
}

</mosaic_0001>

<bundles_post_ra>
// kernel: crlnet_forward.1
= control target key start
LH: loop header
LB: loop body
LE: loop exit
PB: predicated region body
PF: predicated region fallthrough
CT: control target
= control target key end

     0   :  { %s10585_s0 = inlined_call_operand.vmem [shape: f32[256,252], index: 0, kind: input, shape index: {}]   ;;  %s10586_s1 = inlined_call_operand.vmem [shape: f32[1008,67], index: 1, kind: input, shape index: {}]   ;;  %s10587_s2 = inlined_call_operand.vmem [shape: f32[252,450], index: 2, kind: input, shape index: {}]   ;;  %s10588_s3 = inlined_call_operand.vmem [shape: f32[1,450], index: 3, kind: input, shape index: {}]   ;;  %s10589_s4 = inlined_call_operand.vmem [shape: f32[450,212], index: 4, kind: input, shape index: {}]   ;;  %s10590_s5 = inlined_call_operand.vmem [shape: f32[1,212], index: 5, kind: input, shape index: {}]   ;;  %s10591_s6 = inlined_call_operand.vmem [shape: f32[212,50], index: 6, kind: input, shape index: {}]   ;;  %s10592_s7 = inlined_call_operand.vmem [shape: f32[1,50], index: 7, kind: input, shape index: {}]   ;;  %s10593_s8 = inlined_call_operand.vmem [shape: f32[67,120], index: 8, kind: input, shape index: {}]   ;;  %s10594_s9 = inlined_call_operand.vmem [shape: f32[1,120], index: 9, kind: input, shape index: {}]   ;;  %s10595_s10 = inlined_call_operand.vmem [shape: f32[120,60], index: 10, kind: input, shape index: {}]   ;;  %s10596_s11 = inlined_call_operand.vmem [shape: f32[1,60], index: 11, kind: input, shape index: {}]   ;;  %s10597_s12 = inlined_call_operand.vmem [shape: f32[60,15], index: 12, kind: input, shape index: {}]   ;;  %s10598_s13 = inlined_call_operand.vmem [shape: f32[1,15], index: 13, kind: input, shape index: {}]   ;;  %s10599_s14 = inlined_call_operand.vmem [shape: f32[50,64], index: 14, kind: input, shape index: {}]   ;;  %s10600_s15 = inlined_call_operand.vmem [shape: f32[128,64], index: 15, kind: input, shape index: {}]   ;;  %s10601_s16 = inlined_call_operand.vmem [shape: f32[8,128], index: 16, kind: input, shape index: {}]   ;;  %s10602_s17 = inlined_call_operand.vmem [shape: f32[64,128], index: 17, kind: input, shape index: {}]   ;;  %s10603_s18 = inlined_call_operand.vmem [shape: f32[504,4], index: 18, kind: input, shape index: {}]   ;;  %s10604_s19 = inlined_call_operand.vmem [shape: f32[8,504], index: 19, kind: input, shape index: {}]   ;;  %s10605_s20 = inlined_call_operand.vmem [shape: f32[4,128], index: 20, kind: input, shape index: {}]   ;;  %s10606_s21 = inlined_call_operand.vmem [shape: f32[1,128], index: 21, kind: input, shape index: {}]   ;;  %s10607_s22 = inlined_call_operand.vmem [shape: f32[16,128], index: 22, kind: output, shape index: {}]  }
   0x1   :  { %10612 = sst [smem:[#allocation3_spill]] %s10585_s0 }
   0x2   :  { %10613 = sst [smem:[#allocation4_spill]] %s10586_s1 }
   0x3   :  { %10614 = sst [smem:[#allocation5_spill]] %s10587_s2 }
   0x4   :  { %10615 = sst [smem:[#allocation6_spill]] %s10588_s3  ;;  %s7754_s3 = smov 0  }
   0x5   :  { %10616 = sst [smem:[#allocation7_spill]] %s10589_s4 }
   0x6   :  { %10617 = sst [smem:[#allocation8_spill]] %s10590_s5 }
   0x7   :  { %10618 = sst [smem:[#allocation9_spill]] %s10591_s6 }
   0x8 LB: > { %10619 = sst [smem:[#allocation2_spill]] %s7633_s3  ;;  %s7760_s28 = sadd.s32 4294967295, %s7633_s3   ;;  %s7633_s3 = sphi %s7754_s3, %s32_s3  }
   0x9   : > { %p5754_p0 = scmp.ge.s32.totalorder %s7633_s3, 1  ;;  %p625_p1 = scmp.lt.s32.totalorder %s7633_s3, 3 }
   0xb   : > { %p626_p2 = pnand %p5754_p0, %p625_p1 }
   0xc   : > { %s10620_s4 = sld [smem:[#allocation5_spill]] (!%p626_p2)  ;;  %s5755_s1 = sshll.u32 (!%p626_p2), %s7760_s28, 4  ;;  %vm891_vm0 = vcmask (!%p626_p2), 1014784   ;;  %vm940_vm1 = vcmask (!%p626_p2), 1043456   ;;  %vm7635_vm2 = vmmov (!%p626_p2), 1  }
   0xd   : > { %629 = sbr.rel (%p626_p2) target bundleno = 2146 (0x862), region = 108  ;;  %p693_p3 = scmp.lt.s32.totalorder (!%p626_p2), %s5755_s1, 31  ;;  %vm8092_vm3 = vmpackc.low (!%p626_p2), %vm940_vm1, %vm7635_vm2 }
   0xe   : > { %s10621_s30 = sld [smem:[#allocation3_spill]] (!%p626_p2)  ;;  %s10624_s24 = sld [smem:[#allocation7_spill]] (!%p626_p2) }
   0xf   : > { %s10625_s23 = sld [smem:[#allocation6_spill]] (!%p626_p2)  ;;  %s699_s27 = smul.u32 (!%p626_p2), 63, %s7760_s28 }
  0x10   : > { %p705_p5 = scmp.lt.s32.totalorder (!%p626_p2), %s7760_s28, 1 }
  0x11   : > { %p700_p4 = scmp.lt.s32.totalorder (!%p626_p2), %s699_s27, 125 }
  0x12   : > { %v742_v0 = vld [vmem:[%s10620_s4 + $0x8] sm:$0xff] (!%p626_p2)  ;;  %v741_v2 = vld [vmem:[%s10620_s4] sm:$0xff] (!%p626_p2)  ;;  %v744_v43 = vld [vmem:[%s10620_s4 + $0x18] sm:$0xff] (!%p626_p2) }
  0x13   : > { %v746_v1 = vld [vmem:[%s10620_s4 + $0x28] sm:$0xff] (!%p626_p2)  ;;  %v745_v4 = vld [vmem:[%s10620_s4 + $0x20] sm:$0xff] (!%p626_p2)  ;;  %v748_v44 = vld [vmem:[%s10620_s4 + $0x38] sm:$0xff] (!%p626_p2) }
  0x14   : > { %v7086_v3 = vpack.c.bf16 %v746_v1, %v742_v0  ;;  %v750_v5 = vld [vmem:[%s10620_s4 + $0x48] sm:$0xff]  ;;  %v7088_v7 = vpack.c.bf16 %v745_v4, %v741_v2  ;;  %v749_v9 = vld [vmem:[%s10620_s4 + $0x40] sm:$0xff]  ;;  %s10631_s1 = smov (!%p693_p3, %s5755_s1), 31  ;;  %v743_v45 = vld [vmem:[%s10620_s4 + $0x10] sm:$0xff]  ;;  %v7152_v47 = vpack.c.bf16 %v748_v44, %v744_v43  ;;  %s10633_s27 = smov (!%p700_p4, %s699_s27), 125 }
  0x15   : > { %v754_v6 = vld [vmem:[%s10620_s4 + $0x68] sm:$0xff]  ;;  %v753_v10 = vld [vmem:[%s10620_s4 + $0x60] sm:$0xff]  ;;  %s6050_s0 = sshll.u32 %s10631_s1, 4  ;;  %v747_v46 = vld [vmem:[%s10620_s4 + $0x30] sm:$0xff]  ;;  %s10627_s1 = sld [smem:[#allocation8_spill]] }
  0x16   : > { %v7090_v8 = vpack.c.bf16 %v754_v6, %v750_v5  ;;  %v758_v11 = vld [vmem:[%s10620_s4 + $0x88] sm:$0xff]  ;;  %7087 = vmatprep.subr.bf16.mxu0 %v7086_v3  ;;  %v7092_v13 = vpack.c.bf16 %v753_v10, %v749_v9  ;;  %v757_v15 = vld [vmem:[%s10620_s4 + $0x80] sm:$0xff]  ;;  %s7852_s3 = scalar_lea.vmem %s10621_s30, %s6050_s0  ;;  %v7154_v48 = vpack.c.bf16 %v747_v46, %v743_v45  ;;  %v752_v50 = vld [vmem:[%s10620_s4 + $0x58] sm:$0xff]  ;;  %7153 = vmatprep.subr.bf16.mxu1 %v7152_v47  ;;  %s10626_s30 = sld [smem:[#allocation9_spill]] }
  0x17   : > { %v762_v12 = vld [vmem:[%s10620_s4 + $0xa8] sm:$0xff]  ;;  %7089 = vmatpush1.bf16.msra.mxu0 %v7088_v7  ;;  %v761_v16 = vld [vmem:[%s10620_s4 + $0xa0] sm:$0xff]  ;;  %v756_v52 = vld [vmem:[%s10620_s4 + $0x78] sm:$0xff]  ;;  %s5758_s0 = sshll.u32 %s10633_s27, 3  ;;  %s10635_s28 = smov (!%p705_p5, %s7760_s28), 1 }
  0x18   : > { %7091 = vmatprep.subr.bf16.mxu0 %v7090_v8  ;;  %v7094_v14 = vpack.c.bf16 %v762_v12, %v758_v11  ;;  %v766_v17 = vld [vmem:[%s10620_s4 + $0xc8] sm:$0xff]  ;;  %v7096_v19 = vpack.c.bf16 %v761_v16, %v757_v15  ;;  %v765_v21 = vld [vmem:[%s10620_s4 + $0xc0] sm:$0xff]  ;;  %v751_v53 = vld [vmem:[%s10620_s4 + $0x50] sm:$0xff]  ;;  %v7156_v58 = vpack.c.bf16 %v756_v52, %v752_v50  ;;  %7155 = vmatpush1.bf16.msra.mxu1 %v7154_v48  ;;  %s5759_s6 = sshll.u32 %s10635_s28, 3 }
  0x19   : > { %v770_v18 = vld [vmem:[%s10620_s4 + $0xe8] sm:$0xff]  ;;  %v769_v22 = vld [vmem:[%s10620_s4 + $0xe0] sm:$0xff]  ;;  %v755_v54 = vld [vmem:[%s10620_s4 + $0x70] sm:$0xff] }
  0x1a   : > { %v7098_v20 = vpack.c.bf16 %v770_v18, %v766_v17  ;;  %v774_v23 = vld [vmem:[%s10620_s4 + $0x108] sm:$0xff]  ;;  %v7100_v25 = vpack.c.bf16 %v769_v22, %v765_v21  ;;  %v773_v27 = vld [vmem:[%s10620_s4 + $0x100] sm:$0xff]  ;;  %v760_v59 = vld [vmem:[%s10620_s4 + $0x98] sm:$0xff]  ;;  %v7158_v62 = vpack.c.bf16 %v755_v54, %v751_v53  ;;  %7157 = vmatprep.subr.bf16.mxu1 %v7156_v58 }
  0x1b   : > { %7093 = vmatpush1.bf16.msra.mxu0 %v7092_v13  ;;  %v778_v24 = vld [vmem:[%s10620_s4 + $0x128] sm:$0xff]  ;;  %v777_v28 = vld [vmem:[%s10620_s4 + $0x120] sm:$0xff]  ;;  %v764_v63 = vld [vmem:[%s10620_s4 + $0xb8] sm:$0xff] }
  0x1c   : > { %7095 = vmatprep.subr.bf16.mxu0 %v7094_v14  ;;  %v7102_v26 = vpack.c.bf16 %v778_v24, %v774_v23  ;;  %v782_v29 = vld [vmem:[%s10620_s4 + $0x148] sm:$0xff]  ;;  %v7104_v31 = vpack.c.bf16 %v777_v28, %v773_v27  ;;  %v781_v33 = vld [vmem:[%s10620_s4 + $0x140] sm:$0xff]  ;;  %v7160_v0 = vpack.c.bf16 %v764_v63, %v760_v59  ;;  %v759_v1 = vld [vmem:[%s10620_s4 + $0x90] sm:$0xff]  ;;  %7159 = vmatpush1.bf16.msra.mxu1 %v7158_v62 }
  0x1d   : > { %v786_v30 = vld [vmem:[%s10620_s4 + $0x168] sm:$0xff]  ;;  %v785_v34 = vld [vmem:[%s10620_s4 + $0x160] sm:$0xff]  ;;  %v763_v2 = vld [vmem:[%s10620_s4 + $0xb0] sm:$0xff] }
  0x1e   : > { %v7106_v32 = vpack.c.bf16 %v786_v30, %v782_v29  ;;  %v790_v35 = vld [vmem:[%s10620_s4 + $0x188] sm:$0xff]  ;;  %v7108_v37 = vpack.c.bf16 %v785_v34, %v781_v33  ;;  %v789_v38 = vld [vmem:[%s10620_s4 + $0x180] sm:$0xff]  ;;  %v768_v4 = vld [vmem:[%s10620_s4 + $0xd8] sm:$0xff]  ;;  %v7162_v11 = vpack.c.bf16 %v763_v2, %v759_v1  ;;  %7161 = vmatprep.subr.bf16.mxu1 %v7160_v0 }
  0x1f   : > { %7097 = vmatpush1.bf16.msra.mxu0 %v7096_v19  ;;  %v794_v36 = vld [vmem:[%s10620_s4 + $0x1a8] sm:$0xff]  ;;  %v793_v39 = vld [vmem:[%s10620_s4 + $0x1a0] sm:$0xff]  ;;  %v772_v5 = vld [vmem:[%s10620_s4 + $0xf8] sm:$0xff] }
  0x20   : > { %7099 = vmatprep.subr.bf16.mxu0 %v7098_v20  ;;  %v7110_v40 = vpack.c.bf16 %v794_v36, %v790_v35  ;;  %v798_v41 = vld [vmem:[%s10620_s4 + $0x1c8] sm:$0xff]  ;;  %v7112_v51 = vpack.c.bf16 %v793_v39, %v789_v38  ;;  %v797_v56 = vld [vmem:[%s10620_s4 + $0x1c0] sm:$0xff]  ;;  %v7164_v12 = vpack.c.bf16 %v772_v5, %v768_v4  ;;  %v767_v13 = vld [vmem:[%s10620_s4 + $0xd0] sm:$0xff]  ;;  %7163 = vmatpush1.bf16.msra.mxu1 %v7162_v11 }
  0x21   : > { %v802_v42 = vld [vmem:[%s10620_s4 + $0x1e8] sm:$0xff]  ;;  %v801_v57 = vld [vmem:[%s10620_s4 + $0x1e0] sm:$0xff]  ;;  %v771_v14 = vld [vmem:[%s10620_s4 + $0xf0] sm:$0xff] }
  0x22   : > { %v710_v49 = vld [vmem:[%s7852_s3 + $0x8] sm:$0xff]  ;;  %v7114_v55 = vpack.c.bf16 %v802_v42, %v798_v41  ;;  %v7116_v3 = vpack.c.bf16 %v801_v57, %v797_v56  ;;  %v805_v7 = vld [vmem:[%s10620_s4 + $0x200] sm:$0xff]  ;;  %v776_v16 = vld [vmem:[%s10620_s4 + $0x118] sm:$0xff]  ;;  %v7166_v23 = vpack.c.bf16 %v771_v14, %v767_v13  ;;  %7165 = vmatprep.subr.bf16.mxu1 %v7164_v12 }
  0x23   : > { %7101 = vmatpush1.bf16.msra.mxu0 %v7100_v25  ;;  %5762 = vmatprep.mubr.msk.f32.mxu0 %vm891_vm0, %v710_v49  ;;  %v806_v60 = vld [vmem:[%s10620_s4 + $0x208] sm:$0xff]  ;;  %v809_v8 = vld [vmem:[%s10620_s4 + $0x220] sm:$0xff]  ;;  %v780_v17 = vld [vmem:[%s10620_s4 + $0x138] sm:$0xff] }
  0x24   : > { %7103 = vmatprep.subr.bf16.mxu0 %v7102_v26  ;;  %v810_v61 = vld [vmem:[%s10620_s4 + $0x228] sm:$0xff]  ;;  %5780 = vmatprep.mubr.msk.f32.mxu1 %vm891_vm0, %v710_v49  ;;  %v7120_v15 = vpack.c.bf16 %v809_v8, %v805_v7  ;;  %v813_v19 = vld [vmem:[%s10620_s4 + $0x240] sm:$0xff]  ;;  %v7168_v24 = vpack.c.bf16 %v780_v17, %v776_v16  ;;  %v775_v25 = vld [vmem:[%s10620_s4 + $0x110] sm:$0xff] }
  0x25   : > { %v7118_v6 = vpack.c.bf16 %v810_v61, %v806_v60  ;;  %v814_v9 = vld [vmem:[%s10620_s4 + $0x248] sm:$0xff]  ;;  %v817_v20 = vld [vmem:[%s10620_s4 + $0x260] sm:$0xff]  ;;  %v779_v26 = vld [vmem:[%s10620_s4 + $0x130] sm:$0xff]  ;;  %7167 = vmatpush1.bf16.msra.mxu1 %v7166_v23 }
  0x26   : > { %v818_v10 = vld [vmem:[%s10620_s4 + $0x268] sm:$0xff]  ;;  %v7124_v27 = vpack.c.bf16 %v817_v20, %v813_v19  ;;  %v784_v28 = vld [vmem:[%s10620_s4 + $0x158] sm:$0xff]  ;;  %v7170_v35 = vpack.c.bf16 %v779_v26, %v775_v25  ;;  %7169 = vmatprep.subr.bf16.mxu1 %v7168_v24  ;;  %v787_v38 = vld [vmem:[%s10620_s4 + $0x170] sm:$0xff] }
  0x27   : > { %7105 = vmatpush1.bf16.msra.mxu0 %v7104_v31  ;;  %v7122_v18 = vpack.c.bf16 %v818_v10, %v814_v9  ;;  %v822_v21 = vld [vmem:[%s10620_s4 + $0x288] sm:$0xff]  ;;  %v788_v29 = vld [vmem:[%s10620_s4 + $0x178] sm:$0xff]  ;;  %v821_v31 = vld [vmem:[%s10620_s4 + $0x280] sm:$0xff] }
  0x28   : > { %7107 = vmatprep.subr.bf16.mxu0 %v7106_v32  ;;  %v826_v22 = vld [vmem:[%s10620_s4 + $0x2a8] sm:$0xff]  ;;  %v825_v32 = vld [vmem:[%s10620_s4 + $0x2a0] sm:$0xff]  ;;  %v7172_v36 = vpack.c.bf16 %v788_v29, %v784_v28  ;;  %v796_v41 = vld [vmem:[%s10620_s4 + $0x1b8] sm:$0xff] }
  0x29   : > { %v7126_v30 = vpack.c.bf16 %v826_v22, %v822_v21  ;;  %v830_v33 = vld [vmem:[%s10620_s4 + $0x2c8] sm:$0xff]  ;;  %v7128_v39 = vpack.c.bf16 %v825_v32, %v821_v31  ;;  %v829_v43 = vld [vmem:[%s10620_s4 + $0x2c0] sm:$0xff]  ;;  %7171 = vmatpush1.bf16.msra.mxu1 %v7170_v35  ;;  %v791_v49 = vld [vmem:[%s10620_s4 + $0x190] sm:$0xff] }
  0x2a   : > { %v834_v34 = vld [vmem:[%s10620_s4 + $0x2e8] sm:$0xff]  ;;  %v833_v44 = vld [vmem:[%s10620_s4 + $0x2e0] sm:$0xff]  ;;  %7173 = vmatprep.subr.bf16.mxu1 %v7172_v36  ;;  %v795_v50 = vld [vmem:[%s10620_s4 + $0x1b0] sm:$0xff] }
  0x2b   : > { %7109 = vmatpush1.bf16.msra.mxu0 %v7108_v37  ;;  %v783_v37 = vld [vmem:[%s10620_s4 + $0x150] sm:$0xff]  ;;  %v7130_v42 = vpack.c.bf16 %v834_v34, %v830_v33  ;;  %v838_v45 = vld [vmem:[%s10620_s4 + $0x308] sm:$0xff]  ;;  %v800_v52 = vld [vmem:[%s10620_s4 + $0x1d8] sm:$0xff]  ;;  %v7178_v59 = vpack.c.bf16 %v795_v50, %v791_v49 }
  0x2c   : > { %7111 = vmatprep.subr.bf16.mxu0 %v7110_v40  ;;  %v792_v40 = vld [vmem:[%s10620_s4 + $0x198] sm:$0xff]  ;;  %v842_v46 = vld [vmem:[%s10620_s4 + $0x328] sm:$0xff]  ;;  %v7174_v47 = vpack.c.bf16 %v787_v38, %v783_v37  ;;  %v841_v56 = vld [vmem:[%s10620_s4 + $0x320] sm:$0xff] }
  0x2d   : > { %v7176_v48 = vpack.c.bf16 %v796_v41, %v792_v40  ;;  %v804_v53 = vld [vmem:[%s10620_s4 + $0x1f8] sm:$0xff]  ;;  %v7134_v54 = vpack.c.bf16 %v842_v46, %v838_v45  ;;  %v846_v57 = vld [vmem:[%s10620_s4 + $0x348] sm:$0xff]  ;;  %v799_v61 = vld [vmem:[%s10620_s4 + $0x1d0] sm:$0xff] }
  0x2e   : > { %v850_v58 = vld [vmem:[%s10620_s4 + $0x368] sm:$0xff]  ;;  %7175 = vmatpush1.bf16.msra.mxu1 %v7174_v47  ;;  %v7180_v60 = vpack.c.bf16 %v804_v53, %v800_v52  ;;  %v803_v62 = vld [vmem:[%s10620_s4 + $0x1f0] sm:$0xff]  ;;  %v808_v0 = vld [vmem:[%s10620_s4 + $0x218] sm:$0xff] }
  0x2f   : > { %7113 = vmatpush1.bf16.msra.mxu0 %v7112_v51  ;;  %v7132_v51 = vpack.c.bf16 %v833_v44, %v829_v43  ;;  %7177 = vmatprep.subr.bf16.mxu1 %v7176_v48  ;;  %v812_v1 = vld [vmem:[%s10620_s4 + $0x238] sm:$0xff]  ;;  %v7138_v2 = vpack.c.bf16 %v850_v58, %v846_v57  ;;  %v849_v4 = vld [vmem:[%s10620_s4 + $0x360] sm:$0xff]  ;;  %v854_v5 = vld [vmem:[%s10620_s4 + $0x388] sm:$0xff]  ;;  %v7182_v7 = vpack.c.bf16 %v803_v62, %v799_v61 }
  0x30   : > { %7115 = vmatprep.subr.bf16.mxu0 %v7114_v55  ;;  %v837_v55 = vld [vmem:[%s10620_s4 + $0x300] sm:$0xff]  ;;  %v7184_v8 = vpack.c.bf16 %v812_v1, %v808_v0  ;;  %v807_v9 = vld [vmem:[%s10620_s4 + $0x210] sm:$0xff]  ;;  %v816_v12 = vld [vmem:[%s10620_s4 + $0x258] sm:$0xff] }
  0x31   : > { %v7136_v63 = vpack.c.bf16 %v841_v56, %v837_v55  ;;  %v811_v10 = vld [vmem:[%s10620_s4 + $0x230] sm:$0xff]  ;;  %v820_v13 = vld [vmem:[%s10620_s4 + $0x278] sm:$0xff]  ;;  %v857_v16 = vld [vmem:[%s10620_s4 + $0x3a0] sm:$0xff] }
  0x32   : > { %7179 = vmatpush1.bf16.msra.mxu1 %v7178_v59  ;;  %v862_v17 = vld [vmem:[%s10620_s4 + $0x3c8] sm:$0xff]  ;;  %v7186_v19 = vpack.c.bf16 %v811_v10, %v807_v9  ;;  %v7188_v20 = vpack.c.bf16 %v820_v13, %v816_v12  ;;  %v815_v21 = vld [vmem:[%s10620_s4 + $0x250] sm:$0xff]  ;;  %v824_v24 = vld [vmem:[%s10620_s4 + $0x298] sm:$0xff] }
  0x33   : > { %7117 = vmatpush1.bf16.msra.mxu0 %v7116_v3  ;;  %v845_v3 = vld [vmem:[%s10620_s4 + $0x340] sm:$0xff]  ;;  %7181 = vmatprep.subr.bf16.mxu1 %v7180_v60  ;;  %v819_v22 = vld [vmem:[%s10620_s4 + $0x270] sm:$0xff]  ;;  %v828_v25 = vld [vmem:[%s10620_s4 + $0x2b8] sm:$0xff] }
  0x34   : > { %7119 = vmatprep.subr.bf16.mxu0 %v7118_v6  ;;  %v858_v6 = vld [vmem:[%s10620_s4 + $0x3a8] sm:$0xff]  ;;  %v7140_v11 = vpack.c.bf16 %v849_v4, %v845_v3  ;;  %v865_v28 = vld [vmem:[%s10620_s4 + $0x3e0] sm:$0xf]  ;;  %v1470_v32 = vld [vmem:[%s10624_s24 + $0x18] sm:$0xff]  ;;  %v7192_v33 = vpack.c.bf16 %v828_v25, %v824_v24 }
  0x35   : > { %v7142_v14 = vpack.c.bf16 %v858_v6, %v854_v5  ;;  %v1468_v31 = vld [vmem:[%s10624_s24 + $0x8] sm:$0xff]  ;;  %v823_v34 = vld [vmem:[%s10620_s4 + $0x290] sm:$0xff]  ;;  %v832_v37 = vld [vmem:[%s10620_s4 + $0x2d8] sm:$0xff] }
  0x36   : > { %7183 = vmatpush1.bf16.msra.mxu1 %v7182_v7  ;;  %v827_v35 = vld [vmem:[%s10620_s4 + $0x2b0] sm:$0xff]  ;;  %v836_v38 = vld [vmem:[%s10620_s4 + $0x2f8] sm:$0xff]  ;;  %v1467_v40 = vld [vmem:[%s10624_s24] sm:$0xff] }
  0x37   : > { %7121 = vmatpush1.bf16.msra.mxu0 %v7120_v15  ;;  %v853_v15 = vld [vmem:[%s10620_s4 + $0x380] sm:$0xff]  ;;  %7185 = vmatprep.subr.bf16.mxu1 %v7184_v8  ;;  %v1469_v41 = vld [vmem:[%s10624_s24 + $0x10] sm:$0xff]  ;;  %v1472_v43 = vld [vmem:[%s10624_s24 + $0x28] sm:$0xff]  ;;  %v7196_v45 = vpack.c.bf16 %v836_v38, %v832_v37 }
  0x38   : > { %7123 = vmatprep.subr.bf16.mxu0 %v7122_v18  ;;  %v866_v18 = vld [vmem:[%s10620_s4 + $0x3e8] sm:$0xf]  ;;  %v7144_v23 = vpack.c.bf16 %v857_v16, %v853_v15  ;;  %v1474_v44 = vld [vmem:[%s10624_s24 + $0x38] sm:$0xff]  ;;  %v831_v46 = vld [vmem:[%s10620_s4 + $0x2d0] sm:$0xff] }
  0x39   : > { %v7146_v26 = vpack.c.bf16 %v866_v18, %v862_v17  ;;  %v835_v47 = vld [vmem:[%s10620_s4 + $0x2f0] sm:$0xff]  ;;  %v8137_v48 = vld [vmem:[%s7852_s3] sm:$0xff]  ;;  %v840_v49 = vld [vmem:[%s10620_s4 + $0x318] sm:$0xff]  ;;  %v7222_v53 = vpack.c.bf16 %v1474_v44, %v1472_v43 }
  0x3a   : > { %7187 = vmatpush1.bf16.msra.mxu1 %v7186_v19  ;;  %v844_v50 = vld [vmem:[%s10620_s4 + $0x338] sm:$0xff]  ;;  %v1473_v55 = vld [vmem:[%s10624_s24 + $0x30] sm:$0xff]  ;;  %v7198_v56 = vpack.c.bf16 %v835_v47, %v831_v46  ;;  %v1476_v57 = vld [vmem:[%s10624_s24 + $0x48] sm:$0xff] }
  0x3b   : > { %7125 = vmatpush1.bf16.msra.mxu0 %v7124_v27  ;;  %v861_v27 = vld [vmem:[%s10620_s4 + $0x3c0] sm:$0xff]  ;;  %7189 = vmatprep.subr.bf16.mxu1 %v7188_v20  ;;  %v8146_v52 = vld [vmem:[%s7852_s3 + $0x18] sm:$0xff]  ;;  %v7200_v59 = vpack.c.bf16 %v844_v50, %v840_v49  ;;  %v839_v60 = vld [vmem:[%s10620_s4 + $0x310] sm:$0xff] }
  0x3c   : > { %7127 = vmatprep.subr.bf16.mxu0 %v7126_v30  ;;  %v7190_v30 = vpack.c.bf16 %v819_v22, %v815_v21  ;;  %v7149_v36 = vpack.c.bf16 %v865_v28, %v861_v27  ;;  %v1478_v58 = vld [vmem:[%s10624_s24 + $0x58] sm:$0xff]  ;;  %v843_v61 = vld [vmem:[%s10620_s4 + $0x330] sm:$0xff]  ;;  %v1475_v4 = vld [vmem:[%s10624_s24 + $0x40] sm:$0xff] }
  0x3d   : > { %v8170_v62 = vld [vmem:[%s7852_s3 + $0x10] sm:$0xff]  ;;  %v852_v0 = vld [vmem:[%s10620_s4 + $0x378] sm:$0xff]  ;;  %v7226_v3 = vpack.c.bf16 %v1478_v58, %v1476_v57  ;;  %v7202_v6 = vpack.c.bf16 %v843_v61, %v839_v60  ;;  %v1480_v7 = vld [vmem:[%s10624_s24 + $0x68] sm:$0xff] }
  0x3e   : > { %7191 = vmatpush1.bf16.msra.mxu1 %v7190_v30  ;;  %v1477_v5 = vld [vmem:[%s10624_s24 + $0x50] sm:$0xff]  ;;  %v1482_v8 = vld [vmem:[%s10624_s24 + $0x78] sm:$0xff]  ;;  %v8203_v12 = vld [vmem:[%s7852_s3 + $0x20] sm:$0xff] }
  0x3f   : > { %7129 = vmatpush1.bf16.msra.mxu0 %v7128_v39  ;;  %v7218_v39 = vpack.c.bf16 %v1470_v32, %v1468_v31  ;;  %7193 = vmatprep.subr.bf16.mxu1 %v7192_v33  ;;  %v847_v10 = vld [vmem:[%s10620_s4 + $0x350] sm:$0xff]  ;;  %v856_v13 = vld [vmem:[%s10620_s4 + $0x398] sm:$0xff]  ;;  %v7228_v15 = vpack.c.bf16 %v1477_v5, %v1475_v4  ;;  %v7230_v17 = vpack.c.bf16 %v1482_v8, %v1480_v7  ;;  %v1479_v18 = vld [vmem:[%s10624_s24 + $0x60] sm:$0xff] }
  0x40   : > { %7131 = vmatprep.subr.bf16.mxu0 %v7130_v42  ;;  %v7194_v42 = vpack.c.bf16 %v827_v35, %v823_v34  ;;  %v8212_v16 = vld [vmem:[%s7852_s3 + $0x38] sm:$0xff]  ;;  %v1481_v19 = vld [vmem:[%s10624_s24 + $0x70] sm:$0xff]  ;;  %v1484_v21 = vld [vmem:[%s10624_s24 + $0x88] sm:$0xff] }
  0x41   : > { %v1486_v22 = vld [vmem:[%s10624_s24 + $0x98] sm:$0xff]  ;;  %v855_v24 = vld [vmem:[%s10620_s4 + $0x390] sm:$0xff]  ;;  %v7232_v30 = vpack.c.bf16 %v1481_v19, %v1479_v18  ;;  %v8245_v31 = vld [vmem:[%s7852_s3 + $0x48] sm:$0xff] }
  0x42   : > { %7195 = vmatpush1.bf16.msra.mxu1 %v7194_v42  ;;  %v859_v25 = vld [vmem:[%s10620_s4 + $0x3b0] sm:$0xff]  ;;  %v864_v27 = vld [vmem:[%s10620_s4 + $0x3d8] sm:$0xff]  ;;  %v7234_v32 = vpack.c.bf16 %v1486_v22, %v1484_v21  ;;  %v1483_v33 = vld [vmem:[%s10624_s24 + $0x80] sm:$0xff] }
  0x43   : > { %7133 = vmatpush1.bf16.msra.mxu0 %v7132_v51  ;;  %v7220_v51 = vpack.c.bf16 %v1469_v41, %v1467_v40  ;;  %7197 = vmatprep.subr.bf16.mxu1 %v7196_v45  ;;  %v868_v28 = vld [vmem:[%s10620_s4 + $0x3f8] sm:$0xf]  ;;  %v1485_v34 = vld [vmem:[%s10624_s24 + $0x90] sm:$0xff]  ;;  %v7210_v35 = vpack.c.bf16 %v859_v25, %v855_v24  ;;  %v8269_v41 = vld [vmem:[%s7852_s3 + $0x40] sm:$0xff] }
  0x44   : > { %7135 = vmatprep.subr.bf16.mxu0 %v7134_v54  ;;  %v1471_v54 = vld [vmem:[%s10624_s24 + $0x20] sm:$0xff]  ;;  %v1490_v37 = vld [vmem:[%s10624_s24 + $0xb8] sm:$0xff]  ;;  %v7212_v38 = vpack.c.bf16 %v868_v28, %v864_v27  ;;  %v867_v40 = vld [vmem:[%s10620_s4 + $0x3f0] sm:$0xf]  ;;  %v7236_v42 = vpack.c.bf16 %v1485_v34, %v1483_v33 }
  0x45   : > { %v7224_v1 = vpack.c.bf16 %v1473_v55, %v1471_v54  ;;  %v8272_v43 = vld [vmem:[%s7852_s3 + $0x58] sm:$0xff]  ;;  %v1487_v45 = vld [vmem:[%s10624_s24 + $0xa0] sm:$0xff]  ;;  %v1489_v46 = vld [vmem:[%s10624_s24 + $0xb0] sm:$0xff] }
  0x46   : > { %7199 = vmatpush1.bf16.msra.mxu1 %v7198_v56  ;;  %v1492_v49 = vld [vmem:[%s10624_s24 + $0xc8] sm:$0xff]  ;;  %v1494_v50 = vld [vmem:[%s10624_s24 + $0xd8] sm:$0xff]  ;;  %v1491_v56 = vld [vmem:[%s10624_s24 + $0xc0] sm:$0xff] }
  0x47   : > { %7137 = vmatpush1.bf16.msra.mxu0 %v7136_v63  ;;  %v848_v63 = vld [vmem:[%s10620_s4 + $0x358] sm:$0xff]  ;;  %7201 = vmatprep.subr.bf16.mxu1 %v7200_v59  ;;  %v8295_v54 = vld [vmem:[%s7852_s3 + $0x68] sm:$0xff]  ;;  %v7242_v55 = vpack.c.bf16 %v1494_v50, %v1492_v49  ;;  %v1493_v57 = vld [vmem:[%s10624_s24 + $0xd0] sm:$0xff] }
  0x48   : > { %7139 = vmatprep.subr.bf16.mxu0 %v7138_v2  ;;  %v8179_v2 = vld [vmem:[%s7852_s3 + $0x28] sm:$0xff]  ;;  %v7204_v9 = vpack.c.bf16 %v852_v0, %v848_v63  ;;  %v1498_v59 = vld [vmem:[%s10624_s24 + $0xf8] sm:$0xff]  ;;  %v8315_v60 = vld [vmem:[%s7852_s3 + $0x60] sm:$0xff]  ;;  %v7244_v61 = vpack.c.bf16 %v1493_v57, %v1491_v56 }
  0x49   : > { %v1496_v58 = vld [vmem:[%s10624_s24 + $0xe8] sm:$0xff]  ;;  %v8318_v63 = vld [vmem:[%s7852_s3 + $0x78] sm:$0xff]  ;;  %v8339_v5 = vld [vmem:[%s7852_s3 + $0x70] sm:$0xff] }
  0x4a   : > { %7203 = vmatpush1.bf16.msra.mxu1 %v7202_v6  ;;  %v7246_v0 = vpack.c.bf16 %v1498_v59, %v1496_v58  ;;  %v1500_v4 = vld [vmem:[%s10624_s24 + $0x108] sm:$0xff]  ;;  %v1499_v8 = vld [vmem:[%s10624_s24 + $0x100] sm:$0xff]  ;;  %v8387_v19 = vld [vmem:[%s7852_s3 + $0x90] sm:$0xff] }
  0x4b   : > { %7141 = vmatpush1.bf16.msra.mxu0 %v7140_v11  ;;  %v851_v11 = vld [vmem:[%s10620_s4 + $0x370] sm:$0xff]  ;;  %7205 = vmatprep.subr.bf16.mxu1 %v7204_v9  ;;  %v1508_v18 = vld [vmem:[%s10624_s24 + $0x148] sm:$0xff]  ;;  %v1507_v22 = vld [vmem:[%s10624_s24 + $0x140] sm:$0xff] }
  0x4c   : > { %7143 = vmatprep.subr.bf16.mxu0 %v7142_v14  ;;  %v860_v14 = vld [vmem:[%s10620_s4 + $0x3b8] sm:$0xff]  ;;  %v7206_v20 = vpack.c.bf16 %v851_v11, %v847_v10  ;;  %v1501_v9 = vld [vmem:[%s10624_s24 + $0x110] sm:$0xff]  ;;  %v1504_v10 = vld [vmem:[%s10624_s24 + $0x128] sm:$0xff] }
  0x4d   : > { %v8363_v11 = vld [vmem:[%s7852_s3 + $0x80] sm:$0xff]  ;;  %v1512_v24 = vld [vmem:[%s10624_s24 + $0x168] sm:$0xff]  ;;  %v1514_v25 = vld [vmem:[%s10624_s24 + $0x178] sm:$0xff] }
  0x4e   : > { %7207 = vmatpush1.bf16.msra.mxu1 %v7206_v20  ;;  %v732_v28 = vld [vmem:[%s7852_s3 + $0xb8] sm:$0xff]  ;;  %v1516_v33 = vld [vmem:[%s10624_s24 + $0x188] sm:$0xff]  ;;  %v1521_v49 = vld [vmem:[%s10624_s24 + $0x1b0] sm:$0xff] }
  0x4f   : > { %7145 = vmatpush1.bf16.msra.mxu0 %v7144_v23  ;;  %v7208_v23 = vpack.c.bf16 %v860_v14, %v856_v13  ;;  %v7252_v13 = vpack.c.bf16 %v1501_v9, %v1499_v8  ;;  %v1518_v34 = vld [vmem:[%s10624_s24 + $0x198] sm:$0xff]  ;;  %v1524_v50 = vld [vmem:[%s10624_s24 + $0x1c8] sm:$0xff]  ;;  %v737_v57 = vld [vmem:[%s7852_s3 + $0xe0] sm:$0xff]  ;;  %v871_v8 = vlaneseq }
  0x50   : > { %7148 = vmatprep.subr.msk.bf16.mxu0 %vm8092_vm3, %v7146_v26  ;;  %v8236_v26 = vld [vmem:[%s7852_s3 + $0x30] sm:$0xff]  ;;  %v740_v58 = vld [vmem:[%s7852_s3 + $0xf8] sm:$0xff] }
  0x51   : > { %7209 = vmatprep.subr.bf16.mxu1 %v7208_v23  ;;  %v1509_v23 = vld [vmem:[%s10624_s24 + $0x150] sm:$0xff]  ;;  %v8513_v9 = vshrl.u32 %v871_v8, 7 }
  0x52   : > { %7211 = vmatpush1.bf16.msra.mxu1 %v7210_v35  ;;  %v7260_v27 = vpack.c.bf16 %v1509_v23, %v1507_v22  ;;  %v731_v35 = vld [vmem:[%s7852_s3 + $0xb0] sm:$0xff] }
  0x53   : > { %7151 = vmatpush1.bf16.msk.msra.mxu0 %vm8092_vm3, %v7149_v36  ;;  %v1488_v36 = vld [vmem:[%s10624_s24 + $0xa8] sm:$0xff]  ;;  %7214 = vmatprep.subr.msk.bf16.mxu1 %vm8092_vm3, %v7212_v38  ;;  %v7266_v38 = vpack.c.bf16 %v1518_v34, %v1516_v33  ;;  %v739_v59 = vld [vmem:[%s7852_s3 + $0xf0] sm:$0xff] }
  0x54   : > { %7219 = vmatprep.subr.bf16.mxu0 %v7218_v39  ;;  %v863_v39 = vld [vmem:[%s10620_s4 + $0x3d0] sm:$0xff]  ;;  %v7238_v44 = vpack.c.bf16 %v1490_v37, %v1488_v36  ;;  %v734_v37 = vld [vmem:[%s7852_s3 + $0xc8] sm:$0xff] }
  0x55   : > { %v7215_v47 = vpack.c.bf16 %v867_v40, %v863_v39  ;;  %v1515_v39 = vld [vmem:[%s10624_s24 + $0x180] sm:$0xff]  ;;  %v1517_v40 = vld [vmem:[%s10624_s24 + $0x190] sm:$0xff] }
  0x56   : > { %1018 = vmatmul.mubr.f32.vlgmr.msra.gmra.mrb[0].mxu0 %v8137_v48 }
  0x57   : > { %5763 = vmatprep.mubr.msk.f32.mxu0 %vm891_vm0, %v8146_v52  ;;  %7221 = vmatpush1.bf16.msra.mxu0 %v7220_v51  ;;  %v8292_v51 = vld [vmem:[%s7852_s3 + $0x50] sm:$0xff] }
  0x58   : > { %7223 = vmatprep.subr.bf16.mxu0 %v7222_v53  ;;  %v7240_v53 = vpack.c.bf16 %v1489_v46, %v1487_v45  ;;  %7217 = vmatpush1.bf16.msk.msra.mxu1 %vm8092_vm3, %v7215_v47  ;;  %v736_v45 = vld [vmem:[%s7852_s3 + $0xd8] sm:$0xff]  ;;  %v1519_v47 = vld [vmem:[%s10624_s24 + $0x1a0] sm:$0xff] }
  0x5a   : > { %1024 = vmatmul.mubr.f32.gmra.mrb[2].mxu0 %v8170_v62 }
  0x5b   : > { %5764 = vmatprep.mubr.msk.f32.mxu0 %vm891_vm0, %v8179_v2  ;;  %7225 = vmatpush1.bf16.msra.mxu0 %v7224_v1  ;;  %v1495_v1 = vld [vmem:[%s10624_s24 + $0xe0] sm:$0xff] }
  0x5c   : > { %7227 = vmatprep.subr.bf16.mxu0 %v7226_v3  ;;  %1179 = vmatmul.mubr.f32.vlgmr.msra.gmra.mrb[0].mxu1 %v8137_v48  ;;  %v1497_v3 = vld [vmem:[%s10624_s24 + $0xf0] sm:$0xff]  ;;  %v1502_v48 = vld [vmem:[%s10624_s24 + $0x118] sm:$0xff] }
  0x5d   : > { %5781 = vmatprep.mubr.msk.f32.mxu1 %vm891_vm0, %v8146_v52  ;;  %v7248_v6 = vpack.c.bf16 %v1497_v3, %v1495_v1  ;;  %v8342_v52 = vld [vmem:[%s7852_s3 + $0x88] sm:$0xff]  ;;  %v7250_v7 = vpack.c.bf16 %v1502_v48, %v1500_v4  ;;  %v1530_v1 = vld [vmem:[%s10624_s24 + $0x1f8] sm:$0xff]  ;;  %v1527_v4 = vld [vmem:[%s10624_s24 + $0x1e0] sm:$0xff] }
  0x5e   : > { %1030 = vmatmul.mubr.f32.gmra.mrb[4].mxu0 %v8203_v12  ;;  %v1529_v48 = vld [vmem:[%s10624_s24 + $0x1f0] sm:$0xff] }
  0x5f   : > { %5765 = vmatprep.mubr.msk.f32.mxu0 %vm891_vm0, %v8212_v16  ;;  %7229 = vmatpush1.bf16.msra.mxu0 %v7228_v15  ;;  %v1503_v15 = vld [vmem:[%s10624_s24 + $0x120] sm:$0xff] }
  0x60   : > { %7231 = vmatprep.subr.bf16.mxu0 %v7230_v17  ;;  %1185 = vmatmul.mubr.f32.gmra.mrb[2].mxu1 %v8170_v62  ;;  %v1506_v62 = vld [vmem:[%s10624_s24 + $0x138] sm:$0xff]  ;;  %v1505_v17 = vld [vmem:[%s10624_s24 + $0x130] sm:$0xff] }
  0x61   : > { %5782 = vmatprep.mubr.msk.f32.mxu1 %vm891_vm0, %v8179_v2  ;;  %v8366_v2 = vld [vmem:[%s7852_s3 + $0x98] sm:$0xff]  ;;  %v7254_v14 = vpack.c.bf16 %v1506_v62, %v1504_v10  ;;  %v7256_v20 = vpack.c.bf16 %v1505_v17, %v1503_v15  ;;  %v873_v10 = vsub.s32 0, %v8513_v9  ;;  %v8519_v62 = vld [vmem:[%s10625_s23] sm:$0xf]  ;;  %s10628_s23 = sld [smem:[#allocation4_spill]] }
  0x62   : > { %1036 = vmatmul.mubr.f32.gmra.mrb[6].mxu0 %v8236_v26 }
  0x63   : > { %5766 = vmatprep.mubr.msk.f32.mxu0 %vm891_vm0, %v8245_v31  ;;  %7233 = vmatpush1.bf16.msra.mxu0 %v7232_v30  ;;  %v7262_v30 = vpack.c.bf16 %v1514_v25, %v1512_v24  ;;  %v2067_v24 = vld [vmem:[%s10626_s30] sm:$0xff] }
  0x64   : > { %7235 = vmatprep.subr.bf16.mxu0 %v7234_v32  ;;  %1191 = vmatmul.mubr.f32.gmra.mrb[4].mxu1 %v8203_v12  ;;  %v1510_v12 = vld [vmem:[%s10624_s24 + $0x158] sm:$0xff]  ;;  %v1513_v32 = vld [vmem:[%s10624_s24 + $0x170] sm:$0xff] }
  0x65   : > { %5783 = vmatprep.mubr.msk.f32.mxu1 %vm891_vm0, %v8212_v16  ;;  %v8390_v16 = vld [vmem:[%s7852_s3 + $0xa8] sm:$0xff]  ;;  %v7258_v21 = vpack.c.bf16 %v1510_v12, %v1508_v18  ;;  %v1531_v12 = vld [vmem:[%s10624_s24 + $0x200] sm:$0xff] }
  0x66   : > { %1042 = vmatmul.mubr.f32.gmra.mrb[8].mxu0 %v8269_v41 }
  0x67   : > { %5767 = vmatprep.mubr.msk.f32.mxu0 %vm891_vm0, %v8272_v43  ;;  %7237 = vmatpush1.bf16.msra.mxu0 %v7236_v42  ;;  %v1522_v42 = vld [vmem:[%s10624_s24 + $0x1b8] sm:$0xff]  ;;  %s9068_s5 = scalar_lea.vmem %s10628_s23, %s5758_s0 }
  0x68   : > { %7239 = vmatprep.subr.bf16.mxu0 %v7238_v44  ;;  %1197 = vmatmul.mubr.f32.gmra.mrb[6].mxu1 %v8236_v26  ;;  %v8411_v26 = vld [vmem:[%s7852_s3 + $0xa0] sm:$0xff]  ;;  %v7268_v44 = vpack.c.bf16 %v1517_v40, %v1515_v39 }
  0x69   : > { %5784 = vmatprep.mubr.msk.f32.mxu1 %vm891_vm0, %v8245_v31  ;;  %v1511_v31 = vld [vmem:[%s10624_s24 + $0x160] sm:$0xff] }
  0x6a   : > { %1048 = vmatmul.mubr.f32.gmra.mrb[10].mxu0 %v8292_v51  ;;  %v7264_v36 = vpack.c.bf16 %v1513_v32, %v1511_v31  ;;  %v2069_v31 = vld [vmem:[%s10626_s30 + $0x10] sm:$0xff]  ;;  %v2070_v32 = vld [vmem:[%s10626_s30 + $0x18] sm:$0xff] }
  0x6b   : > { %5768 = vmatprep.mubr.msk.f32.mxu0 %vm891_vm0, %v8295_v54  ;;  %7241 = vmatpush1.bf16.msra.mxu0 %v7240_v53  ;;  %v735_v53 = vld [vmem:[%s7852_s3 + $0xd0] sm:$0xff] }
  0x6c   : > { %7243 = vmatprep.subr.bf16.mxu0 %v7242_v55  ;;  %1203 = vmatmul.mubr.f32.gmra.mrb[8].mxu1 %v8269_v41  ;;  %v1520_v41 = vld [vmem:[%s10624_s24 + $0x1a8] sm:$0xff] }
  0x6d   : > { %5785 = vmatprep.mubr.msk.f32.mxu1 %vm891_vm0, %v8272_v43  ;;  %v733_v43 = vld [vmem:[%s7852_s3 + $0xc0] sm:$0xff]  ;;  %v7270_v46 = vpack.c.bf16 %v1522_v42, %v1520_v41  ;;  %v738_v55 = vld [vmem:[%s7852_s3 + $0xe8] sm:$0xff]  ;;  %v1542_v42 = vld [vmem:[%s10624_s24 + $0x258] sm:$0xff]  ;;  %s708_s3 = scalar_lea.vmem %s10607_s22, %s5759_s6 }
  0x6e   : > { %1054 = vmatmul.mubr.f32.gmra.mrb[12].mxu0 %v8315_v60  ;;  %v1540_v41 = vld [vmem:[%s10624_s24 + $0x248] sm:$0xff] }
  0x6f   : > { %5769 = vmatprep.mubr.msk.f32.mxu0 %vm891_vm0, %v8318_v63  ;;  %7245 = vmatpush1.bf16.msra.mxu0 %v7244_v61  ;;  %v1525_v61 = vld [vmem:[%s10624_s24 + $0x1d0] sm:$0xff] }
  0x70   : > { %7247 = vmatprep.subr.bf16.mxu0 %v7246_v0  ;;  %1209 = vmatmul.mubr.f32.gmra.mrb[10].mxu1 %v8292_v51  ;;  %v1526_v51 = vld [vmem:[%s10624_s24 + $0x1d8] sm:$0xff]  ;;  %v1528_v0 = vld [vmem:[%s10624_s24 + $0x1e8] sm:$0xff] }
  0x71   : > { %5786 = vmatprep.mubr.msk.f32.mxu1 %vm891_vm0, %v8295_v54  ;;  %v7272_v54 = vpack.c.bf16 %v1521_v49, %v1519_v47  ;;  %v7274_v56 = vpack.c.bf16 %v1526_v51, %v1524_v50  ;;  %v7278_v3 = vpack.c.bf16 %v1530_v1, %v1528_v0  ;;  %v2071_v50 = vld [vmem:[%s10626_s30 + $0x20] sm:$0xff]  ;;  %v2072_v51 = vld [vmem:[%s10626_s30 + $0x28] sm:$0xff] }
  0x72   : > { %1060 = vmatmul.mubr.f32.gmra.mrb[14].mxu0 %v8339_v5  ;;  %v7337_v1 = vpack.c.bf16 %v2072_v51, %v2071_v50  ;;  %v1551_v50 = vld [vmem:[%s10624_s24 + $0x2a0] sm:$0xff]  ;;  %v1553_v51 = vld [vmem:[%s10624_s24 + $0x2b0] sm:$0xff] }
  0x73   : > { %5770 = vmatprep.mubr.msk.f32.mxu0 %vm891_vm0, %v8342_v52  ;;  %7249 = vmatpush1.bf16.msra.mxu0 %v7248_v6  ;;  %v1532_v6 = vld [vmem:[%s10624_s24 + $0x208] sm:$0xff] }
  0x74   : > { %7251 = vmatprep.subr.bf16.mxu0 %v7250_v7  ;;  %1215 = vmatmul.mubr.f32.gmra.mrb[12].mxu1 %v8315_v60  ;;  %v1523_v60 = vld [vmem:[%s10624_s24 + $0x1c0] sm:$0xff] }
  0x75   : > { %5787 = vmatprep.mubr.msk.f32.mxu1 %vm891_vm0, %v8318_v63  ;;  %v7276_v63 = vpack.c.bf16 %v1525_v61, %v1523_v60  ;;  %v1544_v60 = vld [vmem:[%s10624_s24 + $0x268] sm:$0xff]  ;;  %v1546_v61 = vld [vmem:[%s10624_s24 + $0x278] sm:$0xff] }
  0x76   : > { %1066 = vmatmul.mubr.f32.gmra.mrb[16].mxu0 %v8363_v11  ;;  %v7294_v8 = vpack.c.bf16 %v1546_v61, %v1544_v60 }
  0x77   : > { %5771 = vmatprep.mubr.msk.f32.mxu0 %vm891_vm0, %v8366_v2  ;;  %7253 = vmatpush1.bf16.msra.mxu0 %v7252_v13  ;;  %v8525_v13 = vrot.slane %v8519_v62, %v873_v10 }
  0x78   : > { %7255 = vmatprep.subr.bf16.mxu0 %v7254_v14  ;;  %1221 = vmatmul.mubr.f32.gmra.mrb[14].mxu1 %v8339_v5  ;;  %v7280_v5 = vpack.c.bf16 %v1529_v48, %v1527_v4 }
  0x79   : > { %5788 = vmatprep.mubr.msk.f32.mxu1 %vm891_vm0, %v8342_v52  ;;  %v1534_v52 = vld [vmem:[%s10624_s24 + $0x218] sm:$0xff] }
  0x7a   : > { %1072 = vmatmul.mubr.f32.gmra.mrb[18].mxu0 %v8387_v19  ;;  %v7282_v7 = vpack.c.bf16 %v1534_v52, %v1532_v6  ;;  %v2074_v6 = vld [vmem:[%s10626_s30 + $0x38] sm:$0xff] }
  0x7b   : > { %5772 = vmatprep.mubr.msk.f32.mxu0 %vm891_vm0, %v8390_v16  ;;  %7257 = vmatpush1.bf16.msra.mxu0 %v7256_v20 }
  0x7c   : > { %7259 = vmatprep.subr.bf16.mxu0 %v7258_v21  ;;  %1227 = vmatmul.mubr.f32.gmra.mrb[16].mxu1 %v8363_v11  ;;  %v877_v11 = vsub.s32 1, %v8513_v9  ;;  %v1538_v21 = vld [vmem:[%s10624_s24 + $0x238] sm:$0xff] }
  0x7d   : > { %5789 = vmatprep.mubr.msk.f32.mxu1 %vm891_vm0, %v8366_v2 }
  0x7e   : > { %1078 = vmatmul.mubr.f32.gmra.mrb[20].mxu0 %v8411_v26  ;;  %v8530_v2 = vrot.slane %v8519_v62, %v877_v11 }
  0x7f   : > { %5773 = vmatprep.mubr.msk.f32.mxu0 %vm891_vm0, %v732_v28  ;;  %7261 = vmatpush1.bf16.msra.mxu0 %v7260_v27 }
  0x80   : > { %7263 = vmatprep.subr.bf16.mxu0 %v7262_v30  ;;  %1233 = vmatmul.mubr.f32.gmra.mrb[18].mxu1 %v8387_v19  ;;  %v1533_v19 = vld [vmem:[%s10624_s24 + $0x210] sm:$0xff]  ;;  %v2068_v30 = vld [vmem:[%s10626_s30 + $0x8] sm:$0xff] }
  0x81   : > { %5790 = vmatprep.mubr.msk.f32.mxu1 %vm891_vm0, %v8390_v16  ;;  %v1536_v16 = vld [vmem:[%s10624_s24 + $0x228] sm:$0xff]  ;;  %v7284_v27 = vpack.c.bf16 %v1533_v19, %v1531_v12  ;;  %v1550_v19 = vld [vmem:[%s10624_s24 + $0x298] sm:$0xff] }
  0x82   : > { %1084 = vmatmul.mubr.f32.gmra.mrb[22].mxu0 %v731_v35  ;;  %v1548_v12 = vld [vmem:[%s10624_s24 + $0x288] sm:$0xff] }
  0x83   : > { %5774 = vmatprep.mubr.msk.f32.mxu0 %vm891_vm0, %v734_v37  ;;  %7265 = vmatpush1.bf16.msra.mxu0 %v7264_v36  ;;  %v1535_v36 = vld [vmem:[%s10624_s24 + $0x220] sm:$0xff] }
  0x84   : > { %7267 = vmatprep.subr.bf16.mxu0 %v7266_v38  ;;  %1239 = vmatmul.mubr.f32.gmra.mrb[20].mxu1 %v8411_v26  ;;  %v7331_v38 = vpack.c.bf16 %v2068_v30, %v2067_v24 }
  0x85   : > { %5791 = vmatprep.mubr.msk.f32.mxu1 %vm891_vm0, %v732_v28  ;;  %v7636_v28 = vmov 0.0|0.0  }
  0x86   : > { %1090 = vmatmul.mubr.f32.gmra.mrb[24].mxu0 %v733_v43  ;;  %7330 = vmatprep.subr.bf16.mxu1 %v7636_v28 }
  0x87   : > { %5775 = vmatprep.mubr.msk.f32.mxu0 %vm891_vm0, %v736_v45  ;;  %7269 = vmatpush1.bf16.msra.mxu0 %v7268_v44 }
  0x88   : > { %7271 = vmatprep.subr.bf16.mxu0 %v7270_v46  ;;  %1245 = vmatmul.mubr.f32.gmra.mrb[22].mxu1 %v731_v35  ;;  %v7286_v35 = vpack.c.bf16 %v1538_v21, %v1536_v16 }
  0x89   : > { %5792 = vmatprep.mubr.msk.f32.mxu1 %vm891_vm0, %v734_v37  ;;  %v1537_v37 = vld [vmem:[%s10624_s24 + $0x230] sm:$0xff]  ;;  %7332 = vmatpush1.bf16.msra.mxu1 %v7331_v38 }
  0x8a   : > { %1096 = vmatmul.mubr.f32.gmra.mrb[26].mxu0 %v735_v53  ;;  %v7288_v49 = vpack.c.bf16 %v1537_v37, %v1535_v36  ;;  %7333 = vmatprep.subr.bf16.mxu1 %v7636_v28  ;;  %v1552_v36 = vld [vmem:[%s10624_s24 + $0x2a8] sm:$0xff]  ;;  %v1554_v37 = vld [vmem:[%s10624_s24 + $0x2b8] sm:$0xff] }
  0x8b   : > { %5776 = vmatprep.mubr.msk.f32.mxu0 %vm891_vm0, %v738_v55  ;;  %7273 = vmatpush1.bf16.msra.mxu0 %v7272_v54 }
  0x8c   : > { %7275 = vmatprep.subr.bf16.mxu0 %v7274_v56  ;;  %1251 = vmatmul.mubr.f32.gmra.mrb[24].mxu1 %v733_v43  ;;  %v1539_v56 = vld [vmem:[%s10624_s24 + $0x240] sm:$0xff] }
  0x8d   : > { %5793 = vmatprep.mubr.msk.f32.mxu1 %vm891_vm0, %v736_v45  ;;  %v7334_v45 = vpack.c.bf16 %v2070_v32, %v2069_v31  ;;  %v7298_v31 = vpack.c.bf16 %v1550_v19, %v1548_v12  ;;  %v1547_v32 = vld [vmem:[%s10624_s24 + $0x280] sm:$0xff] }
  0x8e   : > { %1102 = vmatmul.mubr.f32.gmra.mrb[28].mxu0 %v737_v57 }
  0x8f   : > { %5777 = vmatprep.mubr.msk.f32.mxu0 %vm891_vm0, %v740_v58  ;;  %7277 = vmatpush1.bf16.msra.mxu0 %v7276_v63 }
  0x90   : > { %1257 = vmatmul.mubr.f32.gmra.mrb[26].mxu1 %v735_v53  ;;  %7279 = vmatprep.subr.bf16.mxu0 %v7278_v3 }
  0x91   : > { %5794 = vmatprep.mubr.msk.f32.mxu1 %vm891_vm0, %v738_v55  ;;  %v7290_v55 = vpack.c.bf16 %v1542_v42, %v1540_v41  ;;  %7335 = vmatpush1.bf16.msra.mxu1 %v7334_v45  ;;  %v2078_v45 = vld [vmem:[%s10626_s30 + $0x58] sm:$0xff] }
  0x92   : > { %1108 = vmatmul.mubr.f32.gmra.mrb[30].mxu0 %v739_v59  ;;  %7336 = vmatprep.subr.bf16.mxu1 %v7636_v28 }
  0x93   : > { %7281 = vmatpush1.bf16.msra.mxu0 %v7280_v5  ;;  %v2073_v5 = vld [vmem:[%s10626_s30 + $0x30] sm:$0xff] }
  0x94   : > { %1263 = vmatmul.mubr.f32.gmra.mrb[28].mxu1 %v737_v57  ;;  %7283 = vmatprep.subr.bf16.mxu0 %v7282_v7  ;;  %v1541_v57 = vld [vmem:[%s10624_s24 + $0x250] sm:$0xff]  ;;  %v7340_v21 = vpack.c.bf16 %v2074_v6, %v2073_v5 }
  0x95   : > { %5795 = vmatprep.mubr.msk.f32.mxu1 %vm891_vm0, %v740_v58  ;;  %v7292_v48 = vpack.c.bf16 %v1541_v57, %v1539_v56  ;;  %7338 = vmatpush1.bf16.msra.mxu1 %v7337_v1  ;;  %v1556_v56 = vld [vmem:[%s10624_s24 + $0x2c8] sm:$0xff]  ;;  %v1558_v57 = vld [vmem:[%s10624_s24 + $0x2d8] sm:$0xff]  ;;  %v7304_v1 = vpack.c.bf16 %v1553_v51, %v1551_v50  ;;  %v1563_v51 = vld [vmem:[%s10624_s24 + $0x300] sm:$0xff] }
  0x96   : > { %7339 = vmatprep.subr.bf16.mxu1 %v7636_v28  ;;  %v7306_v6 = vpack.c.bf16 %v1558_v57, %v1556_v56 }
  0x98   : > { %1269 = vmatmul.mubr.f32.gmra.mrb[30].mxu1 %v739_v59 }
  0x99   : > { %7341 = vmatpush1.bf16.msra.mxu1 %v7340_v21 }
  0x9a   : > { %7342 = vmatprep.subr.bf16.mxu1 %v7636_v28 }
 0x129   : > { %v1019_v14 = vpop.f32.mrb[0].mxu0 }
 0x12a   : > { %v1020_v15 = vadd.f32 %v1019_v14, %v8525_v13  ;;  %v1021_v17 = vpop.f32.mrb[1].mxu0  ;;  %v1543_v14 = vld [vmem:[%s10624_s24 + $0x260] sm:$0xff] }
 0x12b   : > { %v1022_v18 = vadd.f32 %v1021_v17, %v8530_v2 }
 0x12c   : > { %vm1275_vm4 = vcmp.ge.f32.partialorder %v1020_v15, 0.0  ;;  %v1339_v20 = vmul.f32 0.01, %v1020_v15 }
 0x12d   : > { %v1340_v22 = vmul.f32 0.01, %v1022_v18  ;;  %v1025_v23 = vpop.f32.mrb[2].mxu0  ;;  %vm1276_vm5 = vcmp.ge.f32.partialorder %v1022_v18, 0.0 }
 0x12e   : > { %v1026_v25 = vadd.f32 %v1025_v23, %v8525_v13  ;;  %v1027_v26 = vpop.f32.mrb[3].mxu0  ;;  %v1403_v39 = vsel %vm1275_vm4, %v1020_v15, %v1339_v20  ;;  %v1545_v15 = vld [vmem:[%s10624_s24 + $0x270] sm:$0xff] }
 0x12f   : > { %v1028_v33 = vadd.f32 %v1027_v26, %v8530_v2  ;;  %v1404_v34 = vsel %vm1276_vm5, %v1022_v18, %v1340_v22  ;;  %v7296_v24 = vpack.c.bf16 %v1545_v15, %v1543_v14  ;;  %v2076_v26 = vld [vmem:[%s10626_s30 + $0x48] sm:$0xff] }
 0x130   : > { %v1343_v40 = vmul.f32 0.01, %v1026_v25  ;;  %1713 = vmatprep.mubr.f32.mxu0 %v1404_v34  ;;  %vm1279_vm7 = vcmp.ge.f32.partialorder %v1026_v25, 0.0 }
 0x131   : > { %v1344_v43 = vmul.f32 0.01, %v1028_v33  ;;  %v1031_v44 = vpop.f32.mrb[4].mxu0  ;;  %1714 = vmatmul.mubr.f32.vlgmr.msra.gmra.mrb[32].mxu0 %v1403_v39  ;;  %vm1280_vm6 = vcmp.ge.f32.partialorder %v1028_v33, 0.0 }
 0x132   : > { %v1032_v46 = vadd.f32 %v1031_v44, %v8525_v13  ;;  %7285 = vmatpush1.bf16.msra.mxu0 %v7284_v27  ;;  %v1033_v47 = vpop.f32.mrb[5].mxu0  ;;  %v1407_v59 = vsel %vm1279_vm7, %v1026_v25, %v1343_v40  ;;  %v2075_v25 = vld [vmem:[%s10626_s30 + $0x40] sm:$0xff]  ;;  %v2077_v44 = vld [vmem:[%s10626_s30 + $0x50] sm:$0xff] }
 0x133   : > { %v1034_v53 = vadd.f32 %v1033_v47, %v8530_v2  ;;  %v1408_v54 = vsel %vm1280_vm6, %v1028_v33, %v1344_v43  ;;  %7287 = vmatprep.subr.bf16.mxu0 %v7286_v35  ;;  %v1549_v33 = vld [vmem:[%s10624_s24 + $0x290] sm:$0xff]  ;;  %v7343_v40 = vpack.c.bf16 %v2076_v26, %v2075_v25  ;;  %v7346_v61 = vpack.c.bf16 %v2078_v45, %v2077_v44  ;;  %v2082_v25 = vld [vmem:[%s10626_s30 + $0x78] sm:$0xff]  ;;  %v2083_v45 = vld [vmem:[%s10626_s30 + $0x80] sm:$0xff] }
 0x134   : > { %v1347_v58 = vmul.f32 0.01, %v1032_v46  ;;  %1719 = vmatprep.mubr.f32.mxu0 %v1408_v54  ;;  %vm1283_vm9 = vcmp.ge.f32.partialorder %v1032_v46, 0.0  ;;  %v7300_v43 = vpack.c.bf16 %v1549_v33, %v1547_v32  ;;  %v1561_v32 = vld [vmem:[%s10624_s24 + $0x2f0] sm:$0xff] }
 0x135   : > { %v1348_v63 = vmul.f32 0.01, %v1034_v53  ;;  %v1037_v0 = vpop.f32.mrb[6].mxu0  ;;  %1720 = vmatmul.mubr.f32.gmra.mrb[34].mxu0 %v1407_v59  ;;  %vm1284_vm8 = vcmp.ge.f32.partialorder %v1034_v53, 0.0  ;;  %7344 = vmatpush1.bf16.msra.mxu1 %v7343_v40 }
 0x136   : > { %v1038_v3 = vadd.f32 %v1037_v0, %v8525_v13  ;;  %v1039_v4 = vpop.f32.mrb[7].mxu0  ;;  %7289 = vmatpush1.bf16.msra.mxu0 %v7288_v49  ;;  %v1411_v18 = vsel %vm1283_vm9, %v1032_v46, %v1347_v58  ;;  %v7302_v49 = vpack.c.bf16 %v1554_v37, %v1552_v36  ;;  %7345 = vmatprep.subr.bf16.mxu1 %v7636_v28  ;;  %v1564_v36 = vld [vmem:[%s10624_s24 + $0x308] sm:$0xff]  ;;  %v1566_v37 = vld [vmem:[%s10624_s24 + $0x318] sm:$0xff] }
 0x137   : > { %v1040_v52 = vadd.f32 %v1039_v4, %v8530_v2  ;;  %v1412_v7 = vsel %vm1284_vm8, %v1034_v53, %v1348_v63  ;;  %7291 = vmatprep.subr.bf16.mxu0 %v7290_v55  ;;  %v8655_v53 = vpop.f32.mrb[0].mxu1  ;;  %v2080_v4 = vld [vmem:[%s10626_s30 + $0x68] sm:$0xff]  ;;  %v7314_v50 = vpack.c.bf16 %v1566_v37, %v1564_v36  ;;  %v1571_v37 = vld [vmem:[%s10624_s24 + $0x340] sm:$0xff] }
 0x138   : > { %v1351_v17 = vmul.f32 0.01, %v1038_v3  ;;  %1725 = vmatprep.mubr.f32.mxu0 %v1412_v7  ;;  %vm1287_vm11 = vcmp.ge.f32.partialorder %v1038_v3, 0.0  ;;  %v8664_v58 = vpop.f32.mrb[1].mxu1  ;;  %v1557_v7 = vld [vmem:[%s10624_s24 + $0x2d0] sm:$0xff] }
 0x139   : > { %v1352_v20 = vmul.f32 0.01, %v1040_v52  ;;  %v1043_v16 = vpop.f32.mrb[8].mxu0  ;;  %1726 = vmatmul.mubr.f32.gmra.mrb[36].mxu0 %v1411_v18  ;;  %vm1288_vm10 = vcmp.ge.f32.partialorder %v1040_v52, 0.0  ;;  %v1562_v18 = vld [vmem:[%s10624_s24 + $0x2f8] sm:$0xff]  ;;  %7347 = vmatpush1.bf16.msra.mxu1 %v7346_v61 }
 0x13a   : > { %v1044_v22 = vadd.f32 %v1043_v16, %v8525_v13  ;;  %v1045_v23 = vpop.f32.mrb[9].mxu0  ;;  %7293 = vmatpush1.bf16.msra.mxu0 %v7292_v48  ;;  %v1415_v35 = vsel %vm1287_vm11, %v1038_v3, %v1351_v17  ;;  %v2079_v3 = vld [vmem:[%s10626_s30 + $0x60] sm:$0xff]  ;;  %v1560_v17 = vld [vmem:[%s10624_s24 + $0x2e8] sm:$0xff]  ;;  %7348 = vmatprep.subr.bf16.mxu1 %v7636_v28 }
 0x13b   : > { %v1046_v27 = vadd.f32 %v1045_v23, %v8530_v2  ;;  %v1416_v30 = vsel %vm1288_vm10, %v1040_v52, %v1352_v20  ;;  %7295 = vmatprep.subr.bf16.mxu0 %v7294_v8  ;;  %v1555_v52 = vld [vmem:[%s10624_s24 + $0x2c0] sm:$0xff]  ;;  %v8681_v8 = vpop.f32.mrb[2].mxu1  ;;  %v7349_v16 = vpack.c.bf16 %v2080_v4, %v2079_v3 }
 0x13c   : > { %v1355_v34 = vmul.f32 0.01, %v1044_v22  ;;  %1731 = vmatprep.mubr.f32.mxu0 %v1416_v30  ;;  %vm1291_vm13 = vcmp.ge.f32.partialorder %v1044_v22, 0.0  ;;  %v8690_v12 = vpop.f32.mrb[3].mxu1  ;;  %v7308_v23 = vpack.c.bf16 %v1557_v7, %v1555_v52  ;;  %v7310_v30 = vpack.c.bf16 %v1562_v18, %v1560_v17  ;;  %v1569_v17 = vld [vmem:[%s10624_s24 + $0x330] sm:$0xff] }
 0x13d   : > { %v1356_v38 = vmul.f32 0.01, %v1046_v27  ;;  %v1049_v39 = vpop.f32.mrb[10].mxu0  ;;  %1732 = vmatmul.mubr.f32.gmra.mrb[38].mxu0 %v1415_v35  ;;  %vm1292_vm12 = vcmp.ge.f32.partialorder %v1046_v27, 0.0  ;;  %v8707_v33 = vpop.f32.mrb[4].mxu1  ;;  %7350 = vmatpush1.bf16.msra.mxu1 %v7349_v16  ;;  %v1572_v16 = vld [vmem:[%s10624_s24 + $0x348] sm:$0xff] }
 0x13e   : > { %v1050_v41 = vadd.f32 %v1049_v39, %v8525_v13  ;;  %v1051_v42 = vpop.f32.mrb[11].mxu0  ;;  %7297 = vmatpush1.bf16.msra.mxu0 %v7296_v24  ;;  %v1419_v55 = vsel %vm1291_vm13, %v1044_v22, %v1355_v34  ;;  %v2081_v24 = vld [vmem:[%s10626_s30 + $0x70] sm:$0xff]  ;;  %7351 = vmatprep.subr.bf16.mxu1 %v7636_v28 }
 0x13f   : > { %v1052_v46 = vadd.f32 %v1051_v42, %v8530_v2  ;;  %v1420_v47 = vsel %vm1292_vm12, %v1046_v27, %v1356_v38  ;;  %7299 = vmatprep.subr.bf16.mxu0 %v7298_v31  ;;  %v1559_v31 = vld [vmem:[%s10624_s24 + $0x2e0] sm:$0xff]  ;;  %v8716_v38 = vpop.f32.mrb[5].mxu1 }
 0x140   : > { %v1359_v54 = vmul.f32 0.01, %v1050_v41  ;;  %1737 = vmatprep.mubr.f32.mxu0 %v1420_v47  ;;  %vm1295_vm15 = vcmp.ge.f32.partialorder %v1050_v41, 0.0  ;;  %v7312_v44 = vpack.c.bf16 %v1561_v32, %v1559_v31  ;;  %v2087_v31 = vld [vmem:[%s10626_s30 + $0xa0] sm:$0xff]  ;;  %v2088_v32 = vld [vmem:[%s10626_s30 + $0xa8] sm:$0xff] }
 0x141   : > { %v1360_v59 = vmul.f32 0.01, %v1052_v46  ;;  %v1055_v60 = vpop.f32.mrb[12].mxu0  ;;  %1738 = vmatmul.mubr.f32.gmra.mrb[40].mxu0 %v1419_v55  ;;  %vm1296_vm14 = vcmp.ge.f32.partialorder %v1052_v46, 0.0  ;;  %v8733_v55 = vpop.f32.mrb[6].mxu1 }
 0x142   : > { %v1056_v63 = vadd.f32 %v1055_v60, %v8525_v13  ;;  %v1057_v0 = vpop.f32.mrb[13].mxu0  ;;  %7301 = vmatpush1.bf16.msra.mxu0 %v7300_v43  ;;  %v1423_v15 = vsel %vm1295_vm15, %v1050_v41, %v1359_v54  ;;  %v7352_v41 = vpack.c.bf16 %v2082_v25, %v2081_v24  ;;  %v1565_v54 = vld [vmem:[%s10624_s24 + $0x310] sm:$0xff]  ;;  %v1570_v60 = vld [vmem:[%s10624_s24 + $0x338] sm:$0xff]  ;;  %v8742_v61 = vpop.f32.mrb[7].mxu1 }
 0x143   : > { %v1058_v48 = vadd.f32 %v1057_v0, %v8530_v2  ;;  %v1424_v5 = vsel %vm1296_vm14, %v1052_v46, %v1360_v59  ;;  %7303 = vmatprep.subr.bf16.mxu0 %v7302_v49  ;;  %v2084_v46 = vld [vmem:[%s10626_s30 + $0x88] sm:$0xff]  ;;  %v8759_v18 = vpop.f32.mrb[8].mxu1  ;;  %vm1642_vm14 = vcmask 1041408  }
 0x144   : > { %v1363_v14 = vmul.f32 0.01, %v1056_v63  ;;  %1743 = vmatprep.mubr.f32.mxu0 %v1424_v5  ;;  %vm1299_vm2 = vcmp.ge.f32.partialorder %v1056_v63, 0.0  ;;  %v1568_v59 = vld [vmem:[%s10624_s24 + $0x328] sm:$0xff]  ;;  %7353 = vmatpush1.bf16.msra.mxu1 %v7352_v41  ;;  %v2085_v5 = vld [vmem:[%s10626_s30 + $0x90] sm:$0xff] }
 0x145   : > { %v1364_v19 = vmul.f32 0.01, %v1058_v48  ;;  %v1061_v20 = vpop.f32.mrb[14].mxu0  ;;  %1744 = vmatmul.mubr.f32.gmra.mrb[42].mxu0 %v1423_v15  ;;  %vm1300_vm0 = vcmp.ge.f32.partialorder %v1058_v48, 0.0  ;;  %7354 = vmatprep.subr.bf16.mxu1 %v7636_v28  ;;  %v1567_v15 = vld [vmem:[%s10624_s24 + $0x320] sm:$0xff] }
 0x146   : > { %v1062_v21 = vadd.f32 %v1061_v20, %v8525_v13  ;;  %v1063_v22 = vpop.f32.mrb[15].mxu0  ;;  %7305 = vmatpush1.bf16.msra.mxu0 %v7304_v1  ;;  %v1427_v35 = vsel %vm1299_vm2, %v1056_v63, %v1363_v14  ;;  %v7355_v1 = vpack.c.bf16 %v2084_v46, %v2083_v45  ;;  %v7318_v14 = vpack.c.bf16 %v1570_v60, %v1568_v59 }
 0x147   : > { %v1064_v26 = vadd.f32 %v1063_v22, %v8530_v2  ;;  %v1428_v27 = vsel %vm1300_vm0, %v1058_v48, %v1364_v19  ;;  %7307 = vmatprep.subr.bf16.mxu0 %v7306_v6  ;;  %v7316_v48 = vpack.c.bf16 %v1565_v54, %v1563_v51  ;;  %v2086_v6 = vld [vmem:[%s10626_s30 + $0x98] sm:$0xff]  ;;  %v8768_v22 = vpop.f32.mrb[9].mxu1 }
 0x148   : > { %v1367_v34 = vmul.f32 0.01, %v1062_v21  ;;  %1749 = vmatprep.mubr.f32.mxu0 %v1428_v27  ;;  %vm1303_vm5 = vcmp.ge.f32.partialorder %v1062_v21, 0.0  ;;  %7356 = vmatpush1.bf16.msra.mxu1 %v7355_v1  ;;  %v7358_v25 = vpack.c.bf16 %v2086_v6, %v2085_v5  ;;  %v1577_v1 = vld [vmem:[%s10624_s24 + $0x370] sm:$0xff] }
 0x149   : > { %v1368_v39 = vmul.f32 0.01, %v1064_v26  ;;  %v1067_v40 = vpop.f32.mrb[16].mxu0  ;;  %1750 = vmatmul.mubr.f32.gmra.mrb[44].mxu0 %v1427_v35  ;;  %vm1304_vm4 = vcmp.ge.f32.partialorder %v1064_v26, 0.0  ;;  %7357 = vmatprep.subr.bf16.mxu1 %v7636_v28 }
 0x14a   : > { %v1068_v42 = vadd.f32 %v1067_v40, %v8525_v13  ;;  %v1069_v43 = vpop.f32.mrb[17].mxu0  ;;  %7309 = vmatpush1.bf16.msra.mxu0 %v7308_v23  ;;  %v1431_v57 = vsel %vm1303_vm5, %v1062_v21, %v1367_v34  ;;  %v1574_v21 = vld [vmem:[%s10624_s24 + $0x358] sm:$0xff]  ;;  %v8785_v40 = vpop.f32.mrb[10].mxu1 }
 0x14b   : > { %v1070_v47 = vadd.f32 %v1069_v43, %v8530_v2  ;;  %v1432_v49 = vsel %vm1304_vm4, %v1064_v26, %v1368_v39  ;;  %7311 = vmatprep.subr.bf16.mxu0 %v7310_v30  ;;  %v7320_v30 = vpack.c.bf16 %v1569_v17, %v1567_v15  ;;  %v7322_v36 = vpack.c.bf16 %v1574_v21, %v1572_v16  ;;  %v1573_v39 = vld [vmem:[%s10624_s24 + $0x350] sm:$0xff]  ;;  %v1576_v43 = vld [vmem:[%s10624_s24 + $0x368] sm:$0xff]  ;;  %v8794_v45 = vpop.f32.mrb[11].mxu1 }
 0x14c   : > { %v1371_v56 = vmul.f32 0.01, %v1068_v42  ;;  %1755 = vmatprep.mubr.f32.mxu0 %v1432_v49  ;;  %vm1307_vm7 = vcmp.ge.f32.partialorder %v1068_v42, 0.0  ;;  %7359 = vmatpush1.bf16.msra.mxu1 %v7358_v25  ;;  %v7361_v49 = vpack.c.bf16 %v2088_v32, %v2087_v31  ;;  %v7324_v54 = vpack.c.bf16 %v1573_v39, %v1571_v37 }
 0x14d   : > { %v1372_v63 = vmul.f32 0.01, %v1070_v47  ;;  %v1073_v0 = vpop.f32.mrb[18].mxu0  ;;  %1756 = vmatmul.mubr.f32.gmra.mrb[46].mxu0 %v1431_v57  ;;  %vm1308_vm6 = vcmp.ge.f32.partialorder %v1070_v47, 0.0  ;;  %7360 = vmatprep.subr.bf16.mxu1 %v7636_v28  ;;  %v2090_v57 = vld [vmem:[%s10626_s30 + $0xb8] sm:$0xff] }
 0x14e   : > { %v1074_v3 = vadd.f32 %v1073_v0, %v8525_v13  ;;  %v1075_v4 = vpop.f32.mrb[19].mxu0  ;;  %7313 = vmatpush1.bf16.msra.mxu0 %v7312_v44  ;;  %v1435_v20 = vsel %vm1307_vm7, %v1068_v42, %v1371_v56  ;;  %v1578_v44 = vld [vmem:[%s10624_s24 + $0x378] sm:$0xff]  ;;  %v2089_v56 = vld [vmem:[%s10626_s30 + $0xb0] sm:$0xff]  ;;  %v1575_v0 = vld [vmem:[%s10624_s24 + $0x360] sm:$0xff] }
 0x14f   : > { %v1076_v52 = vadd.f32 %v1075_v4, %v8530_v2  ;;  %v1436_v7 = vsel %vm1308_vm6, %v1070_v47, %v1372_v63  ;;  %7315 = vmatprep.subr.bf16.mxu0 %v7314_v50  ;;  %v7326_v63 = vpack.c.bf16 %v1578_v44, %v1576_v43  ;;  %v7328_v17 = vpack.c.bf16 %v1577_v1, %v1575_v0 }
 0x150   : > { %v1375_v19 = vmul.f32 0.01, %v1074_v3  ;;  %1761 = vmatprep.mubr.f32.mxu0 %v1436_v7  ;;  %vm1311_vm9 = vcmp.ge.f32.partialorder %v1074_v3, 0.0  ;;  %7362 = vmatpush1.bf16.msra.mxu1 %v7361_v49  ;;  %v7364_v7 = vpack.c.bf16 %v2090_v57, %v2089_v56 }
 0x151   : > { %v1376_v23 = vmul.f32 0.01, %v1076_v52  ;;  %v1079_v24 = vpop.f32.mrb[20].mxu0  ;;  %1762 = vmatmul.mubr.f32.gmra.mrb[48].mxu0 %v1435_v20  ;;  %vm1312_vm8 = vcmp.ge.f32.partialorder %v1076_v52, 0.0  ;;  %7363 = vmatprep.subr.bf16.mxu1 %v7636_v28  ;;  %v2092_v20 = vld [vmem:[%s10626_s30 + $0xc8] sm:$0xff] }
 0x152   : > { %v1080_v26 = vadd.f32 %v1079_v24, %v8525_v13  ;;  %v1081_v27 = vpop.f32.mrb[21].mxu0  ;;  %7317 = vmatpush1.bf16.msra.mxu0 %v7316_v48  ;;  %v1439_v42 = vsel %vm1311_vm9, %v1074_v3, %v1375_v19  ;;  %v8811_v3 = vpop.f32.mrb[12].mxu1  ;;  %v2091_v19 = vld [vmem:[%s10626_s30 + $0xc0] sm:$0xff] }
 0x153   : > { %v1082_v34 = vadd.f32 %v1081_v27, %v8530_v2  ;;  %v1440_v35 = vsel %vm1312_vm8, %v1076_v52, %v1376_v23  ;;  %7319 = vmatprep.subr.bf16.mxu0 %v7318_v14  ;;  %v8814_v5 = vpop.f32.mrb[13].mxu1  ;;  %v885_v23 = vsub.s32 3, %v8513_v9  ;;  %v1580_v27 = vld [vmem:[%s10624_s24 + $0x388] sm:$0x3] }
 0x154   : > { %v1379_v41 = vmul.f32 0.01, %v1080_v26  ;;  %1767 = vmatprep.mubr.f32.mxu0 %v1440_v35  ;;  %vm1315_vm11 = vcmp.ge.f32.partialorder %v1080_v26, 0.0  ;;  %v8826_v24 = vpop.f32.mrb[14].mxu1  ;;  %7365 = vmatpush1.bf16.msra.mxu1 %v7364_v7 }
 0x155   : > { %v1380_v46 = vmul.f32 0.01, %v1082_v34  ;;  %v1085_v47 = vpop.f32.mrb[22].mxu0  ;;  %1768 = vmatmul.mubr.f32.gmra.mrb[50].mxu0 %v1439_v42  ;;  %vm1316_vm10 = vcmp.ge.f32.partialorder %v1082_v34, 0.0  ;;  %7366 = vmatprep.subr.bf16.mxu1 %v7636_v28  ;;  %v1579_v42 = vld [vmem:[%s10624_s24 + $0x380] sm:$0x3] }
 0x156   : > { %v1086_v50 = vadd.f32 %v1085_v47, %v8525_v13  ;;  %v1087_v51 = vpop.f32.mrb[23].mxu0  ;;  %7321 = vmatpush1.bf16.msra.mxu0 %v7320_v30  ;;  %v1443_v48 = vsel %vm1315_vm11, %v1080_v26, %v1379_v41  ;;  %v8832_v30 = vpop.f32.mrb[15].mxu1  ;;  %v8838_v41 = vrot.slane %v8519_v62, %v885_v23  ;;  %v881_v47 = vsub.s32 2, %v8513_v9 }
 0x157   : > { %v1088_v59 = vadd.f32 %v1087_v51, %v8530_v2  ;;  %v1444_v60 = vsel %vm1316_vm10, %v1082_v34, %v1380_v46  ;;  %7323 = vmatprep.subr.bf16.mxu0 %v7322_v36  ;;  %v7367_v34 = vpack.c.bf16 %v2092_v20, %v2091_v19  ;;  %v8844_v43 = vpop.f32.mrb[16].mxu1  ;;  %vm1593_vm10 = vcmask 539648  }
 0x158   : > { %v1383_v4 = vmul.f32 0.01, %v1086_v50  ;;  %1773 = vmatprep.mubr.f32.mxu0 %v1444_v60  ;;  %vm1319_vm13 = vcmp.ge.f32.partialorder %v1086_v50, 0.0  ;;  %v8847_v49 = vpop.f32.mrb[17].mxu1  ;;  %v1183_v60 = vadd.f32 %v8664_v58, %v8838_v41 }
 0x159   : > { %v1384_v6 = vmul.f32 0.01, %v1088_v59  ;;  %v1091_v52 = vpop.f32.mrb[24].mxu0  ;;  %1774 = vmatmul.mubr.f32.gmra.mrb[52].mxu0 %v1443_v48  ;;  %vm1320_vm12 = vcmp.ge.f32.partialorder %v1088_v59, 0.0  ;;  %7368 = vmatpush1.bf16.msra.mxu1 %v7367_v34 }
 0x15a   : > { %v1092_v14 = vadd.f32 %v1091_v52, %v8525_v13  ;;  %v1093_v15 = vpop.f32.mrb[25].mxu0  ;;  %7325 = vmatpush1.bf16.msra.mxu0 %v7324_v54  ;;  %v1447_v26 = vsel %vm1319_vm13, %v1086_v50, %v1383_v4  ;;  %v8858_v4 = vrot.slane %v8519_v62, %v881_v47  ;;  %v1342_v19 = vmul.f32 0.01, %v1183_v60 }
 0x15b   : > { %v1094_v16 = vadd.f32 %v1093_v15, %v8530_v2  ;;  %v1448_v21 = vsel %vm1320_vm12, %v1088_v59, %v1384_v6  ;;  %7327 = vmatprep.subr.bf16.mxu0 %v7326_v63  ;;  %v8854_v63 = vpop.f32.mrb[18].mxu1  ;;  %vm1278_vm7 = vcmp.ge.f32.partialorder %v1183_v60, 0.0  ;;  %v1207_v47 = vadd.f32 %v8768_v22, %v8838_v41 }
 0x15c   : > { %v1387_v25 = vmul.f32 0.01, %v1092_v14  ;;  %1779 = vmatprep.mubr.f32.mxu0 %v1448_v21  ;;  %vm1323_vm0 = vcmp.ge.f32.partialorder %v1092_v14, 0.0  ;;  %v8860_v48 = vpop.f32.mrb[19].mxu1 }
 0x15d   : > { %v1388_v31 = vmul.f32 0.01, %v1094_v16  ;;  %v1097_v32 = vpop.f32.mrb[26].mxu0  ;;  %1780 = vmatmul.mubr.f32.gmra.mrb[54].mxu0 %v1447_v26  ;;  %vm1324_vm15 = vcmp.ge.f32.partialorder %v1094_v16, 0.0  ;;  %v8866_v20 = vpop.f32.mrb[20].mxu1 }
 0x15e   : > { %v1098_v35 = vadd.f32 %v1097_v32, %v8525_v13  ;;  %v1099_v36 = vpop.f32.mrb[27].mxu0  ;;  %7329 = vmatpush1.bf16.msra.mxu0 %v7328_v17  ;;  %v1451_v46 = vsel %vm1323_vm0, %v1092_v14, %v1387_v25  ;;  %v1189_v17 = vadd.f32 %v8690_v12, %v8838_v41  ;;  %v8870_v23 = vpop.f32.mrb[21].mxu1  ;;  %v1406_v25 = vsel %vm1278_vm7, %v1183_v60, %v1342_v19 }
 0x15f   : > { %v1100_v37 = vadd.f32 %v1099_v36, %v8530_v2  ;;  %v1452_v39 = vsel %vm1324_vm15, %v1094_v16, %v1388_v31  ;;  %5796 = vmatprep.subr.msk.mxu0 %vm1642_vm14, %v1580_v27  ;;  %v1181_v16 = vadd.f32 %v8655_v53, %v8858_v4  ;;  %v1195_v12 = vadd.f32 %v8716_v38, %v8838_v41  ;;  %v8874_v27 = vpop.f32.mrb[22].mxu1 }
 0x160   : > { %v1391_v44 = vmul.f32 0.01, %v1098_v35  ;;  %1785 = vmatprep.mubr.f32.mxu0 %v1452_v39  ;;  %vm1327_vm4 = vcmp.ge.f32.partialorder %v1098_v35, 0.0  ;;  %v1346_v26 = vmul.f32 0.01, %v1189_v17  ;;  %v1187_v53 = vadd.f32 %v8681_v8, %v8858_v4  ;;  %v8878_v34 = vpop.f32.mrb[23].mxu1 }
 0x161   : > { %v1392_v50 = vmul.f32 0.01, %v1100_v37  ;;  %v1103_v51 = vpop.f32.mrb[28].mxu0  ;;  %1786 = vmatmul.mubr.f32.gmra.mrb[56].mxu0 %v1451_v46  ;;  %vm1328_vm2 = vcmp.ge.f32.partialorder %v1100_v37, 0.0  ;;  %v1341_v31 = vmul.f32 0.01, %v1181_v16  ;;  %v1201_v38 = vadd.f32 %v8742_v61, %v8838_v41 }
 0x162   : > { %v1104_v54 = vadd.f32 %v1103_v51, %v8525_v13  ;;  %v1105_v56 = vpop.f32.mrb[29].mxu0  ;;  %5797 = vmatpush1.msk.msra.mxu0 %vm1642_vm14, %v1579_v42  ;;  %v1455_v1 = vsel %vm1327_vm4, %v1098_v35, %v1391_v44  ;;  %vm1282_vm11 = vcmp.ge.f32.partialorder %v1189_v17, 0.0  ;;  %vm1277_vm12 = vcmp.ge.f32.partialorder %v1181_v16, 0.0 }
 0x163   : > { %v1106_v57 = vadd.f32 %v1105_v56, %v8530_v2  ;;  %v1456_v59 = vsel %vm1328_vm2, %v1100_v37, %v1392_v50  ;;  %7381 = vmatprep.subr.bf16.mxu0 %v7636_v28  ;;  %v1410_v35 = vsel %vm1282_vm11, %v1189_v17, %v1346_v26  ;;  %v1350_v36 = vmul.f32 0.01, %v1195_v12  ;;  %v8883_v37 = vpop.f32.mrb[24].mxu1 }
 0x164   : > { %v1395_v0 = vmul.f32 0.01, %v1104_v54  ;;  %1791 = vmatprep.mubr.f32.mxu0 %v1456_v59  ;;  %vm1331_vm6 = vcmp.ge.f32.partialorder %v1104_v54, 0.0  ;;  %v1193_v39 = vadd.f32 %v8707_v33, %v8858_v4  ;;  %v1405_v8 = vsel %vm1277_vm12, %v1181_v16, %v1341_v31  ;;  %v8887_v44 = vpop.f32.mrb[25].mxu1 }
 0x165   : > { %v1396_v6 = vmul.f32 0.01, %v1106_v57  ;;  %v1109_v52 = vpop.f32.mrb[30].mxu0  ;;  %1792 = vmatmul.mubr.f32.gmra.mrb[58].mxu0 %v1455_v1  ;;  %vm1332_vm5 = vcmp.ge.f32.partialorder %v1106_v57, 0.0  ;;  %v1345_v42 = vmul.f32 0.01, %v1187_v53  ;;  %v1199_v51 = vadd.f32 %v8733_v55, %v8858_v4 }
 0x166   : > { %v1110_v7 = vadd.f32 %v1109_v52, %v8525_v13  ;;  %v1111_v58 = vpop.f32.mrb[31].mxu0  ;;  %v1459_v21 = vsel %vm1331_vm6, %v1104_v54, %v1395_v0  ;;  %vm1286_vm13 = vcmp.ge.f32.partialorder %v1195_v12, 0.0  ;;  %vm1281_vm15 = vcmp.ge.f32.partialorder %v1187_v53, 0.0  ;;  %v8892_v50 = vpop.f32.mrb[26].mxu1 }
 0x167   : > { %v1112_v14 = vadd.f32 %v1111_v58, %v8530_v2  ;;  %v1460_v15 = vsel %vm1332_vm5, %v1106_v57, %v1396_v6  ;;  %v1414_v46 = vsel %vm1286_vm13, %v1195_v12, %v1350_v36  ;;  %v1354_v61 = vmul.f32 0.01, %v1201_v38  ;;  %v8896_v56 = vpop.f32.mrb[27].mxu1 }
 0x168   : > { %v1399_v62 = vmul.f32 0.01, %v1110_v7  ;;  %1797 = vmatprep.mubr.f32.mxu0 %v1460_v15  ;;  %vm1335_vm9 = vcmp.ge.f32.partialorder %v1110_v7, 0.0  ;;  %v1409_v33 = vsel %vm1281_vm15, %v1187_v53, %v1345_v42  ;;  %v1349_v54 = vmul.f32 0.01, %v1193_v39  ;;  %v8901_v60 = vpop.f32.mrb[28].mxu1 }
 0x169   : > { %v1400_v13 = vmul.f32 0.01, %v1112_v14  ;;  %1798 = vmatmul.mubr.f32.gmra.mrb[60].mxu0 %v1459_v21  ;;  %vm1336_vm8 = vcmp.ge.f32.partialorder %v1112_v14, 0.0  ;;  %vm1290_vm0 = vcmp.ge.f32.partialorder %v1201_v38, 0.0  ;;  %vm1285_vm2 = vcmp.ge.f32.partialorder %v1193_v39, 0.0  ;;  %v8905_v6 = vpop.f32.mrb[29].mxu1 }
 0x16a   : > { %v1463_v32 = vsel %vm1335_vm9, %v1110_v7, %v1399_v62  ;;  %v1418_v57 = vsel %vm1290_vm0, %v1201_v38, %v1354_v61  ;;  %v1213_v59 = vadd.f32 %v8794_v45, %v8838_v41  ;;  %v1358_v22 = vmul.f32 0.01, %v1207_v47 }
 0x16b   : > { %v1464_v2 = vsel %vm1336_vm8, %v1112_v14, %v1400_v13  ;;  %v1205_v0 = vadd.f32 %v8759_v18, %v8858_v4  ;;  %v1413_v55 = vsel %vm1285_vm2, %v1193_v39, %v1349_v54  ;;  %v1353_v1 = vmul.f32 0.01, %v1199_v51  ;;  %v8910_v58 = vpop.f32.mrb[30].mxu1 }
 0x16c   : > { %1803 = vmatprep.mubr.f32.mxu0 %v1464_v2  ;;  %vm1294_vm4 = vcmp.ge.f32.partialorder %v1207_v47, 0.0  ;;  %vm1289_vm5 = vcmp.ge.f32.partialorder %v1199_v51, 0.0  ;;  %v1219_v7 = vadd.f32 %v8814_v5, %v8838_v41  ;;  %v1362_v45 = vmul.f32 0.01, %v1213_v59  ;;  %v8914_v17 = vpop.f32.mrb[31].mxu1 }
 0x16d   : > { %1804 = vmatmul.mubr.f32.gmra.mrb[62].mxu0 %v1463_v32  ;;  %v1422_v52 = vsel %vm1294_vm4, %v1207_v47, %v1358_v22  ;;  %v1211_v14 = vadd.f32 %v8785_v40, %v8858_v4  ;;  %v1417_v18 = vsel %vm1289_vm5, %v1199_v51, %v1353_v1  ;;  %v1357_v15 = vmul.f32 0.01, %v1205_v0 }
 0x16e   : > { %5798 = vmatprep.mubr.msk.f32.mxu0 %vm1593_vm10, %v1406_v25  ;;  %vm1298_vm6 = vcmp.ge.f32.partialorder %v1213_v59, 0.0  ;;  %vm1293_vm7 = vcmp.ge.f32.partialorder %v1205_v0, 0.0  ;;  %v1225_v62 = vadd.f32 %v8832_v30, %v8838_v41  ;;  %v1366_v5 = vmul.f32 0.01, %v1219_v7 }
 0x16f   : > { %v1426_v19 = vsel %vm1298_vm6, %v1213_v59, %v1362_v45  ;;  %v1217_v16 = vadd.f32 %v8811_v3, %v8858_v4  ;;  %v1421_v21 = vsel %vm1293_vm7, %v1205_v0, %v1357_v15  ;;  %v1361_v13 = vmul.f32 0.01, %v1211_v14 }
 0x170   : > { %vm1302_vm8 = vcmp.ge.f32.partialorder %v1219_v7, 0.0  ;;  %vm1297_vm9 = vcmp.ge.f32.partialorder %v1211_v14, 0.0  ;;  %v1231_v2 = vadd.f32 %v8847_v49, %v8838_v41  ;;  %v1370_v25 = vmul.f32 0.01, %v1225_v62 }
 0x171   : > { %1875 = vmatmul.mubr.f32.vlgmr.msra.gmra.mrb[32].mxu0 %v1405_v8  ;;  %v1430_v40 = vsel %vm1302_vm8, %v1219_v7, %v1366_v5  ;;  %v1223_v12 = vadd.f32 %v8826_v24, %v8858_v4  ;;  %v1425_v30 = vsel %vm1297_vm9, %v1211_v14, %v1361_v13  ;;  %v1365_v26 = vmul.f32 0.01, %v1217_v16 }
 0x172   : > { %5799 = vmatprep.mubr.msk.f32.mxu0 %vm1593_vm10, %v1410_v35  ;;  %vm1306_vm11 = vcmp.ge.f32.partialorder %v1225_v62, 0.0  ;;  %vm1301_vm12 = vcmp.ge.f32.partialorder %v1217_v16, 0.0  ;;  %v1237_v31 = vadd.f32 %v8860_v48, %v8838_v41  ;;  %v1374_v53 = vmul.f32 0.01, %v1231_v2 }
 0x173   : > { %v1434_v3 = vsel %vm1306_vm11, %v1225_v62, %v1370_v25  ;;  %v1229_v32 = vadd.f32 %v8844_v43, %v8858_v4  ;;  %v1429_v49 = vsel %vm1301_vm12, %v1217_v16, %v1365_v26  ;;  %v1369_v35 = vmul.f32 0.01, %v1223_v12 }
 0x174   : > { %vm1310_vm13 = vcmp.ge.f32.partialorder %v1231_v2, 0.0  ;;  %vm1305_vm15 = vcmp.ge.f32.partialorder %v1223_v12, 0.0  ;;  %v1243_v38 = vadd.f32 %v8870_v23, %v8838_v41  ;;  %v1378_v36 = vmul.f32 0.01, %v1237_v31 }
 0x175   : > { %1881 = vmatmul.mubr.f32.gmra.mrb[34].mxu0 %v1409_v33  ;;  %v1438_v24 = vsel %vm1310_vm13, %v1231_v2, %v1374_v53  ;;  %v1235_v39 = vadd.f32 %v8854_v63, %v8858_v4  ;;  %v1433_v48 = vsel %vm1305_vm15, %v1223_v12, %v1369_v35  ;;  %v1373_v8 = vmul.f32 0.01, %v1229_v32  ;;  %v2410_v53 = vld [vmem:[%s10593_s8 + $0x8] sm:$0xff] }
 0x176   : > { %5800 = vmatprep.mubr.msk.f32.mxu0 %vm1593_vm10, %v1414_v46  ;;  %vm1314_vm0 = vcmp.ge.f32.partialorder %v1237_v31, 0.0  ;;  %vm1309_vm2 = vcmp.ge.f32.partialorder %v1229_v32, 0.0  ;;  %v1249_v42 = vadd.f32 %v8878_v34, %v8838_v41  ;;  %v1382_v46 = vmul.f32 0.01, %v1243_v38 }
 0x177   : > { %v1442_v43 = vsel %vm1314_vm0, %v1237_v31, %v1378_v36  ;;  %v1241_v47 = vadd.f32 %v8866_v20, %v8858_v4  ;;  %v1437_v23 = vsel %vm1309_vm2, %v1229_v32, %v1373_v8  ;;  %v1377_v61 = vmul.f32 0.01, %v1235_v39  ;;  %v2409_v31 = vld [vmem:[%s10593_s8] sm:$0xff]  ;;  %v2411_v36 = vld [vmem:[%s10593_s8 + $0x10] sm:$0xff] }
 0x178   : > { %vm1318_vm4 = vcmp.ge.f32.partialorder %v1243_v38, 0.0  ;;  %vm1313_vm5 = vcmp.ge.f32.partialorder %v1235_v39, 0.0  ;;  %v1255_v51 = vadd.f32 %v8887_v44, %v8838_v41  ;;  %v1386_v33 = vmul.f32 0.01, %v1249_v42 }
 0x179   : > { %1887 = vmatmul.mubr.f32.gmra.mrb[36].mxu0 %v1413_v55  ;;  %v1446_v63 = vsel %vm1318_vm4, %v1243_v38, %v1382_v46  ;;  %v1247_v54 = vadd.f32 %v8874_v27, %v8858_v4  ;;  %v1441_v34 = vsel %vm1313_vm5, %v1235_v39, %v1377_v61  ;;  %vm1322_vm6 = vcmp.ge.f32.partialorder %v1249_v42, 0.0  ;;  %v2412_v39 = vld [vmem:[%s10593_s8 + $0x18] sm:$0xff] }
 0x17a   : > { %5801 = vmatprep.mubr.msk.f32.mxu0 %vm1593_vm10, %v1418_v57  ;;  %v1381_v57 = vmul.f32 0.01, %v1241_v47  ;;  %vm1317_vm7 = vcmp.ge.f32.partialorder %v1241_v47, 0.0  ;;  %v1450_v20 = vsel %vm1322_vm6, %v1249_v42, %v1386_v33  ;;  %v1261_v59 = vadd.f32 %v8896_v56, %v8838_v41  ;;  %v2414_v33 = vld [vmem:[%s10593_s8 + $0x28] sm:$0xff] }
 0x17b   : > { %v1390_v22 = vmul.f32 0.01, %v1255_v51  ;;  %v1253_v0 = vadd.f32 %v8883_v37, %v8858_v4  ;;  %v1385_v55 = vmul.f32 0.01, %v1247_v54  ;;  %vm1326_vm8 = vcmp.ge.f32.partialorder %v1255_v51, 0.0 }
 0x17c   : > { %v1445_v44 = vsel %vm1317_vm7, %v1241_v47, %v1381_v57  ;;  %vm1321_vm9 = vcmp.ge.f32.partialorder %v1247_v54, 0.0  ;;  %v1267_v1 = vadd.f32 %v8905_v6, %v8838_v41  ;;  %v1259_v7 = vadd.f32 %v8892_v50, %v8858_v4 }
 0x17d   : > { %1893 = vmatmul.mubr.f32.gmra.mrb[38].mxu0 %v1417_v18  ;;  %v1454_v27 = vsel %vm1326_vm8, %v1255_v51, %v1390_v22  ;;  %v1449_v56 = vsel %vm1321_vm9, %v1247_v54, %v1385_v55  ;;  %v1389_v45 = vmul.f32 0.01, %v1253_v0  ;;  %vm1330_vm11 = vcmp.ge.f32.partialorder %v1261_v59, 0.0  ;;  %v2413_v51 = vld [vmem:[%s10593_s8 + $0x20] sm:$0xff] }
 0x17e   : > { %5802 = vmatprep.mubr.msk.f32.mxu0 %vm1593_vm10, %v1422_v52  ;;  %v1394_v52 = vmul.f32 0.01, %v1261_v59  ;;  %vm1325_vm12 = vcmp.ge.f32.partialorder %v1253_v0, 0.0  ;;  %v1273_v14 = vadd.f32 %v8914_v17, %v8838_v41  ;;  %v1398_v18 = vmul.f32 0.01, %v1267_v1 }
 0x17f   : > { %v1265_v15 = vadd.f32 %v8901_v60, %v8858_v4  ;;  %v1453_v6 = vsel %vm1325_vm12, %v1253_v0, %v1389_v45  ;;  %vm1334_vm13 = vcmp.ge.f32.partialorder %v1267_v1, 0.0  ;;  %vm1329_vm15 = vcmp.ge.f32.partialorder %v1259_v7, 0.0 }
 0x180   : > { %v1458_v37 = vsel %vm1330_vm11, %v1261_v59, %v1394_v52  ;;  %v1462_v50 = vsel %vm1334_vm13, %v1267_v1, %v1398_v18  ;;  %v1402_v62 = vmul.f32 0.01, %v1273_v14  ;;  %v1271_v5 = vadd.f32 %v8910_v58, %v8858_v4  ;;  %v2093_v4 = vld [vmem:[%s10626_s30 + $0xd0] sm:$0xf]  ;;  %v1581_v58 = vld [vmem:[%s10627_s1] sm:$0x3] }
 0x181   : > { %1899 = vmatmul.mubr.f32.gmra.mrb[40].mxu0 %v1421_v21  ;;  %v1397_v21 = vmul.f32 0.01, %v1265_v15  ;;  %vm1338_vm0 = vcmp.ge.f32.partialorder %v1273_v14, 0.0  ;;  %vm1333_vm2 = vcmp.ge.f32.partialorder %v1265_v15, 0.0  ;;  %vm7638_vm5 = vmmov 0   ;;  %v2416_v1 = vld [vmem:[%s10593_s8 + $0x38] sm:$0xff] }
 0x182   : > { %5803 = vmatprep.mubr.msk.f32.mxu0 %vm1593_vm10, %v1426_v19  ;;  %v1393_v19 = vmul.f32 0.01, %v1259_v7  ;;  %v1466_v41 = vsel %vm1338_vm0, %v1273_v14, %v1402_v62  ;;  %v1401_v17 = vmul.f32 0.01, %v1271_v5  ;;  %vm1337_vm4 = vcmp.ge.f32.partialorder %v1271_v5, 0.0 }
 0x183   : > { %v1461_v60 = vsel %vm1333_vm2, %v1265_v15, %v1397_v21  ;;  %v8979_v2 = vrot.slane %v1581_v58, %v873_v10  ;;  %v8983_v25 = vrot.slane %v1581_v58, %v877_v11  ;;  %vm2101_vm7 = vcmask 687104  }
 0x184   : > { %v1457_v16 = vsel %vm1329_vm15, %v1259_v7, %v1393_v19  ;;  %v1465_v13 = vsel %vm1337_vm4, %v1271_v5, %v1401_v17  ;;  %v7370_v35 = vpack.c.bf16 %v2410_v53, %v2409_v31  ;;  %v7376_v0 = vpack.c.bf16 %v2414_v33, %v2413_v51  ;;  %v2417_v17 = vld [vmem:[%s10593_s8 + $0x40] sm:$0x7] }
 0x185   : > { %1905 = vmatmul.mubr.f32.gmra.mrb[42].mxu0 %v1425_v30  ;;  %vm2615_vm4 = vcmask 1042432  }
 0x186   : > { %5804 = vmatprep.mubr.msk.f32.mxu0 %vm1593_vm10, %v1430_v40  ;;  %v7637_v40 = vmov 0.0  }
 0x187   : > { %2205 = vmatprep.subr.mxu1 %v7637_v40 }
 0x188   : > { %5815 = vmatpush1.msk.msra.mxu1 %vm940_vm1, %v2093_v4 }
 0x189   : > { %1911 = vmatmul.mubr.f32.gmra.mrb[44].mxu0 %v1429_v49  ;;  %7369 = vmatprep.subr.bf16.mxu1 %v7636_v28 }
 0x18a   : > { %5805 = vmatprep.mubr.msk.f32.mxu0 %vm1593_vm10, %v1434_v3 }
 0x18d   : > { %1917 = vmatmul.mubr.f32.gmra.mrb[46].mxu0 %v1433_v48 }
 0x18e   : > { %5806 = vmatprep.mubr.msk.f32.mxu0 %vm1593_vm10, %v1438_v24 }
 0x191   : > { %1923 = vmatmul.mubr.f32.gmra.mrb[48].mxu0 %v1437_v23  ;;  %v7373_v23 = vpack.c.bf16 %v2412_v39, %v2411_v36 }
 0x192   : > { %5807 = vmatprep.mubr.msk.f32.mxu0 %vm1593_vm10, %v1442_v43 }
 0x195   : > { %1929 = vmatmul.mubr.f32.gmra.mrb[50].mxu0 %v1441_v34 }
 0x196   : > { %5808 = vmatprep.mubr.msk.f32.mxu0 %vm1593_vm10, %v1446_v63 }
 0x199   : > { %1935 = vmatmul.mubr.f32.gmra.mrb[52].mxu0 %v1445_v44 }
 0x19a   : > { %5809 = vmatprep.mubr.msk.f32.mxu0 %vm1593_vm10, %v1450_v20 }
 0x19d   : > { %1941 = vmatmul.mubr.f32.gmra.mrb[54].mxu0 %v1449_v56 }
 0x19e   : > { %5810 = vmatprep.mubr.msk.f32.mxu0 %vm1593_vm10, %v1454_v27  ;;  %v2415_v27 = vld [vmem:[%s10593_s8 + $0x30] sm:$0xff] }
 0x19f   : > { %v7379_v18 = vpack.c.bf16 %v2416_v1, %v2415_v27 }
 0x1a1   : > { %1947 = vmatmul.mubr.f32.gmra.mrb[56].mxu0 %v1453_v6 }
 0x1a2   : > { %5811 = vmatprep.mubr.msk.f32.mxu0 %vm1593_vm10, %v1458_v37 }
 0x1a5   : > { %1953 = vmatmul.mubr.f32.gmra.mrb[58].mxu0 %v1457_v16 }
 0x1a6   : > { %5812 = vmatprep.mubr.msk.f32.mxu0 %vm1593_vm10, %v1462_v50 }
 0x1a9   : > { %1959 = vmatmul.mubr.f32.gmra.mrb[60].mxu0 %v1461_v60 }
 0x1aa   : > { %5813 = vmatprep.mubr.msk.f32.mxu0 %vm1593_vm10, %v1466_v41 }
 0x1ad   : > { %1965 = vmatmul.mubr.f32.gmra.mrb[62].mxu0 %v1465_v13 }
 0x1ae   : > { %6595 = vmatprep.mubr.msk.f32.mxu0 %vm7638_vm5, %v7637_v40 }
 0x244   : > { %v1876_v12 = vpop.f32.mrb[32].mxu0 }
 0x245   : > { %v7548_v30 = vadd.f32 %v1876_v12, %v8979_v2  ;;  %v1878_v26 = vpop.f32.mrb[33].mxu0 }
 0x246   : > { %v7549_v3 = vadd.f32 %v1878_v26, %v8983_v25 }
 0x247   : > { %v2003_v10 = vmul.f32 0.01, %v7548_v30  ;;  %vm1971_vm10 = vcmp.ge.f32.partialorder %v7548_v30, 0.0 }
 0x248   : > { %vm1972_vm6 = vcmp.ge.f32.partialorder %v7549_v3, 0.0  ;;  %v2004_v9 = vmul.f32 0.01, %v7549_v3  ;;  %v1882_v11 = vpop.f32.mrb[34].mxu0 }
 0x249   : > { %v7550_v32 = vadd.f32 %v1882_v11, %v8979_v2  ;;  %v1884_v49 = vpop.f32.mrb[35].mxu0  ;;  %v2035_v48 = vsel %vm1971_vm10, %v7548_v30, %v2003_v10 }
 0x24a   : > { %v7551_v24 = vadd.f32 %v1884_v49, %v8983_v25  ;;  %v2036_v38 = vsel %vm1972_vm6, %v7549_v3, %v2004_v9 }
 0x24b   : > { %v2005_v8 = vmul.f32 0.01, %v7550_v32  ;;  %5816 = vmatprep.mubr.msk.f32.mxu1 %vm2101_vm7, %v2036_v38  ;;  %vm1973_vm9 = vcmp.ge.f32.partialorder %v7550_v32, 0.0 }
 0x24c   : > { %vm1974_vm8 = vcmp.ge.f32.partialorder %v7551_v24, 0.0  ;;  %v2006_v43 = vmul.f32 0.01, %v7551_v24  ;;  %v1888_v42 = vpop.f32.mrb[36].mxu0  ;;  %2218 = vmatmul.mubr.f32.vlgmr.msra.gmra.mrb[32].mxu1 %v2035_v48 }
 0x24d   : > { %v7552_v46 = vadd.f32 %v1888_v42, %v8979_v2  ;;  %7371 = vmatpush3.bf16.msra.mxu1 %v7370_v35  ;;  %v1890_v47 = vpop.f32.mrb[37].mxu0  ;;  %v2037_v34 = vsel %vm1973_vm9, %v7550_v32, %v2005_v8 }
 0x24e   : > { %v7553_v61 = vadd.f32 %v1890_v47, %v8983_v25  ;;  %v2038_v63 = vsel %vm1974_vm8, %v7551_v24, %v2006_v43  ;;  %7372 = vmatprep.subr.bf16.mxu1 %v7636_v28 }
 0x24f   : > { %v2007_v54 = vmul.f32 0.01, %v7552_v46  ;;  %5817 = vmatprep.mubr.msk.f32.mxu1 %vm2101_vm7, %v2038_v63  ;;  %vm1975_vm12 = vcmp.ge.f32.partialorder %v7552_v46, 0.0 }
 0x250   : > { %vm1976_vm11 = vcmp.ge.f32.partialorder %v7553_v61, 0.0  ;;  %v2008_v57 = vmul.f32 0.01, %v7553_v61  ;;  %v1894_v20 = vpop.f32.mrb[38].mxu0  ;;  %2223 = vmatmul.mubr.f32.gmra.mrb[34].mxu1 %v2037_v34 }
 0x251   : > { %v7554_v59 = vadd.f32 %v1894_v20, %v8979_v2  ;;  %v1896_v22 = vpop.f32.mrb[39].mxu0  ;;  %7374 = vmatpush3.bf16.msra.mxu1 %v7373_v23  ;;  %v2039_v7 = vsel %vm1975_vm12, %v7552_v46, %v2007_v54 }
 0x252   : > { %v7555_v44 = vadd.f32 %v1896_v22, %v8983_v25  ;;  %v2040_v55 = vsel %vm1976_vm11, %v7553_v61, %v2008_v57  ;;  %7375 = vmatprep.subr.bf16.mxu1 %v7636_v28 }
 0x253   : > { %v2009_v52 = vmul.f32 0.01, %v7554_v59  ;;  %5818 = vmatprep.mubr.msk.f32.mxu1 %vm2101_vm7, %v2040_v55  ;;  %vm1977_vm15 = vcmp.ge.f32.partialorder %v7554_v59, 0.0 }
 0x254   : > { %vm1978_vm13 = vcmp.ge.f32.partialorder %v7555_v44, 0.0  ;;  %v2010_v56 = vmul.f32 0.01, %v7555_v44  ;;  %v1900_v45 = vpop.f32.mrb[40].mxu0  ;;  %2228 = vmatmul.mubr.f32.gmra.mrb[36].mxu1 %v2039_v7 }
 0x255   : > { %v7556_v37 = vadd.f32 %v1900_v45, %v8979_v2  ;;  %v1902_v14 = vpop.f32.mrb[41].mxu0  ;;  %7377 = vmatpush3.bf16.msra.mxu1 %v7376_v0  ;;  %v2041_v50 = vsel %vm1977_vm15, %v7554_v59, %v2009_v52 }
 0x256   : > { %v7557_v15 = vadd.f32 %v1902_v14, %v8983_v25  ;;  %v2042_v6 = vsel %vm1978_vm13, %v7555_v44, %v2010_v56  ;;  %7378 = vmatprep.subr.bf16.mxu1 %v7636_v28 }
 0x257   : > { %v2011_v19 = vmul.f32 0.01, %v7556_v37  ;;  %5819 = vmatprep.mubr.msk.f32.mxu1 %vm2101_vm7, %v2042_v6  ;;  %vm1979_vm2 = vcmp.ge.f32.partialorder %v7556_v37, 0.0 }
 0x258   : > { %vm1980_vm0 = vcmp.ge.f32.partialorder %v7557_v15, 0.0  ;;  %v2012_v62 = vmul.f32 0.01, %v7557_v15  ;;  %v1906_v5 = vpop.f32.mrb[42].mxu0  ;;  %2233 = vmatmul.mubr.f32.gmra.mrb[38].mxu1 %v2041_v50 }
 0x259   : > { %v7558_v16 = vadd.f32 %v1906_v5, %v8979_v2  ;;  %v1908_v21 = vpop.f32.mrb[43].mxu0  ;;  %7380 = vmatpush3.bf16.msra.mxu1 %v7379_v18  ;;  %v2043_v4 = vsel %vm1979_vm2, %v7556_v37, %v2011_v19 }
 0x25a   : > { %v7559_v41 = vadd.f32 %v1908_v21, %v8983_v25  ;;  %v2044_v60 = vsel %vm1980_vm0, %v7557_v15, %v2012_v62  ;;  %6374 = vmatprep.subr.mxu1 %v7637_v40 }
 0x25b   : > { %v2013_v13 = vmul.f32 0.01, %v7558_v16  ;;  %5820 = vmatprep.mubr.msk.f32.mxu1 %vm2101_vm7, %v2044_v60  ;;  %vm1981_vm6 = vcmp.ge.f32.partialorder %v7558_v16, 0.0 }
 0x25c   : > { %vm1982_vm10 = vcmp.ge.f32.partialorder %v7559_v41, 0.0  ;;  %v2014_v58 = vmul.f32 0.01, %v7559_v41  ;;  %v1912_v12 = vpop.f32.mrb[44].mxu0  ;;  %2238 = vmatmul.mubr.f32.gmra.mrb[40].mxu1 %v2043_v4 }
 0x25d   : > { %v7560_v30 = vadd.f32 %v1912_v12, %v8979_v2  ;;  %v1914_v26 = vpop.f32.mrb[45].mxu0  ;;  %6375 = vmatpush3.msk.msra.mxu1 %vm2615_vm4, %v2417_v17  ;;  %v2045_v10 = vsel %vm1981_vm6, %v7558_v16, %v2013_v13 }
 0x25e   : > { %v7561_v3 = vadd.f32 %v1914_v26, %v8983_v25  ;;  %v2046_v31 = vsel %vm1982_vm10, %v7559_v41, %v2014_v58  ;;  %7540 = vmatprep.subr.bf16.mxu1 %v7636_v28 }
 0x25f   : > { %v2015_v53 = vmul.f32 0.01, %v7560_v30  ;;  %5821 = vmatprep.mubr.msk.f32.mxu1 %vm2101_vm7, %v2046_v31  ;;  %vm1983_vm9 = vcmp.ge.f32.partialorder %v7560_v30, 0.0 }
 0x260   : > { %vm1984_vm8 = vcmp.ge.f32.partialorder %v7561_v3, 0.0  ;;  %v2016_v9 = vmul.f32 0.01, %v7561_v3  ;;  %v1918_v11 = vpop.f32.mrb[46].mxu0  ;;  %2243 = vmatmul.mubr.f32.gmra.mrb[42].mxu1 %v2045_v10 }
 0x261   : > { %v7562_v32 = vadd.f32 %v1918_v11, %v8979_v2  ;;  %v1920_v49 = vpop.f32.mrb[47].mxu0  ;;  %v2047_v36 = vsel %vm1983_vm9, %v7560_v30, %v2015_v53 }
 0x262   : > { %v7563_v35 = vadd.f32 %v1920_v49, %v8983_v25  ;;  %v2048_v24 = vsel %vm1984_vm8, %v7561_v3, %v2016_v9 }
 0x263   : > { %v2017_v38 = vmul.f32 0.01, %v7562_v32  ;;  %5822 = vmatprep.mubr.msk.f32.mxu1 %vm2101_vm7, %v2048_v24  ;;  %vm1985_vm12 = vcmp.ge.f32.partialorder %v7562_v32, 0.0 }
 0x264   : > { %vm1986_vm11 = vcmp.ge.f32.partialorder %v7563_v35, 0.0  ;;  %v2018_v39 = vmul.f32 0.01, %v7563_v35  ;;  %v1924_v48 = vpop.f32.mrb[48].mxu0  ;;  %2248 = vmatmul.mubr.f32.gmra.mrb[44].mxu1 %v2047_v36 }
 0x265   : > { %v7564_v8 = vadd.f32 %v1924_v48, %v8979_v2  ;;  %v1926_v43 = vpop.f32.mrb[49].mxu0  ;;  %v2049_v23 = vsel %vm1985_vm12, %v7562_v32, %v2017_v38 }
 0x266   : > { %v7565_v42 = vadd.f32 %v1926_v43, %v8983_v25  ;;  %v2050_v46 = vsel %vm1986_vm11, %v7563_v35, %v2018_v39 }
 0x267   : > { %v2019_v47 = vmul.f32 0.01, %v7564_v8  ;;  %5823 = vmatprep.mubr.msk.f32.mxu1 %vm2101_vm7, %v2050_v46  ;;  %vm1987_vm15 = vcmp.ge.f32.partialorder %v7564_v8, 0.0 }
 0x268   : > { %vm1988_vm13 = vcmp.ge.f32.partialorder %v7565_v42, 0.0  ;;  %v2020_v61 = vmul.f32 0.01, %v7565_v42  ;;  %v1930_v63 = vpop.f32.mrb[50].mxu0  ;;  %2253 = vmatmul.mubr.f32.gmra.mrb[46].mxu1 %v2049_v23  ;;  %v2347_v23 = vld [vmem:[%s9068_s5 + $0x8] sm:$0xff] }
 0x269   : > { %v7566_v51 = vadd.f32 %v1930_v63, %v8979_v2  ;;  %v1932_v33 = vpop.f32.mrb[51].mxu0  ;;  %v2051_v20 = vsel %vm1987_vm15, %v7564_v8, %v2019_v47  ;;  %v2349_v63 = vld [vmem:[%s9068_s5 + $0x18] sm:$0xff] }
 0x26a   : > { %v7567_v54 = vadd.f32 %v1932_v33, %v8983_v25  ;;  %v2052_v34 = vsel %vm1988_vm13, %v7565_v42, %v2020_v61  ;;  %v2348_v61 = vld [vmem:[%s9068_s5 + $0x10] sm:$0xff]  ;;  %v2351_v33 = vld [vmem:[%s9068_s5 + $0x28] sm:$0xff] }
 0x26b   : > { %v2021_v57 = vmul.f32 0.01, %v7566_v51  ;;  %5824 = vmatprep.mubr.msk.f32.mxu1 %vm2101_vm7, %v2052_v34  ;;  %vm1989_vm2 = vcmp.ge.f32.partialorder %v7566_v51, 0.0  ;;  %v2353_v34 = vld [vmem:[%s9068_s5 + $0x38] sm:$0xff] }
 0x26c   : > { %vm1990_vm0 = vcmp.ge.f32.partialorder %v7567_v54, 0.0  ;;  %v2022_v59 = vmul.f32 0.01, %v7567_v54  ;;  %v1936_v22 = vpop.f32.mrb[52].mxu0  ;;  %2258 = vmatmul.mubr.f32.gmra.mrb[48].mxu1 %v2051_v20  ;;  %v3189_v20 = vld [vmem:[%s10595_s10 + $0x8] sm:$0xff] }
 0x26d   : > { %v7568_v0 = vadd.f32 %v1936_v22, %v8979_v2  ;;  %v1938_v44 = vpop.f32.mrb[53].mxu0  ;;  %v2053_v52 = vsel %vm1989_vm2, %v7566_v51, %v2021_v57  ;;  %v2350_v51 = vld [vmem:[%s9068_s5 + $0x20] sm:$0xff] }
 0x26e   : > { %v7569_v55 = vadd.f32 %v1938_v44, %v8983_v25  ;;  %v2054_v27 = vsel %vm1990_vm0, %v7567_v54, %v2022_v59  ;;  %v2352_v54 = vld [vmem:[%s9068_s5 + $0x30] sm:$0xff]  ;;  %v3188_v57 = vld [vmem:[%s10595_s10] sm:$0xff]  ;;  %v3191_v44 = vld [vmem:[%s10595_s10 + $0x18] sm:$0xff] }
 0x26f   : > { %v2023_v1 = vmul.f32 0.01, %v7568_v0  ;;  %5825 = vmatprep.mubr.msk.f32.mxu1 %vm2101_vm7, %v2054_v27  ;;  %vm1991_vm10 = vcmp.ge.f32.partialorder %v7568_v0, 0.0  ;;  %v2354_v59 = vld [vmem:[%s9068_s5 + $0x40] sm:$0xff]  ;;  %v7382_v22 = vpack.c.bf16 %v3189_v20, %v3188_v57 }
 0x270   : > { %vm1992_vm4 = vcmp.ge.f32.partialorder %v7569_v55, 0.0  ;;  %v2024_v7 = vmul.f32 0.01, %v7569_v55  ;;  %v1942_v56 = vpop.f32.mrb[54].mxu0  ;;  %2263 = vmatmul.mubr.f32.gmra.mrb[50].mxu1 %v2053_v52  ;;  %v3192_v52 = vld [vmem:[%s10595_s10 + $0x20] sm:$0xff] }
 0x271   : > { %v7570_v45 = vadd.f32 %v1942_v56, %v8979_v2  ;;  %v1944_v37 = vpop.f32.mrb[55].mxu0  ;;  %v2055_v6 = vsel %vm1991_vm10, %v7568_v0, %v2023_v1  ;;  %vm2425_vm10 = vcmask 547840   ;;  %7383 = vmatpush3.bf16.msra.mxu0 %v7382_v22  ;;  %v3190_v0 = vld [vmem:[%s10595_s10 + $0x10] sm:$0xff]  ;;  %v2357_v56 = vld [vmem:[%s9068_s5 + $0x58] sm:$0xff] }
 0x272   : > { %v7571_v14 = vadd.f32 %v1944_v37, %v8983_v25  ;;  %v2056_v18 = vsel %vm1992_vm4, %v7569_v55, %v2024_v7  ;;  %7384 = vmatprep.subr.bf16.mxu0 %v7636_v28  ;;  %v2355_v55 = vld [vmem:[%s9068_s5 + $0x48] sm:$0xff]  ;;  %v7385_v27 = vpack.c.bf16 %v3191_v44, %v3190_v0  ;;  %v2356_v1 = vld [vmem:[%s9068_s5 + $0x50] sm:$0xff]  ;;  %v2358_v37 = vld [vmem:[%s9068_s5 + $0x60] sm:$0xff] }
 0x273   : > { %v2025_v15 = vmul.f32 0.01, %v7570_v45  ;;  %5826 = vmatprep.mubr.msk.f32.mxu1 %vm2101_vm7, %v2056_v18  ;;  %vm1993_vm8 = vcmp.ge.f32.partialorder %v7570_v45, 0.0  ;;  %v3193_v7 = vld [vmem:[%s10595_s10 + $0x28] sm:$0xff]  ;;  %v3195_v18 = vld [vmem:[%s10595_s10 + $0x38] sm:$0xff]  ;;  %v2386_v44 = vld [vmem:[%s9068_s5 + $0x140] sm:$0xff] }
 0x274   : > { %vm1994_vm6 = vcmp.ge.f32.partialorder %v7571_v14, 0.0  ;;  %v2026_v19 = vmul.f32 0.01, %v7571_v14  ;;  %v1948_v50 = vpop.f32.mrb[56].mxu0  ;;  %2268 = vmatmul.mubr.f32.gmra.mrb[52].mxu1 %v2055_v6 }
 0x275   : > { %v7572_v62 = vadd.f32 %v1948_v50, %v8979_v2  ;;  %v1950_v5 = vpop.f32.mrb[57].mxu0  ;;  %v2057_v60 = vsel %vm1993_vm8, %v7570_v45, %v2025_v15  ;;  %7386 = vmatpush3.bf16.msra.mxu0 %v7385_v27  ;;  %v7388_v45 = vpack.c.bf16 %v3193_v7, %v3192_v52  ;;  %v2359_v15 = vld [vmem:[%s9068_s5 + $0x68] sm:$0xff]  ;;  %v3196_v50 = vld [vmem:[%s10595_s10 + $0x40] sm:$0xff] }
 0x276   : > { %v7573_v16 = vadd.f32 %v1950_v5, %v8983_v25  ;;  %v2058_v21 = vsel %vm1994_vm6, %v7571_v14, %v2026_v19  ;;  %7387 = vmatprep.subr.bf16.mxu0 %v7636_v28  ;;  %v3194_v14 = vld [vmem:[%s10595_s10 + $0x30] sm:$0xff]  ;;  %v2361_v5 = vld [vmem:[%s9068_s5 + $0x78] sm:$0xff]  ;;  %vm3210_vm6 = vcmask 982016  }
 0x277   : > { %v2027_v41 = vmul.f32 0.01, %v7572_v62  ;;  %5827 = vmatprep.mubr.msk.f32.mxu1 %vm2101_vm7, %v2058_v21  ;;  %vm1995_vm11 = vcmp.ge.f32.partialorder %v7572_v62, 0.0  ;;  %v7391_v6 = vpack.c.bf16 %v3195_v18, %v3194_v14  ;;  %v2360_v19 = vld [vmem:[%s9068_s5 + $0x70] sm:$0xff]  ;;  %v2362_v21 = vld [vmem:[%s9068_s5 + $0x80] sm:$0xff]  ;;  %v2389_v14 = vld [vmem:[%s9068_s5 + $0x158] sm:$0xff] }
 0x278   : > { %vm1996_vm9 = vcmp.ge.f32.partialorder %v7573_v16, 0.0  ;;  %v2028_v17 = vmul.f32 0.01, %v7573_v16  ;;  %v1954_v13 = vpop.f32.mrb[58].mxu0  ;;  %2273 = vmatmul.mubr.f32.gmra.mrb[54].mxu1 %v2057_v60  ;;  %v3198_v60 = vld [vmem:[%s10595_s10 + $0x50] sm:$0xff] }
 0x279   : > { %v7574_v4 = vadd.f32 %v1954_v13, %v8979_v2  ;;  %v1956_v58 = vpop.f32.mrb[59].mxu0  ;;  %v2059_v3 = vsel %vm1995_vm11, %v7572_v62, %v2027_v41  ;;  %7389 = vmatpush3.bf16.msra.mxu0 %v7388_v45  ;;  %v3197_v62 = vld [vmem:[%s10595_s10 + $0x48] sm:$0xff] }
 0x27a   : > { %v7575_v12 = vadd.f32 %v1956_v58, %v8983_v25  ;;  %v2060_v30 = vsel %vm1996_vm9, %v7573_v16, %v2028_v17  ;;  %7390 = vmatprep.subr.bf16.mxu0 %v7636_v28  ;;  %v7394_v16 = vpack.c.bf16 %v3197_v62, %v3196_v50  ;;  %v2363_v41 = vld [vmem:[%s9068_s5 + $0x88] sm:$0xff]  ;;  %v3199_v17 = vld [vmem:[%s10595_s10 + $0x58] sm:$0xff]  ;;  %v3969_v58 = vld [vmem:[%s10597_s12] sm:$0xff] }
 0x27b   : > { %v2029_v26 = vmul.f32 0.01, %v7574_v4  ;;  %5828 = vmatprep.mubr.msk.f32.mxu1 %vm2101_vm7, %v2060_v30  ;;  %vm1997_vm13 = vcmp.ge.f32.partialorder %v7574_v4, 0.0  ;;  %v7397_v13 = vpack.c.bf16 %v3199_v17, %v3198_v60  ;;  %v2391_v62 = vld [vmem:[%s9068_s5 + $0x168] sm:$0xff]  ;;  %v2393_v17 = vld [vmem:[%s9068_s5 + $0x178] sm:$0xff] }
 0x27c   : > { %vm1998_vm12 = vcmp.ge.f32.partialorder %v7575_v12, 0.0  ;;  %v2030_v31 = vmul.f32 0.01, %v7575_v12  ;;  %v1960_v53 = vpop.f32.mrb[60].mxu0  ;;  %2278 = vmatmul.mubr.f32.gmra.mrb[56].mxu1 %v2059_v3  ;;  %v3200_v3 = vld [vmem:[%s10595_s10 + $0x60] sm:$0xff] }
 0x27d   : > { %v7576_v10 = vadd.f32 %v1960_v53, %v8979_v2  ;;  %v1962_v9 = vpop.f32.mrb[61].mxu0  ;;  %v2061_v35 = vsel %vm1997_vm13, %v7574_v4, %v2029_v26  ;;  %7392 = vmatpush3.bf16.msra.mxu0 %v7391_v6  ;;  %v2364_v4 = vld [vmem:[%s9068_s5 + $0x90] sm:$0xff]  ;;  %v2365_v26 = vld [vmem:[%s9068_s5 + $0x98] sm:$0xff]  ;;  %v2390_v6 = vld [vmem:[%s9068_s5 + $0x160] sm:$0xff] }
 0x27e   : > { %v7577_v11 = vadd.f32 %v1962_v9, %v8983_v25  ;;  %v2062_v32 = vsel %vm1998_vm12, %v7575_v12, %v2030_v31  ;;  %7393 = vmatprep.subr.bf16.mxu0 %v7636_v28  ;;  %v3970_v12 = vld [vmem:[%s10597_s12 + $0x8] sm:$0xff] }
 0x27f   : > { %v2031_v49 = vmul.f32 0.01, %v7576_v10  ;;  %5829 = vmatprep.mubr.msk.f32.mxu1 %vm2101_vm7, %v2062_v32  ;;  %vm1999_vm0 = vcmp.ge.f32.partialorder %v7576_v10, 0.0  ;;  %v9194_v30 = vpack.c.bf16 %v3970_v12, %v3969_v58  ;;  %v3201_v31 = vld [vmem:[%s10595_s10 + $0x68] sm:$0xff]  ;;  %v2368_v32 = vld [vmem:[%s9068_s5 + $0xb0] sm:$0xff]  ;;  %v2394_v58 = vld [vmem:[%s9068_s5 + $0x180] sm:$0xff] }
 0x280   : > { %vm2000_vm15 = vcmp.ge.f32.partialorder %v7577_v11, 0.0  ;;  %v2032_v24 = vmul.f32 0.01, %v7577_v11  ;;  %v1966_v38 = vpop.f32.mrb[62].mxu0  ;;  %2283 = vmatmul.mubr.f32.gmra.mrb[58].mxu1 %v2061_v35  ;;  %v7400_v53 = vpack.c.bf16 %v3201_v31, %v3200_v3  ;;  %v2367_v9 = vld [vmem:[%s9068_s5 + $0xa8] sm:$0xff]  ;;  %v2370_v35 = vld [vmem:[%s9068_s5 + $0xc0] sm:$0xff] }
 0x281   : > { %v7578_v36 = vadd.f32 %v1966_v38, %v8979_v2  ;;  %v1968_v39 = vpop.f32.mrb[63].mxu0  ;;  %v2063_v42 = vsel %vm1999_vm0, %v7576_v10, %v2031_v49  ;;  %7395 = vmatpush3.bf16.msra.mxu0 %v7394_v16  ;;  %v2366_v10 = vld [vmem:[%s9068_s5 + $0xa0] sm:$0xff]  ;;  %v2369_v49 = vld [vmem:[%s9068_s5 + $0xb8] sm:$0xff]  ;;  %v2372_v38 = vld [vmem:[%s9068_s5 + $0xd0] sm:$0xff] }
 0x282   : > { %v7579_v48 = vadd.f32 %v1968_v39, %v8983_v25  ;;  %v2064_v8 = vsel %vm2000_vm15, %v7577_v11, %v2032_v24  ;;  %v2346_v25 = vld [vmem:[%s9068_s5] sm:$0xff]  ;;  %7396 = vmatprep.subr.bf16.mxu0 %v7636_v28  ;;  %v3202_v11 = vld [vmem:[%s10595_s10 + $0x70] sm:$0xff]  ;;  %v2371_v24 = vld [vmem:[%s9068_s5 + $0xc8] sm:$0xff] }
 0x283   : > { %v2033_v43 = vmul.f32 0.01, %v7578_v36  ;;  %5830 = vmatprep.mubr.msk.f32.mxu1 %vm2101_vm7, %v2064_v8  ;;  %vm2001_vm4 = vcmp.ge.f32.partialorder %v7578_v36, 0.0  ;;  %v2374_v39 = vld [vmem:[%s9068_s5 + $0xe0] sm:$0xff]  ;;  %v2376_v8 = vld [vmem:[%s9068_s5 + $0xf0] sm:$0xff]  ;;  %v2395_v3 = vld [vmem:[%s9068_s5 + $0x188] sm:$0xff] }
 0x284   : > { %vm2002_vm2 = vcmp.ge.f32.partialorder %v7579_v48, 0.0  ;;  %v2034_v46 = vmul.f32 0.01, %v7579_v48  ;;  %2288 = vmatmul.mubr.f32.gmra.mrb[60].mxu1 %v2063_v42  ;;  %v2378_v42 = vld [vmem:[%s9068_s5 + $0x100] sm:$0xff] }
 0x285   : > { %v2065_v2 = vsel %vm2001_vm4, %v7578_v36, %v2033_v43  ;;  %7398 = vmatpush3.bf16.msra.mxu0 %v7397_v13  ;;  %v2373_v36 = vld [vmem:[%s9068_s5 + $0xd8] sm:$0xff] }
 0x286   : > { %v2066_v47 = vsel %vm2002_vm2, %v7579_v48, %v2034_v46  ;;  %7399 = vmatprep.subr.bf16.mxu0 %v7636_v28  ;;  %v2375_v48 = vld [vmem:[%s9068_s5 + $0xe8] sm:$0xff]  ;;  %v2377_v43 = vld [vmem:[%s9068_s5 + $0xf8] sm:$0xff] }
 0x287   : > { %5831 = vmatprep.mubr.msk.f32.mxu1 %vm2101_vm7, %v2066_v47  ;;  %v2379_v46 = vld [vmem:[%s9068_s5 + $0x108] sm:$0xff]  ;;  %v2380_v47 = vld [vmem:[%s9068_s5 + $0x110] sm:$0xff] }
 0x288   : > { %2293 = vmatmul.mubr.f32.gmra.mrb[62].mxu1 %v2065_v2  ;;  %v3971_v2 = vld [vmem:[%s10597_s12 + $0x10] sm:$0xff] }
 0x289   : > { %6376 = vmatprep.mubr.msk.f32.mxu1 %vm7638_vm5, %v7637_v40  ;;  %7401 = vmatpush3.bf16.msra.mxu0 %v7400_v53 }
 0x28a   : > { %6593 = vmatprep.subr.mxu0 %v7637_v40 }
 0x28c   : > { %6377 = vmatmul.mubr.msk.f32.vlgmr.msra.gmra.mrb[64].mxu1 %vm2425_vm10, %v2346_v25  ;;  %v3972_v25 = vld [vmem:[%s10597_s12 + $0x18] sm:$0xff] }
 0x28d   : > { %6379 = vmatprep.mubr.msk.f32.mxu1 %vm7638_vm5, %v7637_v40  ;;  %7544 = vmatpush3.bf16.msra.mxu1 %v9194_v30 }
 0x28e   : > { %7541 = vmatprep.subr.bf16.mxu1 %v7636_v28  ;;  %6594 = vmatpush3.msra.mxu0 %v3202_v11  ;;  %v3974_v11 = vld [vmem:[%s10597_s12 + $0x28] sm:$0xff] }
 0x28f   : > { %7402 = vmatprep.subr.bf16.mxu0 %v7636_v28 }
 0x290   : > { %6380 = vmatmul.mubr.msk.f32.gmra.mrb[66].mxu1 %vm2425_vm10, %v2347_v23  ;;  %v9279_v23 = vpack.c.bf16 %v3972_v25, %v3971_v2  ;;  %v2400_v25 = vld [vmem:[%s9068_s5 + $0x1b0] sm:$0xff] }
 0x291   : > { %6382 = vmatprep.mubr.msk.f32.mxu1 %vm7638_vm5, %v7637_v40 }
 0x292   : > { %7545 = vmatpush3.bf16.msra.mxu1 %v9279_v23 }
 0x293   : > { %7542 = vmatprep.subr.bf16.mxu1 %v7636_v28 }
 0x294   : > { %6383 = vmatmul.mubr.msk.f32.gmra.mrb[68].mxu1 %vm2425_vm10, %v2348_v61  ;;  %v2381_v61 = vld [vmem:[%s9068_s5 + $0x118] sm:$0xff] }
 0x295   : > { %6385 = vmatprep.mubr.msk.f32.mxu1 %vm7638_vm5, %v7637_v40 }
 0x298   : > { %6386 = vmatmul.mubr.msk.f32.gmra.mrb[70].mxu1 %vm2425_vm10, %v2349_v63  ;;  %v2382_v63 = vld [vmem:[%s9068_s5 + $0x120] sm:$0xff] }
 0x299   : > { %6388 = vmatprep.mubr.msk.f32.mxu1 %vm7638_vm5, %v7637_v40 }
 0x29c   : > { %6389 = vmatmul.mubr.msk.f32.gmra.mrb[72].mxu1 %vm2425_vm10, %v2350_v51  ;;  %v2383_v51 = vld [vmem:[%s9068_s5 + $0x128] sm:$0xff] }
 0x29d   : > { %6391 = vmatprep.mubr.msk.f32.mxu1 %vm7638_vm5, %v7637_v40 }
 0x2a0   : > { %6392 = vmatmul.mubr.msk.f32.gmra.mrb[74].mxu1 %vm2425_vm10, %v2351_v33 }
 0x2a1   : > { %6394 = vmatprep.mubr.msk.f32.mxu1 %vm7638_vm5, %v7637_v40 }
 0x2a4   : > { %6395 = vmatmul.mubr.msk.f32.gmra.mrb[76].mxu1 %vm2425_vm10, %v2352_v54 }
 0x2a5   : > { %6397 = vmatprep.mubr.msk.f32.mxu1 %vm7638_vm5, %v7637_v40 }
 0x2a8   : > { %6398 = vmatmul.mubr.msk.f32.gmra.mrb[78].mxu1 %vm2425_vm10, %v2353_v34  ;;  %v2384_v34 = vld [vmem:[%s9068_s5 + $0x130] sm:$0xff] }
 0x2a9   : > { %6400 = vmatprep.mubr.msk.f32.mxu1 %vm7638_vm5, %v7637_v40 }
 0x2ac   : > { %6401 = vmatmul.mubr.msk.f32.gmra.mrb[80].mxu1 %vm2425_vm10, %v2354_v59  ;;  %v2385_v59 = vld [vmem:[%s9068_s5 + $0x138] sm:$0xff] }
 0x2ad   : > { %6403 = vmatprep.mubr.msk.f32.mxu1 %vm7638_vm5, %v7637_v40 }
 0x2b0   : > { %6404 = vmatmul.mubr.msk.f32.gmra.mrb[82].mxu1 %vm2425_vm10, %v2355_v55 }
 0x2b1   : > { %6406 = vmatprep.mubr.msk.f32.mxu1 %vm7638_vm5, %v7637_v40 }
 0x2b4   : > { %6407 = vmatmul.mubr.msk.f32.gmra.mrb[84].mxu1 %vm2425_vm10, %v2356_v1  ;;  %v2387_v1 = vld [vmem:[%s9068_s5 + $0x148] sm:$0xff] }
 0x2b5   : > { %6409 = vmatprep.mubr.msk.f32.mxu1 %vm7638_vm5, %v7637_v40 }
 0x2b8   : > { %6410 = vmatmul.mubr.msk.f32.gmra.mrb[86].mxu1 %vm2425_vm10, %v2357_v56  ;;  %v2388_v56 = vld [vmem:[%s9068_s5 + $0x150] sm:$0xff] }
 0x2b9   : > { %6412 = vmatprep.mubr.msk.f32.mxu1 %vm7638_vm5, %v7637_v40 }
 0x2bc   : > { %6413 = vmatmul.mubr.msk.f32.gmra.mrb[88].mxu1 %vm2425_vm10, %v2358_v37 }
 0x2bd   : > { %6415 = vmatprep.mubr.msk.f32.mxu1 %vm7638_vm5, %v7637_v40 }
 0x2c0   : > { %6416 = vmatmul.mubr.msk.f32.gmra.mrb[90].mxu1 %vm2425_vm10, %v2359_v15 }
 0x2c1   : > { %6418 = vmatprep.mubr.msk.f32.mxu1 %vm7638_vm5, %v7637_v40 }
 0x2c4   : > { %6419 = vmatmul.mubr.msk.f32.gmra.mrb[92].mxu1 %vm2425_vm10, %v2360_v19 }
 0x2c5   : > { %6421 = vmatprep.mubr.msk.f32.mxu1 %vm7638_vm5, %v7637_v40 }
 0x2c8   : > { %6422 = vmatmul.mubr.msk.f32.gmra.mrb[94].mxu1 %vm2425_vm10, %v2361_v5 }
 0x2c9   : > { %6424 = vmatprep.mubr.msk.f32.mxu1 %vm7638_vm5, %v7637_v40 }
 0x2cc   : > { %6425 = vmatmul.mubr.msk.f32.gmra.mrb[96].mxu1 %vm2425_vm10, %v2362_v21  ;;  %v2392_v21 = vld [vmem:[%s9068_s5 + $0x170] sm:$0xff] }
 0x2cd   : > { %6427 = vmatprep.mubr.msk.f32.mxu1 %vm7638_vm5, %v7637_v40 }
 0x2d0   : > { %6428 = vmatmul.mubr.msk.f32.gmra.mrb[98].mxu1 %vm2425_vm10, %v2363_v41 }
 0x2d1   : > { %6430 = vmatprep.mubr.msk.f32.mxu1 %vm7638_vm5, %v7637_v40 }
 0x2d4   : > { %6431 = vmatmul.mubr.msk.f32.gmra.mrb[100].mxu1 %vm2425_vm10, %v2364_v4 }
 0x2d5   : > { %6433 = vmatprep.mubr.msk.f32.mxu1 %vm7638_vm5, %v7637_v40 }
 0x2d8   : > { %6434 = vmatmul.mubr.msk.f32.gmra.mrb[102].mxu1 %vm2425_vm10, %v2365_v26 }
 0x2d9   : > { %6436 = vmatprep.mubr.msk.f32.mxu1 %vm7638_vm5, %v7637_v40 }
 0x2dc   : > { %6437 = vmatmul.mubr.msk.f32.gmra.mrb[104].mxu1 %vm2425_vm10, %v2366_v10  ;;  %v2396_v10 = vld [vmem:[%s9068_s5 + $0x190] sm:$0xff] }
 0x2dd   : > { %6439 = vmatprep.mubr.msk.f32.mxu1 %vm7638_vm5, %v7637_v40 }
 0x2e0   : > { %6440 = vmatmul.mubr.msk.f32.gmra.mrb[106].mxu1 %vm2425_vm10, %v2367_v9  ;;  %v3973_v9 = vld [vmem:[%s10597_s12 + $0x20] sm:$0xff] }
 0x2e1   : > { %6442 = vmatprep.mubr.msk.f32.mxu1 %vm7638_vm5, %v7637_v40 }
 0x2e4   : > { %6443 = vmatmul.mubr.msk.f32.gmra.mrb[108].mxu1 %vm2425_vm10, %v2368_v32 }
 0x2e5   : > { %6445 = vmatprep.mubr.msk.f32.mxu1 %vm7638_vm5, %v7637_v40 }
 0x2e8   : > { %6446 = vmatmul.mubr.msk.f32.gmra.mrb[110].mxu1 %vm2425_vm10, %v2369_v49  ;;  %v9381_v49 = vpack.c.bf16 %v3974_v11, %v3973_v9 }
 0x2e9   : > { %6448 = vmatprep.mubr.msk.f32.mxu1 %vm7638_vm5, %v7637_v40 }
 0x2ea   : > { %7546 = vmatpush3.bf16.msra.mxu1 %v9381_v49 }
 0x2eb   : > { %7543 = vmatprep.subr.bf16.mxu1 %v7636_v28 }
 0x2ec   : > { %6449 = vmatmul.mubr.msk.f32.gmra.mrb[112].mxu1 %vm2425_vm10, %v2370_v35 }
 0x2ed   : > { %6451 = vmatprep.mubr.msk.f32.mxu1 %vm7638_vm5, %v7637_v40 }
 0x2f0   : > { %6452 = vmatmul.mubr.msk.f32.gmra.mrb[114].mxu1 %vm2425_vm10, %v2371_v24  ;;  %v2397_v24 = vld [vmem:[%s9068_s5 + $0x198] sm:$0xff] }
 0x2f1   : > { %6454 = vmatprep.mubr.msk.f32.mxu1 %vm7638_vm5, %v7637_v40 }
 0x2f4   : > { %6455 = vmatmul.mubr.msk.f32.gmra.mrb[116].mxu1 %vm2425_vm10, %v2372_v38 }
 0x2f5   : > { %6457 = vmatprep.mubr.msk.f32.mxu1 %vm7638_vm5, %v7637_v40 }
 0x2f8   : > { %6458 = vmatmul.mubr.msk.f32.gmra.mrb[118].mxu1 %vm2425_vm10, %v2373_v36 }
 0x2f9   : > { %6460 = vmatprep.mubr.msk.f32.mxu1 %vm7638_vm5, %v7637_v40 }
 0x2fc   : > { %6461 = vmatmul.mubr.msk.f32.gmra.mrb[120].mxu1 %vm2425_vm10, %v2374_v39  ;;  %v2398_v39 = vld [vmem:[%s9068_s5 + $0x1a0] sm:$0xff] }
 0x2fd   : > { %6463 = vmatprep.mubr.msk.f32.mxu1 %vm7638_vm5, %v7637_v40 }
 0x300   : > { %6464 = vmatmul.mubr.msk.f32.gmra.mrb[122].mxu1 %vm2425_vm10, %v2375_v48 }
 0x301   : > { %6466 = vmatprep.mubr.msk.f32.mxu1 %vm7638_vm5, %v7637_v40 }
 0x304   : > { %6467 = vmatmul.mubr.msk.f32.gmra.mrb[124].mxu1 %vm2425_vm10, %v2376_v8 }
 0x305   : > { %6469 = vmatprep.mubr.msk.f32.mxu1 %vm7638_vm5, %v7637_v40 }
 0x308   : > { %6470 = vmatmul.mubr.msk.f32.gmra.mrb[126].mxu1 %vm2425_vm10, %v2377_v43  ;;  %v9401_v43 = vld [vmem:[%s10594_s9] ss:$0 sm:$0xff] }
 0x309   : > { %6472 = vmatprep.mubr.msk.f32.mxu1 %vm7638_vm5, %v7637_v40 }
 0x30c   : > { %6473 = vmatmul.mubr.msk.f32.gmra.mrb[128].mxu1 %vm2425_vm10, %v2378_v42  ;;  %v2399_v42 = vld [vmem:[%s9068_s5 + $0x1a8] sm:$0xff] }
 0x30d   : > { %6475 = vmatprep.mubr.msk.f32.mxu1 %vm7638_vm5, %v7637_v40 }
 0x310   : > { %6476 = vmatmul.mubr.msk.f32.gmra.mrb[130].mxu1 %vm2425_vm10, %v2379_v46 }
 0x311   : > { %6478 = vmatprep.mubr.msk.f32.mxu1 %vm7638_vm5, %v7637_v40 }
 0x314   : > { %6479 = vmatmul.mubr.msk.f32.gmra.mrb[132].mxu1 %vm2425_vm10, %v2380_v47 }
 0x315   : > { %6481 = vmatprep.mubr.msk.f32.mxu1 %vm7638_vm5, %v7637_v40 }
 0x318   : > { %6482 = vmatmul.mubr.msk.f32.gmra.mrb[134].mxu1 %vm2425_vm10, %v2381_v61 }
 0x319   : > { %6484 = vmatprep.mubr.msk.f32.mxu1 %vm7638_vm5, %v7637_v40 }
 0x31c   : > { %6485 = vmatmul.mubr.msk.f32.gmra.mrb[136].mxu1 %vm2425_vm10, %v2382_v63 }
 0x31d   : > { %6487 = vmatprep.mubr.msk.f32.mxu1 %vm7638_vm5, %v7637_v40 }
 0x31f   : > { %v9295_v33 = vpop.f32.mrb[32].mxu1 }
 0x320   : > { %v2221_v54 = vpop.f32.mrb[33].mxu1  ;;  %6488 = vmatmul.mubr.msk.f32.gmra.mrb[138].mxu1 %vm2425_vm10, %v2383_v51 }
 0x321   : > { %6490 = vmatprep.mubr.msk.f32.mxu1 %vm7638_vm5, %v7637_v40 }
 0x323   : > { %v9301_v57 = vpop.f32.mrb[34].mxu1 }
 0x324   : > { %v2226_v20 = vpop.f32.mrb[35].mxu1  ;;  %6491 = vmatmul.mubr.msk.f32.gmra.mrb[140].mxu1 %vm2425_vm10, %v2384_v34 }
 0x325   : > { %6493 = vmatprep.mubr.msk.f32.mxu1 %vm7638_vm5, %v7637_v40  ;;  %v2401_v20 = vld [vmem:[%s9068_s5 + $0x1b8] sm:$0xff] }
 0x327   : > { %v9307_v22 = vpop.f32.mrb[36].mxu1 }
 0x328   : > { %v2231_v0 = vpop.f32.mrb[37].mxu1  ;;  %6494 = vmatmul.mubr.msk.f32.gmra.mrb[142].mxu1 %vm2425_vm10, %v2385_v59 }
 0x329   : > { %6496 = vmatprep.mubr.msk.f32.mxu1 %vm7638_vm5, %v7637_v40 }
 0x32b   : > { %v9313_v55 = vpop.f32.mrb[38].mxu1 }
 0x32c   : > { %v2236_v27 = vpop.f32.mrb[39].mxu1  ;;  %6497 = vmatmul.mubr.msk.f32.gmra.mrb[144].mxu1 %vm2425_vm10, %v2386_v44 }
 0x32d   : > { %6499 = vmatprep.mubr.msk.f32.mxu1 %vm7638_vm5, %v7637_v40 }
 0x32f   : > { %v9319_v52 = vpop.f32.mrb[40].mxu1 }
 0x330   : > { %v2241_v7 = vpop.f32.mrb[41].mxu1  ;;  %6500 = vmatmul.mubr.msk.f32.gmra.mrb[146].mxu1 %vm2425_vm10, %v2387_v1 }
 0x331   : > { %6502 = vmatprep.mubr.msk.f32.mxu1 %vm7638_vm5, %v7637_v40  ;;  %v2402_v7 = vld [vmem:[%s9068_s5 + $0x1c0] sm:$0xff] }
 0x333   : > { %v9325_v45 = vpop.f32.mrb[42].mxu1 }
 0x334   : > { %v2246_v37 = vpop.f32.mrb[43].mxu1  ;;  %6503 = vmatmul.mubr.msk.f32.gmra.mrb[148].mxu1 %vm2425_vm10, %v2388_v56 }
 0x335   : > { %6505 = vmatprep.mubr.msk.f32.mxu1 %vm7638_vm5, %v7637_v40 }
 0x337   : > { %v9331_v18 = vpop.f32.mrb[44].mxu1 }
 0x338   : > { %v2251_v15 = vpop.f32.mrb[45].mxu1  ;;  %6506 = vmatmul.mubr.msk.f32.gmra.mrb[150].mxu1 %vm2425_vm10, %v2389_v14 }
 0x339   : > { %6508 = vmatprep.mubr.msk.f32.mxu1 %vm7638_vm5, %v7637_v40 }
 0x33b   : > { %v9337_v19 = vpop.f32.mrb[46].mxu1 }
 0x33c   : > { %v2256_v50 = vpop.f32.mrb[47].mxu1  ;;  %6509 = vmatmul.mubr.msk.f32.gmra.mrb[152].mxu1 %vm2425_vm10, %v2390_v6  ;;  %v2403_v6 = vld [vmem:[%s9068_s5 + $0x1c8] sm:$0xff] }
 0x33d   : > { %6511 = vmatprep.mubr.msk.f32.mxu1 %vm7638_vm5, %v7637_v40 }
 0x33f   : > { %v9343_v5 = vpop.f32.mrb[48].mxu1 }
 0x340   : > { %v2261_v16 = vpop.f32.mrb[49].mxu1  ;;  %6512 = vmatmul.mubr.msk.f32.gmra.mrb[154].mxu1 %vm2425_vm10, %v2391_v62 }
 0x341   : > { %6514 = vmatprep.mubr.msk.f32.mxu1 %vm7638_vm5, %v7637_v40 }
 0x343   : > { %v9349_v41 = vpop.f32.mrb[50].mxu1 }
 0x344   : > { %v2266_v60 = vpop.f32.mrb[51].mxu1  ;;  %6515 = vmatmul.mubr.msk.f32.gmra.mrb[156].mxu1 %vm2425_vm10, %v2392_v21 }
 0x345   : > { %6517 = vmatprep.mubr.msk.f32.mxu1 %vm7638_vm5, %v7637_v40  ;;  %v2404_v60 = vld [vmem:[%s9068_s5 + $0x1d0] sm:$0xff] }
 0x347   : > { %v9355_v13 = vpop.f32.mrb[52].mxu1 }
 0x348   : > { %v2271_v4 = vpop.f32.mrb[53].mxu1  ;;  %6518 = vmatmul.mubr.msk.f32.gmra.mrb[158].mxu1 %vm2425_vm10, %v2393_v17 }
 0x349   : > { %6520 = vmatprep.mubr.msk.f32.mxu1 %vm7638_vm5, %v7637_v40 }
 0x34b   : > { %v9361_v12 = vpop.f32.mrb[54].mxu1 }
 0x34c   : > { %v2276_v26 = vpop.f32.mrb[55].mxu1  ;;  %6521 = vmatmul.mubr.msk.f32.gmra.mrb[160].mxu1 %vm2425_vm10, %v2394_v58 }
 0x34d   : > { %6523 = vmatprep.mubr.msk.f32.mxu1 %vm7638_vm5, %v7637_v40 }
 0x34f   : > { %v9367_v31 = vpop.f32.mrb[56].mxu1 }
 0x350   : > { %v2281_v53 = vpop.f32.mrb[57].mxu1  ;;  %6524 = vmatmul.mubr.msk.f32.gmra.mrb[162].mxu1 %vm2425_vm10, %v2395_v3 }
 0x351   : > { %6526 = vmatprep.mubr.msk.f32.mxu1 %vm7638_vm5, %v7637_v40  ;;  %v2405_v53 = vld [vmem:[%s9068_s5 + $0x1d8] sm:$0xff] }
 0x353   : > { %v9379_v32 = vpop.f32.mrb[58].mxu1 }
 0x354   : > { %v2286_v35 = vpop.f32.mrb[59].mxu1  ;;  %6527 = vmatmul.mubr.msk.f32.gmra.mrb[164].mxu1 %vm2425_vm10, %v2396_v10 }
 0x355   : > { %6529 = vmatprep.mubr.msk.f32.mxu1 %vm7638_vm5, %v7637_v40 }
 0x357   : > { %v9389_v38 = vpop.f32.mrb[60].mxu1 }
 0x358   : > { %v2291_v36 = vpop.f32.mrb[61].mxu1  ;;  %6530 = vmatmul.mubr.msk.f32.gmra.mrb[166].mxu1 %vm2425_vm10, %v2397_v24  ;;  %v2406_v24 = vld [vmem:[%s9068_s5 + $0x1e0] sm:$0xff] }
 0x359   : > { %6532 = vmatprep.mubr.msk.f32.mxu1 %vm7638_vm5, %v7637_v40 }
 0x35b   : > { %v9395_v48 = vpop.f32.mrb[62].mxu1 }
 0x35c   : > { %v2296_v8 = vpop.f32.mrb[63].mxu1  ;;  %6533 = vmatmul.mubr.msk.f32.gmra.mrb[168].mxu1 %vm2425_vm10, %v2398_v39 }
 0x35d   : > { %6535 = vmatprep.mubr.msk.f32.mxu1 %vm7638_vm5, %v7637_v40 }
 0x35f   : > { %v2685_v46 = vpop.f32.mrb[64].mxu1 }
 0x360   : > { %v2686_v47 = vadd.f32 %v9401_v43, %v2685_v46  ;;  %v6378_v2 = vpop.f32.mrb[65].mxu1  ;;  %6536 = vmatmul.mubr.msk.f32.gmra.mrb[170].mxu1 %vm2425_vm10, %v2399_v42 }
 0x361   : > { %6538 = vmatprep.mubr.msk.f32.mxu1 %vm7638_vm5, %v7637_v40 }
 0x362   : > { %vm2999_vm7 = vcmp.ge.f32.partialorder %v2686_v47, 0.0  ;;  %v3062_v61 = vmul.f32 0.01, %v2686_v47 }
 0x363   : > { %v2690_v63 = vpop.f32.mrb[66].mxu1 }
 0x364   : > { %v3125_v51 = vsel %vm2999_vm7, %v2686_v47, %v3062_v61  ;;  %v2691_v54 = vadd.f32 %v9401_v43, %v2690_v63  ;;  %v6381_v34 = vpop.f32.mrb[67].mxu1  ;;  %6539 = vmatmul.mubr.msk.f32.gmra.mrb[172].mxu1 %vm2425_vm10, %v2400_v25  ;;  %v2407_v47 = vld [vmem:[%s9068_s5 + $0x1e8] sm:$0xff] }
 0x365   : > { %6596 = vmatmul.mubr.msk.f32.vlgmr.msra.gmra.mrb[64].mxu0 %vm3210_vm6, %v3125_v51  ;;  %6541 = vmatprep.mubr.msk.f32.mxu1 %vm7638_vm5, %v7637_v40 }
 0x366   : > { %vm3000_vm8 = vcmp.ge.f32.partialorder %v2691_v54, 0.0  ;;  %v3063_v59 = vmul.f32 0.01, %v2691_v54  ;;  %6598 = vmatprep.mubr.msk.f32.mxu0 %vm7638_vm5, %v7637_v40  ;;  %7404 = vmatpush3.bf16.msra.mxu0 %v9194_v30 }
 0x367   : > { %v2695_v0 = vpop.f32.mrb[68].mxu1  ;;  %7405 = vmatprep.subr.bf16.mxu0 %v7636_v28 }
 0x368   : > { %v2696_v44 = vadd.f32 %v9401_v43, %v2695_v0  ;;  %v6384_v27 = vpop.f32.mrb[69].mxu1  ;;  %6542 = vmatmul.mubr.msk.f32.gmra.mrb[174].mxu1 %vm2425_vm10, %v2401_v20  ;;  %v3126_v1 = vsel %vm3000_vm8, %v2691_v54, %v3063_v59  ;;  %v2408_v54 = vld [vmem:[%s9068_s5 + $0x1f0] sm:$0xff] }
 0x369   : > { %6599 = vmatmul.mubr.msk.f32.gmra.mrb[66].mxu0 %vm3210_vm6, %v3126_v1  ;;  %6544 = vmatprep.mubr.msk.f32.mxu1 %vm7638_vm5, %v7637_v40 }
 0x36a   : > { %vm3001_vm9 = vcmp.ge.f32.partialorder %v2696_v44, 0.0  ;;  %v3064_v56 = vmul.f32 0.01, %v2696_v44  ;;  %6601 = vmatprep.mubr.msk.f32.mxu0 %vm7638_vm5, %v7637_v40  ;;  %7407 = vmatpush3.bf16.msra.mxu0 %v9279_v23 }
 0x36b   : > { %v2700_v30 = vpop.f32.mrb[70].mxu1  ;;  %7408 = vmatprep.subr.bf16.mxu0 %v7636_v28 }
 0x36c   : > { %v2701_v37 = vadd.f32 %v9401_v43, %v2700_v30  ;;  %v6387_v14 = vpop.f32.mrb[71].mxu1  ;;  %6545 = vmatmul.mubr.msk.f32.gmra.mrb[176].mxu1 %vm2425_vm10, %v2402_v7  ;;  %v3127_v15 = vsel %vm3001_vm9, %v2696_v44, %v3064_v56 }
 0x36d   : > { %6602 = vmatmul.mubr.msk.f32.gmra.mrb[68].mxu0 %vm3210_vm6, %v3127_v15  ;;  %6547 = vmatprep.mubr.msk.f32.mxu1 %vm7638_vm5, %v7637_v40 }
 0x36e   : > { %vm3002_vm11 = vcmp.ge.f32.partialorder %v2701_v37, 0.0  ;;  %v3065_v50 = vmul.f32 0.01, %v2701_v37  ;;  %6604 = vmatprep.mubr.msk.f32.mxu0 %vm7638_vm5, %v7637_v40  ;;  %7410 = vmatpush3.bf16.msra.mxu0 %v9381_v49 }
 0x36f   : > { %v2705_v23 = vpop.f32.mrb[72].mxu1  ;;  %7411 = vmatprep.subr.bf16.mxu0 %v7636_v28 }
 0x370   : > { %v2706_v62 = vadd.f32 %v9401_v43, %v2705_v23  ;;  %v6390_v16 = vpop.f32.mrb[73].mxu1  ;;  %6548 = vmatmul.mubr.msk.f32.gmra.mrb[178].mxu1 %vm2425_vm10, %v2403_v6  ;;  %v3128_v21 = vsel %vm3002_vm11, %v2701_v37, %v3065_v50 }
 0x371   : > { %6605 = vmatmul.mubr.msk.f32.gmra.mrb[70].mxu0 %vm3210_vm6, %v3128_v21  ;;  %6550 = vmatprep.mubr.msk.f32.mxu1 %vm7638_vm5, %v7637_v40 }
 0x372   : > { %vm3003_vm12 = vcmp.ge.f32.partialorder %v2706_v62, 0.0  ;;  %v3066_v17 = vmul.f32 0.01, %v2706_v62  ;;  %6607 = vmatprep.mubr.msk.f32.mxu0 %vm7638_vm5, %v7637_v40 }
 0x373   : > { %v2710_v4 = vpop.f32.mrb[74].mxu1 }
 0x374   : > { %v2711_v58 = vadd.f32 %v9401_v43, %v2710_v4  ;;  %v6393_v26 = vpop.f32.mrb[75].mxu1  ;;  %6551 = vmatmul.mubr.msk.f32.gmra.mrb[180].mxu1 %vm2425_vm10, %v2404_v60  ;;  %v3129_v3 = vsel %vm3003_vm12, %v2706_v62, %v3066_v17  ;;  %v3975_v4 = vld [vmem:[%s10597_s12 + $0x30] sm:$0xff] }
 0x375   : > { %6608 = vmatmul.mubr.msk.f32.gmra.mrb[72].mxu0 %vm3210_vm6, %v3129_v3  ;;  %6553 = vmatprep.mubr.msk.f32.mxu1 %vm7638_vm5, %v7637_v40 }
 0x376   : > { %vm3004_vm13 = vcmp.ge.f32.partialorder %v2711_v58, 0.0  ;;  %v3067_v10 = vmul.f32 0.01, %v2711_v58  ;;  %6610 = vmatprep.mubr.msk.f32.mxu0 %vm7638_vm5, %v7637_v40 }
 0x377   : > { %v2715_v9 = vpop.f32.mrb[76].mxu1 }
 0x378   : > { %v2716_v11 = vadd.f32 %v9401_v43, %v2715_v9  ;;  %v6396_v49 = vpop.f32.mrb[77].mxu1  ;;  %6554 = vmatmul.mubr.msk.f32.gmra.mrb[182].mxu1 %vm2425_vm10, %v2405_v53  ;;  %v3130_v35 = vsel %vm3004_vm13, %v2711_v58, %v3067_v10  ;;  %v3976_v58 = vld [vmem:[%s10597_s12 + $0x38] sm:$0xf] }
 0x379   : > { %6611 = vmatmul.mubr.msk.f32.gmra.mrb[74].mxu0 %vm3210_vm6, %v3130_v35  ;;  %6556 = vmatprep.mubr.msk.f32.mxu1 %vm7638_vm5, %v7637_v40  ;;  %v7412_v3 = vpack.c.bf16 %v3976_v58, %v3975_v4 }
 0x37a   : > { %vm3005_vm15 = vcmp.ge.f32.partialorder %v2716_v11, 0.0  ;;  %v3068_v36 = vmul.f32 0.01, %v2716_v11  ;;  %6613 = vmatprep.mubr.msk.f32.mxu0 %vm7638_vm5, %v7637_v40 }
 0x37b   : > { %v2720_v39 = vpop.f32.mrb[78].mxu1  ;;  %7547 = vmatpush3.bf16.msk.msra.mxu1 %vm8092_vm3, %v7412_v3  ;;  %7414 = vmatpush3.bf16.msk.msra.mxu0 %vm8092_vm3, %v7412_v3 }
 0x37c   : > { %v2721_v8 = vadd.f32 %v9401_v43, %v2720_v39  ;;  %v6399_v42 = vpop.f32.mrb[79].mxu1  ;;  %6557 = vmatmul.mubr.msk.f32.gmra.mrb[184].mxu1 %vm2425_vm10, %v2406_v24  ;;  %v3131_v46 = vsel %vm3005_vm15, %v2716_v11, %v3068_v36 }
 0x37d   : > { %6614 = vmatmul.mubr.msk.f32.gmra.mrb[76].mxu0 %vm3210_vm6, %v3131_v46  ;;  %6559 = vmatprep.mubr.msk.f32.mxu1 %vm7638_vm5, %v7637_v40 }
 0x37e   : > { %vm3006_vm0 = vcmp.ge.f32.partialorder %v2721_v8, 0.0  ;;  %v3069_v2 = vmul.f32 0.01, %v2721_v8  ;;  %6616 = vmatprep.mubr.msk.f32.mxu0 %vm7638_vm5, %v7637_v40 }
 0x37f   : > { %v2725_v25 = vpop.f32.mrb[80].mxu1 }
 0x380   : > { %v2726_v61 = vadd.f32 %v9401_v43, %v2725_v25  ;;  %v6402_v63 = vpop.f32.mrb[81].mxu1  ;;  %6560 = vmatmul.mubr.msk.f32.gmra.mrb[186].mxu1 %vm2425_vm10, %v2407_v47  ;;  %v3132_v51 = vsel %vm3006_vm0, %v2721_v8, %v3069_v2 }
 0x381   : > { %6617 = vmatmul.mubr.msk.f32.gmra.mrb[78].mxu0 %vm3210_vm6, %v3132_v51  ;;  %6562 = vmatprep.mubr.msk.f32.mxu1 %vm7638_vm5, %v7637_v40 }
 0x382   : > { %vm3007_vm2 = vcmp.ge.f32.partialorder %v2726_v61, 0.0  ;;  %v3070_v34 = vmul.f32 0.01, %v2726_v61  ;;  %6619 = vmatprep.mubr.msk.f32.mxu0 %vm7638_vm5, %v7637_v40 }
 0x383   : > { %v2730_v20 = vpop.f32.mrb[82].mxu1 }
 0x384   : > { %v2731_v59 = vadd.f32 %v9401_v43, %v2730_v20  ;;  %v6405_v0 = vpop.f32.mrb[83].mxu1  ;;  %6563 = vmatmul.mubr.msk.f32.gmra.mrb[188].mxu1 %vm2425_vm10, %v2408_v54  ;;  %v3133_v44 = vsel %vm3007_vm2, %v2726_v61, %v3070_v34 }
 0x385   : > { %6620 = vmatmul.mubr.msk.f32.gmra.mrb[80].mxu0 %vm3210_vm6, %v3133_v44  ;;  %6812 = vmatprep.mubr.msk.f32.mxu1 %vm7638_vm5, %v7637_v40 }
 0x386   : > { %vm3008_vm4 = vcmp.ge.f32.partialorder %v2731_v59, 0.0  ;;  %v3071_v27 = vmul.f32 0.01, %v2731_v59  ;;  %6622 = vmatprep.mubr.msk.f32.mxu0 %vm7638_vm5, %v7637_v40 }
 0x387   : > { %v2735_v1 = vpop.f32.mrb[84].mxu1 }
 0x388   : > { %v2736_v7 = vadd.f32 %v9401_v43, %v2735_v1  ;;  %v6408_v56 = vpop.f32.mrb[85].mxu1  ;;  %v3134_v30 = vsel %vm3008_vm4, %v2731_v59, %v3071_v27 }
 0x389   : > { %6623 = vmatmul.mubr.msk.f32.gmra.mrb[82].mxu0 %vm3210_vm6, %v3134_v30 }
 0x38a   : > { %vm3009_vm7 = vcmp.ge.f32.partialorder %v2736_v7, 0.0  ;;  %v3072_v37 = vmul.f32 0.01, %v2736_v7  ;;  %6625 = vmatprep.mubr.msk.f32.mxu0 %vm7638_vm5, %v7637_v40 }
 0x38b   : > { %v2740_v14 = vpop.f32.mrb[86].mxu1 }
 0x38c   : > { %v2741_v15 = vadd.f32 %v9401_v43, %v2740_v14  ;;  %v6411_v6 = vpop.f32.mrb[87].mxu1  ;;  %v3135_v50 = vsel %vm3009_vm7, %v2736_v7, %v3072_v37 }
 0x38d   : > { %6626 = vmatmul.mubr.msk.f32.gmra.mrb[84].mxu0 %vm3210_vm6, %v3135_v50 }
 0x38e   : > { %vm3010_vm10 = vcmp.ge.f32.partialorder %v2741_v15, 0.0  ;;  %v3073_v23 = vmul.f32 0.01, %v2741_v15  ;;  %6628 = vmatprep.mubr.msk.f32.mxu0 %vm7638_vm5, %v7637_v40 }
 0x38f   : > { %v2745_v62 = vpop.f32.mrb[88].mxu1 }
 0x390   : > { %v2746_v16 = vadd.f32 %v9401_v43, %v2745_v62  ;;  %v6414_v21 = vpop.f32.mrb[89].mxu1  ;;  %v3136_v60 = vsel %vm3010_vm10, %v2741_v15, %v3073_v23 }
 0x391   : > { %6629 = vmatmul.mubr.msk.f32.gmra.mrb[86].mxu0 %vm3210_vm6, %v3136_v60 }
 0x392   : > { %vm3011_vm8 = vcmp.ge.f32.partialorder %v2746_v16, 0.0  ;;  %v3074_v17 = vmul.f32 0.01, %v2746_v16  ;;  %6631 = vmatprep.mubr.msk.f32.mxu0 %vm7638_vm5, %v7637_v40 }
 0x393   : > { %v2750_v26 = vpop.f32.mrb[90].mxu1 }
 0x394   : > { %v2751_v53 = vadd.f32 %v9401_v43, %v2750_v26  ;;  %v6417_v10 = vpop.f32.mrb[91].mxu1  ;;  %v3137_v9 = vsel %vm3011_vm8, %v2746_v16, %v3074_v17 }
 0x395   : > { %6632 = vmatmul.mubr.msk.f32.gmra.mrb[88].mxu0 %vm3210_vm6, %v3137_v9 }
 0x396   : > { %vm3012_vm9 = vcmp.ge.f32.partialorder %v2751_v53, 0.0  ;;  %v3075_v11 = vmul.f32 0.01, %v2751_v53  ;;  %6634 = vmatprep.mubr.msk.f32.mxu0 %vm7638_vm5, %v7637_v40 }
 0x397   : > { %v2755_v49 = vpop.f32.mrb[92].mxu1 }
 0x398   : > { %v2756_v35 = vadd.f32 %v9401_v43, %v2755_v49  ;;  %v6420_v24 = vpop.f32.mrb[93].mxu1  ;;  %v3138_v36 = vsel %vm3012_vm9, %v2751_v53, %v3075_v11 }
 0x399   : > { %6635 = vmatmul.mubr.msk.f32.gmra.mrb[90].mxu0 %vm3210_vm6, %v3138_v36 }
 0x39a   : > { %vm3013_vm11 = vcmp.ge.f32.partialorder %v2756_v35, 0.0  ;;  %v3076_v39 = vmul.f32 0.01, %v2756_v35  ;;  %6637 = vmatprep.mubr.msk.f32.mxu0 %vm7638_vm5, %v7637_v40 }
 0x39b   : > { %v2760_v8 = vpop.f32.mrb[94].mxu1 }
 0x39c   : > { %v2761_v42 = vadd.f32 %v9401_v43, %v2760_v8  ;;  %v6423_v46 = vpop.f32.mrb[95].mxu1  ;;  %v3139_v47 = vsel %vm3013_vm11, %v2756_v35, %v3076_v39 }
 0x39d   : > { %6638 = vmatmul.mubr.msk.f32.gmra.mrb[92].mxu0 %vm3210_vm6, %v3139_v47 }
 0x39e   : > { %vm3014_vm3 = vcmp.ge.f32.partialorder %v2761_v42, 0.0  ;;  %v3077_v29 = vmul.f32 0.01, %v2761_v42  ;;  %6640 = vmatprep.mubr.msk.f32.mxu0 %vm7638_vm5, %v7637_v40 }
 0x39f   : > { %v2765_v2 = vpop.f32.mrb[96].mxu1 }
 0x3a0   : > { %v2766_v25 = vadd.f32 %v9401_v43, %v2765_v2  ;;  %v6426_v61 = vpop.f32.mrb[97].mxu1  ;;  %v3140_v63 = vsel %vm3014_vm3, %v2761_v42, %v3077_v29 }
 0x3a1   : > { %6641 = vmatmul.mubr.msk.f32.gmra.mrb[94].mxu0 %vm3210_vm6, %v3140_v63 }
 0x3a2   : > { %vm3015_vm12 = vcmp.ge.f32.partialorder %v2766_v25, 0.0  ;;  %v3078_v51 = vmul.f32 0.01, %v2766_v25  ;;  %6643 = vmatprep.mubr.msk.f32.mxu0 %vm7638_vm5, %v7637_v40 }
 0x3a3   : > { %v2770_v54 = vpop.f32.mrb[98].mxu1 }
 0x3a4   : > { %v2771_v34 = vadd.f32 %v9401_v43, %v2770_v54  ;;  %v6429_v20 = vpop.f32.mrb[99].mxu1  ;;  %v3141_v59 = vsel %vm3015_vm12, %v2766_v25, %v3078_v51 }
 0x3a5   : > { %6644 = vmatmul.mubr.msk.f32.gmra.mrb[96].mxu0 %vm3210_vm6, %v3141_v59 }
 0x3a6   : > { %vm3016_vm13 = vcmp.ge.f32.partialorder %v2771_v34, 0.0  ;;  %v3079_v0 = vmul.f32 0.01, %v2771_v34  ;;  %6646 = vmatprep.mubr.msk.f32.mxu0 %vm7638_vm5, %v7637_v40 }
 0x3a7   : > { %v2775_v44 = vpop.f32.mrb[100].mxu1 }
 0x3a8   : > { %v2776_v27 = vadd.f32 %v9401_v43, %v2775_v44  ;;  %v6432_v1 = vpop.f32.mrb[101].mxu1  ;;  %v3142_v7 = vsel %vm3016_vm13, %v2771_v34, %v3079_v0 }
 0x3a9   : > { %6647 = vmatmul.mubr.msk.f32.gmra.mrb[98].mxu0 %vm3210_vm6, %v3142_v7 }
 0x3aa   : > { %vm3017_vm15 = vcmp.ge.f32.partialorder %v2776_v27, 0.0  ;;  %v3080_v56 = vmul.f32 0.01, %v2776_v27  ;;  %6649 = vmatprep.mubr.msk.f32.mxu0 %vm7638_vm5, %v7637_v40 }
 0x3ab   : > { %v2780_v30 = vpop.f32.mrb[102].mxu1 }
 0x3ac   : > { %v2781_v37 = vadd.f32 %v9401_v43, %v2780_v30  ;;  %v6435_v14 = vpop.f32.mrb[103].mxu1  ;;  %v3143_v15 = vsel %vm3017_vm15, %v2776_v27, %v3080_v56 }
 0x3ad   : > { %6650 = vmatmul.mubr.msk.f32.gmra.mrb[100].mxu0 %vm3210_vm6, %v3143_v15 }
 0x3ae   : > { %vm3018_vm0 = vcmp.ge.f32.partialorder %v2781_v37, 0.0  ;;  %v3081_v6 = vmul.f32 0.01, %v2781_v37  ;;  %6652 = vmatprep.mubr.msk.f32.mxu0 %vm7638_vm5, %v7637_v40 }
 0x3af   : > { %v2785_v50 = vpop.f32.mrb[104].mxu1 }
 0x3b0   : > { %v2786_v23 = vadd.f32 %v9401_v43, %v2785_v50  ;;  %v6438_v62 = vpop.f32.mrb[105].mxu1  ;;  %v3144_v16 = vsel %vm3018_vm0, %v2781_v37, %v3081_v6 }
 0x3b1   : > { %6653 = vmatmul.mubr.msk.f32.gmra.mrb[102].mxu0 %vm3210_vm6, %v3144_v16 }
 0x3b2   : > { %vm3019_vm2 = vcmp.ge.f32.partialorder %v2786_v23, 0.0  ;;  %v3082_v21 = vmul.f32 0.01, %v2786_v23  ;;  %6655 = vmatprep.mubr.msk.f32.mxu0 %vm7638_vm5, %v7637_v40 }
 0x3b3   : > { %v2790_v60 = vpop.f32.mrb[106].mxu1 }
 0x3b4   : > { %v2791_v17 = vadd.f32 %v9401_v43, %v2790_v60  ;;  %v6441_v4 = vpop.f32.mrb[107].mxu1  ;;  %v3145_v58 = vsel %vm3019_vm2, %v2786_v23, %v3082_v21 }
 0x3b5   : > { %6656 = vmatmul.mubr.msk.f32.gmra.mrb[104].mxu0 %vm3210_vm6, %v3145_v58 }
 0x3b6   : > { %vm3020_vm4 = vcmp.ge.f32.partialorder %v2791_v17, 0.0  ;;  %v3083_v26 = vmul.f32 0.01, %v2791_v17  ;;  %6658 = vmatprep.mubr.msk.f32.mxu0 %vm7638_vm5, %v7637_v40 }
 0x3b7   : > { %v2795_v3 = vpop.f32.mrb[108].mxu1 }
 0x3b8   : > { %v2796_v53 = vadd.f32 %v9401_v43, %v2795_v3  ;;  %v6444_v10 = vpop.f32.mrb[109].mxu1  ;;  %v3146_v9 = vsel %vm3020_vm4, %v2791_v17, %v3083_v26 }
 0x3b9   : > { %6659 = vmatmul.mubr.msk.f32.gmra.mrb[106].mxu0 %vm3210_vm6, %v3146_v9 }
 0x3ba   : > { %vm3021_vm7 = vcmp.ge.f32.partialorder %v2796_v53, 0.0  ;;  %v3084_v11 = vmul.f32 0.01, %v2796_v53  ;;  %6661 = vmatprep.mubr.msk.f32.mxu0 %vm7638_vm5, %v7637_v40 }
 0x3bb   : > { %v2800_v49 = vpop.f32.mrb[110].mxu1 }
 0x3bc   : > { %v2801_v35 = vadd.f32 %v9401_v43, %v2800_v49  ;;  %v6447_v24 = vpop.f32.mrb[111].mxu1  ;;  %v3147_v36 = vsel %vm3021_vm7, %v2796_v53, %v3084_v11 }
 0x3bd   : > { %6662 = vmatmul.mubr.msk.f32.gmra.mrb[108].mxu0 %vm3210_vm6, %v3147_v36 }
 0x3be   : > { %vm3022_vm10 = vcmp.ge.f32.partialorder %v2801_v35, 0.0  ;;  %v3085_v39 = vmul.f32 0.01, %v2801_v35  ;;  %6664 = vmatprep.mubr.msk.f32.mxu0 %vm7638_vm5, %v7637_v40 }
 0x3bf   : > { %v2805_v8 = vpop.f32.mrb[112].mxu1 }
 0x3c0   : > { %v2806_v42 = vadd.f32 %v9401_v43, %v2805_v8  ;;  %v6450_v46 = vpop.f32.mrb[113].mxu1  ;;  %v3148_v47 = vsel %vm3022_vm10, %v2801_v35, %v3085_v39  ;;  %v4746_v39 = vld [vmem:[%s10599_s14] sm:$0xff]  ;;  %v4747_v8 = vld [vmem:[%s10599_s14 + $0x8] sm:$0xff] }
 0x3c1   : > { %6665 = vmatmul.mubr.msk.f32.gmra.mrb[110].mxu0 %vm3210_vm6, %v3148_v47 }
 0x3c2   : > { %vm3023_vm8 = vcmp.ge.f32.partialorder %v2806_v42, 0.0  ;;  %v3086_v29 = vmul.f32 0.01, %v2806_v42  ;;  %6667 = vmatprep.mubr.msk.f32.mxu0 %vm7638_vm5, %v7637_v40 }
 0x3c3   : > { %v2810_v2 = vpop.f32.mrb[114].mxu1 }
 0x3c4   : > { %v2811_v25 = vadd.f32 %v9401_v43, %v2810_v2  ;;  %v6453_v61 = vpop.f32.mrb[115].mxu1  ;;  %v3149_v63 = vsel %vm3023_vm8, %v2806_v42, %v3086_v29  ;;  %v9594_v42 = vpack.c.bf16 %v4747_v8, %v4746_v39 }
 0x3c5   : > { %6668 = vmatmul.mubr.msk.f32.gmra.mrb[112].mxu0 %vm3210_vm6, %v3149_v63 }
 0x3c6   : > { %vm3024_vm9 = vcmp.ge.f32.partialorder %v2811_v25, 0.0  ;;  %v3087_v51 = vmul.f32 0.01, %v2811_v25  ;;  %6670 = vmatprep.mubr.msk.f32.mxu0 %vm7638_vm5, %v7637_v40  ;;  %7416 = vmatprep.subr.bf16.mxu0 %v9594_v42 }
 0x3c7   : > { %v2815_v54 = vpop.f32.mrb[116].mxu1 }
 0x3c8   : > { %v2816_v34 = vadd.f32 %v9401_v43, %v2815_v54  ;;  %v6456_v20 = vpop.f32.mrb[117].mxu1  ;;  %v3150_v59 = vsel %vm3024_vm9, %v2811_v25, %v3087_v51 }
 0x3c9   : > { %6671 = vmatmul.mubr.msk.f32.gmra.mrb[114].mxu0 %vm3210_vm6, %v3150_v59 }
 0x3ca   : > { %vm3025_vm11 = vcmp.ge.f32.partialorder %v2816_v34, 0.0  ;;  %v3088_v0 = vmul.f32 0.01, %v2816_v34  ;;  %6673 = vmatprep.mubr.msk.f32.mxu0 %vm7638_vm5, %v7637_v40 }
 0x3cb   : > { %v2820_v44 = vpop.f32.mrb[118].mxu1 }
 0x3cc   : > { %v2821_v27 = vadd.f32 %v9401_v43, %v2820_v44  ;;  %v6459_v1 = vpop.f32.mrb[119].mxu1  ;;  %v3151_v7 = vsel %vm3025_vm11, %v2816_v34, %v3088_v0 }
 0x3cd   : > { %6674 = vmatmul.mubr.msk.f32.gmra.mrb[116].mxu0 %vm3210_vm6, %v3151_v7 }
 0x3ce   : > { %vm3026_vm3 = vcmp.ge.f32.partialorder %v2821_v27, 0.0  ;;  %v3089_v56 = vmul.f32 0.01, %v2821_v27  ;;  %6676 = vmatprep.mubr.msk.f32.mxu0 %vm7638_vm5, %v7637_v40 }
 0x3cf   : > { %v2825_v30 = vpop.f32.mrb[120].mxu1 }
 0x3d0   : > { %v2826_v37 = vadd.f32 %v9401_v43, %v2825_v30  ;;  %v6462_v14 = vpop.f32.mrb[121].mxu1  ;;  %v3152_v15 = vsel %vm3026_vm3, %v2821_v27, %v3089_v56 }
 0x3d1   : > { %6677 = vmatmul.mubr.msk.f32.gmra.mrb[118].mxu0 %vm3210_vm6, %v3152_v15 }
 0x3d2   : > { %vm3027_vm12 = vcmp.ge.f32.partialorder %v2826_v37, 0.0  ;;  %v3090_v6 = vmul.f32 0.01, %v2826_v37  ;;  %6679 = vmatprep.mubr.msk.f32.mxu0 %vm7638_vm5, %v7637_v40 }
 0x3d3   : > { %v2830_v50 = vpop.f32.mrb[122].mxu1 }
 0x3d4   : > { %v2831_v23 = vadd.f32 %v9401_v43, %v2830_v50  ;;  %v6465_v62 = vpop.f32.mrb[123].mxu1  ;;  %v3153_v16 = vsel %vm3027_vm12, %v2826_v37, %v3090_v6 }
 0x3d5   : > { %6680 = vmatmul.mubr.msk.f32.gmra.mrb[120].mxu0 %vm3210_vm6, %v3153_v16 }
 0x3d6   : > { %vm3028_vm13 = vcmp.ge.f32.partialorder %v2831_v23, 0.0  ;;  %v3091_v21 = vmul.f32 0.01, %v2831_v23  ;;  %6682 = vmatprep.mubr.msk.f32.mxu0 %vm7638_vm5, %v7637_v40 }
 0x3d7   : > { %v2835_v60 = vpop.f32.mrb[124].mxu1 }
 0x3d8   : > { %v2836_v17 = vadd.f32 %v9401_v43, %v2835_v60  ;;  %v6468_v4 = vpop.f32.mrb[125].mxu1  ;;  %v3154_v58 = vsel %vm3028_vm13, %v2831_v23, %v3091_v21 }
 0x3d9   : > { %6683 = vmatmul.mubr.msk.f32.gmra.mrb[122].mxu0 %vm3210_vm6, %v3154_v58 }
 0x3da   : > { %vm3029_vm15 = vcmp.ge.f32.partialorder %v2836_v17, 0.0  ;;  %v3092_v26 = vmul.f32 0.01, %v2836_v17  ;;  %6685 = vmatprep.mubr.msk.f32.mxu0 %vm7638_vm5, %v7637_v40 }
 0x3db   : > { %v2840_v3 = vpop.f32.mrb[126].mxu1 }
 0x3dc   : > { %v2841_v53 = vadd.f32 %v9401_v43, %v2840_v3  ;;  %v6471_v10 = vpop.f32.mrb[127].mxu1  ;;  %v3155_v9 = vsel %vm3029_vm15, %v2836_v17, %v3092_v26 }
 0x3dd   : > { %6686 = vmatmul.mubr.msk.f32.gmra.mrb[124].mxu0 %vm3210_vm6, %v3155_v9 }
 0x3de   : > { %vm3030_vm0 = vcmp.ge.f32.partialorder %v2841_v53, 0.0  ;;  %v3093_v11 = vmul.f32 0.01, %v2841_v53  ;;  %6688 = vmatprep.mubr.msk.f32.mxu0 %vm7638_vm5, %v7637_v40 }
 0x3df   : > { %v2845_v49 = vpop.f32.mrb[128].mxu1 }
 0x3e0   : > { %v2846_v35 = vadd.f32 %v9401_v43, %v2845_v49  ;;  %v6474_v24 = vpop.f32.mrb[129].mxu1  ;;  %v3156_v36 = vsel %vm3030_vm0, %v2841_v53, %v3093_v11 }
 0x3e1   : > { %6689 = vmatmul.mubr.msk.f32.gmra.mrb[126].mxu0 %vm3210_vm6, %v3156_v36 }
 0x3e2   : > { %vm3031_vm2 = vcmp.ge.f32.partialorder %v2846_v35, 0.0  ;;  %v3094_v46 = vmul.f32 0.01, %v2846_v35  ;;  %6691 = vmatprep.mubr.msk.f32.mxu0 %vm7638_vm5, %v7637_v40 }
 0x3e3   : > { %v2850_v47 = vpop.f32.mrb[130].mxu1 }
 0x3e4   : > { %v2851_v29 = vadd.f32 %v9401_v43, %v2850_v47  ;;  %v6477_v2 = vpop.f32.mrb[131].mxu1  ;;  %v3157_v25 = vsel %vm3031_vm2, %v2846_v35, %v3094_v46 }
 0x3e5   : > { %6692 = vmatmul.mubr.msk.f32.gmra.mrb[128].mxu0 %vm3210_vm6, %v3157_v25 }
 0x3e6   : > { %vm3032_vm4 = vcmp.ge.f32.partialorder %v2851_v29, 0.0  ;;  %v3095_v61 = vmul.f32 0.01, %v2851_v29  ;;  %6694 = vmatprep.mubr.msk.f32.mxu0 %vm7638_vm5, %v7637_v40 }
 0x3e7   : > { %v2855_v63 = vpop.f32.mrb[132].mxu1 }
 0x3e8   : > { %v2856_v51 = vadd.f32 %v9401_v43, %v2855_v63  ;;  %v6480_v54 = vpop.f32.mrb[133].mxu1  ;;  %v3158_v34 = vsel %vm3032_vm4, %v2851_v29, %v3095_v61 }
 0x3e9   : > { %6695 = vmatmul.mubr.msk.f32.gmra.mrb[130].mxu0 %vm3210_vm6, %v3158_v34 }
 0x3ea   : > { %vm3033_vm7 = vcmp.ge.f32.partialorder %v2856_v51, 0.0  ;;  %v3096_v20 = vmul.f32 0.01, %v2856_v51  ;;  %6697 = vmatprep.mubr.msk.f32.mxu0 %vm7638_vm5, %v7637_v40 }
 0x3eb   : > { %v2860_v59 = vpop.f32.mrb[134].mxu1 }
 0x3ec   : > { %v2861_v0 = vadd.f32 %v9401_v43, %v2860_v59  ;;  %v6483_v44 = vpop.f32.mrb[135].mxu1  ;;  %v3159_v27 = vsel %vm3033_vm7, %v2856_v51, %v3096_v20 }
 0x3ed   : > { %6698 = vmatmul.mubr.msk.f32.gmra.mrb[132].mxu0 %vm3210_vm6, %v3159_v27 }
 0x3ee   : > { %vm3034_vm10 = vcmp.ge.f32.partialorder %v2861_v0, 0.0  ;;  %v3097_v1 = vmul.f32 0.01, %v2861_v0  ;;  %6700 = vmatprep.mubr.msk.f32.mxu0 %vm7638_vm5, %v7637_v40 }
 0x3ef   : > { %v2865_v7 = vpop.f32.mrb[136].mxu1 }
 0x3f0   : > { %v2866_v56 = vadd.f32 %v9401_v43, %v2865_v7  ;;  %v6486_v30 = vpop.f32.mrb[137].mxu1  ;;  %v3160_v37 = vsel %vm3034_vm10, %v2861_v0, %v3097_v1 }
 0x3f1   : > { %6701 = vmatmul.mubr.msk.f32.gmra.mrb[134].mxu0 %vm3210_vm6, %v3160_v37 }
 0x3f2   : > { %vm3035_vm8 = vcmp.ge.f32.partialorder %v2866_v56, 0.0  ;;  %v3098_v14 = vmul.f32 0.01, %v2866_v56  ;;  %6703 = vmatprep.mubr.msk.f32.mxu0 %vm7638_vm5, %v7637_v40 }
 0x3f3   : > { %v2870_v15 = vpop.f32.mrb[138].mxu1 }
 0x3f4   : > { %v2871_v6 = vadd.f32 %v9401_v43, %v2870_v15  ;;  %v6489_v50 = vpop.f32.mrb[139].mxu1  ;;  %v3161_v23 = vsel %vm3035_vm8, %v2866_v56, %v3098_v14 }
 0x3f5   : > { %6704 = vmatmul.mubr.msk.f32.gmra.mrb[136].mxu0 %vm3210_vm6, %v3161_v23 }
 0x3f6   : > { %vm3036_vm9 = vcmp.ge.f32.partialorder %v2871_v6, 0.0  ;;  %v3099_v62 = vmul.f32 0.01, %v2871_v6  ;;  %6706 = vmatprep.mubr.msk.f32.mxu0 %vm7638_vm5, %v7637_v40 }
 0x3f7   : > { %v2875_v16 = vpop.f32.mrb[140].mxu1 }
 0x3f8   : > { %v2876_v21 = vadd.f32 %v9401_v43, %v2875_v16  ;;  %v6492_v60 = vpop.f32.mrb[141].mxu1  ;;  %v3162_v17 = vsel %vm3036_vm9, %v2871_v6, %v3099_v62 }
 0x3f9   : > { %6707 = vmatmul.mubr.msk.f32.gmra.mrb[138].mxu0 %vm3210_vm6, %v3162_v17 }
 0x3fa   : > { %vm3037_vm11 = vcmp.ge.f32.partialorder %v2876_v21, 0.0  ;;  %v3100_v4 = vmul.f32 0.01, %v2876_v21  ;;  %6709 = vmatprep.mubr.msk.f32.mxu0 %vm7638_vm5, %v7637_v40 }
 0x3fb   : > { %v2880_v58 = vpop.f32.mrb[142].mxu1 }
 0x3fc   : > { %v2881_v26 = vadd.f32 %v9401_v43, %v2880_v58  ;;  %v6495_v3 = vpop.f32.mrb[143].mxu1  ;;  %v3163_v53 = vsel %vm3037_vm11, %v2876_v21, %v3100_v4 }
 0x3fd   : > { %6710 = vmatmul.mubr.msk.f32.gmra.mrb[140].mxu0 %vm3210_vm6, %v3163_v53 }
 0x3fe   : > { %vm3038_vm3 = vcmp.ge.f32.partialorder %v2881_v26, 0.0  ;;  %v3101_v10 = vmul.f32 0.01, %v2881_v26  ;;  %6712 = vmatprep.mubr.msk.f32.mxu0 %vm7638_vm5, %v7637_v40 }
 0x3ff   : > { %v2885_v9 = vpop.f32.mrb[144].mxu1 }
 0x400   : > { %v2886_v11 = vadd.f32 %v9401_v43, %v2885_v9  ;;  %v6498_v49 = vpop.f32.mrb[145].mxu1  ;;  %v3164_v35 = vsel %vm3038_vm3, %v2881_v26, %v3101_v10 }
 0x401   : > { %6713 = vmatmul.mubr.msk.f32.gmra.mrb[142].mxu0 %vm3210_vm6, %v3164_v35 }
 0x402   : > { %vm3039_vm12 = vcmp.ge.f32.partialorder %v2886_v11, 0.0  ;;  %v3102_v24 = vmul.f32 0.01, %v2886_v11  ;;  %6715 = vmatprep.mubr.msk.f32.mxu0 %vm7638_vm5, %v7637_v40 }
 0x403   : > { %v2890_v36 = vpop.f32.mrb[146].mxu1 }
 0x404   : > { %v2891_v39 = vadd.f32 %v9401_v43, %v2890_v36  ;;  %v6501_v8 = vpop.f32.mrb[147].mxu1  ;;  %v3165_v46 = vsel %vm3039_vm12, %v2886_v11, %v3102_v24 }
 0x405   : > { %6716 = vmatmul.mubr.msk.f32.gmra.mrb[144].mxu0 %vm3210_vm6, %v3165_v46 }
 0x406   : > { %vm3040_vm13 = vcmp.ge.f32.partialorder %v2891_v39, 0.0  ;;  %v3103_v47 = vmul.f32 0.01, %v2891_v39  ;;  %6718 = vmatprep.mubr.msk.f32.mxu0 %vm7638_vm5, %v7637_v40 }
 0x407   : > { %v2895_v29 = vpop.f32.mrb[148].mxu1 }
 0x408   : > { %v2896_v2 = vadd.f32 %v9401_v43, %v2895_v29  ;;  %v6504_v25 = vpop.f32.mrb[149].mxu1  ;;  %v3166_v61 = vsel %vm3040_vm13, %v2891_v39, %v3103_v47 }
 0x409   : > { %6719 = vmatmul.mubr.msk.f32.gmra.mrb[146].mxu0 %vm3210_vm6, %v3166_v61 }
 0x40a   : > { %vm3041_vm15 = vcmp.ge.f32.partialorder %v2896_v2, 0.0  ;;  %v3104_v63 = vmul.f32 0.01, %v2896_v2  ;;  %6721 = vmatprep.mubr.msk.f32.mxu0 %vm7638_vm5, %v7637_v40 }
 0x40b   : > { %v2900_v51 = vpop.f32.mrb[150].mxu1 }
 0x40c   : > { %v2901_v54 = vadd.f32 %v9401_v43, %v2900_v51  ;;  %v6507_v34 = vpop.f32.mrb[151].mxu1  ;;  %v3167_v20 = vsel %vm3041_vm15, %v2896_v2, %v3104_v63 }
 0x40d   : > { %6722 = vmatmul.mubr.msk.f32.gmra.mrb[148].mxu0 %vm3210_vm6, %v3167_v20 }
 0x40e   : > { %vm3042_vm0 = vcmp.ge.f32.partialorder %v2901_v54, 0.0  ;;  %v3105_v59 = vmul.f32 0.01, %v2901_v54  ;;  %6724 = vmatprep.mubr.msk.f32.mxu0 %vm7638_vm5, %v7637_v40 }
 0x40f   : > { %v2905_v0 = vpop.f32.mrb[152].mxu1 }
 0x410   : > { %v2906_v44 = vadd.f32 %v9401_v43, %v2905_v0  ;;  %v6510_v27 = vpop.f32.mrb[153].mxu1  ;;  %v3168_v1 = vsel %vm3042_vm0, %v2901_v54, %v3105_v59 }
 0x411   : > { %6725 = vmatmul.mubr.msk.f32.gmra.mrb[150].mxu0 %vm3210_vm6, %v3168_v1 }
 0x412   : > { %vm3043_vm2 = vcmp.ge.f32.partialorder %v2906_v44, 0.0  ;;  %v3106_v7 = vmul.f32 0.01, %v2906_v44  ;;  %6727 = vmatprep.mubr.msk.f32.mxu0 %vm7638_vm5, %v7637_v40 }
 0x413   : > { %v2910_v56 = vpop.f32.mrb[154].mxu1 }
 0x414   : > { %v2911_v30 = vadd.f32 %v9401_v43, %v2910_v56  ;;  %v6513_v37 = vpop.f32.mrb[155].mxu1  ;;  %v3169_v14 = vsel %vm3043_vm2, %v2906_v44, %v3106_v7 }
 0x415   : > { %6728 = vmatmul.mubr.msk.f32.gmra.mrb[152].mxu0 %vm3210_vm6, %v3169_v14 }
 0x416   : > { %vm3044_vm4 = vcmp.ge.f32.partialorder %v2911_v30, 0.0  ;;  %v3107_v15 = vmul.f32 0.01, %v2911_v30  ;;  %6730 = vmatprep.mubr.msk.f32.mxu0 %vm7638_vm5, %v7637_v40 }
 0x417   : > { %v2915_v6 = vpop.f32.mrb[156].mxu1 }
 0x418   : > { %v2916_v50 = vadd.f32 %v9401_v43, %v2915_v6  ;;  %v6516_v23 = vpop.f32.mrb[157].mxu1  ;;  %v3170_v62 = vsel %vm3044_vm4, %v2911_v30, %v3107_v15 }
 0x419   : > { %6731 = vmatmul.mubr.msk.f32.gmra.mrb[154].mxu0 %vm3210_vm6, %v3170_v62 }
 0x41a   : > { %vm3045_vm7 = vcmp.ge.f32.partialorder %v2916_v50, 0.0  ;;  %v3108_v16 = vmul.f32 0.01, %v2916_v50  ;;  %6733 = vmatprep.mubr.msk.f32.mxu0 %vm7638_vm5, %v7637_v40 }
 0x41b   : > { %v2920_v21 = vpop.f32.mrb[158].mxu1 }
 0x41c   : > { %v2921_v60 = vadd.f32 %v9401_v43, %v2920_v21  ;;  %v6519_v17 = vpop.f32.mrb[159].mxu1  ;;  %v3171_v4 = vsel %vm3045_vm7, %v2916_v50, %v3108_v16 }
 0x41d   : > { %6734 = vmatmul.mubr.msk.f32.gmra.mrb[156].mxu0 %vm3210_vm6, %v3171_v4 }
 0x41e   : > { %vm3046_vm10 = vcmp.ge.f32.partialorder %v2921_v60, 0.0  ;;  %v3109_v58 = vmul.f32 0.01, %v2921_v60  ;;  %6736 = vmatprep.mubr.msk.f32.mxu0 %vm7638_vm5, %v7637_v40 }
 0x41f   : > { %v2925_v26 = vpop.f32.mrb[160].mxu1 }
 0x420   : > { %v2926_v3 = vadd.f32 %v9401_v43, %v2925_v26  ;;  %v6522_v53 = vpop.f32.mrb[161].mxu1  ;;  %v3172_v10 = vsel %vm3046_vm10, %v2921_v60, %v3109_v58 }
 0x421   : > { %6737 = vmatmul.mubr.msk.f32.gmra.mrb[158].mxu0 %vm3210_vm6, %v3172_v10 }
 0x422   : > { %vm3047_vm8 = vcmp.ge.f32.partialorder %v2926_v3, 0.0  ;;  %v3110_v9 = vmul.f32 0.01, %v2926_v3  ;;  %6739 = vmatprep.mubr.msk.f32.mxu0 %vm7638_vm5, %v7637_v40 }
 0x423   : > { %v2930_v11 = vpop.f32.mrb[162].mxu1 }
 0x424   : > { %v2931_v49 = vadd.f32 %v9401_v43, %v2930_v11  ;;  %v6525_v35 = vpop.f32.mrb[163].mxu1  ;;  %v3173_v24 = vsel %vm3047_vm8, %v2926_v3, %v3110_v9  ;;  %vm3984_vm8 = vcmask 490496  }
 0x425   : > { %6740 = vmatmul.mubr.msk.f32.gmra.mrb[160].mxu0 %vm3210_vm6, %v3173_v24 }
 0x426   : > { %vm3048_vm9 = vcmp.ge.f32.partialorder %v2931_v49, 0.0  ;;  %v3111_v36 = vmul.f32 0.01, %v2931_v49  ;;  %6742 = vmatprep.mubr.msk.f32.mxu0 %vm7638_vm5, %v7637_v40 }
 0x427   : > { %v2935_v39 = vpop.f32.mrb[164].mxu1 }
 0x428   : > { %v2936_v8 = vadd.f32 %v9401_v43, %v2935_v39  ;;  %v6528_v46 = vpop.f32.mrb[165].mxu1  ;;  %v3174_v47 = vsel %vm3048_vm9, %v2931_v49, %v3111_v36 }
 0x429   : > { %6743 = vmatmul.mubr.msk.f32.gmra.mrb[162].mxu0 %vm3210_vm6, %v3174_v47 }
 0x42a   : > { %vm3049_vm11 = vcmp.ge.f32.partialorder %v2936_v8, 0.0  ;;  %v3112_v29 = vmul.f32 0.01, %v2936_v8  ;;  %6745 = vmatprep.mubr.msk.f32.mxu0 %vm7638_vm5, %v7637_v40 }
 0x42b   : > { %v2940_v2 = vpop.f32.mrb[166].mxu1 }
 0x42c   : > { %v2941_v25 = vadd.f32 %v9401_v43, %v2940_v2  ;;  %v6531_v61 = vpop.f32.mrb[167].mxu1  ;;  %v3175_v63 = vsel %vm3049_vm11, %v2936_v8, %v3112_v29  ;;  %v9710_v2 = vld [vmem:[%s10596_s11] ss:$0 sm:$0xff] }
 0x42d   : > { %6746 = vmatmul.mubr.msk.f32.gmra.mrb[164].mxu0 %vm3210_vm6, %v3175_v63 }
 0x42e   : > { %vm3050_vm3 = vcmp.ge.f32.partialorder %v2941_v25, 0.0  ;;  %v3113_v51 = vmul.f32 0.01, %v2941_v25  ;;  %6748 = vmatprep.mubr.msk.f32.mxu0 %vm7638_vm5, %v7637_v40 }
 0x42f   : > { %v2945_v54 = vpop.f32.mrb[168].mxu1 }
 0x430   : > { %v2946_v34 = vadd.f32 %v9401_v43, %v2945_v54  ;;  %v6534_v20 = vpop.f32.mrb[169].mxu1  ;;  %v3176_v59 = vsel %vm3050_vm3, %v2941_v25, %v3113_v51 }
 0x431   : > { %6749 = vmatmul.mubr.msk.f32.gmra.mrb[166].mxu0 %vm3210_vm6, %v3176_v59 }
 0x432   : > { %vm3051_vm12 = vcmp.ge.f32.partialorder %v2946_v34, 0.0  ;;  %v3114_v0 = vmul.f32 0.01, %v2946_v34  ;;  %6751 = vmatprep.mubr.msk.f32.mxu0 %vm7638_vm5, %v7637_v40 }
 0x433   : > { %v2950_v44 = vpop.f32.mrb[170].mxu1 }
 0x434   : > { %v2951_v27 = vadd.f32 %v9401_v43, %v2950_v44  ;;  %v6537_v1 = vpop.f32.mrb[171].mxu1  ;;  %v3177_v7 = vsel %vm3051_vm12, %v2946_v34, %v3114_v0 }
 0x435   : > { %6752 = vmatmul.mubr.msk.f32.gmra.mrb[168].mxu0 %vm3210_vm6, %v3177_v7 }
 0x436   : > { %vm3052_vm13 = vcmp.ge.f32.partialorder %v2951_v27, 0.0  ;;  %v3115_v56 = vmul.f32 0.01, %v2951_v27  ;;  %6754 = vmatprep.mubr.msk.f32.mxu0 %vm7638_vm5, %v7637_v40 }
 0x437   : > { %v2955_v30 = vpop.f32.mrb[172].mxu1 }
 0x438   : > { %v2956_v37 = vadd.f32 %v9401_v43, %v2955_v30  ;;  %v6540_v14 = vpop.f32.mrb[173].mxu1  ;;  %v9684_v15 = vpop.f32.mrb[64].mxu0  ;;  %v3178_v6 = vsel %vm3052_vm13, %v2951_v27, %v3115_v56 }
 0x439   : > { %v6597_v50 = vpop.f32.mrb[65].mxu0  ;;  %6755 = vmatmul.mubr.msk.f32.gmra.mrb[170].mxu0 %vm3210_vm6, %v3178_v6 }
 0x43a   : > { %vm3053_vm15 = vcmp.ge.f32.partialorder %v2956_v37, 0.0  ;;  %v3116_v23 = vmul.f32 0.01, %v2956_v37  ;;  %6757 = vmatprep.mubr.msk.f32.mxu0 %vm7638_vm5, %v7637_v40 }
 0x43b   : > { %v2960_v62 = vpop.f32.mrb[174].mxu1 }
 0x43c   : > { %v2961_v16 = vadd.f32 %v9401_v43, %v2960_v62  ;;  %v6543_v21 = vpop.f32.mrb[175].mxu1  ;;  %v9690_v60 = vpop.f32.mrb[66].mxu0  ;;  %v3179_v17 = vsel %vm3053_vm15, %v2956_v37, %v3116_v23 }
 0x43d   : > { %v6600_v4 = vpop.f32.mrb[67].mxu0  ;;  %6758 = vmatmul.mubr.msk.f32.gmra.mrb[172].mxu0 %vm3210_vm6, %v3179_v17 }
 0x43e   : > { %vm3054_vm0 = vcmp.ge.f32.partialorder %v2961_v16, 0.0  ;;  %v3117_v58 = vmul.f32 0.01, %v2961_v16  ;;  %6760 = vmatprep.mubr.msk.f32.mxu0 %vm7638_vm5, %v7637_v40 }
 0x43f   : > { %v2965_v26 = vpop.f32.mrb[176].mxu1 }
 0x440   : > { %v2966_v3 = vadd.f32 %v9401_v43, %v2965_v26  ;;  %v6546_v53 = vpop.f32.mrb[177].mxu1  ;;  %v9696_v10 = vpop.f32.mrb[68].mxu0  ;;  %v3180_v9 = vsel %vm3054_vm0, %v2961_v16, %v3117_v58 }
 0x441   : > { %v6603_v11 = vpop.f32.mrb[69].mxu0  ;;  %6761 = vmatmul.mubr.msk.f32.gmra.mrb[174].mxu0 %vm3210_vm6, %v3180_v9 }
 0x442   : > { %vm3055_vm2 = vcmp.ge.f32.partialorder %v2966_v3, 0.0  ;;  %v3118_v49 = vmul.f32 0.01, %v2966_v3  ;;  %6763 = vmatprep.mubr.msk.f32.mxu0 %vm7638_vm5, %v7637_v40 }
 0x443   : > { %v2970_v35 = vpop.f32.mrb[178].mxu1 }
 0x444   : > { %v2971_v24 = vadd.f32 %v9401_v43, %v2970_v35  ;;  %v6549_v36 = vpop.f32.mrb[179].mxu1  ;;  %v9702_v39 = vpop.f32.mrb[70].mxu0  ;;  %v3181_v8 = vsel %vm3055_vm2, %v2966_v3, %v3118_v49  ;;  %v9715_v43 = vld [vmem:[%s10594_s9] ss:$0 sm:$0xff] }
 0x445   : > { %v6606_v46 = vpop.f32.mrb[71].mxu0  ;;  %6764 = vmatmul.mubr.msk.f32.gmra.mrb[176].mxu0 %vm3210_vm6, %v3181_v8 }
 0x446   : > { %vm3056_vm4 = vcmp.ge.f32.partialorder %v2971_v24, 0.0  ;;  %v3119_v47 = vmul.f32 0.01, %v2971_v24  ;;  %6766 = vmatprep.mubr.msk.f32.mxu0 %vm7638_vm5, %v7637_v40 }
 0x447   : > { %v2975_v29 = vpop.f32.mrb[180].mxu1 }
 0x448   : > { %v2976_v25 = vadd.f32 %v9715_v43, %v2975_v29  ;;  %v6552_v61 = vpop.f32.mrb[181].mxu1  ;;  %v3486_v63 = vpop.f32.mrb[72].mxu0  ;;  %v3182_v51 = vsel %vm3056_vm4, %v2971_v24, %v3119_v47 }
 0x449   : > { %v3487_v54 = vadd.f32 %v9710_v2, %v3486_v63  ;;  %v6609_v34 = vpop.f32.mrb[73].mxu0  ;;  %6767 = vmatmul.mubr.msk.f32.gmra.mrb[178].mxu0 %vm3210_vm6, %v3182_v51 }
 0x44a   : > { %vm3057_vm7 = vcmp.ge.f32.partialorder %v2976_v25, 0.0  ;;  %v3120_v20 = vmul.f32 0.01, %v2976_v25  ;;  %6769 = vmatprep.mubr.msk.f32.mxu0 %vm7638_vm5, %v7637_v40 }
 0x44b   : > { %vm3784_vm10 = vcmp.ge.f32.partialorder %v3487_v54, 0.0  ;;  %v3847_v59 = vmul.f32 0.01, %v3487_v54  ;;  %v2980_v0 = vpop.f32.mrb[182].mxu1 }
 0x44c   : > { %v2981_v44 = vadd.f32 %v9715_v43, %v2980_v0  ;;  %v6555_v27 = vpop.f32.mrb[183].mxu1  ;;  %v3491_v1 = vpop.f32.mrb[74].mxu0  ;;  %v3183_v7 = vsel %vm3057_vm7, %v2976_v25, %v3120_v20  ;;  %v3467_v25 = vadd.f32 %v9710_v2, %v9684_v15 }
 0x44d   : > { %v3910_v56 = vsel %vm3784_vm10, %v3487_v54, %v3847_v59  ;;  %v3492_v30 = vadd.f32 %v9710_v2, %v3491_v1  ;;  %v6612_v37 = vpop.f32.mrb[75].mxu0  ;;  %6770 = vmatmul.mubr.msk.f32.gmra.mrb[180].mxu0 %vm3210_vm6, %v3183_v7 }
 0x44e   : > { %vm3058_vm9 = vcmp.ge.f32.partialorder %v2981_v44, 0.0  ;;  %v3121_v14 = vmul.f32 0.01, %v2981_v44  ;;  %6813 = vmatmul.mubr.msk.f32.vlgmr.msra.gmra.mrb[190].mxu1 %vm3984_vm8, %v3910_v56  ;;  %6772 = vmatprep.mubr.msk.f32.mxu0 %vm7638_vm5, %v7637_v40  ;;  %vm3780_vm4 = vcmp.ge.f32.partialorder %v3467_v25, 0.0  ;;  %v4748_v37 = vld [vmem:[%s10599_s14 + $0x10] sm:$0xff] }
 0x44f   : > { %vm3785_vm11 = vcmp.ge.f32.partialorder %v3492_v30, 0.0  ;;  %v3848_v6 = vmul.f32 0.01, %v3492_v30  ;;  %v2985_v50 = vpop.f32.mrb[184].mxu1  ;;  %6815 = vmatprep.mubr.msk.f32.mxu1 %vm7638_vm5, %v7637_v40 }
 0x450   : > { %v2986_v23 = vadd.f32 %v9715_v43, %v2985_v50  ;;  %v6558_v62 = vpop.f32.mrb[185].mxu1  ;;  %v3496_v16 = vpop.f32.mrb[76].mxu0  ;;  %v3184_v21 = vsel %vm3058_vm9, %v2981_v44, %v3121_v14  ;;  %v3472_v44 = vadd.f32 %v9710_v2, %v9690_v60  ;;  %v4749_v14 = vld [vmem:[%s10599_s14 + $0x18] sm:$0xff] }
 0x451   : > { %v3497_v17 = vadd.f32 %v9710_v2, %v3496_v16  ;;  %v6615_v4 = vpop.f32.mrb[77].mxu0  ;;  %6773 = vmatmul.mubr.msk.f32.gmra.mrb[182].mxu0 %vm3210_vm6, %v3184_v21  ;;  %v3911_v58 = vsel %vm3785_vm11, %v3492_v30, %v3848_v6  ;;  %v7419_v16 = vpack.c.bf16 %v4749_v14, %v4748_v37 }
 0x452   : > { %vm3059_vm3 = vcmp.ge.f32.partialorder %v2986_v23, 0.0  ;;  %v3122_v26 = vmul.f32 0.01, %v2986_v23  ;;  %6816 = vmatmul.mubr.msk.f32.gmra.mrb[192].mxu1 %vm3984_vm8, %v3911_v58  ;;  %6775 = vmatprep.mubr.msk.f32.mxu0 %vm7638_vm5, %v7637_v40  ;;  %v3844_v50 = vmul.f32 0.01, %v3472_v44  ;;  %vm3781_vm10 = vcmp.ge.f32.partialorder %v3472_v44, 0.0 }
 0x453   : > { %vm3786_vm12 = vcmp.ge.f32.partialorder %v3497_v17, 0.0  ;;  %v3849_v3 = vmul.f32 0.01, %v3497_v17  ;;  %v2990_v53 = vpop.f32.mrb[186].mxu1  ;;  %6818 = vmatprep.mubr.msk.f32.mxu1 %vm7638_vm5, %v7637_v40  ;;  %v4750_v58 = vld [vmem:[%s10599_s14 + $0x20] sm:$0xff] }
 0x454   : > { %v2991_v9 = vadd.f32 %v9715_v43, %v2990_v53  ;;  %v6561_v11 = vpop.f32.mrb[187].mxu1  ;;  %v3501_v49 = vpop.f32.mrb[78].mxu0  ;;  %v3185_v35 = vsel %vm3059_vm3, %v2986_v23, %v3122_v26  ;;  %v3477_v23 = vadd.f32 %v9710_v2, %v9696_v10  ;;  %v4751_v26 = vld [vmem:[%s10599_s14 + $0x28] sm:$0xff]  ;;  %v9784_v10 = vld [vmem:[%s10592_s7] ss:$0 sm:$0xff] }
 0x455   : > { %v3502_v24 = vadd.f32 %v9710_v2, %v3501_v49  ;;  %v6618_v36 = vpop.f32.mrb[79].mxu0  ;;  %6776 = vmatmul.mubr.msk.f32.gmra.mrb[184].mxu0 %vm3210_vm6, %v3185_v35  ;;  %v3912_v8 = vsel %vm3786_vm12, %v3497_v17, %v3849_v3  ;;  %v3907_v49 = vsel %vm3781_vm10, %v3472_v44, %v3844_v50  ;;  %v7423_v35 = vpack.c.bf16 %v4751_v26, %v4750_v58 }
 0x456   : > { %vm3060_vm13 = vcmp.ge.f32.partialorder %v2991_v9, 0.0  ;;  %v3123_v46 = vmul.f32 0.01, %v2991_v9  ;;  %6819 = vmatmul.mubr.msk.f32.gmra.mrb[194].mxu1 %vm3984_vm8, %v3912_v8  ;;  %6778 = vmatprep.mubr.msk.f32.mxu0 %vm7638_vm5, %v7637_v40  ;;  %v3845_v53 = vmul.f32 0.01, %v3477_v23  ;;  %vm3782_vm11 = vcmp.ge.f32.partialorder %v3477_v23, 0.0 }
 0x457   : > { %vm3787_vm15 = vcmp.ge.f32.partialorder %v3502_v24, 0.0  ;;  %v3850_v47 = vmul.f32 0.01, %v3502_v24  ;;  %v2995_v29 = vpop.f32.mrb[188].mxu1  ;;  %6821 = vmatprep.mubr.msk.f32.mxu1 %vm7638_vm5, %v7637_v40  ;;  %v2260_v58 = vadd.f32 %v9784_v10, %v9343_v5 }
 0x458   : > { %v2996_v61 = vadd.f32 %v9715_v43, %v2995_v29  ;;  %v3506_v63 = vpop.f32.mrb[80].mxu0  ;;  %v6564_v51 = vpop.f32.mrb[189].mxu1  ;;  %v3186_v54 = vsel %vm3060_vm13, %v2991_v9, %v3123_v46  ;;  %v3843_v43 = vmul.f32 0.01, %v3467_v25  ;;  %v3482_v9 = vadd.f32 %v9710_v2, %v9702_v39 }
 0x459   : > { %v3507_v34 = vadd.f32 %v9710_v2, %v3506_v63  ;;  %v6621_v20 = vpop.f32.mrb[81].mxu0  ;;  %6779 = vmatmul.mubr.msk.f32.gmra.mrb[186].mxu0 %vm3210_vm6, %v3186_v54  ;;  %v3913_v59 = vsel %vm3787_vm15, %v3502_v24, %v3850_v47  ;;  %v2220_v24 = vadd.f32 %v9784_v10, %v9295_v33  ;;  %v2225_v46 = vadd.f32 %v9784_v10, %v9301_v57 }
 0x45a   : > { %vm3061_vm0 = vcmp.ge.f32.partialorder %v2996_v61, 0.0  ;;  %v3124_v0 = vmul.f32 0.01, %v2996_v61  ;;  %6822 = vmatmul.mubr.msk.f32.gmra.mrb[196].mxu1 %vm3984_vm8, %v3913_v59  ;;  %6781 = vmatprep.mubr.msk.f32.mxu0 %vm7638_vm5, %v7637_v40  ;;  %v3906_v6 = vsel %vm3780_vm4, %v3467_v25, %v3843_v43  ;;  %v2230_v39 = vadd.f32 %v9784_v10, %v9307_v22  ;;  %v4752_v22 = vld [vmem:[%s10599_s14 + $0x30] sm:$0x3] }
 0x45b   : > { %vm3788_vm2 = vcmp.ge.f32.partialorder %v3507_v34, 0.0  ;;  %v3851_v15 = vmul.f32 0.01, %v3507_v34  ;;  %6824 = vmatprep.mubr.msk.f32.mxu1 %vm7638_vm5, %v7637_v40  ;;  %v3846_v47 = vmul.f32 0.01, %v3482_v9  ;;  %v3908_v25 = vsel %vm3782_vm11, %v3477_v23, %v3845_v53 }
 0x45c   : > { %v3511_v27 = vpop.f32.mrb[82].mxu0  ;;  %v3187_v1 = vsel %vm3061_vm0, %v2996_v61, %v3124_v0  ;;  %vm3783_vm12 = vcmp.ge.f32.partialorder %v3482_v9, 0.0  ;;  %v2314_v51 = vmul.f32 0.01, %v2220_v24  ;;  %vm2299_vm13 = vcmp.ge.f32.partialorder %v2225_v46, 0.0 }
 0x45d   : > { %v3512_v7 = vadd.f32 %v9710_v2, %v3511_v27  ;;  %v6624_v56 = vpop.f32.mrb[83].mxu0  ;;  %6782 = vmatmul.mubr.msk.f32.gmra.mrb[188].mxu0 %vm3210_vm6, %v3187_v1  ;;  %v3914_v30 = vsel %vm3788_vm2, %v3507_v34, %v3851_v15  ;;  %v2315_v54 = vmul.f32 0.01, %v2225_v46  ;;  %vm2298_vm15 = vcmp.ge.f32.partialorder %v2220_v24, 0.0 }
 0x45e   : > { %6825 = vmatmul.mubr.msk.f32.gmra.mrb[198].mxu1 %vm3984_vm8, %v3914_v30  ;;  %6800 = vmatprep.mubr.msk.f32.mxu0 %vm7638_vm5, %v7637_v40  ;;  %vm4753_vm2 = vcmask 408576   ;;  %v2316_v20 = vmul.f32 0.01, %v2230_v39  ;;  %v2235_v59 = vadd.f32 %v9784_v10, %v9313_v55  ;;  %v2240_v0 = vadd.f32 %v9784_v10, %v9319_v52 }
 0x45f   : > { %vm3789_vm7 = vcmp.ge.f32.partialorder %v3512_v7, 0.0  ;;  %v3852_v60 = vmul.f32 0.01, %v3512_v7  ;;  %6827 = vmatprep.mubr.msk.f32.mxu1 %vm7638_vm5, %v7637_v40  ;;  %v3909_v43 = vsel %vm3783_vm12, %v3482_v9, %v3846_v47  ;;  %vm2300_vm4 = vcmp.ge.f32.partialorder %v2230_v39, 0.0 }
 0x460   : > { %v3516_v62 = vpop.f32.mrb[84].mxu0  ;;  %v2331_v55 = vsel %vm2299_vm13, %v2225_v46, %v2315_v54  ;;  %v2332_v56 = vsel %vm2300_vm4, %v2230_v39, %v2316_v20  ;;  %v2245_v30 = vadd.f32 %v9784_v10, %v9325_v45  ;;  %vm2301_vm10 = vcmp.ge.f32.partialorder %v2235_v59, 0.0 }
 0x461   : > { %v3517_v21 = vadd.f32 %v9710_v2, %v3516_v62  ;;  %v6627_v17 = vpop.f32.mrb[85].mxu0  ;;  %6801 = vmatmul.mubr.msk.f32.vlgmr.msra.gmra.mrb[190].mxu0 %vm3984_vm8, %v3906_v6  ;;  %v3915_v4 = vsel %vm3789_vm7, %v3512_v7, %v3852_v60  ;;  %v2330_v7 = vsel %vm2298_vm15, %v2220_v24, %v2314_v51  ;;  %v2317_v14 = vmul.f32 0.01, %v2235_v59 }
 0x462   : > { %6828 = vmatmul.mubr.msk.f32.gmra.mrb[200].mxu1 %vm3984_vm8, %v3915_v4  ;;  %6803 = vmatprep.mubr.msk.f32.mxu0 %vm7638_vm5, %v7637_v40  ;;  %v2318_v60 = vmul.f32 0.01, %v2240_v0  ;;  %v2250_v6 = vadd.f32 %v9784_v10, %v9331_v18  ;;  %v2255_v45 = vadd.f32 %v9784_v10, %v9337_v19  ;;  %vm2303_vm11 = vcmp.ge.f32.partialorder %v2245_v30, 0.0 }
 0x463   : > { %vm3790_vm9 = vcmp.ge.f32.partialorder %v3517_v21, 0.0  ;;  %v3853_v3 = vmul.f32 0.01, %v3517_v21  ;;  %7418 = vmatpush3.bf16.msra.mxu0 %v9594_v42  ;;  %6830 = vmatprep.mubr.msk.f32.mxu1 %vm7638_vm5, %v7637_v40  ;;  %v2319_v4 = vmul.f32 0.01, %v2245_v30  ;;  %v2265_v9 = vadd.f32 %v9784_v10, %v9349_v41 }
 0x464   : > { %v3521_v11 = vpop.f32.mrb[86].mxu0  ;;  %7420 = vmatprep.subr.bf16.mxu0 %v7419_v16  ;;  %v2320_v53 = vmul.f32 0.01, %v2250_v6  ;;  %vm2305_vm13 = vcmp.ge.f32.partialorder %v2255_v45, 0.0  ;;  %v2322_v46 = vmul.f32 0.01, %v2260_v58 }
 0x465   : > { %v3522_v36 = vadd.f32 %v9710_v2, %v3521_v11  ;;  %v6630_v8 = vpop.f32.mrb[87].mxu0  ;;  %6804 = vmatmul.mubr.msk.f32.gmra.mrb[192].mxu0 %vm3984_vm8, %v3907_v49  ;;  %v3916_v42 = vsel %vm3790_vm9, %v3517_v21, %v3853_v3  ;;  %v2333_v21 = vsel %vm2301_vm10, %v2235_v59, %v2317_v14  ;;  %v2270_v11 = vadd.f32 %v9784_v10, %v9355_v13 }
 0x466   : > { %6831 = vmatmul.mubr.msk.f32.gmra.mrb[202].mxu1 %vm3984_vm8, %v3916_v42  ;;  %6806 = vmatprep.mubr.msk.f32.mxu0 %vm7638_vm5, %v7637_v40  ;;  %v2321_v49 = vmul.f32 0.01, %v2255_v45  ;;  %v2335_v24 = vsel %vm2303_vm11, %v2245_v30, %v2319_v4  ;;  %vm2306_vm15 = vcmp.ge.f32.partialorder %v2260_v58, 0.0  ;;  %v2323_v13 = vmul.f32 0.01, %v2265_v9 }
 0x467   : > { %vm3791_vm3 = vcmp.ge.f32.partialorder %v3522_v36, 0.0  ;;  %v3854_v33 = vmul.f32 0.01, %v3522_v36  ;;  %7422 = vmatpush3.bf16.msra.mxu0 %v7419_v16  ;;  %6833 = vmatprep.mubr.msk.f32.mxu1 %vm7638_vm5, %v7637_v40  ;;  %v2324_v39 = vmul.f32 0.01, %v2270_v11  ;;  %vm2308_vm4 = vcmp.ge.f32.partialorder %v2270_v11, 0.0 }
 0x468   : > { %v3526_v29 = vpop.f32.mrb[88].mxu0  ;;  %7424 = vmatprep.subr.bf16.mxu0 %v7423_v35  ;;  %v2337_v47 = vsel %vm2305_vm13, %v2255_v45, %v2321_v49  ;;  %v2285_v59 = vadd.f32 %v9784_v10, %v9379_v32 }
 0x469   : > { %v3527_v57 = vadd.f32 %v9710_v2, %v3526_v29  ;;  %v6633_v61 = vpop.f32.mrb[89].mxu0  ;;  %6807 = vmatmul.mubr.msk.f32.gmra.mrb[194].mxu0 %vm3984_vm8, %v3908_v25  ;;  %v3917_v63 = vsel %vm3791_vm3, %v3522_v36, %v3854_v33  ;;  %vm2304_vm3 = vcmp.ge.f32.partialorder %v2250_v6, 0.0  ;;  %v2275_v29 = vadd.f32 %v9784_v10, %v9361_v12 }
 0x46a   : > { %6834 = vmatmul.mubr.msk.f32.gmra.mrb[204].mxu1 %vm3984_vm8, %v3917_v63  ;;  %6809 = vmatprep.mubr.msk.f32.mxu0 %vm7638_vm5, %v7637_v40  ;;  %v2336_v42 = vsel %vm2304_vm3, %v2250_v6, %v2320_v53  ;;  %v2280_v25 = vadd.f32 %v9784_v10, %v9367_v31  ;;  %v2340_v31 = vsel %vm2308_vm4, %v2270_v11, %v2324_v39  ;;  %v2327_v32 = vmul.f32 0.01, %v2285_v59 }
 0x46b   : > { %vm3792_vm0 = vcmp.ge.f32.partialorder %v3527_v57, 0.0  ;;  %v3855_v34 = vmul.f32 0.01, %v3527_v57  ;;  %7426 = vmatpush3.bf16.msra.mxu0 %v7423_v35  ;;  %6836 = vmatprep.mubr.msk.f32.mxu1 %vm7638_vm5, %v7637_v40  ;;  %vm2311_vm3 = vcmp.ge.f32.partialorder %v2285_v59, 0.0 }
 0x46c   : > { %v3531_v15 = vpop.f32.mrb[90].mxu0  ;;  %7001 = vmatprep.subr.msk.mxu0 %vm1642_vm14, %v4752_v22  ;;  %v2326_v20 = vmul.f32 0.01, %v2280_v25  ;;  %v2343_v6 = vsel %vm2311_vm3, %v2285_v59, %v2327_v32 }
 0x46d   : > { %v3532_v44 = vadd.f32 %v9710_v2, %v3531_v15  ;;  %v6636_v27 = vpop.f32.mrb[91].mxu0  ;;  %6810 = vmatmul.mubr.msk.f32.gmra.mrb[196].mxu0 %vm3984_vm8, %v3909_v43  ;;  %v3918_v1 = vsel %vm3792_vm0, %v3527_v57, %v3855_v34  ;;  %v2325_v34 = vmul.f32 0.01, %v2275_v29  ;;  %v2290_v15 = vadd.f32 %v9784_v10, %v9389_v38 }
 0x46e   : > { %6837 = vmatmul.mubr.msk.f32.gmra.mrb[206].mxu1 %vm3984_vm8, %v3918_v1  ;;  %7003 = vmatprep.mubr.msk.f32.mxu0 %vm4753_vm2, %v2330_v7  ;;  %v2295_v7 = vadd.f32 %v9784_v10, %v9395_v48 }
 0x46f   : > { %vm3793_vm7 = vcmp.ge.f32.partialorder %v3532_v44, 0.0  ;;  %v3856_v52 = vmul.f32 0.01, %v3532_v44  ;;  %7002 = vmatpush3.msk.msra.mxu0 %vm1642_vm14, %v4752_v22  ;;  %6839 = vmatprep.mubr.msk.f32.mxu1 %vm7638_vm5, %v7637_v40  ;;  %vm2302_vm14 = vcmp.ge.f32.partialorder %v2240_v0, 0.0  ;;  %v2338_v22 = vsel %vm2306_vm15, %v2260_v58, %v2322_v46 }
 0x470   : > { %v3536_v37 = vpop.f32.mrb[92].mxu0  ;;  %7427 = vmatprep.subr.bf16.mxu0 %v7636_v28  ;;  %v2334_v17 = vsel %vm2302_vm14, %v2240_v0, %v2318_v60  ;;  %vm2309_vm14 = vcmp.ge.f32.partialorder %v2275_v29, 0.0  ;;  %v2329_v48 = vmul.f32 0.01, %v2295_v7  ;;  %vm2313_vm15 = vcmp.ge.f32.partialorder %v2295_v7, 0.0 }
 0x471   : > { %v3537_v50 = vadd.f32 %v9710_v2, %v3536_v37  ;;  %v6639_v23 = vpop.f32.mrb[93].mxu0  ;;  %7004 = vmatmul.mubr.msk.f32.vlgmr.msra.gmra.mrb[198].mxu0 %vm4753_vm2, %v2331_v55  ;;  %v3919_v62 = vsel %vm3793_vm7, %v3532_v44, %v3856_v52  ;;  %vm2307_vm7 = vcmp.ge.f32.partialorder %v2265_v9, 0.0  ;;  %v2341_v55 = vsel %vm2309_vm14, %v2275_v29, %v2325_v34 }
 0x472   : > { %6840 = vmatmul.mubr.msk.f32.gmra.mrb[208].mxu1 %vm3984_vm8, %v3919_v62  ;;  %7006 = vmatprep.mubr.msk.f32.mxu0 %vm4753_vm2, %v2332_v56  ;;  %v2339_v12 = vsel %vm2307_vm7, %v2265_v9, %v2323_v13  ;;  %v2328_v56 = vmul.f32 0.01, %v2290_v15 }
 0x473   : > { %vm3794_vm9 = vcmp.ge.f32.partialorder %v3537_v50, 0.0  ;;  %v3857_v16 = vmul.f32 0.01, %v3537_v50  ;;  %6842 = vmatprep.mubr.msk.f32.mxu1 %vm7638_vm5, %v7637_v40 }
 0x474   : > { %v3541_v18 = vpop.f32.mrb[94].mxu0 }
 0x475   : > { %v3542_v26 = vadd.f32 %v9710_v2, %v3541_v18  ;;  %v6642_v3 = vpop.f32.mrb[95].mxu0  ;;  %7007 = vmatmul.mubr.msk.f32.gmra.mrb[200].mxu0 %vm4753_vm2, %v2333_v21  ;;  %v3920_v19 = vsel %vm3794_vm9, %v3537_v50, %v3857_v16  ;;  %vm2310_vm9 = vcmp.ge.f32.partialorder %v2280_v25, 0.0  ;;  %v2345_v21 = vsel %vm2313_vm15, %v2295_v7, %v2329_v48 }
 0x476   : > { %6843 = vmatmul.mubr.msk.f32.gmra.mrb[210].mxu1 %vm3984_vm8, %v3920_v19  ;;  %7009 = vmatprep.mubr.msk.f32.mxu0 %vm4753_vm2, %v2334_v17  ;;  %v2342_v52 = vsel %vm2310_vm9, %v2280_v25, %v2326_v20 }
 0x477   : > { %vm3795_vm12 = vcmp.ge.f32.partialorder %v3542_v26, 0.0  ;;  %v3858_v5 = vmul.f32 0.01, %v3542_v26  ;;  %6845 = vmatprep.mubr.msk.f32.mxu1 %vm7638_vm5, %v7637_v40 }
 0x478   : > { %v3546_v35 = vpop.f32.mrb[96].mxu0 }
 0x479   : > { %v3547_v41 = vadd.f32 %v9710_v2, %v3546_v35  ;;  %v6645_v36 = vpop.f32.mrb[97].mxu0  ;;  %7010 = vmatmul.mubr.msk.f32.gmra.mrb[202].mxu0 %vm4753_vm2, %v2335_v24  ;;  %v3921_v8 = vsel %vm3795_vm12, %v3542_v26, %v3858_v5  ;;  %vm2312_vm12 = vcmp.ge.f32.partialorder %v2290_v15, 0.0 }
 0x47a   : > { %6846 = vmatmul.mubr.msk.f32.gmra.mrb[212].mxu1 %vm3984_vm8, %v3921_v8  ;;  %7012 = vmatprep.mubr.msk.f32.mxu0 %vm4753_vm2, %v2336_v42  ;;  %v2344_v45 = vsel %vm2312_vm12, %v2290_v15, %v2328_v56 }
 0x47b   : > { %vm3796_vm0 = vcmp.ge.f32.partialorder %v3547_v41, 0.0  ;;  %v3859_v33 = vmul.f32 0.01, %v3547_v41  ;;  %6848 = vmatprep.mubr.msk.f32.mxu1 %vm7638_vm5, %v7637_v40 }
 0x47c   : > { %v3551_v57 = vpop.f32.mrb[98].mxu0 }
 0x47d   : > { %v3552_v61 = vadd.f32 %v9710_v2, %v3551_v57  ;;  %v6648_v63 = vpop.f32.mrb[99].mxu0  ;;  %7013 = vmatmul.mubr.msk.f32.gmra.mrb[204].mxu0 %vm4753_vm2, %v2337_v47  ;;  %v3922_v51 = vsel %vm3796_vm0, %v3547_v41, %v3859_v33 }
 0x47e   : > { %6849 = vmatmul.mubr.msk.f32.gmra.mrb[214].mxu1 %vm3984_vm8, %v3922_v51  ;;  %7015 = vmatprep.mubr.msk.f32.mxu0 %vm4753_vm2, %v2338_v22 }
 0x47f   : > { %vm3797_vm10 = vcmp.ge.f32.partialorder %v3552_v61, 0.0  ;;  %v3860_v54 = vmul.f32 0.01, %v3552_v61  ;;  %6851 = vmatprep.mubr.msk.f32.mxu1 %vm7638_vm5, %v7637_v40 }
 0x480   : > { %v3556_v0 = vpop.f32.mrb[100].mxu0 }
 0x481   : > { %v3557_v43 = vadd.f32 %v9710_v2, %v3556_v0  ;;  %v6651_v44 = vpop.f32.mrb[101].mxu0  ;;  %7016 = vmatmul.mubr.msk.f32.gmra.mrb[206].mxu0 %vm4753_vm2, %v2339_v12  ;;  %v3923_v27 = vsel %vm3797_vm10, %v3552_v61, %v3860_v54 }
 0x482   : > { %6852 = vmatmul.mubr.msk.f32.gmra.mrb[216].mxu1 %vm3984_vm8, %v3923_v27  ;;  %7018 = vmatprep.mubr.msk.f32.mxu0 %vm4753_vm2, %v2340_v31 }
 0x483   : > { %vm3798_vm11 = vcmp.ge.f32.partialorder %v3557_v43, 0.0  ;;  %v3861_v1 = vmul.f32 0.01, %v3557_v43  ;;  %6854 = vmatprep.mubr.msk.f32.mxu1 %vm7638_vm5, %v7637_v40 }
 0x484   : > { %v3561_v38 = vpop.f32.mrb[102].mxu0 }
 0x485   : > { %v3562_v30 = vadd.f32 %v9710_v2, %v3561_v38  ;;  %v6654_v37 = vpop.f32.mrb[103].mxu0  ;;  %7019 = vmatmul.mubr.msk.f32.gmra.mrb[208].mxu0 %vm4753_vm2, %v2341_v55  ;;  %v3924_v14 = vsel %vm3798_vm11, %v3557_v43, %v3861_v1 }
 0x486   : > { %6855 = vmatmul.mubr.msk.f32.gmra.mrb[218].mxu1 %vm3984_vm8, %v3924_v14  ;;  %7021 = vmatprep.mubr.msk.f32.mxu0 %vm4753_vm2, %v2342_v52 }
 0x487   : > { %vm3799_vm13 = vcmp.ge.f32.partialorder %v3562_v30, 0.0  ;;  %v3862_v60 = vmul.f32 0.01, %v3562_v30  ;;  %6857 = vmatprep.mubr.msk.f32.mxu1 %vm7638_vm5, %v7637_v40 }
 0x488   : > { %v3566_v10 = vpop.f32.mrb[104].mxu0 }
 0x489   : > { %v3567_v50 = vadd.f32 %v9710_v2, %v3566_v10  ;;  %v6657_v23 = vpop.f32.mrb[105].mxu0  ;;  %7022 = vmatmul.mubr.msk.f32.gmra.mrb[210].mxu0 %vm4753_vm2, %v2343_v6  ;;  %v3925_v62 = vsel %vm3799_vm13, %v3562_v30, %v3862_v60 }
 0x48a   : > { %6858 = vmatmul.mubr.msk.f32.gmra.mrb[220].mxu1 %vm3984_vm8, %v3925_v62  ;;  %7024 = vmatprep.mubr.msk.f32.mxu0 %vm4753_vm2, %v2344_v45 }
 0x48b   : > { %vm3800_vm0 = vcmp.ge.f32.partialorder %v3567_v50, 0.0  ;;  %v3863_v16 = vmul.f32 0.01, %v3567_v50  ;;  %6860 = vmatprep.mubr.msk.f32.mxu1 %vm7638_vm5, %v7637_v40 }
 0x48c   : > { %v3571_v18 = vpop.f32.mrb[106].mxu0 }
 0x48d   : > { %v3572_v17 = vadd.f32 %v9710_v2, %v3571_v18  ;;  %v6660_v4 = vpop.f32.mrb[107].mxu0  ;;  %7025 = vmatmul.mubr.msk.f32.gmra.mrb[212].mxu0 %vm4753_vm2, %v2345_v21  ;;  %v3926_v58 = vsel %vm3800_vm0, %v3567_v50, %v3863_v16 }
 0x48e   : > { %6861 = vmatmul.mubr.msk.f32.gmra.mrb[222].mxu1 %vm3984_vm8, %v3926_v58  ;;  %7059 = vmatprep.mubr.msk.f32.mxu0 %vm7638_vm5, %v7637_v40 }
 0x48f   : > { %vm3801_vm4 = vcmp.ge.f32.partialorder %v3572_v17, 0.0  ;;  %v3864_v26 = vmul.f32 0.01, %v3572_v17  ;;  %6863 = vmatprep.mubr.msk.f32.mxu1 %vm7638_vm5, %v7637_v40 }
 0x490   : > { %v3576_v3 = vpop.f32.mrb[108].mxu0 }
 0x491   : > { %v3577_v19 = vadd.f32 %v9710_v2, %v3576_v3  ;;  %v6663_v53 = vpop.f32.mrb[109].mxu0  ;;  %v3927_v9 = vsel %vm3801_vm4, %v3572_v17, %v3864_v26 }
 0x492   : > { %6864 = vmatmul.mubr.msk.f32.gmra.mrb[224].mxu1 %vm3984_vm8, %v3927_v9 }
 0x493   : > { %vm3802_vm7 = vcmp.ge.f32.partialorder %v3577_v19, 0.0  ;;  %v3865_v11 = vmul.f32 0.01, %v3577_v19  ;;  %6866 = vmatprep.mubr.msk.f32.mxu1 %vm7638_vm5, %v7637_v40 }
 0x494   : > { %v3581_v5 = vpop.f32.mrb[110].mxu0 }
 0x495   : > { %v3582_v49 = vadd.f32 %v9710_v2, %v3581_v5  ;;  %v6666_v35 = vpop.f32.mrb[111].mxu0  ;;  %v3928_v24 = vsel %vm3802_vm7, %v3577_v19, %v3865_v11 }
 0x496   : > { %6867 = vmatmul.mubr.msk.f32.gmra.mrb[226].mxu1 %vm3984_vm8, %v3928_v24 }
 0x497   : > { %vm3803_vm2 = vcmp.ge.f32.partialorder %v3582_v49, 0.0  ;;  %v3866_v41 = vmul.f32 0.01, %v3582_v49  ;;  %6869 = vmatprep.mubr.msk.f32.mxu1 %vm7638_vm5, %v7637_v40 }
 0x498   : > { %v3586_v36 = vpop.f32.mrb[112].mxu0 }
 0x499   : > { %v3587_v8 = vadd.f32 %v9710_v2, %v3586_v36  ;;  %v6669_v42 = vpop.f32.mrb[113].mxu0  ;;  %v3929_v46 = vsel %vm3803_vm2, %v3582_v49, %v3866_v41 }
 0x49a   : > { %6870 = vmatmul.mubr.msk.f32.gmra.mrb[228].mxu1 %vm3984_vm8, %v3929_v46 }
 0x49b   : > { %vm3804_vm10 = vcmp.ge.f32.partialorder %v3587_v8, 0.0  ;;  %v3867_v13 = vmul.f32 0.01, %v3587_v8  ;;  %6872 = vmatprep.mubr.msk.f32.mxu1 %vm7638_vm5, %v7637_v40 }
 0x49c   : > { %v3591_v39 = vpop.f32.mrb[114].mxu0 }
 0x49d   : > { %v3592_v33 = vadd.f32 %v9710_v2, %v3591_v39  ;;  %v6672_v47 = vpop.f32.mrb[115].mxu0  ;;  %v3930_v29 = vsel %vm3804_vm10, %v3587_v8, %v3867_v13 }
 0x49e   : > { %6873 = vmatmul.mubr.msk.f32.gmra.mrb[230].mxu1 %vm3984_vm8, %v3930_v29 }
 0x49f   : > { %vm3805_vm14 = vcmp.ge.f32.partialorder %v3592_v33, 0.0  ;;  %v3868_v25 = vmul.f32 0.01, %v3592_v33  ;;  %6875 = vmatprep.mubr.msk.f32.mxu1 %vm7638_vm5, %v7637_v40 }
 0x4a0   : > { %v3596_v57 = vpop.f32.mrb[116].mxu0 }
 0x4a1   : > { %v3597_v61 = vadd.f32 %v9710_v2, %v3596_v57  ;;  %v6675_v63 = vpop.f32.mrb[117].mxu0  ;;  %v3931_v51 = vsel %vm3805_vm14, %v3592_v33, %v3868_v25 }
 0x4a2   : > { %6876 = vmatmul.mubr.msk.f32.gmra.mrb[232].mxu1 %vm3984_vm8, %v3931_v51 }
 0x4a3   : > { %vm3806_vm9 = vcmp.ge.f32.partialorder %v3597_v61, 0.0  ;;  %v3869_v22 = vmul.f32 0.01, %v3597_v61  ;;  %6878 = vmatprep.mubr.msk.f32.mxu1 %vm7638_vm5, %v7637_v40 }
 0x4a4   : > { %v3601_v54 = vpop.f32.mrb[118].mxu0 }
 0x4a5   : > { %v3602_v12 = vadd.f32 %v9710_v2, %v3601_v54  ;;  %v6678_v31 = vpop.f32.mrb[119].mxu0  ;;  %v3932_v34 = vsel %vm3806_vm9, %v3597_v61, %v3869_v22 }
 0x4a6   : > { %6879 = vmatmul.mubr.msk.f32.gmra.mrb[234].mxu1 %vm3984_vm8, %v3932_v34 }
 0x4a7   : > { %vm3807_vm11 = vcmp.ge.f32.partialorder %v3602_v12, 0.0  ;;  %v3870_v20 = vmul.f32 0.01, %v3602_v12  ;;  %6881 = vmatprep.mubr.msk.f32.mxu1 %vm7638_vm5, %v7637_v40 }
 0x4a8   : > { %v3606_v59 = vpop.f32.mrb[120].mxu0 }
 0x4a9   : > { %v3607_v0 = vadd.f32 %v9710_v2, %v3606_v59  ;;  %v6681_v15 = vpop.f32.mrb[121].mxu0  ;;  %v3933_v43 = vsel %vm3807_vm11, %v3602_v12, %v3870_v20 }
 0x4aa   : > { %6882 = vmatmul.mubr.msk.f32.gmra.mrb[236].mxu1 %vm3984_vm8, %v3933_v43 }
 0x4ab   : > { %vm3808_vm3 = vcmp.ge.f32.partialorder %v3607_v0, 0.0  ;;  %v3871_v44 = vmul.f32 0.01, %v3607_v0  ;;  %6884 = vmatprep.mubr.msk.f32.mxu1 %vm7638_vm5, %v7637_v40 }
 0x4ac   : > { %v3611_v27 = vpop.f32.mrb[122].mxu0 }
 0x4ad   : > { %v3612_v1 = vadd.f32 %v9710_v2, %v3611_v27  ;;  %v6684_v32 = vpop.f32.mrb[123].mxu0  ;;  %v3934_v7 = vsel %vm3808_vm3, %v3607_v0, %v3871_v44 }
 0x4ae   : > { %6885 = vmatmul.mubr.msk.f32.gmra.mrb[238].mxu1 %vm3984_vm8, %v3934_v7 }
 0x4af   : > { %vm3809_vm12 = vcmp.ge.f32.partialorder %v3612_v1, 0.0  ;;  %v3872_v38 = vmul.f32 0.01, %v3612_v1  ;;  %6887 = vmatprep.mubr.msk.f32.mxu1 %vm7638_vm5, %v7637_v40 }
 0x4b0   : > { %v3616_v55 = vpop.f32.mrb[124].mxu0 }
 0x4b1   : > { %v3617_v52 = vadd.f32 %v9710_v2, %v3616_v55  ;;  %v6687_v56 = vpop.f32.mrb[125].mxu0  ;;  %v3935_v30 = vsel %vm3809_vm12, %v3612_v1, %v3872_v38 }
 0x4b2   : > { %6888 = vmatmul.mubr.msk.f32.gmra.mrb[240].mxu1 %vm3984_vm8, %v3935_v30 }
 0x4b3   : > { %vm3810_vm13 = vcmp.ge.f32.partialorder %v3617_v52, 0.0  ;;  %v3873_v37 = vmul.f32 0.01, %v3617_v52  ;;  %6890 = vmatprep.mubr.msk.f32.mxu1 %vm7638_vm5, %v7637_v40 }
 0x4b4   : > { %v3621_v14 = vpop.f32.mrb[126].mxu0 }
 0x4b5   : > { %v3622_v60 = vadd.f32 %v9710_v2, %v3621_v14  ;;  %v6690_v48 = vpop.f32.mrb[127].mxu0  ;;  %v3936_v10 = vsel %vm3810_vm13, %v3617_v52, %v3873_v37 }
 0x4b6   : > { %6891 = vmatmul.mubr.msk.f32.gmra.mrb[242].mxu1 %vm3984_vm8, %v3936_v10 }
 0x4b7   : > { %vm3811_vm15 = vcmp.ge.f32.partialorder %v3622_v60, 0.0  ;;  %v3874_v6 = vmul.f32 0.01, %v3622_v60  ;;  %6893 = vmatprep.mubr.msk.f32.mxu1 %vm7638_vm5, %v7637_v40 }
 0x4b8   : > { %v3626_v50 = vpop.f32.mrb[128].mxu0 }
 0x4b9   : > { %v3627_v23 = vadd.f32 %v9710_v2, %v3626_v50  ;;  %v6693_v62 = vpop.f32.mrb[129].mxu0  ;;  %v3937_v45 = vsel %vm3811_vm15, %v3622_v60, %v3874_v6 }
 0x4ba   : > { %6894 = vmatmul.mubr.msk.f32.gmra.mrb[244].mxu1 %vm3984_vm8, %v3937_v45 }
 0x4bb   : > { %vm3812_vm0 = vcmp.ge.f32.partialorder %v3627_v23, 0.0  ;;  %v3875_v16 = vmul.f32 0.01, %v3627_v23  ;;  %6896 = vmatprep.mubr.msk.f32.mxu1 %vm7638_vm5, %v7637_v40 }
 0x4bc   : > { %v3631_v18 = vpop.f32.mrb[130].mxu0 }
 0x4bd   : > { %v3632_v21 = vadd.f32 %v9710_v2, %v3631_v18  ;;  %v6696_v17 = vpop.f32.mrb[131].mxu0  ;;  %v3938_v4 = vsel %vm3812_vm0, %v3627_v23, %v3875_v16 }
 0x4be   : > { %6897 = vmatmul.mubr.msk.f32.gmra.mrb[246].mxu1 %vm3984_vm8, %v3938_v4 }
 0x4bf   : > { %vm3813_vm4 = vcmp.ge.f32.partialorder %v3632_v21, 0.0  ;;  %v3876_v58 = vmul.f32 0.01, %v3632_v21  ;;  %6899 = vmatprep.mubr.msk.f32.mxu1 %vm7638_vm5, %v7637_v40 }
 0x4c0   : > { %v3636_v26 = vpop.f32.mrb[132].mxu0 }
 0x4c1   : > { %v3637_v3 = vadd.f32 %v9710_v2, %v3636_v26  ;;  %v6699_v19 = vpop.f32.mrb[133].mxu0  ;;  %v3939_v53 = vsel %vm3813_vm4, %v3632_v21, %v3876_v58 }
 0x4c2   : > { %6900 = vmatmul.mubr.msk.f32.gmra.mrb[248].mxu1 %vm3984_vm8, %v3939_v53 }
 0x4c3   : > { %vm3814_vm7 = vcmp.ge.f32.partialorder %v3637_v3, 0.0  ;;  %v3877_v9 = vmul.f32 0.01, %v3637_v3  ;;  %6902 = vmatprep.mubr.msk.f32.mxu1 %vm7638_vm5, %v7637_v40 }
 0x4c4   : > { %v3641_v11 = vpop.f32.mrb[134].mxu0 }
 0x4c5   : > { %v3642_v5 = vadd.f32 %v9710_v2, %v3641_v11  ;;  %v6702_v49 = vpop.f32.mrb[135].mxu0  ;;  %v3940_v35 = vsel %vm3814_vm7, %v3637_v3, %v3877_v9 }
 0x4c6   : > { %6903 = vmatmul.mubr.msk.f32.gmra.mrb[250].mxu1 %vm3984_vm8, %v3940_v35 }
 0x4c7   : > { %vm3815_vm2 = vcmp.ge.f32.partialorder %v3642_v5, 0.0  ;;  %v3878_v24 = vmul.f32 0.01, %v3642_v5  ;;  %6905 = vmatprep.mubr.msk.f32.mxu1 %vm7638_vm5, %v7637_v40 }
 0x4c8   : > { %v3646_v41 = vpop.f32.mrb[136].mxu0 }
 0x4c9   : > { %v3647_v36 = vadd.f32 %v9710_v2, %v3646_v41  ;;  %v6705_v8 = vpop.f32.mrb[137].mxu0  ;;  %v3941_v42 = vsel %vm3815_vm2, %v3642_v5, %v3878_v24 }
 0x4ca   : > { %6906 = vmatmul.mubr.msk.f32.gmra.mrb[252].mxu1 %vm3984_vm8, %v3941_v42 }
 0x4cb   : > { %vm3816_vm10 = vcmp.ge.f32.partialorder %v3647_v36, 0.0  ;;  %v3879_v46 = vmul.f32 0.01, %v3647_v36  ;;  %6908 = vmatprep.mubr.msk.f32.mxu1 %vm7638_vm5, %v7637_v40 }
 0x4cc   : > { %v3651_v13 = vpop.f32.mrb[138].mxu0 }
 0x4cd   : > { %v3652_v39 = vadd.f32 %v9710_v2, %v3651_v13  ;;  %v6708_v33 = vpop.f32.mrb[139].mxu0  ;;  %v3942_v47 = vsel %vm3816_vm10, %v3647_v36, %v3879_v46  ;;  %v10017_v36 = vld [vmem:[%s10596_s11] ss:$0 sm:$0xff] }
 0x4ce   : > { %6909 = vmatmul.mubr.msk.f32.gmra.mrb[254].mxu1 %vm3984_vm8, %v3942_v47 }
 0x4cf   : > { %vm3817_vm14 = vcmp.ge.f32.partialorder %v3652_v39, 0.0  ;;  %v3880_v29 = vmul.f32 0.01, %v3652_v39  ;;  %6911 = vmatprep.mubr.msk.f32.mxu1 %vm7638_vm5, %v7637_v40 }
 0x4d0   : > { %v3656_v25 = vpop.f32.mrb[140].mxu0 }
 0x4d1   : > { %v3943_v57 = vsel %vm3817_vm14, %v3652_v39, %v3880_v29  ;;  %v3657_v61 = vadd.f32 %v9710_v2, %v3656_v25  ;;  %v6711_v63 = vpop.f32.mrb[141].mxu0 }
 0x4d2   : > { %6912 = vmatmul.mubr.msk.f32.gmra.mrb[0].mxu1 %vm3984_vm8, %v3943_v57 }
 0x4d3   : > { %vm3818_vm9 = vcmp.ge.f32.partialorder %v3657_v61, 0.0  ;;  %v3881_v51 = vmul.f32 0.01, %v3657_v61  ;;  %6914 = vmatprep.mubr.msk.f32.mxu1 %vm7638_vm5, %v7637_v40 }
 0x4d4   : > { %v3661_v22 = vpop.f32.mrb[142].mxu0 }
 0x4d5   : > { %v3944_v54 = vsel %vm3818_vm9, %v3657_v61, %v3881_v51  ;;  %v3662_v12 = vadd.f32 %v9710_v2, %v3661_v22  ;;  %v6714_v31 = vpop.f32.mrb[143].mxu0 }
 0x4d6   : > { %6915 = vmatmul.mubr.msk.f32.gmra.mrb[2].mxu1 %vm3984_vm8, %v3944_v54 }
 0x4d7   : > { %vm3819_vm11 = vcmp.ge.f32.partialorder %v3662_v12, 0.0  ;;  %v3882_v34 = vmul.f32 0.01, %v3662_v12  ;;  %6917 = vmatprep.mubr.msk.f32.mxu1 %vm7638_vm5, %v7637_v40 }
 0x4d8   : > { %v3666_v20 = vpop.f32.mrb[144].mxu0 }
 0x4d9   : > { %v3945_v59 = vsel %vm3819_vm11, %v3662_v12, %v3882_v34  ;;  %v3667_v0 = vadd.f32 %v9710_v2, %v3666_v20  ;;  %v6717_v15 = vpop.f32.mrb[145].mxu0 }
 0x4da   : > { %6918 = vmatmul.mubr.msk.f32.gmra.mrb[4].mxu1 %vm3984_vm8, %v3945_v59 }
 0x4db   : > { %vm3820_vm3 = vcmp.ge.f32.partialorder %v3667_v0, 0.0  ;;  %v3883_v43 = vmul.f32 0.01, %v3667_v0  ;;  %6920 = vmatprep.mubr.msk.f32.mxu1 %vm7638_vm5, %v7637_v40 }
 0x4dc   : > { %v3671_v44 = vpop.f32.mrb[146].mxu0 }
 0x4dd   : > { %v3946_v27 = vsel %vm3820_vm3, %v3667_v0, %v3883_v43  ;;  %v3672_v1 = vadd.f32 %v9710_v2, %v3671_v44  ;;  %v6720_v32 = vpop.f32.mrb[147].mxu0 }
 0x4de   : > { %6921 = vmatmul.mubr.msk.f32.gmra.mrb[6].mxu1 %vm3984_vm8, %v3946_v27 }
 0x4df   : > { %vm3821_vm12 = vcmp.ge.f32.partialorder %v3672_v1, 0.0  ;;  %v3884_v7 = vmul.f32 0.01, %v3672_v1  ;;  %6923 = vmatprep.mubr.msk.f32.mxu1 %vm7638_vm5, %v7637_v40 }
 0x4e0   : > { %v3676_v38 = vpop.f32.mrb[148].mxu0 }
 0x4e1   : > { %v3947_v55 = vsel %vm3821_vm12, %v3672_v1, %v3884_v7  ;;  %v3677_v52 = vadd.f32 %v9710_v2, %v3676_v38  ;;  %v6723_v56 = vpop.f32.mrb[149].mxu0 }
 0x4e2   : > { %6924 = vmatmul.mubr.msk.f32.gmra.mrb[8].mxu1 %vm3984_vm8, %v3947_v55 }
 0x4e3   : > { %vm3822_vm13 = vcmp.ge.f32.partialorder %v3677_v52, 0.0  ;;  %v3885_v30 = vmul.f32 0.01, %v3677_v52  ;;  %6926 = vmatprep.mubr.msk.f32.mxu1 %vm7638_vm5, %v7637_v40 }
 0x4e4   : > { %v3681_v37 = vpop.f32.mrb[150].mxu0 }
 0x4e5   : > { %v3948_v14 = vsel %vm3822_vm13, %v3677_v52, %v3885_v30  ;;  %v3682_v60 = vadd.f32 %v9710_v2, %v3681_v37  ;;  %v6726_v48 = vpop.f32.mrb[151].mxu0 }
 0x4e6   : > { %6927 = vmatmul.mubr.msk.f32.gmra.mrb[10].mxu1 %vm3984_vm8, %v3948_v14 }
 0x4e7   : > { %vm3823_vm15 = vcmp.ge.f32.partialorder %v3682_v60, 0.0  ;;  %v3886_v10 = vmul.f32 0.01, %v3682_v60  ;;  %6929 = vmatprep.mubr.msk.f32.mxu1 %vm7638_vm5, %v7637_v40 }
 0x4e8   : > { %v3686_v6 = vpop.f32.mrb[152].mxu0 }
 0x4e9   : > { %v3949_v50 = vsel %vm3823_vm15, %v3682_v60, %v3886_v10  ;;  %v3687_v23 = vadd.f32 %v9710_v2, %v3686_v6  ;;  %v6729_v62 = vpop.f32.mrb[153].mxu0 }
 0x4ea   : > { %6930 = vmatmul.mubr.msk.f32.gmra.mrb[12].mxu1 %vm3984_vm8, %v3949_v50 }
 0x4eb   : > { %vm3824_vm0 = vcmp.ge.f32.partialorder %v3687_v23, 0.0  ;;  %v3887_v45 = vmul.f32 0.01, %v3687_v23  ;;  %6932 = vmatprep.mubr.msk.f32.mxu1 %vm7638_vm5, %v7637_v40 }
 0x4ec   : > { %v3691_v16 = vpop.f32.mrb[154].mxu0 }
 0x4ed   : > { %v3950_v18 = vsel %vm3824_vm0, %v3687_v23, %v3887_v45  ;;  %v3692_v21 = vadd.f32 %v9710_v2, %v3691_v16  ;;  %v6732_v17 = vpop.f32.mrb[155].mxu0 }
 0x4ee   : > { %6933 = vmatmul.mubr.msk.f32.gmra.mrb[14].mxu1 %vm3984_vm8, %v3950_v18 }
 0x4ef   : > { %vm3825_vm4 = vcmp.ge.f32.partialorder %v3692_v21, 0.0  ;;  %v3888_v4 = vmul.f32 0.01, %v3692_v21  ;;  %6935 = vmatprep.mubr.msk.f32.mxu1 %vm7638_vm5, %v7637_v40 }
 0x4f0   : > { %v3696_v58 = vpop.f32.mrb[156].mxu0 }
 0x4f1   : > { %v3951_v26 = vsel %vm3825_vm4, %v3692_v21, %v3888_v4  ;;  %v3697_v3 = vadd.f32 %v9710_v2, %v3696_v58  ;;  %v6735_v19 = vpop.f32.mrb[157].mxu0  ;;  %v10060_v4 = vld [vmem:[%s10598_s13] ss:$0 sm:$0xff] }
 0x4f2   : > { %6936 = vmatmul.mubr.msk.f32.gmra.mrb[16].mxu1 %vm3984_vm8, %v3951_v26 }
 0x4f3   : > { %vm3826_vm7 = vcmp.ge.f32.partialorder %v3697_v3, 0.0  ;;  %v3889_v53 = vmul.f32 0.01, %v3697_v3  ;;  %6938 = vmatprep.mubr.msk.f32.mxu1 %vm7638_vm5, %v7637_v40 }
 0x4f4   : > { %v3701_v9 = vpop.f32.mrb[158].mxu0 }
 0x4f5   : > { %v3952_v11 = vsel %vm3826_vm7, %v3697_v3, %v3889_v53  ;;  %v3702_v5 = vadd.f32 %v9710_v2, %v3701_v9  ;;  %v6738_v49 = vpop.f32.mrb[159].mxu0 }
 0x4f6   : > { %6939 = vmatmul.mubr.msk.f32.gmra.mrb[18].mxu1 %vm3984_vm8, %v3952_v11 }
 0x4f7   : > { %vm3827_vm2 = vcmp.ge.f32.partialorder %v3702_v5, 0.0  ;;  %v3890_v35 = vmul.f32 0.01, %v3702_v5  ;;  %6941 = vmatprep.mubr.msk.f32.mxu1 %vm7638_vm5, %v7637_v40 }
 0x4f8   : > { %v3706_v24 = vpop.f32.mrb[160].mxu0 }
 0x4f9   : > { %v3953_v41 = vsel %vm3827_vm2, %v3702_v5, %v3890_v35  ;;  %v3707_v8 = vadd.f32 %v10017_v36, %v3706_v24  ;;  %v6741_v42 = vpop.f32.mrb[161].mxu0 }
 0x4fa   : > { %6942 = vmatmul.mubr.msk.f32.gmra.mrb[20].mxu1 %vm3984_vm8, %v3953_v41 }
 0x4fb   : > { %vm3828_vm10 = vcmp.ge.f32.partialorder %v3707_v8, 0.0  ;;  %v3891_v2 = vmul.f32 0.01, %v3707_v8  ;;  %6944 = vmatprep.mubr.msk.f32.mxu1 %vm7638_vm5, %v7637_v40 }
 0x4fc   : > { %v3711_v46 = vpop.f32.mrb[162].mxu0 }
 0x4fd   : > { %v3954_v13 = vsel %vm3828_vm10, %v3707_v8, %v3891_v2  ;;  %v3712_v39 = vadd.f32 %v10017_v36, %v3711_v46  ;;  %v6744_v33 = vpop.f32.mrb[163].mxu0  ;;  %vm5124_vm10 = vcmask 105472  }
 0x4fe   : > { %6945 = vmatmul.mubr.msk.f32.gmra.mrb[22].mxu1 %vm3984_vm8, %v3954_v13 }
 0x4ff   : > { %vm3829_vm14 = vcmp.ge.f32.partialorder %v3712_v39, 0.0  ;;  %v3892_v47 = vmul.f32 0.01, %v3712_v39  ;;  %6947 = vmatprep.mubr.msk.f32.mxu1 %vm7638_vm5, %v7637_v40 }
 0x500   : > { %v3716_v29 = vpop.f32.mrb[164].mxu0 }
 0x501   : > { %v3955_v25 = vsel %vm3829_vm14, %v3712_v39, %v3892_v47  ;;  %v3717_v57 = vadd.f32 %v10017_v36, %v3716_v29  ;;  %v6747_v61 = vpop.f32.mrb[165].mxu0 }
 0x502   : > { %6948 = vmatmul.mubr.msk.f32.gmra.mrb[24].mxu1 %vm3984_vm8, %v3955_v25 }
 0x503   : > { %vm3830_vm9 = vcmp.ge.f32.partialorder %v3717_v57, 0.0  ;;  %v3893_v63 = vmul.f32 0.01, %v3717_v57  ;;  %6950 = vmatprep.mubr.msk.f32.mxu1 %vm7638_vm5, %v7637_v40 }
 0x504   : > { %v3721_v51 = vpop.f32.mrb[166].mxu0 }
 0x505   : > { %v3956_v22 = vsel %vm3830_vm9, %v3717_v57, %v3893_v63  ;;  %v3722_v54 = vadd.f32 %v10017_v36, %v3721_v51  ;;  %v6750_v12 = vpop.f32.mrb[167].mxu0 }
 0x506   : > { %6951 = vmatmul.mubr.msk.f32.gmra.mrb[26].mxu1 %vm3984_vm8, %v3956_v22 }
 0x507   : > { %vm3831_vm11 = vcmp.ge.f32.partialorder %v3722_v54, 0.0  ;;  %v3894_v31 = vmul.f32 0.01, %v3722_v54  ;;  %6953 = vmatprep.mubr.msk.f32.mxu1 %vm7638_vm5, %v7637_v40 }
 0x508   : > { %v3726_v34 = vpop.f32.mrb[168].mxu0 }
 0x509   : > { %v3957_v20 = vsel %vm3831_vm11, %v3722_v54, %v3894_v31  ;;  %v3727_v59 = vadd.f32 %v10017_v36, %v3726_v34  ;;  %v6753_v0 = vpop.f32.mrb[169].mxu0 }
 0x50a   : > { %6954 = vmatmul.mubr.msk.f32.gmra.mrb[28].mxu1 %vm3984_vm8, %v3957_v20 }
 0x50b   : > { %vm3832_vm3 = vcmp.ge.f32.partialorder %v3727_v59, 0.0  ;;  %v3895_v15 = vmul.f32 0.01, %v3727_v59  ;;  %6956 = vmatprep.mubr.msk.f32.mxu1 %vm7638_vm5, %v7637_v40 }
 0x50c   : > { %v3731_v43 = vpop.f32.mrb[170].mxu0 }
 0x50d   : > { %v3958_v44 = vsel %vm3832_vm3, %v3727_v59, %v3895_v15  ;;  %v3732_v27 = vadd.f32 %v10017_v36, %v3731_v43  ;;  %v6756_v1 = vpop.f32.mrb[171].mxu0 }
 0x50e   : > { %6957 = vmatmul.mubr.msk.f32.gmra.mrb[30].mxu1 %vm3984_vm8, %v3958_v44 }
 0x50f   : > { %vm3833_vm12 = vcmp.ge.f32.partialorder %v3732_v27, 0.0  ;;  %v3896_v32 = vmul.f32 0.01, %v3732_v27  ;;  %6959 = vmatprep.mubr.msk.f32.mxu1 %vm7638_vm5, %v7637_v40 }
 0x510   : > { %v3736_v7 = vpop.f32.mrb[172].mxu0 }
 0x511   : > { %v3959_v38 = vsel %vm3833_vm12, %v3732_v27, %v3896_v32  ;;  %v3737_v55 = vadd.f32 %v10017_v36, %v3736_v7  ;;  %v6759_v52 = vpop.f32.mrb[173].mxu0 }
 0x512   : > { %6960 = vmatmul.mubr.msk.f32.gmra.mrb[32].mxu1 %vm3984_vm8, %v3959_v38 }
 0x513   : > { %vm3834_vm13 = vcmp.ge.f32.partialorder %v3737_v55, 0.0  ;;  %v3897_v56 = vmul.f32 0.01, %v3737_v55  ;;  %6962 = vmatprep.mubr.msk.f32.mxu1 %vm7638_vm5, %v7637_v40 }
 0x514   : > { %v3741_v30 = vpop.f32.mrb[174].mxu0 }
 0x515   : > { %v3960_v37 = vsel %vm3834_vm13, %v3737_v55, %v3897_v56  ;;  %v3742_v14 = vadd.f32 %v10017_v36, %v3741_v30  ;;  %v6762_v60 = vpop.f32.mrb[175].mxu0 }
 0x516   : > { %6963 = vmatmul.mubr.msk.f32.gmra.mrb[34].mxu1 %vm3984_vm8, %v3960_v37 }
 0x517   : > { %vm3835_vm15 = vcmp.ge.f32.partialorder %v3742_v14, 0.0  ;;  %v3898_v48 = vmul.f32 0.01, %v3742_v14  ;;  %6965 = vmatprep.mubr.msk.f32.mxu1 %vm7638_vm5, %v7637_v40 }
 0x518   : > { %v3746_v10 = vpop.f32.mrb[176].mxu0 }
 0x519   : > { %v3961_v6 = vsel %vm3835_vm15, %v3742_v14, %v3898_v48  ;;  %v3747_v50 = vadd.f32 %v10017_v36, %v3746_v10  ;;  %v6765_v23 = vpop.f32.mrb[177].mxu0 }
 0x51a   : > { %6966 = vmatmul.mubr.msk.f32.gmra.mrb[36].mxu1 %vm3984_vm8, %v3961_v6 }
 0x51b   : > { %vm3836_vm0 = vcmp.ge.f32.partialorder %v3747_v50, 0.0  ;;  %v3899_v62 = vmul.f32 0.01, %v3747_v50  ;;  %6968 = vmatprep.mubr.msk.f32.mxu1 %vm7638_vm5, %v7637_v40 }
 0x51c   : > { %v3751_v45 = vpop.f32.mrb[178].mxu0 }
 0x51d   : > { %v3962_v16 = vsel %vm3836_vm0, %v3747_v50, %v3899_v62  ;;  %v3752_v18 = vadd.f32 %v10017_v36, %v3751_v45  ;;  %v6768_v21 = vpop.f32.mrb[179].mxu0 }
 0x51e   : > { %6969 = vmatmul.mubr.msk.f32.gmra.mrb[38].mxu1 %vm3984_vm8, %v3962_v16 }
 0x51f   : > { %vm3837_vm4 = vcmp.ge.f32.partialorder %v3752_v18, 0.0  ;;  %v3900_v17 = vmul.f32 0.01, %v3752_v18  ;;  %6971 = vmatprep.mubr.msk.f32.mxu1 %vm7638_vm5, %v7637_v40 }
 0x520   : > { %v3756_v58 = vpop.f32.mrb[180].mxu0 }
 0x521   : > { %v3963_v26 = vsel %vm3837_vm4, %v3752_v18, %v3900_v17  ;;  %v3757_v3 = vadd.f32 %v10017_v36, %v3756_v58  ;;  %v6771_v19 = vpop.f32.mrb[181].mxu0  ;;  %v4263_v53 = vpop.f32.mrb[190].mxu1 }
 0x522   : > { %v4264_v9 = vadd.f32 %v10060_v4, %v4263_v53  ;;  %v6814_v11 = vpop.f32.mrb[191].mxu1  ;;  %6972 = vmatmul.mubr.msk.f32.gmra.mrb[40].mxu1 %vm3984_vm8, %v3963_v26 }
 0x523   : > { %vm3838_vm7 = vcmp.ge.f32.partialorder %v3757_v3, 0.0  ;;  %v3901_v5 = vmul.f32 0.01, %v3757_v3  ;;  %6974 = vmatprep.mubr.msk.f32.mxu1 %vm7638_vm5, %v7637_v40 }
 0x524   : > { %v4624_v49 = vmul.f32 0.01, %v4264_v9  ;;  %v3761_v35 = vpop.f32.mrb[182].mxu0  ;;  %vm4561_vm2 = vcmp.ge.f32.partialorder %v4264_v9, 0.0 }
 0x525   : > { %v3964_v24 = vsel %vm3838_vm7, %v3757_v3, %v3901_v5  ;;  %v3762_v41 = vadd.f32 %v10017_v36, %v3761_v35  ;;  %v6774_v8 = vpop.f32.mrb[183].mxu0  ;;  %v4268_v42 = vpop.f32.mrb[192].mxu1 }
 0x526   : > { %v4269_v2 = vadd.f32 %v10060_v4, %v4268_v42  ;;  %v6817_v46 = vpop.f32.mrb[193].mxu1  ;;  %6975 = vmatmul.mubr.msk.f32.gmra.mrb[42].mxu1 %vm3984_vm8, %v3964_v24  ;;  %v4687_v13 = vsel %vm4561_vm2, %v4264_v9, %v4624_v49 }
 0x527   : > { %vm3839_vm14 = vcmp.ge.f32.partialorder %v3762_v41, 0.0  ;;  %v3902_v39 = vmul.f32 0.01, %v3762_v41  ;;  %v5137_v33 = vsel %vm5124_vm10, %v4687_v13, -inf  ;;  %6977 = vmatprep.mubr.msk.f32.mxu1 %vm7638_vm5, %v7637_v40 }
 0x528   : > { %v4625_v47 = vmul.f32 0.01, %v4269_v2  ;;  %v3766_v29 = vpop.f32.mrb[184].mxu0  ;;  %5138 = vmax.xlane.f32.xlu0 %v5137_v33  ;;  %vm4562_vm9 = vcmp.ge.f32.partialorder %v4269_v2, 0.0 }
 0x529   : > { %v3965_v25 = vsel %vm3839_vm14, %v3762_v41, %v3902_v39  ;;  %v3767_v57 = vadd.f32 %v10017_v36, %v3766_v29  ;;  %v6777_v61 = vpop.f32.mrb[185].mxu0  ;;  %v4273_v63 = vpop.f32.mrb[194].mxu1 }
 0x52a   : > { %v4274_v51 = vadd.f32 %v10060_v4, %v4273_v63  ;;  %v6820_v22 = vpop.f32.mrb[195].mxu1  ;;  %6978 = vmatmul.mubr.msk.f32.gmra.mrb[44].mxu1 %vm3984_vm8, %v3965_v25  ;;  %v4688_v54 = vsel %vm4562_vm9, %v4269_v2, %v4625_v47 }
 0x52b   : > { %vm3840_vm11 = vcmp.ge.f32.partialorder %v3767_v57, 0.0  ;;  %v3903_v12 = vmul.f32 0.01, %v3767_v57  ;;  %v5140_v31 = vsel %vm5124_vm10, %v4688_v54, -inf  ;;  %6980 = vmatprep.mubr.msk.f32.mxu1 %vm7638_vm5, %v7637_v40 }
 0x52c   : > { %v4626_v34 = vmul.f32 0.01, %v4274_v51  ;;  %v3771_v20 = vpop.f32.mrb[186].mxu0  ;;  %5141 = vmax.xlane.f32.xlu1 %v5140_v31  ;;  %vm4563_vm3 = vcmp.ge.f32.partialorder %v4274_v51, 0.0 }
 0x52d   : > { %v3966_v59 = vsel %vm3840_vm11, %v3767_v57, %v3903_v12  ;;  %v3772_v0 = vadd.f32 %v10017_v36, %v3771_v20  ;;  %v6780_v15 = vpop.f32.mrb[187].mxu0  ;;  %v4278_v43 = vpop.f32.mrb[196].mxu1 }
 0x52e   : > { %v4279_v44 = vadd.f32 %v10060_v4, %v4278_v43  ;;  %v6823_v27 = vpop.f32.mrb[197].mxu1  ;;  %6981 = vmatmul.mubr.msk.f32.gmra.mrb[46].mxu1 %vm3984_vm8, %v3966_v59  ;;  %v4689_v1 = vsel %vm4563_vm3, %v4274_v51, %v4626_v34  ;;  %v4951_v43 = vld [vmem:[%s10600_s15 + $0x8] sm:$0xff] }
 0x52f   : > { %vm3841_vm12 = vcmp.ge.f32.partialorder %v3772_v0, 0.0  ;;  %v3904_v32 = vmul.f32 0.01, %v3772_v0  ;;  %v5143_v7 = vsel %vm5124_vm10, %v4689_v1, -inf  ;;  %6983 = vmatprep.mubr.msk.f32.mxu1 %vm7638_vm5, %v7637_v40  ;;  %v4950_v27 = vld [vmem:[%s10600_s15] sm:$0xff] }
 0x530   : > { %v4627_v38 = vmul.f32 0.01, %v4279_v44  ;;  %v3776_v55 = vpop.f32.mrb[188].mxu0  ;;  %5144 = vmax.xlane.f32.xlu0 %v5143_v7  ;;  %vm4564_vm13 = vcmp.ge.f32.partialorder %v4279_v44, 0.0 }
 0x531   : > { %v3967_v52 = vsel %vm3841_vm12, %v3772_v0, %v3904_v32  ;;  %v3777_v56 = vadd.f32 %v10017_v36, %v3776_v55  ;;  %v6783_v30 = vpop.f32.mrb[189].mxu0  ;;  %v4283_v37 = vpop.f32.mrb[198].mxu1 }
 0x532   : > { %v4284_v14 = vadd.f32 %v10060_v4, %v4283_v37  ;;  %v6826_v60 = vpop.f32.mrb[199].mxu1  ;;  %6984 = vmatmul.mubr.msk.f32.gmra.mrb[48].mxu1 %vm3984_vm8, %v3967_v52  ;;  %v4690_v48 = vsel %vm4564_vm13, %v4279_v44, %v4627_v38 }
 0x533   : > { %vm3842_vm15 = vcmp.ge.f32.partialorder %v3777_v56, 0.0  ;;  %v3905_v10 = vmul.f32 0.01, %v3777_v56  ;;  %v5146_v6 = vsel %vm5124_vm10, %v4690_v48, -inf  ;;  %6986 = vmatprep.mubr.msk.f32.mxu1 %vm7638_vm5, %v7637_v40  ;;  %v4953_v48 = vld [vmem:[%s10600_s15 + $0x18] sm:$0xff] }
 0x534   : > { %v4628_v50 = vmul.f32 0.01, %v4284_v14  ;;  %v4243_v23 = vpop.f32.mrb[190].mxu0  ;;  %5147 = vmax.xlane.f32.xlu1 %v5146_v6  ;;  %vm4565_vm0 = vcmp.ge.f32.partialorder %v4284_v14, 0.0  ;;  %v4952_v6 = vld [vmem:[%s10600_s15 + $0x10] sm:$0xff] }
 0x535   : > { %v3968_v36 = vsel %vm3842_vm15, %v3777_v56, %v3905_v10  ;;  %v4244_v62 = vadd.f32 %v10060_v4, %v4243_v23  ;;  %v6802_v45 = vpop.f32.mrb[191].mxu0  ;;  %v4288_v16 = vpop.f32.mrb[200].mxu1 }
 0x536   : > { %v4289_v18 = vadd.f32 %v10060_v4, %v4288_v16  ;;  %v6829_v21 = vpop.f32.mrb[201].mxu1  ;;  %6987 = vmatmul.mubr.msk.f32.gmra.mrb[50].mxu1 %vm3984_vm8, %v3968_v36  ;;  %v4691_v17 = vsel %vm4565_vm0, %v4284_v14, %v4628_v50 }
 0x537   : > { %v4620_v58 = vmul.f32 0.01, %v4244_v62  ;;  %v5149_v26 = vsel %vm5124_vm10, %v4691_v17, -inf  ;;  %vm4557_vm4 = vcmp.ge.f32.partialorder %v4244_v62, 0.0 }
 0x538   : > { %v4629_v3 = vmul.f32 0.01, %v4289_v18  ;;  %v4248_v19 = vpop.f32.mrb[192].mxu0  ;;  %5150 = vmax.xlane.f32.xlu0 %v5149_v26  ;;  %vm4566_vm7 = vcmp.ge.f32.partialorder %v4289_v18, 0.0  ;;  %v4955_v26 = vld [vmem:[%s10600_s15 + $0x28] sm:$0xff] }
 0x539   : > { %v4249_v53 = vadd.f32 %v10060_v4, %v4248_v19  ;;  %v6805_v9 = vpop.f32.mrb[193].mxu0  ;;  %v4293_v11 = vpop.f32.mrb[202].mxu1  ;;  %v4683_v5 = vsel %vm4557_vm4, %v4244_v62, %v4620_v58 }
 0x53a   : > { %v4294_v49 = vadd.f32 %v10060_v4, %v4293_v11  ;;  %v6832_v35 = vpop.f32.mrb[203].mxu1  ;;  %v5125_v24 = vsel %vm5124_vm10, %v4683_v5, -inf  ;;  %v4692_v8 = vsel %vm4566_vm7, %v4289_v18, %v4629_v3  ;;  %v4954_v3 = vld [vmem:[%s10600_s15 + $0x20] sm:$0xff] }
 0x53b   : > { %v4621_v41 = vmul.f32 0.01, %v4249_v53  ;;  %5126 = vmax.xlane.f32.xlu1 %v5125_v24  ;;  %vm4558_vm2 = vcmp.ge.f32.partialorder %v4249_v53, 0.0  ;;  %v5152_v29 = vsel %vm5124_vm10, %v4692_v8, -inf  ;;  %v4957_v8 = vld [vmem:[%s10600_s15 + $0x38] sm:$0xff] }
 0x53c   : > { %v4630_v42 = vmul.f32 0.01, %v4294_v49  ;;  %v4253_v2 = vpop.f32.mrb[194].mxu0  ;;  %vm4567_vm8 = vcmp.ge.f32.partialorder %v4294_v49, 0.0 }
 0x53d   : > { %v4254_v46 = vadd.f32 %v10060_v4, %v4253_v2  ;;  %v6808_v13 = vpop.f32.mrb[195].mxu0  ;;  %v4298_v39 = vpop.f32.mrb[204].mxu1  ;;  %v4684_v63 = vsel %vm4558_vm2, %v4249_v53, %v4621_v41 }
 0x53e   : > { %v4299_v33 = vadd.f32 %v10060_v4, %v4298_v39  ;;  %v6835_v47 = vpop.f32.mrb[205].mxu1  ;;  %v4693_v25 = vsel %vm4567_vm8, %v4294_v49, %v4630_v42  ;;  %v5128_v0 = vsel %vm5124_vm10, %v4684_v63, -inf  ;;  %v4956_v42 = vld [vmem:[%s10600_s15 + $0x30] sm:$0xff] }
 0x53f   : > { %v4622_v57 = vmul.f32 0.01, %v4254_v46  ;;  %5153 = vmax.xlane.f32.xlu1 %v5152_v29  ;;  %v5155_v61 = vsel %vm5124_vm10, %v4693_v25, -inf  ;;  %vm4559_vm14 = vcmp.ge.f32.partialorder %v4254_v46, 0.0 }
 0x540   : > { %v4631_v51 = vmul.f32 0.01, %v4299_v33  ;;  %v4258_v22 = vpop.f32.mrb[196].mxu0  ;;  %5156 = vmax.xlane.f32.xlu0 %v5155_v61  ;;  %vm4568_vm9 = vcmp.ge.f32.partialorder %v4299_v33, 0.0  ;;  %v4958_v61 = vld [vmem:[%s10600_s15 + $0x40] sm:$0xff] }
 0x541   : > { %v4259_v54 = vadd.f32 %v10060_v4, %v4258_v22  ;;  %v6811_v12 = vpop.f32.mrb[197].mxu0  ;;  %v4303_v31 = vpop.f32.mrb[206].mxu1  ;;  %v4685_v34 = vsel %vm4559_vm14, %v4254_v46, %v4622_v57  ;;  %v4959_v57 = vld [vmem:[%s10600_s15 + $0x48] sm:$0xff] }
 0x542   : > { %v4304_v20 = vadd.f32 %v10060_v4, %v4303_v31  ;;  %v6838_v59 = vpop.f32.mrb[207].mxu1  ;;  %v5131_v15 = vsel %vm5124_vm10, %v4685_v34, -inf  ;;  %v4694_v1 = vsel %vm4568_vm9, %v4299_v33, %v4631_v51 }
 0x543   : > { %v4623_v44 = vmul.f32 0.01, %v4259_v54  ;;  %5129 = vmax.xlane.f32.xlu1 %v5128_v0  ;;  %vm4560_vm3 = vcmp.ge.f32.partialorder %v4259_v54, 0.0  ;;  %v5158_v14 = vsel %vm5124_vm10, %v4694_v1, -inf }
 0x544   : > { %v4632_v32 = vmul.f32 0.01, %v4304_v20  ;;  %5132 = vmax.xlane.f32.xlu0 %v5131_v15  ;;  %v7005_v7 = vpop.f32.mrb[198].mxu0  ;;  %vm4569_vm11 = vcmp.ge.f32.partialorder %v4304_v20, 0.0  ;;  %v4961_v15 = vld [vmem:[%s10600_s15 + $0x58] sm:$0xff] }
 0x545   : > { %v4967_v38 = vmul.f32 %v7005_v7, %v4951_v43  ;;  %v4308_v55 = vpop.f32.mrb[208].mxu1  ;;  %v4871_v52 = vpop.f32.mrb[199].mxu0  ;;  %v4686_v50 = vsel %vm4560_vm3, %v4259_v54, %v4623_v44  ;;  %v4960_v44 = vld [vmem:[%s10600_s15 + $0x50] sm:$0xff] }
 0x546   : > { %v4309_v56 = vadd.f32 %v10060_v4, %v4308_v55  ;;  %v4966_v30 = vmul.f32 %v4950_v27, %v4871_v52  ;;  %v6841_v37 = vpop.f32.mrb[209].mxu1  ;;  %v4695_v60 = vsel %vm4569_vm11, %v4304_v20, %v4632_v32  ;;  %v5134_v58 = vsel %vm5124_vm10, %v4686_v50, -inf }
 0x547   : > { %5159 = vmax.xlane.f32.xlu1 %v5158_v14  ;;  %v5161_v10 = vsel %vm5124_vm10, %v4695_v60, -inf  ;;  %v4963_v14 = vld [vmem:[%s10600_s15 + $0x68] sm:$0xff] }
 0x548   : > { %v4633_v23 = vmul.f32 0.01, %v4309_v56  ;;  %v7428_v36 = vpack.c.bf16 %v4967_v38, %v4966_v30  ;;  %5162 = vmax.xlane.f32.xlu0 %v5161_v10  ;;  %v7008_v62 = vpop.f32.mrb[200].mxu0  ;;  %vm4570_vm12 = vcmp.ge.f32.partialorder %v4309_v56, 0.0 }
 0x549   : > { %v4969_v45 = vmul.f32 %v7008_v62, %v4953_v48  ;;  %v10123_v16 = vpop.f32.mrb[210].mxu1  ;;  %v4881_v18 = vpop.f32.mrb[201].mxu0  ;;  %v4962_v48 = vld [vmem:[%s10600_s15 + $0x60] sm:$0xff] }
 0x54a   : > { %v4968_v21 = vmul.f32 %v4952_v6, %v4881_v18  ;;  %v6844_v17 = vpop.f32.mrb[211].mxu1  ;;  %7429 = vmatpush3.bf16.msra.mxu0 %v7428_v36  ;;  %v4696_v19 = vsel %vm4570_vm12, %v4309_v56, %v4633_v23 }
 0x54b   : > { %5135 = vmax.xlane.f32.xlu1 %v5134_v58  ;;  %7430 = vmatprep.subr.bf16.mxu0 %v7636_v28  ;;  %v5164_v41 = vsel %vm5124_vm10, %v4696_v19, -inf  ;;  %v4965_v58 = vld [vmem:[%s10600_s15 + $0x78] sm:$0xff] }
 0x54c   : > { %v7431_v53 = vpack.c.bf16 %v4969_v45, %v4968_v21  ;;  %v7011_v9 = vpop.f32.mrb[202].mxu0 }
 0x54d   : > { %v4971_v11 = vmul.f32 %v7011_v9, %v4955_v26  ;;  %v10133_v5 = vpop.f32.mrb[212].mxu1  ;;  %v4891_v49 = vpop.f32.mrb[203].mxu0 }
 0x54e   : > { %v4970_v35 = vmul.f32 %v4954_v3, %v4891_v49  ;;  %v6847_v24 = vpop.f32.mrb[213].mxu1  ;;  %7432 = vmatpush3.bf16.msra.mxu0 %v7431_v53  ;;  %v4964_v3 = vld [vmem:[%s10600_s15 + $0x70] sm:$0xff] }
 0x54f   : > { %5165 = vmax.xlane.f32.xlu1 %v5164_v41  ;;  %7433 = vmatprep.subr.bf16.mxu0 %v7636_v28 }
 0x550   : > { %v7434_v2 = vpack.c.bf16 %v4971_v11, %v4970_v35  ;;  %v7014_v46 = vpop.f32.mrb[204].mxu0 }
 0x551   : > { %v4973_v13 = vmul.f32 %v7014_v46, %v4957_v8  ;;  %v4323_v39 = vpop.f32.mrb[214].mxu1  ;;  %v4901_v33 = vpop.f32.mrb[205].mxu0 }
 0x552   : > { %v4324_v47 = vadd.f32 %v10060_v4, %v4323_v39  ;;  %v4972_v29 = vmul.f32 %v4956_v42, %v4901_v33  ;;  %v6850_v25 = vpop.f32.mrb[215].mxu1  ;;  %7435 = vmatpush3.bf16.msra.mxu0 %v7434_v2 }
 0x553   : > { %7436 = vmatprep.subr.bf16.mxu0 %v7636_v28 }
 0x554   : > { %v4636_v63 = vmul.f32 0.01, %v4324_v47  ;;  %v7437_v51 = vpack.c.bf16 %v4973_v13, %v4972_v29  ;;  %v7017_v22 = vpop.f32.mrb[206].mxu0  ;;  %vm4573_vm13 = vcmp.ge.f32.partialorder %v4324_v47, 0.0 }
 0x555   : > { %v4975_v54 = vmul.f32 %v7017_v22, %v4959_v57  ;;  %v4328_v12 = vpop.f32.mrb[216].mxu1  ;;  %v4911_v31 = vpop.f32.mrb[207].mxu0 }
 0x556   : > { %v4329_v34 = vadd.f32 %v10060_v4, %v4328_v12  ;;  %v4974_v20 = vmul.f32 %v4958_v61, %v4911_v31  ;;  %v6853_v59 = vpop.f32.mrb[217].mxu1  ;;  %7438 = vmatpush3.bf16.msra.mxu0 %v7437_v51  ;;  %v4699_v0 = vsel %vm4573_vm13, %v4324_v47, %v4636_v63 }
 0x557   : > { %v5173_v43 = vsel %vm5124_vm10, %v4699_v0, -inf  ;;  %7439 = vmatprep.subr.bf16.mxu0 %v7636_v28  ;;  %v4982_v0 = vld [vmem:[%s10601_s16] sm:$0xff] }
 0x558   : > { %v4637_v27 = vmul.f32 0.01, %v4329_v34  ;;  %v7440_v1 = vpack.c.bf16 %v4975_v54, %v4974_v20  ;;  %5174 = vmax.xlane.f32.xlu0 %v5173_v43  ;;  %v7020_v32 = vpop.f32.mrb[208].mxu0  ;;  %vm4574_vm15 = vcmp.ge.f32.partialorder %v4329_v34, 0.0 }
 0x559   : > { %v4977_v7 = vmul.f32 %v7020_v32, %v4961_v15  ;;  %v4333_v38 = vpop.f32.mrb[218].mxu1  ;;  %v4921_v55 = vpop.f32.mrb[209].mxu0 }
 0x55a   : > { %v4334_v52 = vadd.f32 %v10060_v4, %v4333_v38  ;;  %v4976_v56 = vmul.f32 %v4960_v44, %v4921_v55  ;;  %v6856_v30 = vpop.f32.mrb[219].mxu1  ;;  %7441 = vmatpush3.bf16.msra.mxu0 %v7440_v1  ;;  %v4700_v37 = vsel %vm4574_vm15, %v4329_v34, %v4637_v27 }
 0x55b   : > { %v5176_v60 = vsel %vm5124_vm10, %v4700_v37, -inf  ;;  %7442 = vmatprep.subr.bf16.mxu0 %v7636_v28 }
 0x55c   : > { %v4638_v10 = vmul.f32 0.01, %v4334_v52  ;;  %v7443_v6 = vpack.c.bf16 %v4977_v7, %v4976_v56  ;;  %5177 = vmax.xlane.f32.xlu0 %v5176_v60  ;;  %v7023_v50 = vpop.f32.mrb[210].mxu0  ;;  %vm4575_vm0 = vcmp.ge.f32.partialorder %v4334_v52, 0.0 }
 0x55d   : > { %v4979_v23 = vmul.f32 %v7023_v50, %v4963_v14  ;;  %v4338_v36 = vpop.f32.mrb[220].mxu1  ;;  %v4931_v62 = vpop.f32.mrb[211].mxu0 }
 0x55e   : > { %v4339_v45 = vadd.f32 %v10060_v4, %v4338_v36  ;;  %v4978_v18 = vmul.f32 %v4962_v48, %v4931_v62  ;;  %v6859_v21 = vpop.f32.mrb[221].mxu1  ;;  %7444 = vmatpush3.bf16.msra.mxu0 %v7443_v6  ;;  %v4701_v17 = vsel %vm4575_vm0, %v4334_v52, %v4638_v10 }
 0x55f   : > { %v5179_v26 = vsel %vm5124_vm10, %v4701_v17, -inf  ;;  %7445 = vmatprep.subr.bf16.mxu0 %v7636_v28 }
 0x560   : > { %v4639_v19 = vmul.f32 0.01, %v4339_v45  ;;  %v7446_v53 = vpack.c.bf16 %v4979_v23, %v4978_v18  ;;  %5180 = vmax.xlane.f32.xlu0 %v5179_v26  ;;  %v7026_v9 = vpop.f32.mrb[212].mxu0  ;;  %vm4576_vm4 = vcmp.ge.f32.partialorder %v4339_v45, 0.0 }
 0x561   : > { %v4981_v11 = vmul.f32 %v7026_v9, %v4965_v58  ;;  %v4343_v49 = vpop.f32.mrb[222].mxu1  ;;  %v4941_v35 = vpop.f32.mrb[213].mxu0 }
 0x562   : > { %v4344_v24 = vadd.f32 %v10060_v4, %v4343_v49  ;;  %v4980_v41 = vmul.f32 %v4964_v3, %v4941_v35  ;;  %v6862_v8 = vpop.f32.mrb[223].mxu1  ;;  %7447 = vmatpush3.bf16.msra.mxu0 %v7446_v53  ;;  %v4702_v42 = vsel %vm4576_vm4, %v4339_v45, %v4639_v19 }
 0x563   : > { %v5182_v2 = vsel %vm5124_vm10, %v4702_v42, -inf  ;;  %7448 = vmatprep.subr.bf16.mxu0 %v7636_v28  ;;  %v4314_v8 = vadd.f32 %v10060_v4, %v10123_v16 }
 0x564   : > { %v4640_v46 = vmul.f32 0.01, %v4344_v24  ;;  %v7449_v13 = vpack.c.bf16 %v4981_v11, %v4980_v41  ;;  %5183 = vmax.xlane.f32.xlu1 %v5182_v2  ;;  %vm4577_vm7 = vcmp.ge.f32.partialorder %v4344_v24, 0.0 }
 0x565   : > { %v4348_v39 = vpop.f32.mrb[224].mxu1  ;;  %vm4571_vm4 = vcmp.ge.f32.partialorder %v4314_v8, 0.0 }
 0x566   : > { %v4349_v33 = vadd.f32 %v10060_v4, %v4348_v39  ;;  %v6865_v47 = vpop.f32.mrb[225].mxu1  ;;  %7450 = vmatpush3.bf16.msra.mxu0 %v7449_v13  ;;  %v4703_v29 = vsel %vm4577_vm7, %v4344_v24, %v4640_v46 }
 0x567   : > { %v5185_v25 = vsel %vm5124_vm10, %v4703_v29, -inf  ;;  %v4634_v47 = vmul.f32 0.01, %v4314_v8  ;;  %v4319_v29 = vadd.f32 %v10060_v4, %v10133_v5 }
 0x568   : > { %v4641_v57 = vmul.f32 0.01, %v4349_v33  ;;  %5186 = vmax.xlane.f32.xlu0 %v5185_v25  ;;  %vm4578_vm8 = vcmp.ge.f32.partialorder %v4349_v33, 0.0 }
 0x569   : > { %v4353_v61 = vpop.f32.mrb[226].mxu1  ;;  %7060 = vmatmul.mubr.f32.vlgmr.msra.gmra.mrb[214].mxu0 %v4982_v0 }
 0x56a   : > { %v4354_v63 = vadd.f32 %v10060_v4, %v4353_v61  ;;  %v6868_v51 = vpop.f32.mrb[227].mxu1  ;;  %v4704_v22 = vsel %vm4578_vm8, %v4349_v33, %v4641_v57  ;;  %vm4572_vm8 = vcmp.ge.f32.partialorder %v4319_v29, 0.0 }
 0x56b   : > { %v5188_v54 = vsel %vm5124_vm10, %v4704_v22, -inf  ;;  %v4635_v22 = vmul.f32 0.01, %v4319_v29 }
 0x56c   : > { %v4642_v12 = vmul.f32 0.01, %v4354_v63  ;;  %5189 = vmax.xlane.f32.xlu1 %v5188_v54  ;;  %vm4579_vm2 = vcmp.ge.f32.partialorder %v4354_v63, 0.0 }
 0x56d   : > { %v4358_v31 = vpop.f32.mrb[228].mxu1 }
 0x56e   : > { %v4359_v34 = vadd.f32 %v10060_v4, %v4358_v31  ;;  %v6871_v20 = vpop.f32.mrb[229].mxu1  ;;  %v4705_v59 = vsel %vm4579_vm2, %v4354_v63, %v4642_v12  ;;  %v4697_v12 = vsel %vm4571_vm4, %v4314_v8, %v4634_v47 }
 0x56f   : > { %v5191_v15 = vsel %vm5124_vm10, %v4705_v59, -inf  ;;  %v5167_v59 = vsel %vm5124_vm10, %v4697_v12, -inf }
 0x570   : > { %v4643_v43 = vmul.f32 0.01, %v4359_v34  ;;  %5192 = vmax.xlane.f32.xlu0 %v5191_v15  ;;  %vm4580_vm14 = vcmp.ge.f32.partialorder %v4359_v34, 0.0 }
 0x571   : > { %v4363_v44 = vpop.f32.mrb[230].mxu1 }
 0x572   : > { %v4364_v27 = vadd.f32 %v10060_v4, %v4363_v44  ;;  %v6874_v1 = vpop.f32.mrb[231].mxu1  ;;  %v4706_v32 = vsel %vm4580_vm14, %v4359_v34, %v4643_v43  ;;  %v4698_v43 = vsel %vm4572_vm8, %v4319_v29, %v4635_v22 }
 0x573   : > { %v5194_v7 = vsel %vm5124_vm10, %v4706_v32, -inf }
 0x574   : > { %v4644_v38 = vmul.f32 0.01, %v4364_v27  ;;  %5195 = vmax.xlane.f32.xlu1 %v5194_v7  ;;  %vm4581_vm9 = vcmp.ge.f32.partialorder %v4364_v27, 0.0  ;;  %v5170_v7 = vsel %vm5124_vm10, %v4698_v43, -inf }
 0x575   : > { %v4368_v55 = vpop.f32.mrb[232].mxu1 }
 0x576   : > { %v4369_v52 = vadd.f32 %v10060_v4, %v4368_v55  ;;  %v6877_v56 = vpop.f32.mrb[233].mxu1  ;;  %v4707_v30 = vsel %vm4581_vm9, %v4364_v27, %v4644_v38 }
 0x577   : > { %v5197_v37 = vsel %vm5124_vm10, %v4707_v30, -inf }
 0x578   : > { %v4645_v14 = vmul.f32 0.01, %v4369_v52  ;;  %5198 = vmax.xlane.f32.xlu0 %v5197_v37  ;;  %vm4582_vm11 = vcmp.ge.f32.partialorder %v4369_v52, 0.0 }
 0x579   : > { %v4373_v60 = vpop.f32.mrb[234].mxu1 }
 0x57a   : > { %v4374_v48 = vadd.f32 %v10060_v4, %v4373_v60  ;;  %v6880_v10 = vpop.f32.mrb[235].mxu1  ;;  %v4708_v6 = vsel %vm4582_vm11, %v4369_v52, %v4645_v14 }
 0x57b   : > { %v5200_v50 = vsel %vm5124_vm10, %v4708_v6, -inf }
 0x57c   : > { %v4646_v23 = vmul.f32 0.01, %v4374_v48  ;;  %5201 = vmax.xlane.f32.xlu1 %v5200_v50  ;;  %vm4583_vm3 = vcmp.ge.f32.partialorder %v4374_v48, 0.0 }
 0x57d   : > { %v4378_v36 = vpop.f32.mrb[236].mxu1 }
 0x57e   : > { %v4379_v62 = vadd.f32 %v10060_v4, %v4378_v36  ;;  %v6883_v45 = vpop.f32.mrb[237].mxu1  ;;  %v4709_v18 = vsel %vm4583_vm3, %v4374_v48, %v4646_v23 }
 0x57f   : > { %v5203_v21 = vsel %vm5124_vm10, %v4709_v18, -inf }
 0x580   : > { %v4647_v17 = vmul.f32 0.01, %v4379_v62  ;;  %5204 = vmax.xlane.f32.xlu0 %v5203_v21  ;;  %vm4584_vm12 = vcmp.ge.f32.partialorder %v4379_v62, 0.0 }
 0x581   : > { %v4383_v58 = vpop.f32.mrb[238].mxu1 }
 0x582   : > { %v4384_v26 = vadd.f32 %v10060_v4, %v4383_v58  ;;  %v6886_v3 = vpop.f32.mrb[239].mxu1  ;;  %v4710_v19 = vsel %vm4584_vm12, %v4379_v62, %v4647_v17 }
 0x583   : > { %v5206_v53 = vsel %vm5124_vm10, %v4710_v19, -inf }
 0x584   : > { %v4648_v9 = vmul.f32 0.01, %v4384_v26  ;;  %5207 = vmax.xlane.f32.xlu1 %v5206_v53  ;;  %vm4585_vm13 = vcmp.ge.f32.partialorder %v4384_v26, 0.0 }
 0x585   : > { %v4388_v11 = vpop.f32.mrb[240].mxu1 }
 0x586   : > { %v4389_v49 = vadd.f32 %v10060_v4, %v4388_v11  ;;  %v6889_v35 = vpop.f32.mrb[241].mxu1  ;;  %v4711_v24 = vsel %vm4585_vm13, %v4384_v26, %v4648_v9 }
 0x587   : > { %v5209_v41 = vsel %vm5124_vm10, %v4711_v24, -inf }
 0x588   : > { %v4649_v42 = vmul.f32 0.01, %v4389_v49  ;;  %5210 = vmax.xlane.f32.xlu0 %v5209_v41  ;;  %vm4586_vm15 = vcmp.ge.f32.partialorder %v4389_v49, 0.0 }
 0x589   : > { %v4393_v2 = vpop.f32.mrb[242].mxu1 }
 0x58a   : > { %v4394_v46 = vadd.f32 %v10060_v4, %v4393_v2  ;;  %v6892_v13 = vpop.f32.mrb[243].mxu1  ;;  %v4712_v39 = vsel %vm4586_vm15, %v4389_v49, %v4649_v42  ;;  %v5378_v2 = vld [vmem:[%s10604_s19 + $0x8] sm:$0xff] }
 0x58b   : > { %v5212_v33 = vsel %vm5124_vm10, %v4712_v39, -inf  ;;  %5448 = vmatprep.mubr.f32.mxu0 %v5378_v2 }
 0x58c   : > { %v4650_v25 = vmul.f32 0.01, %v4394_v46  ;;  %5213 = vmax.xlane.f32.xlu1 %v5212_v33  ;;  %vm4587_vm0 = vcmp.ge.f32.partialorder %v4394_v46, 0.0 }
 0x58d   : > { %v4398_v57 = vpop.f32.mrb[244].mxu1 }
 0x58e   : > { %v4399_v16 = vadd.f32 %v10060_v4, %v4398_v57  ;;  %v6895_v61 = vpop.f32.mrb[245].mxu1  ;;  %v4713_v63 = vsel %vm4587_vm0, %v4394_v46, %v4650_v25 }
 0x58f   : > { %v5215_v51 = vsel %vm5124_vm10, %v4713_v63, -inf }
 0x590   : > { %v4651_v54 = vmul.f32 0.01, %v4399_v16  ;;  %5216 = vmax.xlane.f32.xlu0 %v5215_v51  ;;  %vm4588_vm7 = vcmp.ge.f32.partialorder %v4399_v16, 0.0 }
 0x591   : > { %v4403_v31 = vpop.f32.mrb[246].mxu1 }
 0x592   : > { %v4404_v5 = vadd.f32 %v10060_v4, %v4403_v31  ;;  %v6898_v34 = vpop.f32.mrb[247].mxu1  ;;  %v4714_v20 = vsel %vm4588_vm7, %v4399_v16, %v4651_v54 }
 0x593   : > { %v5218_v0 = vsel %vm5124_vm10, %v4714_v20, -inf }
 0x594   : > { %v4652_v15 = vmul.f32 0.01, %v4404_v5  ;;  %5168 = vmax.xlane.f32.xlu0 %v5167_v59  ;;  %5219 = vmax.xlane.f32.xlu1 %v5218_v0  ;;  %vm4589_vm2 = vcmp.ge.f32.partialorder %v4404_v5, 0.0 }
 0x595   : > { %v4408_v44 = vpop.f32.mrb[248].mxu1 }
 0x596   : > { %v4409_v27 = vadd.f32 %v10060_v4, %v4408_v44  ;;  %v6901_v1 = vpop.f32.mrb[249].mxu1  ;;  %v4715_v32 = vsel %vm4589_vm2, %v4404_v5, %v4652_v15 }
 0x597   : > { %v5221_v38 = vsel %vm5124_vm10, %v4715_v32, -inf }
 0x598   : > { %v4653_v55 = vmul.f32 0.01, %v4409_v27  ;;  %5171 = vmax.xlane.f32.xlu1 %v5170_v7  ;;  %5222 = vmax.xlane.f32.xlu0 %v5221_v38  ;;  %vm4590_vm14 = vcmp.ge.f32.partialorder %v4409_v27, 0.0 }
 0x599   : > { %v4413_v52 = vpop.f32.mrb[250].mxu1 }
 0x59a   : > { %v4414_v56 = vadd.f32 %v10060_v4, %v4413_v52  ;;  %v6904_v30 = vpop.f32.mrb[251].mxu1  ;;  %v4716_v37 = vsel %vm4590_vm14, %v4409_v27, %v4653_v55 }
 0x59b   : > { %v5224_v14 = vsel %vm5124_vm10, %v4716_v37, -inf }
 0x59c   : > { %v4654_v60 = vmul.f32 0.01, %v4414_v56  ;;  %5225 = vmax.xlane.f32.xlu1 %v5224_v14  ;;  %vm4591_vm9 = vcmp.ge.f32.partialorder %v4414_v56, 0.0 }
 0x59d   : > { %v4418_v48 = vpop.f32.mrb[252].mxu1 }
 0x59e   : > { %v4419_v10 = vadd.f32 %v10060_v4, %v4418_v48  ;;  %v6907_v6 = vpop.f32.mrb[253].mxu1  ;;  %v4717_v50 = vsel %vm4591_vm9, %v4414_v56, %v4654_v60 }
 0x59f   : > { %v5227_v23 = vsel %vm5124_vm10, %v4717_v50, -inf }
 0x5a0   : > { %v4655_v36 = vmul.f32 0.01, %v4419_v10  ;;  %5228 = vmax.xlane.f32.xlu0 %v5227_v23  ;;  %vm4592_vm11 = vcmp.ge.f32.partialorder %v4419_v10, 0.0 }
 0x5a1   : > { %v4423_v62 = vpop.f32.mrb[254].mxu1 }
 0x5a2   : > { %v4424_v45 = vadd.f32 %v10060_v4, %v4423_v62  ;;  %v6910_v18 = vpop.f32.mrb[255].mxu1  ;;  %v4718_v21 = vsel %vm4592_vm11, %v4419_v10, %v4655_v36 }
 0x5a3   : > { %v5230_v17 = vsel %vm5124_vm10, %v4718_v21, -inf }
 0x5a4   : > { %v4656_v58 = vmul.f32 0.01, %v4424_v45  ;;  %5231 = vmax.xlane.f32.xlu1 %v5230_v17  ;;  %vm4593_vm3 = vcmp.ge.f32.partialorder %v4424_v45, 0.0 }
 0x5a5   : > { %v4428_v26 = vpop.f32.mrb[0].mxu1 }
 0x5a6   : > { %v4429_v3 = vadd.f32 %v10060_v4, %v4428_v26  ;;  %v6913_v19 = vpop.f32.mrb[1].mxu1  ;;  %v4719_v53 = vsel %vm4593_vm3, %v4424_v45, %v4656_v58 }
 0x5a7   : > { %v5233_v9 = vsel %vm5124_vm10, %v4719_v53, -inf }
 0x5a8   : > { %v4657_v11 = vmul.f32 0.01, %v4429_v3  ;;  %5234 = vmax.xlane.f32.xlu0 %v5233_v9  ;;  %vm4594_vm12 = vcmp.ge.f32.partialorder %v4429_v3, 0.0 }
 0x5a9   : > { %v4433_v49 = vpop.f32.mrb[2].mxu1 }
 0x5aa   : > { %v4434_v35 = vadd.f32 %v10060_v4, %v4433_v49  ;;  %v6916_v24 = vpop.f32.mrb[3].mxu1  ;;  %v4720_v41 = vsel %vm4594_vm12, %v4429_v3, %v4657_v11 }
 0x5ab   : > { %v5236_v8 = vsel %vm5124_vm10, %v4720_v41, -inf }
 0x5ac   : > { %v4658_v42 = vmul.f32 0.01, %v4434_v35  ;;  %5237 = vmax.xlane.f32.xlu1 %v5236_v8  ;;  %vm4595_vm13 = vcmp.ge.f32.partialorder %v4434_v35, 0.0 }
 0x5ad   : > { %v4438_v46 = vpop.f32.mrb[4].mxu1 }
 0x5ae   : > { %v4439_v13 = vadd.f32 %v10060_v4, %v4438_v46  ;;  %v6919_v39 = vpop.f32.mrb[5].mxu1  ;;  %v4721_v33 = vsel %vm4595_vm13, %v4434_v35, %v4658_v42 }
 0x5af   : > { %v5239_v47 = vsel %vm5124_vm10, %v4721_v33, -inf }
 0x5b0   : > { %v4659_v29 = vmul.f32 0.01, %v4439_v13  ;;  %5240 = vmax.xlane.f32.xlu0 %v5239_v47  ;;  %vm4596_vm15 = vcmp.ge.f32.partialorder %v4439_v13, 0.0 }
 0x5b1   : > { %v4443_v25 = vpop.f32.mrb[6].mxu1 }
 0x5b2   : > { %v4444_v57 = vadd.f32 %v10060_v4, %v4443_v25  ;;  %v6922_v16 = vpop.f32.mrb[7].mxu1  ;;  %v4722_v61 = vsel %vm4596_vm15, %v4439_v13, %v4659_v29 }
 0x5b3   : > { %v5242_v63 = vsel %vm5124_vm10, %v4722_v61, -inf  ;;  %v10268_v16 = vld [vmem:[%s10598_s13] ss:$0 sm:$0xff] }
 0x5b4   : > { %v4660_v51 = vmul.f32 0.01, %v4444_v57  ;;  %5243 = vmax.xlane.f32.xlu1 %v5242_v63  ;;  %vm4597_vm0 = vcmp.ge.f32.partialorder %v4444_v57, 0.0 }
 0x5b5   : > { %v4448_v22 = vpop.f32.mrb[8].mxu1  ;;  %v10245_v45 = vpop.xlane.xlu0 %5138 }
 0x5b6   : > { %v4449_v54 = vadd.f32 %v10060_v4, %v4448_v22  ;;  %v6925_v12 = vpop.f32.mrb[9].mxu1  ;;  %v4723_v31 = vsel %vm4597_vm0, %v4444_v57, %v4660_v51 }
 0x5b7   : > { %v5245_v5 = vsel %vm5124_vm10, %v4723_v31, -inf }
 0x5b8   : > { %v4661_v34 = vmul.f32 0.01, %v4449_v54  ;;  %5246 = vmax.xlane.f32.xlu0 %v5245_v5  ;;  %vm4598_vm4 = vcmp.ge.f32.partialorder %v4449_v54, 0.0 }
 0x5b9   : > { %v4453_v20 = vpop.f32.mrb[10].mxu1  ;;  %v10241_v10 = vpop.xlane.xlu1 %5141 }
 0x5ba   : > { %v4454_v59 = vadd.f32 %v10060_v4, %v4453_v20  ;;  %v6928_v0 = vpop.f32.mrb[11].mxu1  ;;  %v4724_v15 = vsel %vm4598_vm4, %v4449_v54, %v4661_v34 }
 0x5bb   : > { %v5248_v43 = vsel %vm5124_vm10, %v4724_v15, -inf }
 0x5bc   : > { %v4662_v44 = vmul.f32 0.01, %v4454_v59  ;;  %5249 = vmax.xlane.f32.xlu1 %v5248_v43  ;;  %vm4599_vm7 = vcmp.ge.f32.partialorder %v4454_v59, 0.0 }
 0x5bd   : > { %v4458_v27 = vpop.f32.mrb[12].mxu1  ;;  %v10251_v53 = vpop.xlane.xlu0 %5144 }
 0x5be   : > { %v4459_v1 = vadd.f32 %v10060_v4, %v4458_v27  ;;  %v6931_v32 = vpop.f32.mrb[13].mxu1  ;;  %v4725_v7 = vsel %vm4599_vm7, %v4454_v59, %v4662_v44 }
 0x5bf   : > { %v5251_v38 = vsel %vm5124_vm10, %v4725_v7, -inf }
 0x5c0   : > { %v4663_v55 = vmul.f32 0.01, %v4459_v1  ;;  %5252 = vmax.xlane.f32.xlu0 %v5251_v38  ;;  %vm4600_vm8 = vcmp.ge.f32.partialorder %v4459_v1, 0.0 }
 0x5c1   : > { %v4463_v52 = vpop.f32.mrb[14].mxu1  ;;  %v10247_v21 = vpop.xlane.xlu1 %5147 }
 0x5c2   : > { %v4464_v56 = vadd.f32 %v10060_v4, %v4463_v52  ;;  %v6934_v30 = vpop.f32.mrb[15].mxu1  ;;  %v4726_v37 = vsel %vm4600_vm8, %v4459_v1, %v4663_v55 }
 0x5c3   : > { %v5254_v14 = vsel %vm5124_vm10, %v4726_v37, -inf }
 0x5c4   : > { %v4664_v60 = vmul.f32 0.01, %v4464_v56  ;;  %5255 = vmax.xlane.f32.xlu1 %v5254_v14  ;;  %vm4601_vm2 = vcmp.ge.f32.partialorder %v4464_v56, 0.0 }
 0x5c5   : > { %v4468_v48 = vpop.f32.mrb[16].mxu1  ;;  %v10257_v42 = vpop.xlane.xlu0 %5150 }
 0x5c6   : > { %v4469_v6 = vadd.f32 %v10060_v4, %v4468_v48  ;;  %v6937_v50 = vpop.f32.mrb[17].mxu1  ;;  %v4727_v23 = vsel %vm4601_vm2, %v4464_v56, %v4664_v60 }
 0x5c7   : > { %v5257_v36 = vsel %vm5124_vm10, %v4727_v23, -inf }
 0x5c8   : > { %v4665_v62 = vmul.f32 0.01, %v4469_v6  ;;  %5258 = vmax.xlane.f32.xlu0 %v5257_v36  ;;  %vm4602_vm14 = vcmp.ge.f32.partialorder %v4469_v6, 0.0  ;;  %v10253_v11 = vpop.xlane.xlu1 %5126 }
 0x5c9   : > { %v4473_v18 = vpop.f32.mrb[18].mxu1 }
 0x5ca   : > { %v4474_v17 = vadd.f32 %v10060_v4, %v4473_v18  ;;  %v6940_v58 = vpop.f32.mrb[19].mxu1  ;;  %v4728_v26 = vsel %vm4602_vm14, %v4469_v6, %v4665_v62  ;;  %v5062_v6 = vld [vmem:[%s10603_s18 + $0x8] sm:$0xff]  ;;  %v5077_v18 = vld [vmem:[%s10603_s18 + $0x80] sm:$0xff] }
 0x5cb   : > { %v5260_v3 = vsel %vm5124_vm10, %v4728_v26, -inf  ;;  %v5078_v58 = vld [vmem:[%s10603_s18 + $0x88] sm:$0xff]  ;;  %v5061_v26 = vld [vmem:[%s10603_s18] sm:$0xff] }
 0x5cc   : > { %v4666_v19 = vmul.f32 0.01, %v4474_v17  ;;  %5261 = vmax.xlane.f32.xlu1 %v5260_v3  ;;  %vm4603_vm9 = vcmp.ge.f32.partialorder %v4474_v17, 0.0  ;;  %v10261_v47 = vpop.xlane.xlu1 %5153 }
 0x5cd   : > { %v4478_v9 = vpop.f32.mrb[20].mxu1  ;;  %v10263_v25 = vpop.xlane.xlu0 %5156 }
 0x5ce   : > { %v4479_v49 = vadd.f32 %v10060_v4, %v4478_v9  ;;  %v6943_v35 = vpop.f32.mrb[21].mxu1  ;;  %v4729_v24 = vsel %vm4603_vm9, %v4474_v17, %v4666_v19 }
 0x5cf   : > { %v5263_v41 = vsel %vm5124_vm10, %v4729_v24, -inf }
 0x5d0   : > { %v4667_v8 = vmul.f32 0.01, %v4479_v49  ;;  %5264 = vmax.xlane.f32.xlu0 %v5263_v41  ;;  %vm4604_vm11 = vcmp.ge.f32.partialorder %v4479_v49, 0.0  ;;  %v5130_v12 = vpop.xlane.xlu1 %5129 }
 0x5d1   : > { %v4483_v2 = vpop.f32.mrb[22].mxu1  ;;  %v10273_v20 = vpop.xlane.xlu0 %5132  ;;  %v5315_v19 = vmul.f32 %v5130_v12, %v5062_v6 }
 0x5d2   : > { %v4484_v46 = vadd.f32 %v10060_v4, %v4483_v2  ;;  %v6946_v13 = vpop.f32.mrb[23].mxu1  ;;  %v4730_v39 = vsel %vm4604_vm11, %v4479_v49, %v4667_v8 }
 0x5d3   : > { %v5266_v33 = vsel %vm5124_vm10, %v4730_v39, -inf }
 0x5d4   : > { %v4668_v29 = vmul.f32 0.01, %v4484_v46  ;;  %5267 = vmax.xlane.f32.xlu1 %v5266_v33  ;;  %vm4605_vm3 = vcmp.ge.f32.partialorder %v4484_v46, 0.0  ;;  %v10278_v32 = vpop.xlane.xlu1 %5159 }
 0x5d5   : > { %v4488_v57 = vpop.f32.mrb[24].mxu1  ;;  %v10280_v38 = vpop.xlane.xlu0 %5162 }
 0x5d6   : > { %v4489_v61 = vadd.f32 %v10268_v16, %v4488_v57  ;;  %v6949_v4 = vpop.f32.mrb[25].mxu1  ;;  %v4731_v63 = vsel %vm4605_vm3, %v4484_v46, %v4668_v29  ;;  %v5314_v46 = vmul.f32 %v10253_v11, %v5061_v26  ;;  %v5079_v11 = vld [vmem:[%s10603_s18 + $0x90] sm:$0xff] }
 0x5d7   : > { %v5269_v51 = vsel %vm5124_vm10, %v4731_v63, -inf  ;;  %v5064_v4 = vld [vmem:[%s10603_s18 + $0x18] sm:$0xff] }
 0x5d8   : > { %v4669_v22 = vmul.f32 0.01, %v4489_v61  ;;  %5270 = vmax.xlane.f32.xlu0 %v5269_v51  ;;  %vm4606_vm12 = vcmp.ge.f32.partialorder %v4489_v61, 0.0  ;;  %v5136_v62 = vpop.xlane.xlu1 %5135  ;;  %v7453_v29 = vpack.c.bf16 %v5315_v19, %v5314_v46 }
 0x5d9   : > { %v4493_v54 = vpop.f32.mrb[26].mxu1 }
 0x5da   : > { %v4494_v31 = vadd.f32 %v10268_v16, %v4493_v54  ;;  %v6952_v5 = vpop.f32.mrb[27].mxu1  ;;  %v4732_v34 = vsel %vm4606_vm12, %v4489_v61, %v4669_v22 }
 0x5db   : > { %v5272_v59 = vsel %vm5124_vm10, %v4732_v34, -inf  ;;  %v5063_v5 = vld [vmem:[%s10603_s18 + $0x10] sm:$0xff] }
 0x5dc   : > { %v4670_v0 = vmul.f32 0.01, %v4494_v31  ;;  %5273 = vmax.xlane.f32.xlu1 %v5272_v59  ;;  %vm4607_vm13 = vcmp.ge.f32.partialorder %v4494_v31, 0.0  ;;  %v10301_v57 = vpop.xlane.xlu1 %5165  ;;  %v5317_v59 = vmul.f32 %v5136_v62, %v5064_v4  ;;  %v5082_v62 = vld [vmem:[%s10603_s18 + $0xa8] sm:$0xff] }
 0x5dd   : > { %v4498_v15 = vpop.f32.mrb[28].mxu1 }
 0x5de   : > { %v4499_v43 = vadd.f32 %v10268_v16, %v4498_v15  ;;  %v6955_v44 = vpop.f32.mrb[29].mxu1  ;;  %v4733_v27 = vsel %vm4607_vm13, %v4494_v31, %v4670_v0  ;;  %v5080_v31 = vld [vmem:[%s10603_s18 + $0x98] sm:$0xff] }
 0x5df   : > { %v5275_v1 = vsel %vm5124_vm10, %v4733_v27, -inf }
 0x5e0   : > { %v4671_v7 = vmul.f32 0.01, %v4499_v43  ;;  %5276 = vmax.xlane.f32.xlu0 %v5275_v1  ;;  %vm4608_vm15 = vcmp.ge.f32.partialorder %v4499_v43, 0.0 }
 0x5e1   : > { %v4503_v55 = vpop.f32.mrb[30].mxu1 }
 0x5e2   : > { %v4504_v52 = vadd.f32 %v10268_v16, %v4503_v55  ;;  %v6958_v56 = vpop.f32.mrb[31].mxu1  ;;  %v4734_v30 = vsel %vm4608_vm15, %v4499_v43, %v4671_v7  ;;  %v5316_v55 = vmul.f32 %v10273_v20, %v5063_v5  ;;  %v5081_v20 = vld [vmem:[%s10603_s18 + $0xa0] sm:$0xff] }
 0x5e3   : > { %v5278_v37 = vsel %vm5124_vm10, %v4734_v30, -inf }
 0x5e4   : > { %v4672_v14 = vmul.f32 0.01, %v4504_v52  ;;  %5279 = vmax.xlane.f32.xlu1 %v5278_v37  ;;  %vm4609_vm0 = vcmp.ge.f32.partialorder %v4504_v52, 0.0  ;;  %v7457_v37 = vpack.c.bf16 %v5317_v59, %v5316_v55 }
 0x5e5   : > { %v5175_v60 = vpop.xlane.xlu0 %5174  ;;  %v4508_v48 = vpop.f32.mrb[32].mxu1 }
 0x5e6   : > { %v4509_v50 = vadd.f32 %v10268_v16, %v4508_v48  ;;  %v6961_v23 = vpop.f32.mrb[33].mxu1  ;;  %v4735_v36 = vsel %vm4609_vm0, %v4504_v52, %v4672_v14  ;;  %v5330_v35 = vmul.f32 %v5175_v60, %v5077_v18  ;;  %v5066_v60 = vld [vmem:[%s10603_s18 + $0x28] sm:$0xff]  ;;  %v5065_v18 = vld [vmem:[%s10603_s18 + $0x20] sm:$0xff] }
 0x5e7   : > { %v5281_v17 = vsel %vm5124_vm10, %v4735_v36, -inf }
 0x5e8   : > { %v4673_v3 = vmul.f32 0.01, %v4509_v50  ;;  %5282 = vmax.xlane.f32.xlu0 %v5281_v17  ;;  %vm4610_vm4 = vcmp.ge.f32.partialorder %v4509_v50, 0.0 }
 0x5e9   : > { %v5178_v9 = vpop.xlane.xlu0 %5177  ;;  %v4513_v49 = vpop.f32.mrb[34].mxu1 }
 0x5ea   : > { %v5331_v24 = vmul.f32 %v5178_v9, %v5078_v58  ;;  %v4514_v41 = vadd.f32 %v10268_v16, %v4513_v49  ;;  %v6964_v8 = vpop.f32.mrb[35].mxu1  ;;  %v4736_v2 = vsel %vm4610_vm4, %v4509_v50, %v4673_v3  ;;  %v5319_v58 = vmul.f32 %v10241_v10, %v5066_v60  ;;  %v5068_v10 = vld [vmem:[%s10603_s18 + $0x38] sm:$0xff]  ;;  %v5086_v60 = vld [vmem:[%s10603_s18 + $0xc8] sm:$0xff] }
 0x5eb   : > { %v5284_v13 = vsel %vm5124_vm10, %v4736_v2, -inf }
 0x5ec   : > { %v7451_v39 = vpack.c.bf16 %v5331_v24, %v5330_v35  ;;  %v4674_v33 = vmul.f32 0.01, %v4514_v41  ;;  %5285 = vmax.xlane.f32.xlu1 %v5284_v13  ;;  %vm4611_vm7 = vcmp.ge.f32.partialorder %v4514_v41, 0.0 }
 0x5ed   : > { %v4518_v61 = vpop.f32.mrb[36].mxu1  ;;  %v5181_v54 = vpop.xlane.xlu0 %5180 }
 0x5ee   : > { %v4519_v63 = vadd.f32 %v10268_v16, %v4518_v61  ;;  %v6967_v51 = vpop.f32.mrb[37].mxu1  ;;  %7452 = vmatprep.subr.bf16.mxu0 %v7451_v39  ;;  %v4737_v22 = vsel %vm4611_vm7, %v4514_v41, %v4674_v33  ;;  %v5332_v43 = vmul.f32 %v5181_v54, %v5079_v11  ;;  %v5318_v41 = vmul.f32 %v10245_v45, %v5065_v18  ;;  %v5083_v45 = vld [vmem:[%s10603_s18 + $0xb0] sm:$0xff] }
 0x5ef   : > { %7454 = vmatpush3.bf16.msra.mxu0 %v7453_v29  ;;  %v5287_v12 = vsel %vm5124_vm10, %v4737_v22, -inf  ;;  %v5084_v51 = vld [vmem:[%s10603_s18 + $0xb8] sm:$0xff]  ;;  %v5067_v22 = vld [vmem:[%s10603_s18 + $0x30] sm:$0xff]  ;;  %v5321_v54 = vmul.f32 %v10247_v21, %v5068_v10  ;;  %v5070_v21 = vld [vmem:[%s10603_s18 + $0x48] sm:$0xff] }
 0x5f0   : > { %v4675_v34 = vmul.f32 0.01, %v4519_v63  ;;  %5288 = vmax.xlane.f32.xlu0 %v5287_v12  ;;  %vm4612_vm8 = vcmp.ge.f32.partialorder %v4519_v63, 0.0  ;;  %v7461_v13 = vpack.c.bf16 %v5319_v58, %v5318_v41  ;;  %v5088_v41 = vld [vmem:[%s10603_s18 + $0xd8] sm:$0xff] }
 0x5f1   : > { %v5184_v0 = vpop.xlane.xlu1 %5183  ;;  %v4523_v15 = vpop.f32.mrb[38].mxu1 }
 0x5f2   : > { %v5333_v44 = vmul.f32 %v5184_v0, %v5080_v31  ;;  %v4524_v27 = vadd.f32 %v10268_v16, %v4523_v15  ;;  %v6970_v1 = vpop.f32.mrb[39].mxu1  ;;  %v4738_v7 = vsel %vm4612_vm8, %v4519_v63, %v4675_v34 }
 0x5f3   : > { %v5290_v52 = vsel %vm5124_vm10, %v4738_v7, -inf }
 0x5f4   : > { %v7455_v56 = vpack.c.bf16 %v5333_v44, %v5332_v43  ;;  %v4676_v30 = vmul.f32 0.01, %v4524_v27  ;;  %5291 = vmax.xlane.f32.xlu1 %v5290_v52  ;;  %vm4613_vm2 = vcmp.ge.f32.partialorder %v4524_v27, 0.0  ;;  %v5320_v43 = vmul.f32 %v10251_v53, %v5067_v22  ;;  %v5085_v53 = vld [vmem:[%s10603_s18 + $0xc0] sm:$0xff] }
 0x5f5   : > { %v4528_v14 = vpop.f32.mrb[40].mxu1  ;;  %v5187_v23 = vpop.xlane.xlu0 %5186 }
 0x5f6   : > { %v4529_v48 = vadd.f32 %v10268_v16, %v4528_v14  ;;  %v6973_v6 = vpop.f32.mrb[41].mxu1  ;;  %7456 = vmatprep.subr.bf16.mxu0 %v7455_v56  ;;  %v4739_v50 = vsel %vm4613_vm2, %v4524_v27, %v4676_v30  ;;  %v5334_v19 = vmul.f32 %v5187_v23, %v5081_v20  ;;  %v7465_v7 = vpack.c.bf16 %v5321_v54, %v5320_v43 }
 0x5f7   : > { %7458 = vmatpush3.bf16.msra.mxu0 %v7457_v37  ;;  %v5293_v36 = vsel %vm5124_vm10, %v4739_v50, -inf  ;;  %v5323_v50 = vmul.f32 %v10261_v47, %v5070_v21  ;;  %v5072_v47 = vld [vmem:[%s10603_s18 + $0x58] sm:$0xff]  ;;  %v5093_v21 = vld [vmem:[%s10603_s18 + $0x100] sm:$0xff] }
 0x5f8   : > { %v4677_v17 = vmul.f32 0.01, %v4529_v48  ;;  %5294 = vmax.xlane.f32.xlu0 %v5293_v36  ;;  %vm4614_vm14 = vcmp.ge.f32.partialorder %v4529_v48, 0.0 }
 0x5f9   : > { %v5190_v26 = vpop.xlane.xlu1 %5189  ;;  %v4533_v3 = vpop.f32.mrb[42].mxu1 }
 0x5fa   : > { %v5335_v9 = vmul.f32 %v5190_v26, %v5082_v62  ;;  %v4534_v49 = vadd.f32 %v10268_v16, %v4533_v3  ;;  %v6976_v35 = vpop.f32.mrb[43].mxu1  ;;  %v4740_v24 = vsel %vm4614_vm14, %v4529_v48, %v4677_v17  ;;  %v5069_v48 = vld [vmem:[%s10603_s18 + $0x40] sm:$0xff] }
 0x5fb   : > { %v5296_v8 = vsel %vm5124_vm10, %v4740_v24, -inf  ;;  %v5322_v26 = vmul.f32 %v10257_v42, %v5069_v48  ;;  %v5380_v48 = vld [vmem:[%s10604_s19 + $0x18] sm:$0xff] }
 0x5fc   : > { %v7459_v2 = vpack.c.bf16 %v5335_v9, %v5334_v19  ;;  %v4678_v46 = vmul.f32 0.01, %v4534_v49  ;;  %5297 = vmax.xlane.f32.xlu1 %v5296_v8  ;;  %vm4615_vm9 = vcmp.ge.f32.partialorder %v4534_v49, 0.0  ;;  %v5071_v8 = vld [vmem:[%s10603_s18 + $0x50] sm:$0xff] }
 0x5fd   : > { %v4538_v39 = vpop.f32.mrb[44].mxu1  ;;  %v5193_v4 = vpop.xlane.xlu0 %5192  ;;  %v5324_v10 = vmul.f32 %v10263_v25, %v5071_v8  ;;  %v5073_v25 = vld [vmem:[%s10603_s18 + $0x60] sm:$0xff] }
 0x5fe   : > { %v4539_v33 = vadd.f32 %v10268_v16, %v4538_v39  ;;  %v6979_v29 = vpop.f32.mrb[45].mxu1  ;;  %7460 = vmatprep.subr.bf16.mxu0 %v7459_v2  ;;  %v4741_v61 = vsel %vm4615_vm9, %v4534_v49, %v4678_v46  ;;  %v5336_v5 = vmul.f32 %v5193_v4, %v5083_v45  ;;  %v7469_v49 = vpack.c.bf16 %v5323_v50, %v5322_v26  ;;  %v5089_v45 = vld [vmem:[%s10603_s18 + $0xe0] sm:$0xff]  ;;  %v5095_v50 = vld [vmem:[%s10603_s18 + $0x110] sm:$0xff] }
 0x5ff   : > { %7462 = vmatpush3.bf16.msra.mxu0 %v7461_v13  ;;  %v5299_v63 = vsel %vm5124_vm10, %v4741_v61, -inf  ;;  %v5325_v2 = vmul.f32 %v10278_v32, %v5072_v47  ;;  %v5074_v61 = vld [vmem:[%s10603_s18 + $0x68] sm:$0xff]  ;;  %v5326_v54 = vmul.f32 %v10280_v38, %v5073_v25  ;;  %v5075_v38 = vld [vmem:[%s10603_s18 + $0x70] sm:$0xff] }
 0x600   : > { %v4679_v11 = vmul.f32 0.01, %v4539_v33  ;;  %5300 = vmax.xlane.f32.xlu0 %v5299_v63  ;;  %vm4616_vm11 = vcmp.ge.f32.partialorder %v4539_v33, 0.0  ;;  %v5090_v32 = vld [vmem:[%s10603_s18 + $0xe8] sm:$0xff]  ;;  %v5327_v63 = vmul.f32 %v10301_v57, %v5074_v61 }
 0x601   : > { %v5196_v12 = vpop.xlane.xlu1 %5195  ;;  %v4543_v31 = vpop.f32.mrb[46].mxu1  ;;  %v7473_v29 = vpack.c.bf16 %v5325_v2, %v5324_v10 }
 0x602   : > { %v5337_v34 = vmul.f32 %v5196_v12, %v5084_v51  ;;  %v4544_v59 = vadd.f32 %v10268_v16, %v4543_v31  ;;  %v6982_v0 = vpop.f32.mrb[47].mxu1  ;;  %v4742_v15 = vsel %vm4616_vm11, %v4539_v33, %v4679_v11  ;;  %v7477_v31 = vpack.c.bf16 %v5327_v63, %v5326_v54  ;;  %v5104_v63 = vld [vmem:[%s10603_s18 + $0x158] sm:$0xff] }
 0x603   : > { %v5302_v44 = vsel %vm5124_vm10, %v4742_v15, -inf }
 0x604   : > { %v7463_v27 = vpack.c.bf16 %v5337_v34, %v5336_v5  ;;  %v4680_v1 = vmul.f32 0.01, %v4544_v59  ;;  %5303 = vmax.xlane.f32.xlu1 %v5302_v44  ;;  %vm4617_vm3 = vcmp.ge.f32.partialorder %v4544_v59, 0.0  ;;  %v5091_v34 = vld [vmem:[%s10603_s18 + $0xf0] sm:$0xff]  ;;  %v5076_v44 = vld [vmem:[%s10603_s18 + $0x78] sm:$0xff] }
 0x605   : > { %v4548_v55 = vpop.f32.mrb[48].mxu1  ;;  %v5199_v37 = vpop.xlane.xlu0 %5198 }
 0x606   : > { %v4549_v52 = vadd.f32 %v10268_v16, %v4548_v55  ;;  %v6985_v56 = vpop.f32.mrb[49].mxu1  ;;  %7464 = vmatprep.subr.bf16.mxu0 %v7463_v27  ;;  %v4743_v30 = vsel %vm4617_vm3, %v4544_v59, %v4680_v1  ;;  %v5338_v36 = vmul.f32 %v5199_v37, %v5085_v53  ;;  %v5092_v59 = vld [vmem:[%s10603_s18 + $0xf8] sm:$0xff] }
 0x607   : > { %7466 = vmatpush3.bf16.msra.mxu0 %v7465_v7  ;;  %v5305_v14 = vsel %vm5124_vm10, %v4743_v30, -inf  ;;  %v5094_v56 = vld [vmem:[%s10603_s18 + $0x108] sm:$0xff] }
 0x608   : > { %v4681_v6 = vmul.f32 0.01, %v4549_v52  ;;  %5306 = vmax.xlane.f32.xlu0 %v5305_v14  ;;  %vm4618_vm12 = vcmp.ge.f32.partialorder %v4549_v52, 0.0 }
 0x609   : > { %v5202_v20 = vpop.xlane.xlu1 %5201  ;;  %v4553_v23 = vpop.f32.mrb[50].mxu1 }
 0x60a   : > { %v5339_v62 = vmul.f32 %v5202_v20, %v5086_v60  ;;  %v4554_v18 = vadd.f32 %v10268_v16, %v4553_v23  ;;  %v6988_v17 = vpop.f32.mrb[51].mxu1  ;;  %v4744_v58 = vsel %vm4618_vm12, %v4549_v52, %v4681_v6  ;;  %v5087_v16 = vld [vmem:[%s10603_s18 + $0xd0] sm:$0xff]  ;;  %v5377_v60 = vld [vmem:[%s10604_s19] sm:$0xff]  ;;  %v5096_v23 = vld [vmem:[%s10603_s18 + $0x118] sm:$0xff] }
 0x60b   : > { %v5308_v3 = vsel %vm5124_vm10, %v4744_v58, -inf  ;;  %v5097_v58 = vld [vmem:[%s10603_s18 + $0x120] sm:$0xff] }
 0x60c   : > { %v7467_v19 = vpack.c.bf16 %v5339_v62, %v5338_v36  ;;  %v4682_v9 = vmul.f32 0.01, %v4554_v18  ;;  %5309 = vmax.xlane.f32.xlu1 %v5308_v3  ;;  %vm4619_vm13 = vcmp.ge.f32.partialorder %v4554_v18, 0.0  ;;  %v5098_v3 = vld [vmem:[%s10603_s18 + $0x128] sm:$0xff] }
 0x60d   : > { %v5205_v24 = vpop.xlane.xlu0 %5204 }
 0x60e   : > { %7468 = vmatprep.subr.bf16.mxu0 %v7467_v19  ;;  %v4745_v35 = vsel %vm4619_vm13, %v4554_v18, %v4682_v9  ;;  %v5340_v13 = vmul.f32 %v5205_v24, %v5087_v16  ;;  %v5100_v24 = vld [vmem:[%s10603_s18 + $0x138] sm:$0xff] }
 0x60f   : > { %7470 = vmatpush3.bf16.msra.mxu0 %v7469_v49  ;;  %v5311_v42 = vsel %vm5124_vm10, %v4745_v35, -inf  ;;  %v5099_v35 = vld [vmem:[%s10603_s18 + $0x130] sm:$0xff] }
 0x610   : > { %5312 = vmax.xlane.f32.xlu0 %v5311_v42 }
 0x611   : > { %v5208_v46 = vpop.xlane.xlu1 %5207 }
 0x612   : > { %v5341_v39 = vmul.f32 %v5208_v46, %v5088_v41 }
 0x614   : > { %v7471_v33 = vpack.c.bf16 %v5341_v39, %v5340_v13  ;;  %v5101_v39 = vld [vmem:[%s10603_s18 + $0x140] sm:$0xff] }
 0x615   : > { %v5211_v4 = vpop.xlane.xlu0 %5210 }
 0x616   : > { %7472 = vmatprep.subr.bf16.mxu0 %v7471_v33  ;;  %v5342_v22 = vmul.f32 %v5211_v4, %v5089_v45  ;;  %v5102_v33 = vld [vmem:[%s10603_s18 + $0x148] sm:$0xff] }
 0x617   : > { %7474 = vmatpush3.bf16.msra.mxu0 %v7473_v29 }
 0x619   : > { %v5214_v51 = vpop.xlane.xlu1 %5213 }
 0x61a   : > { %v5343_v11 = vmul.f32 %v5214_v51, %v5090_v32  ;;  %v5103_v32 = vld [vmem:[%s10603_s18 + $0x150] sm:$0xff] }
 0x61c   : > { %v7475_v12 = vpack.c.bf16 %v5343_v11, %v5342_v22 }
 0x61d   : > { %v5217_v5 = vpop.xlane.xlu0 %5216 }
 0x61e   : > { %7476 = vmatprep.subr.bf16.mxu0 %v7475_v12  ;;  %v5344_v15 = vmul.f32 %v5217_v5, %v5091_v34  ;;  %v5105_v12 = vld [vmem:[%s10603_s18 + $0x160] sm:$0xff]  ;;  %v5106_v5 = vld [vmem:[%s10603_s18 + $0x168] sm:$0xff] }
 0x61f   : > { %7478 = vmatpush3.bf16.msra.mxu0 %v7477_v31 }
 0x621   : > { %v5169_v0 = vpop.xlane.xlu0 %5168  ;;  %v5220_v57 = vpop.xlane.xlu1 %5219 }
 0x622   : > { %v5345_v43 = vmul.f32 %v5220_v57, %v5092_v59  ;;  %v5328_v7 = vmul.f32 %v5169_v0, %v5075_v38  ;;  %v5108_v38 = vld [vmem:[%s10603_s18 + $0x178] sm:$0xff] }
 0x624   : > { %v7479_v27 = vpack.c.bf16 %v5345_v43, %v5344_v15  ;;  %v5107_v15 = vld [vmem:[%s10603_s18 + $0x170] sm:$0xff] }
 0x625   : > { %v5172_v1 = vpop.xlane.xlu1 %5171  ;;  %v5223_v52 = vpop.xlane.xlu0 %5222 }
 0x626   : > { %v5329_v55 = vmul.f32 %v5172_v1, %v5076_v44  ;;  %7480 = vmatprep.subr.bf16.mxu0 %v7479_v27  ;;  %v5346_v37 = vmul.f32 %v5223_v52, %v5093_v21  ;;  %v5110_v52 = vld [vmem:[%s10603_s18 + $0x188] sm:$0xff] }
 0x628   : > { %v7481_v30 = vpack.c.bf16 %v5329_v55, %v5328_v7  ;;  %v5109_v55 = vld [vmem:[%s10603_s18 + $0x180] sm:$0xff] }
 0x629   : > { %v5226_v53 = vpop.xlane.xlu1 %5225 }
 0x62a   : > { %v5347_v14 = vmul.f32 %v5226_v53, %v5094_v56  ;;  %7482 = vmatpush3.bf16.msra.mxu0 %v7481_v30 }
 0x62b   : > { %7483 = vmatprep.subr.bf16.mxu0 %v7636_v28 }
 0x62c   : > { %v7484_v6 = vpack.c.bf16 %v5347_v14, %v5346_v37  ;;  %v5111_v14 = vld [vmem:[%s10603_s18 + $0x190] sm:$0xff] }
 0x62d   : > { %5449 = vmatmul.mubr.f32.vlgmr.msra.gmra.mrb[216].mxu0 %v5377_v60  ;;  %v5229_v20 = vpop.xlane.xlu0 %5228 }
 0x62e   : > { %7485 = vmatpush1.bf16.msra.mxu0 %v7484_v6  ;;  %6043 = vmatprep.mubr.msk.f32.mxu0 %vm3210_vm6, %v5380_v48  ;;  %v5348_v62 = vmul.f32 %v5229_v20, %v5095_v50  ;;  %v5112_v48 = vld [vmem:[%s10603_s18 + $0x198] sm:$0xff]  ;;  %vm5525_vm6 = vcmask 31744  }
 0x62f   : > { %7486 = vmatprep.subr.bf16.mxu0 %v7636_v28 }
 0x631   : > { %v5232_v36 = vpop.xlane.xlu1 %5231 }
 0x632   : > { %v5349_v18 = vmul.f32 %v5232_v36, %v5096_v23  ;;  %v5113_v36 = vld [vmem:[%s10603_s18 + $0x1a0] sm:$0xff] }
 0x634   : > { %v7487_v17 = vpack.c.bf16 %v5349_v18, %v5348_v62  ;;  %v5114_v18 = vld [vmem:[%s10603_s18 + $0x1a8] sm:$0xff] }
 0x635   : > { %v5235_v26 = vpop.xlane.xlu0 %5234 }
 0x636   : > { %7488 = vmatpush1.bf16.msra.mxu0 %v7487_v17  ;;  %v5350_v9 = vmul.f32 %v5235_v26, %v5097_v58 }
 0x637   : > { %7489 = vmatprep.subr.bf16.mxu0 %v7636_v28 }
 0x639   : > { %v5238_v19 = vpop.xlane.xlu1 %5237 }
 0x63a   : > { %v5351_v49 = vmul.f32 %v5238_v19, %v5098_v3  ;;  %v5115_v19 = vld [vmem:[%s10603_s18 + $0x1b0] sm:$0xff] }
 0x63c   : > { %v7490_v47 = vpack.c.bf16 %v5351_v49, %v5350_v9  ;;  %v10450_v2 = vpop.f32.mrb[214].mxu0  ;;  %v5116_v49 = vld [vmem:[%s10603_s18 + $0x1b8] sm:$0xff] }
 0x63d   : > { %v5241_v16 = vpop.xlane.xlu0 %5240  ;;  %v7061_v46 = vpop.f32.mrb[215].mxu0 }
 0x63e   : > { %7491 = vmatpush1.bf16.msra.mxu0 %v7490_v47  ;;  %v5352_v41 = vmul.f32 %v5241_v16, %v5099_v35 }
 0x63f   : > { %7492 = vmatprep.subr.bf16.mxu0 %v7636_v28 }
 0x641   : > { %v5244_v42 = vpop.xlane.xlu1 %5243 }
 0x642   : > { %v5353_v8 = vmul.f32 %v5244_v42, %v5100_v24  ;;  %v5117_v42 = vld [vmem:[%s10603_s18 + $0x1c0] sm:$0xff] }
 0x644   : > { %v7493_v13 = vpack.c.bf16 %v5353_v8, %v5352_v41  ;;  %v5118_v8 = vld [vmem:[%s10603_s18 + $0x1c8] sm:$0xff] }
 0x645   : > { %v5247_v10 = vpop.xlane.xlu0 %5246 }
 0x646   : > { %7494 = vmatpush1.bf16.msra.mxu0 %v7493_v13  ;;  %v5354_v61 = vmul.f32 %v5247_v10, %v5101_v39 }
 0x647   : > { %7495 = vmatprep.subr.bf16.mxu0 %v7636_v28 }
 0x649   : > { %v5250_v29 = vpop.xlane.xlu1 %5249 }
 0x64a   : > { %v5355_v45 = vmul.f32 %v5250_v29, %v5102_v33  ;;  %v5119_v33 = vld [vmem:[%s10603_s18 + $0x1d0] sm:$0xff] }
 0x64c   : > { %v7496_v4 = vpack.c.bf16 %v5355_v45, %v5354_v61  ;;  %v5120_v61 = vld [vmem:[%s10603_s18 + $0x1d8] sm:$0xff] }
 0x64d   : > { %v5253_v25 = vpop.xlane.xlu0 %5252 }
 0x64e   : > { %7497 = vmatpush1.bf16.msra.mxu0 %v7496_v4  ;;  %v5356_v22 = vmul.f32 %v5253_v25, %v5103_v32 }
 0x64f   : > { %7498 = vmatprep.subr.bf16.mxu0 %v7636_v28 }
 0x651   : > { %v5256_v51 = vpop.xlane.xlu1 %5255 }
 0x652   : > { %v5357_v11 = vmul.f32 %v5256_v51, %v5104_v63  ;;  %v5121_v63 = vld [vmem:[%s10603_s18 + $0x1e0] sm:$0xff] }
 0x654   : > { %v7499_v54 = vpack.c.bf16 %v5357_v11, %v5356_v22  ;;  %v5122_v22 = vld [vmem:[%s10603_s18 + $0x1e8] sm:$0xff] }
 0x655   : > { %v5259_v31 = vpop.xlane.xlu0 %5258 }
 0x656   : > { %7500 = vmatpush1.bf16.msra.mxu0 %v7499_v54  ;;  %v5358_v59 = vmul.f32 %v5259_v31, %v5105_v12 }
 0x657   : > { %7501 = vmatprep.subr.bf16.mxu0 %v7636_v28 }
 0x659   : > { %v5262_v34 = vpop.xlane.xlu1 %5261 }
 0x65a   : > { %v5359_v0 = vmul.f32 %v5262_v34, %v5106_v5  ;;  %v5123_v5 = vld [vmem:[%s10603_s18 + $0x1f0] sm:$0xff] }
 0x65c   : > { %v7502_v57 = vpack.c.bf16 %v5359_v0, %v5358_v59  ;;  %v5379_v0 = vld [vmem:[%s10604_s19 + $0x10] sm:$0xff] }
 0x65d   : > { %v5265_v43 = vpop.xlane.xlu0 %5264 }
 0x65e   : > { %7503 = vmatpush1.bf16.msra.mxu0 %v7502_v57  ;;  %v5360_v27 = vmul.f32 %v5265_v43, %v5107_v15  ;;  %v5524_v57 = vld [vmem:[%s10605_s20] sm:$0xf] }
 0x65f   : > { %7504 = vmatprep.subr.bf16.mxu0 %v7636_v28 }
 0x661   : > { %v5268_v44 = vpop.xlane.xlu1 %5267 }
 0x662   : > { %v5361_v1 = vmul.f32 %v5268_v44, %v5108_v38  ;;  %v5053_v44 = vld [vmem:[%s10602_s17] sm:$0xff] }
 0x664   : > { %v7505_v7 = vpack.c.bf16 %v5361_v1, %v5360_v27  ;;  %v5054_v27 = vld [vmem:[%s10602_s17 + $0x8] sm:$0xff] }
 0x665   : > { %v5271_v21 = vpop.xlane.xlu0 %5270 }
 0x666   : > { %7506 = vmatpush1.bf16.msra.mxu0 %v7505_v7  ;;  %v5362_v30 = vmul.f32 %v5271_v21, %v5109_v55  ;;  %v7529_v7 = vpack.c.bf16 %v5054_v27, %v5053_v44 }
 0x667   : > { %7507 = vmatprep.subr.bf16.mxu0 %v7636_v28 }
 0x669   : > { %v5274_v56 = vpop.xlane.xlu1 %5273 }
 0x66a   : > { %v5363_v53 = vmul.f32 %v5274_v56, %v5110_v52  ;;  %v5055_v52 = vld [vmem:[%s10602_s17 + $0x10] sm:$0xff]  ;;  %v5056_v56 = vld [vmem:[%s10602_s17 + $0x18] sm:$0xff] }
 0x66c   : > { %v7508_v37 = vpack.c.bf16 %v5363_v53, %v5362_v30  ;;  %v7532_v30 = vpack.c.bf16 %v5056_v56, %v5055_v52  ;;  %v5057_v53 = vld [vmem:[%s10602_s17 + $0x20] sm:$0xff] }
 0x66d   : > { %v5277_v60 = vpop.xlane.xlu0 %5276 }
 0x66e   : > { %7509 = vmatpush1.bf16.msra.mxu0 %v7508_v37  ;;  %v5364_v50 = vmul.f32 %v5277_v60, %v5111_v14  ;;  %v5058_v37 = vld [vmem:[%s10602_s17 + $0x28] sm:$0xff]  ;;  %v5060_v60 = vld [vmem:[%s10602_s17 + $0x38] sm:$0xff] }
 0x66f   : > { %7510 = vmatprep.subr.bf16.mxu0 %v7636_v28  ;;  %v7535_v14 = vpack.c.bf16 %v5058_v37, %v5057_v53 }
 0x671   : > { %v5280_v6 = vpop.xlane.xlu1 %5279 }
 0x672   : > { %v5365_v20 = vmul.f32 %v5280_v6, %v5112_v48 }
 0x674   : > { %v7511_v23 = vpack.c.bf16 %v5365_v20, %v5364_v50 }
 0x675   : > { %v5283_v62 = vpop.xlane.xlu0 %5282 }
 0x676   : > { %7512 = vmatpush1.bf16.msra.mxu0 %v7511_v23  ;;  %v5366_v58 = vmul.f32 %v5283_v62, %v5113_v36  ;;  %v6047_v23 = vld [vmem:[%s10606_s21] ss:$0 sm:$0xff] }
 0x677   : > { %7513 = vmatprep.subr.bf16.mxu0 %v7636_v28 }
 0x679   : > { %v5286_v17 = vpop.xlane.xlu1 %5285 }
 0x67a   : > { %v5367_v26 = vmul.f32 %v5286_v17, %v5114_v18 }
 0x67c   : > { %v7514_v3 = vpack.c.bf16 %v5367_v26, %v5366_v58 }
 0x67d   : > { %v5289_v9 = vpop.xlane.xlu0 %5288 }
 0x67e   : > { %7515 = vmatpush1.bf16.msra.mxu0 %v7514_v3  ;;  %v5368_v35 = vmul.f32 %v5289_v9, %v5115_v19 }
 0x67f   : > { %7516 = vmatprep.subr.bf16.mxu0 %v7636_v28 }
 0x681   : > { %v5292_v47 = vpop.xlane.xlu1 %5291 }
 0x682   : > { %v5369_v16 = vmul.f32 %v5292_v47, %v5116_v49 }
 0x684   : > { %v7517_v24 = vpack.c.bf16 %v5369_v16, %v5368_v35 }
 0x685   : > { %v5295_v41 = vpop.xlane.xlu0 %5294 }
 0x686   : > { %7518 = vmatpush1.bf16.msra.mxu0 %v7517_v24  ;;  %v5370_v13 = vmul.f32 %v5295_v41, %v5117_v42 }
 0x687   : > { %7519 = vmatprep.subr.bf16.mxu0 %v7636_v28 }
 0x689   : > { %v5298_v46 = vpop.xlane.xlu1 %5297 }
 0x68a   : > { %v5371_v39 = vmul.f32 %v5298_v46, %v5118_v8 }
 0x68c   : > { %v7520_v10 = vpack.c.bf16 %v5371_v39, %v5370_v13 }
 0x68d   : > { %v5301_v29 = vpop.xlane.xlu0 %5300 }
 0x68e   : > { %7521 = vmatpush1.bf16.msra.mxu0 %v7520_v10  ;;  %v5372_v4 = vmul.f32 %v5301_v29, %v5119_v33 }
 0x68f   : > { %7522 = vmatprep.subr.bf16.mxu0 %v7636_v28 }
 0x691   : > { %v5304_v45 = vpop.xlane.xlu1 %5303 }
 0x692   : > { %v5373_v32 = vmul.f32 %v5304_v45, %v5120_v61 }
 0x694   : > { %v7523_v25 = vpack.c.bf16 %v5373_v32, %v5372_v4 }
 0x695   : > { %v5307_v51 = vpop.xlane.xlu0 %5306 }
 0x696   : > { %7524 = vmatpush1.bf16.msra.mxu0 %v7523_v25  ;;  %v5374_v54 = vmul.f32 %v5307_v51, %v5121_v63 }
 0x697   : > { %7525 = vmatprep.subr.bf16.mxu0 %v7636_v28 }
 0x699   : > { %v5310_v11 = vpop.xlane.xlu1 %5309 }
 0x69a   : > { %v5375_v12 = vmul.f32 %v5310_v11, %v5122_v22 }
 0x69c   : > { %v7526_v31 = vpack.c.bf16 %v5375_v12, %v5374_v54 }
 0x69d   : > { %v5313_v34 = vpop.xlane.xlu0 %5312 }
 0x69e   : > { %7527 = vmatpush1.bf16.msra.mxu0 %v7526_v31  ;;  %v5376_v59 = vmul.f32 %v5313_v34, %v5123_v5 }
 0x69f   : > { %5514 = vmatprep.subr.mxu0 %v7637_v40 }
 0x6a2   : > { %5515 = vmatpush1.msra.mxu0 %v5376_v59 }
 0x6a3   : > { %5519 = vmatmul.mubr.f32.vlgmr.msra.gmra.mrb[218].mxu0 %v5379_v0  ;;  %7062 = vmatprep.subr.mxu0 %v7637_v40 }
 0x6a4   : > { %7063 = vmatpush3.msk.msra.mxu0 %vm940_vm1, %v5524_v57  ;;  %7064 = vmatprep.mubr.msk.f32.mxu0 %vm7638_vm5, %v7637_v40  ;;  %vm5602_vm1 = vcmask 523264  }
 0x6a5   : > { %7528 = vmatprep.subr.bf16.mxu0 %v7636_v28 }
 0x700   : > { %v6344_v15 = vpop.f32.mrb[216].mxu0 }
 0x701   : > { %v6345_v43 = vpop.f32.mrb[217].mxu0 }
 0x702   : > { %v6346_v38 = vadd.f32 %v6345_v43, %v6344_v15 }
 0x776   : > { %v5520_v1 = vpop.f32.mrb[218].mxu0 }
 0x777   : > { %v5521_v55 = vadd.f32 %v6346_v38, %v5520_v1  ;;  %v5522_v21 = vpop.f32.mrb[219].mxu0 }
 0x779   : > { %7065 = vmatmul.mubr.msk.f32.vlgmr.msra.gmra.mrb[220].mxu0 %vm5525_vm6, %v5521_v55 }
 0x77a   : > { %7530 = vmatpush3.bf16.msra.mxu0 %v7529_v7  ;;  %7083 = vmatprep.mubr.msk.f32.mxu0 %vm7638_vm5, %v7637_v40  ;;  %v5059_v40 = vld [vmem:[%s10602_s17 + $0x30] sm:$0xff] }
 0x77b   : > { %7531 = vmatprep.subr.bf16.mxu0 %v7636_v28  ;;  %v7538_v48 = vpack.c.bf16 %v5060_v60, %v5059_v40 }
 0x77e   : > { %7533 = vmatpush3.bf16.msra.mxu0 %v7532_v30 }
 0x77f   : > { %7534 = vmatprep.subr.bf16.mxu0 %v7636_v28 }
 0x782   : > { %7536 = vmatpush3.bf16.msra.mxu0 %v7535_v14 }
 0x783   : > { %7537 = vmatprep.subr.bf16.mxu0 %v7636_v28 }
 0x786   : > { %7539 = vmatpush3.bf16.msra.mxu0 %v7538_v48 }
 0x789   : > { %7084 = vmatmul.mubr.msk.f32.vlgmr.msra.gmra.mrb[222].mxu0 %vm5602_vm1, %v10450_v2 }
 0x84c   : > { %v5598_v6 = vpop.f32.mrb[220].mxu0 }
 0x84d   : > { %v7066_v50 = vpop.f32.mrb[221].mxu0 }
 0x85c   : > { %v5672_v20 = vpop.f32.mrb[222].mxu0 }
 0x85d   : > { %v5673_v36 = vadd.f32 %v5672_v20, %v5598_v6  ;;  %v7085_v62 = vpop.f32.mrb[223].mxu0 }
 0x85f   : > { %v5683_v28 = vadd.f32 %v6047_v23, %v5673_v36 }
 0x861   : > { %5684 = vst [vmem:[%s708_s3] sm:$0xff] %v5683_v28 }
 0x862 PF: > { %s10629_s27 = sld [smem:[#allocation2_spill]] }
 0x868   : > { %s32_s3 = sadd.s32 1, %s10629_s27  }
 0x869   : > { %p29_p6 = scmp.ge.s32.totalorder %s32_s3, 4  }
 0x86b   :  { %31 = sbr.rel (!%p29_p6) target bundleno = 8 (0x8), region = 141 }

</bundles_post_ra>
